<compile_context>
chip_gen: v6e
topology: v6e:2x2x1
jax: 0.10.0
libtpu: 0.0.40
codegen_flags: <defaults>
</compile_context>

<pallas_src>
import jax
import jax.numpy as jnp
import numpy as np
from jax import lax
from jax.experimental import pallas as pl
from jax.experimental.pallas import tpu as pltpu

# ----------------------------------------------------------------------------
# Static geometry for the 32x32 input used below:
#   conv1 (7x7,s2,p3): 32 -> 16 ; maxpool (3x3,s2,p1): 16 -> 8
#   layer1 (3x3,s1)  : 8        ; layer2 (first conv s2): 8 -> 4
H_IN = 32
H_L1 = 8                 # spatial side after maxpool / through layer1
H_L2 = 4                 # spatial side through layer2
M_L1 = H_L1 * H_L1       # 64  positions per image in layer1
M_L2 = H_L2 * H_L2       # 16  positions per image in layer2
M_PATCH = 9 * M_L1       # 576 conv1 rows per image (one 8x8 grid per maxpool tap)
PAD_ROWS = 16            # sublane-aligned zero padding used for the row shifts


# ----------------------------------------------------------------------------
# Constant 0/1 masks / gather matrices (built with numpy at trace time).
# ----------------------------------------------------------------------------
def _tap_masks(side):
    """mask[t][p] = 1 if, for grid position p=(i,j), the tap position
    (i + t//3 - 1, j + t%3 - 1) lies inside the side x side grid (this encodes
    the zero padding of a 3x3/s1/p1 conv), else 0."""
    n = side * side
    m = np.ones((9, n, 1), np.float32)
    for t in range(9):
        di, dj = t // 3 - 1, t % 3 - 1
        for i in range(side):
            for j in range(side):
                if not (0 <= i + di < side and 0 <= j + dj < side):
                    m[t, i * side + j, 0] = 0.0
    return jnp.asarray(m)


def _stride2_gather():
    """G[t] @ x1 gathers, for each layer2 position (i2, j2), the layer1 value at
    (2*i2+dy-1, 2*j2+dx-1) (t = dy*3+dx), or 0 outside the 8x8 grid."""
    g = np.zeros((9, M_L2, M_L1), np.float32)
    for t in range(9):
        dy, dx = t // 3, t % 3
        for i2 in range(H_L2):
            for j2 in range(H_L2):
                hh, ww = 2 * i2 + dy - 1, 2 * j2 + dx - 1
                if 0 <= hh < H_L1 and 0 <= ww < H_L1:
                    g[t, i2 * H_L2 + j2, hh * H_L1 + ww] = 1.0
    return jnp.asarray(g, dtype=jnp.bfloat16)


def _maxpool_mask():
    """Zeroes the conv1 rows whose maxpool-tap position falls outside the real
    16x16 conv1 grid (post-ReLU values are >= 0, so 0 == -inf padding)."""
    m = np.ones((9, M_L1, 1), np.float32)
    for t in range(9):
        ty, tx = t // 3, t % 3
        for i in range(H_L1):
            for j in range(H_L1):
                if (ty == 0 and i == 0) or (tx == 0 and j == 0):
                    m[t, i * H_L1 + j, 0] = 0.0
    return jnp.asarray(m.reshape(9 * M_L1, 1))


# ----------------------------------------------------------------------------
# XLA glue: im2col for conv1, replicated per maxpool tap, phase ordering.
# ----------------------------------------------------------------------------
def _conv1_maxpool_patches(x_nhwc):
    """7x7/s2/p3 im2col patches for conv1.  Per-image row order is
    t*64 + i*8 + j where t = ty*3+tx is the maxpool tap and (i, j) the maxpool
    output position; the row holds the input window of conv1 output position
    (2i+ty-1, 2j+tx-1).  This makes the 3x3/s2/p1 maxpool an elementwise max
    over 9 aligned row blocks inside the kernel."""
    N, H, W, C = x_nhwc.shape
    k, s, pad = 7, 2, 3
    ho = (H + 2 * pad - k) // s + 1                       # 16
    hp = ho // 2                                          # 8
    xp = jnp.pad(x_nhwc, ((0, 0), (pad, pad), (pad, pad), (0, 0)))
    taps = [xp[:, ky:ky + s * ho:s, kx:kx + s * ho:s, :]
            for ky in range(k) for kx in range(k)]
    p = jnp.concatenate(taps, axis=-1)                    # (N, 16, 16, 49*C)
    p = jnp.pad(p, ((0, 0), (1, 1), (1, 1), (0, 0)))      # pad conv1 grid by 1
    blocks = [p[:, ty:ty + s * hp:s, tx:tx + s * hp:s, :]  # (N, 8, 8, 49*C)
              for ty in range(3) for tx in range(3)]
    q = jnp.stack(blocks, axis=1)                         # (N, 9, 8, 8, 49*C)
    return q.reshape(N * M_PATCH, k * k * C).astype(jnp.bfloat16)


def _prep_constants(params):
    """Pre-transposed / stacked weights (bf16 MXU operands) and f32 BN terms."""
    bf16 = jnp.bfloat16
    w1 = params["conv1_w"].shape[0]

    def wcat(w):                 # (Cout,Cin,3,3) -> (Cin, 9*Cout), tap-major blocks
        co, ci = w.shape[0], w.shape[1]
        t = jnp.transpose(w, (2, 3, 1, 0)).reshape(9, ci, co)
        return jnp.concatenate([t[k] for k in range(9)], axis=1).astype(bf16)

    def taps(w):                 # (Cout,Cin,3,3) -> (9, Cin, Cout)
        co, ci = w.shape[0], w.shape[1]
        return jnp.transpose(w, (2, 3, 1, 0)).reshape(9, ci, co).astype(bf16)

    def sb(s, b):                # (2, C) f32: row0=scale row1=bias
        return jnp.stack([s, b]).astype(jnp.float32)

    wc1 = jnp.transpose(params["conv1_w"], (2, 3, 1, 0)).reshape(-1, w1).astype(bf16)
    sbc1 = sb(params["bn1_s"], params["bn1_b"])

    l1 = params["layer1"]
    wl1 = jnp.stack([wcat(l1[0]["w1"]), wcat(l1[0]["w2"]),
                     wcat(l1[1]["w1"]), wcat(l1[1]["w2"])])            # (4, w1, 9*w1)
    sbl1 = jnp.stack([sb(l1[0]["s1"], l1[0]["b1"]), sb(l1[0]["s2"], l1[0]["b2"]),
                      sb(l1[1]["s1"], l1[1]["b1"]), sb(l1[1]["s2"], l1[1]["b2"])])

    b0, b1 = params["layer2"]
    w2 = b0["w1"].shape[0]
    wl2a = taps(b0["w1"])                                              # (9, w1, w2)
    sbl2a = sb(b0["s1"], b0["b1"])
    wdw = jnp.transpose(b0["dw"], (2, 3, 1, 0)).reshape(w1, w2).astype(bf16)
    sbdw = sb(b0["ds"], b0["db"])
    wl2b = jnp.stack([wcat(b0["w2"]), wcat(b1["w1"]), wcat(b1["w2"])])  # (3, w2, 9*w2)
    sbl2b = jnp.stack([sb(b0["s2"], b0["b2"]), sb(b1["s1"], b1["b1"]),
                       sb(b1["s2"], b1["b2"])])

    return (_maxpool_mask(), wc1, sbc1,
            _tap_masks(H_L1), wl1, sbl1,
            _stride2_gather(), wl2a, sbl2a, wdw, sbdw,
            _tap_masks(H_L2), wl2b, sbl2b)


# ----------------------------------------------------------------------------
# The fused kernel: one grid step == one image, whole backbone in VMEM.
# ----------------------------------------------------------------------------
def _net_kernel(patches_ref, mpmask_ref, wc1_ref, sbc1_ref,
                m8_ref, wl1_ref, sbl1_ref,
                g2_ref, wl2a_ref, sbl2a_ref, wdw_ref, sbdw_ref,
                m4_ref, wl2b_ref, sbl2b_ref,
                o_ref):
    f32, bf16 = jnp.float32, jnp.bfloat16

    def affine(acc, sb):                      # folded BatchNorm, f32 epilogue
        return acc * sb[0:1, :] + sb[1:2, :]

    def conv3x3(xin, mask_ref, wcat, sb, side):
        """3x3/s1/p1 conv on a (side*side, Cin) activation.

        One wide MXU matmul (X @ [W_t0 | ... | W_t8]) produces all 9 per-tap
        partial sums in f32; the spatial gather is then a static row shift
        (sublane slice of a zero-padded copy) plus a constant 0/1 boundary
        mask on the VPU, so the gather uses no MXU work and no bf16
        re-rounding."""
        n = side * side
        z = jnp.dot(xin.astype(bf16), wcat,
                    preferred_element_type=f32)            # (n, 9*Cout) f32
        cout = wcat.shape[1] // 9
        zeros = jnp.zeros((PAD_ROWS, z.shape[1]), f32)
        zp = jnp.concatenate([zeros, z, zeros], axis=0)    # aligned zero pad
        acc = z[:, 4 * cout:5 * cout]                      # centre tap (shift 0)
        for t in range(9):
            if t == 4:
                continue
            di, dj = t // 3 - 1, t % 3 - 1
            s = di * side + dj
            sh = zp[PAD_ROWS + s:PAD_ROWS + s + n, t * cout:(t + 1) * cout]
            acc = acc + mask_ref[t] * sh
        return affine(acc, sb)

    # ---- conv1 + bn1 + relu (evaluated on the 9 maxpool tap grids) ----------
    c1 = jnp.dot(patches_ref[...], wc1_ref[...], preferred_element_type=f32)
    c1 = jnp.maximum(affine(c1, sbc1_ref[...]), 0.0) * mpmask_ref[...]  # (576,w1)

    # ---- maxpool 3x3/s2/p1: elementwise max over 9 aligned row blocks -------
    x = c1[4 * M_L1:5 * M_L1, :]              # centre tap: always in range
    for t in range(9):
        if t != 4:
            x = jnp.maximum(x, c1[t * M_L1:(t + 1) * M_L1, :])

    # ---- layer1: two basic blocks (w1 -> w1, stride 1) ----------------------
    def l1_conv(xin, c):
        return conv3x3(xin, m8_ref, wl1_ref[c], sbl1_ref[c], H_L1)

    x0 = x
    h = jnp.maximum(l1_conv(x0, 0), 0.0)
    x = jnp.maximum(l1_conv(h, 1) + x0, 0.0)
    x0 = x
    h = jnp.maximum(l1_conv(x0, 2), 0.0)
    x1 = jnp.maximum(l1_conv(h, 3) + x0, 0.0)                 # (64, w1)

    # ---- layer2 block 1: 3x3/s2 conv + 1x1/s2 downsample (g2 gather) --------
    x1b = x1.astype(bf16)
    taps_ = [jnp.dot(g2_ref[t], x1b, preferred_element_type=f32).astype(bf16)
             for t in range(9)]                               # 9 x (16, w1)
    acc = None
    for t in range(9):
        d = jnp.dot(taps_[t], wl2a_ref[t], preferred_element_type=f32)
        acc = d if acc is None else acc + d
    h = jnp.maximum(affine(acc, sbl2a_ref[...]), 0.0)         # (16, w2)
    ident = affine(jnp.dot(taps_[4], wdw_ref[...], preferred_element_type=f32),
                   sbdw_ref[...])                             # downsample branch

    def l2_conv(xin, c):
        return conv3x3(xin, m4_ref, wl2b_ref[c], sbl2b_ref[c], H_L2)

    x = jnp.maximum(l2_conv(h, 0) + ident, 0.0)
    # ---- layer2 block 2 ------------------------------------------------------
    x0 = x
    h = jnp.maximum(l2_conv(x0, 1), 0.0)
    x = jnp.maximum(l2_conv(h, 2) + x0, 0.0)                  # (16, w2)

    o_ref[0] = x


def _const_spec(shape):
    nd = len(shape)

    def idx(n):
        return (0,) * nd

    return pl.BlockSpec(shape, idx)


def net_forward(x_nchw, params):
    """Forward pass of the truncated backbone (conv1..layer2), NCHW in/out."""
    N, c_in, hin, win = x_nchw.shape
    assert (hin, win) == (H_IN, H_IN), "kernel is specialised for 32x32 inputs"
    w2 = params["layer2"][0]["w1"].shape[0]

    x = jnp.transpose(x_nchw, (0, 2, 3, 1))                   # NCHW -> NHWC
    patches = _conv1_maxpool_patches(x)                       # (N*576, 49*c_in)
    consts = _prep_constants(params)
    k_c1 = patches.shape[1]

    in_specs = [pl.BlockSpec((M_PATCH, k_c1), lambda n: (n, 0))]
    in_specs += [_const_spec(a.shape) for a in consts]

    out = pl.pallas_call(
        _net_kernel,
        out_shape=jax.ShapeDtypeStruct((N, M_L2, w2), jnp.float32),
        grid_spec=pltpu.PrefetchScalarGridSpec(
            num_scalar_prefetch=0,
            grid=(N,),
            in_specs=in_specs,
            out_specs=pl.BlockSpec((1, M_L2, w2), lambda n: (n, 0, 0)),
        ),
        compiler_params=pltpu.CompilerParams(
            dimension_semantics=("parallel",)),
    )(patches, *consts)

    out = out.reshape(N, H_L2, H_L2, w2)                      # (N, 4, 4, w2)
    return jnp.transpose(out, (0, 3, 1, 2))                   # -> NCHW


# ----------------------------------------------------------------------------
# Parameter initialisation (ResNet-18 structure, reduced widths).
# ----------------------------------------------------------------------------
def _fold_bn(key, c, eps=1e-5):
    k1, k2, k3, k4 = jax.random.split(key, 4)
    gamma = 1.0 + 0.1 * jax.random.normal(k1, (c,), jnp.float32)
    beta = 0.1 * jax.random.normal(k2, (c,), jnp.float32)
    mean = 0.1 * jax.random.normal(k3, (c,), jnp.float32)
    var = 1.0 + 0.1 * jax.random.uniform(k4, (c,), jnp.float32)
    scale = gamma / jnp.sqrt(var + eps)
    bias = beta - mean * scale
    return scale, bias


def _conv_w(key, cout, cin, k):
    return 0.1 * jax.random.normal(key, (cout, cin, k, k), jnp.float32)


def init_params(key, c_in=3, w1=8, w2=16):
    keys = iter(jax.random.split(key, 64))
    p = {}
    p["conv1_w"] = _conv_w(next(keys), w1, c_in, 7)
    p["bn1_s"], p["bn1_b"] = _fold_bn(next(keys), w1)

    def basic(cin, cout, downsample):
        blk = {}
        blk["w1"] = _conv_w(next(keys), cout, cin, 3)
        blk["s1"], blk["b1"] = _fold_bn(next(keys), cout)
        blk["w2"] = _conv_w(next(keys), cout, cout, 3)
        blk["s2"], blk["b2"] = _fold_bn(next(keys), cout)
        if downsample:
            blk["dw"] = _conv_w(next(keys), cout, cin, 1)
            blk["ds"], blk["db"] = _fold_bn(next(keys), cout)
        return blk

    p["layer1"] = [basic(w1, w1, False), basic(w1, w1, False)]
    p["layer2"] = [basic(w1, w2, True), basic(w2, w2, False)]
    return p


# ----------------------------------------------------------------------------
# Pure-JAX reference (same numerics policy: bf16 conv operands, f32 accumulate,
# f32 BN / residual / ReLU epilogue).
# ----------------------------------------------------------------------------
def _ref_conv_bn(x, w, s, b, stride, pad, residual=None, relu=True):
    w_hwio = jnp.transpose(w, (2, 3, 1, 0)).astype(jnp.bfloat16)
    y = lax.conv_general_dilated(
        x.astype(jnp.bfloat16), w_hwio, (stride, stride),
        [(pad, pad), (pad, pad)],
        dimension_numbers=("NHWC", "HWIO", "NHWC"),
        preferred_element_type=jnp.float32)
    y = y * s + b
    if residual is not None:
        y = y + residual
    return jnp.maximum(y, 0.0) if relu else y


def _ref_maxpool(x):
    return lax.reduce_window(x, -jnp.inf, lax.max, (1, 3, 3, 1), (1, 2, 2, 1),
                             [(0, 0), (1, 1), (1, 1), (0, 0)])


def ref_forward(x_nchw, p):
    x = jnp.transpose(x_nchw, (0, 2, 3, 1))
    x = _ref_conv_bn(x, p["conv1_w"], p["bn1_s"], p["bn1_b"], 2, 3)
    x = _ref_maxpool(x)

    def blk_fwd(x, blk, stride):
        if "dw" in blk:
            ident = _ref_conv_bn(x, blk["dw"], blk["ds"], blk["db"], stride, 0,
                                 relu=False)
        else:
            ident = x
        out = _ref_conv_bn(x, blk["w1"], blk["s1"], blk["b1"], stride, 1)
        out = _ref_conv_bn(out, blk["w2"], blk["s2"], blk["b2"], 1, 1,
                           residual=ident)
        return out

    for blk in p["layer1"]:
        x = blk_fwd(x, blk, 1)
    x = blk_fwd(x, p["layer2"][0], 2)
    x = blk_fwd(x, p["layer2"][1], 1)
    return jnp.transpose(x, (0, 3, 1, 2))


# ----------------------------------------------------------------------------
if __name__ == "__main__":
    key = jax.random.PRNGKey(0)
    kx, kp = jax.random.split(key)
    x = jax.random.normal(kx, (2, 3, 32, 32), jnp.float32)    # NCHW input
    params = init_params(kp)

    fwd = jax.jit(net_forward)
    out = jax.block_until_ready(fwd(x, params))

    ref = jax.block_until_ready(jax.jit(ref_forward)(x, params))
    assert out.shape == (2, 16, 4, 4), out.shape
    np.testing.assert_allclose(np.asarray(out), np.asarray(ref),
                               rtol=1e-3, atol=1e-3)
    print("KERNEL_OK")
</pallas_src>

<mosaic_0001>
module attributes {stable_mosaic.version = 11 : i64} {
  func.func @_net_kernel(%arg0: i32, %arg1: memref<576x147xbf16, #tpu.memory_space<vmem>>, %arg2: memref<576x1xf32, #tpu.memory_space<vmem>>, %arg3: memref<147x8xbf16, #tpu.memory_space<vmem>>, %arg4: memref<2x8xf32, #tpu.memory_space<vmem>>, %arg5: memref<9x64x1xf32, #tpu.memory_space<vmem>>, %arg6: memref<4x8x72xbf16, #tpu.memory_space<vmem>>, %arg7: memref<4x2x8xf32, #tpu.memory_space<vmem>>, %arg8: memref<9x16x64xbf16, #tpu.memory_space<vmem>>, %arg9: memref<9x8x16xbf16, #tpu.memory_space<vmem>>, %arg10: memref<2x16xf32, #tpu.memory_space<vmem>>, %arg11: memref<8x16xbf16, #tpu.memory_space<vmem>>, %arg12: memref<2x16xf32, #tpu.memory_space<vmem>>, %arg13: memref<9x16x1xf32, #tpu.memory_space<vmem>>, %arg14: memref<3x16x144xbf16, #tpu.memory_space<vmem>>, %arg15: memref<3x2x16xf32, #tpu.memory_space<vmem>>, %arg16: memref<1x16x16xf32, #tpu.memory_space<vmem>>) attributes {dimension_semantics = [#tpu.dimension_semantics<parallel>], iteration_bounds = array<i64: 2>, scalar_prefetch = 0 : i64, scratch_operands = 0 : i64, tpu.core_type = #tpu.core_type<tc>, window_params = [{transform_indices = @transform_0, window_bounds = array<i64: 576, 147>}, {pipeline_mode = #tpu.pipeline_mode<synchronous>, transform_indices = @transform_1, window_bounds = array<i64: 576, 1>}, {pipeline_mode = #tpu.pipeline_mode<synchronous>, transform_indices = @transform_2, window_bounds = array<i64: 147, 8>}, {pipeline_mode = #tpu.pipeline_mode<synchronous>, transform_indices = @transform_3, window_bounds = array<i64: 2, 8>}, {pipeline_mode = #tpu.pipeline_mode<synchronous>, transform_indices = @transform_4, window_bounds = array<i64: 9, 64, 1>}, {pipeline_mode = #tpu.pipeline_mode<synchronous>, transform_indices = @transform_5, window_bounds = array<i64: 4, 8, 72>}, {pipeline_mode = #tpu.pipeline_mode<synchronous>, transform_indices = @transform_6, window_bounds = array<i64: 4, 2, 8>}, {pipeline_mode = #tpu.pipeline_mode<synchronous>, transform_indices = @transform_7, window_bounds = array<i64: 9, 16, 64>}, {pipeline_mode = #tpu.pipeline_mode<synchronous>, transform_indices = @transform_8, window_bounds = array<i64: 9, 8, 16>}, {pipeline_mode = #tpu.pipeline_mode<synchronous>, transform_indices = @transform_9, window_bounds = array<i64: 2, 16>}, {pipeline_mode = #tpu.pipeline_mode<synchronous>, transform_indices = @transform_10, window_bounds = array<i64: 8, 16>}, {pipeline_mode = #tpu.pipeline_mode<synchronous>, transform_indices = @transform_11, window_bounds = array<i64: 2, 16>}, {pipeline_mode = #tpu.pipeline_mode<synchronous>, transform_indices = @transform_12, window_bounds = array<i64: 9, 16, 1>}, {pipeline_mode = #tpu.pipeline_mode<synchronous>, transform_indices = @transform_13, window_bounds = array<i64: 3, 16, 144>}, {pipeline_mode = #tpu.pipeline_mode<synchronous>, transform_indices = @transform_14, window_bounds = array<i64: 3, 2, 16>}, {transform_indices = @transform_15, window_bounds = array<i64: 1, 16, 16>}]} {
    %c0 = arith.constant 0 : index
    %c0_0 = arith.constant 0 : index
    %0 = vector.load %arg1[%c0, %c0_0] : memref<576x147xbf16, #tpu.memory_space<vmem>>, vector<576x147xbf16>
    %c0_1 = arith.constant 0 : index
    %c0_2 = arith.constant 0 : index
    %1 = vector.load %arg3[%c0_1, %c0_2] : memref<147x8xbf16, #tpu.memory_space<vmem>>, vector<147x8xbf16>
    %cst = arith.constant dense<0.000000e+00> : vector<576x8xf32>
    %2 = tpu.matmul %0, %1, %cst {dimension_numbers = #tpu.dot_dimension_numbers<[1], [0], [0], [1], [0, 0, 1, 1], [], []>} : vector<576x147xbf16>, vector<147x8xbf16>, vector<576x8xf32> -> vector<576x8xf32>
    %c0_3 = arith.constant 0 : index
    %c0_4 = arith.constant 0 : index
    %3 = vector.load %arg4[%c0_3, %c0_4] : memref<2x8xf32, #tpu.memory_space<vmem>>, vector<2x8xf32>
    %4 = vector.extract_strided_slice %3 {offsets = [0, 0], sizes = [1, 8], strides = [1, 1]} : vector<2x8xf32> to vector<1x8xf32>
    %5 = vector.broadcast %4 : vector<1x8xf32> to vector<576x8xf32>
    %6 = arith.mulf %2, %5 : vector<576x8xf32>
    %7 = vector.extract_strided_slice %3 {offsets = [1, 0], sizes = [1, 8], strides = [1, 1]} : vector<2x8xf32> to vector<1x8xf32>
    %8 = vector.broadcast %7 : vector<1x8xf32> to vector<576x8xf32>
    %9 = arith.addf %6, %8 : vector<576x8xf32>
    %cst_5 = arith.constant 0.000000e+00 : f32
    %10 = vector.broadcast %cst_5 : f32 to vector<576x8xf32>
    %11 = arith.maximumf %9, %10 : vector<576x8xf32>
    %c0_6 = arith.constant 0 : index
    %c0_7 = arith.constant 0 : index
    %12 = vector.load %arg2[%c0_6, %c0_7] : memref<576x1xf32, #tpu.memory_space<vmem>>, vector<576x1xf32>
    %13 = vector.broadcast %12 : vector<576x1xf32> to vector<576x8xf32>
    %14 = arith.mulf %11, %13 : vector<576x8xf32>
    %15 = vector.extract_strided_slice %14 {offsets = [256, 0], sizes = [64, 8], strides = [1, 1]} : vector<576x8xf32> to vector<64x8xf32>
    %16 = vector.extract_strided_slice %14 {offsets = [0, 0], sizes = [64, 8], strides = [1, 1]} : vector<576x8xf32> to vector<64x8xf32>
    %17 = arith.maximumf %15, %16 : vector<64x8xf32>
    %18 = vector.extract_strided_slice %14 {offsets = [64, 0], sizes = [64, 8], strides = [1, 1]} : vector<576x8xf32> to vector<64x8xf32>
    %19 = arith.maximumf %17, %18 : vector<64x8xf32>
    %20 = vector.extract_strided_slice %14 {offsets = [128, 0], sizes = [64, 8], strides = [1, 1]} : vector<576x8xf32> to vector<64x8xf32>
    %21 = arith.maximumf %19, %20 : vector<64x8xf32>
    %22 = vector.extract_strided_slice %14 {offsets = [192, 0], sizes = [64, 8], strides = [1, 1]} : vector<576x8xf32> to vector<64x8xf32>
    %23 = arith.maximumf %21, %22 : vector<64x8xf32>
    %24 = vector.extract_strided_slice %14 {offsets = [320, 0], sizes = [64, 8], strides = [1, 1]} : vector<576x8xf32> to vector<64x8xf32>
    %25 = arith.maximumf %23, %24 : vector<64x8xf32>
    %26 = vector.extract_strided_slice %14 {offsets = [384, 0], sizes = [64, 8], strides = [1, 1]} : vector<576x8xf32> to vector<64x8xf32>
    %27 = arith.maximumf %25, %26 : vector<64x8xf32>
    %28 = vector.extract_strided_slice %14 {offsets = [448, 0], sizes = [64, 8], strides = [1, 1]} : vector<576x8xf32> to vector<64x8xf32>
    %29 = arith.maximumf %27, %28 : vector<64x8xf32>
    %30 = vector.extract_strided_slice %14 {offsets = [512, 0], sizes = [64, 8], strides = [1, 1]} : vector<576x8xf32> to vector<64x8xf32>
    %31 = arith.maximumf %29, %30 : vector<64x8xf32>
    %c0_8 = arith.constant 0 : index
    %c0_9 = arith.constant 0 : index
    %c0_10 = arith.constant 0 : index
    %32 = vector.load %arg6[%c0_8, %c0_9, %c0_10] : memref<4x8x72xbf16, #tpu.memory_space<vmem>>, vector<1x8x72xbf16>
    %33 = vector.shape_cast %32 : vector<1x8x72xbf16> to vector<8x72xbf16>
    %c0_11 = arith.constant 0 : index
    %c0_12 = arith.constant 0 : index
    %c0_13 = arith.constant 0 : index
    %34 = vector.load %arg7[%c0_11, %c0_12, %c0_13] : memref<4x2x8xf32, #tpu.memory_space<vmem>>, vector<1x2x8xf32>
    %35 = vector.shape_cast %34 : vector<1x2x8xf32> to vector<2x8xf32>
    %36 = arith.truncf %31 : vector<64x8xf32> to vector<64x8xbf16>
    %cst_14 = arith.constant dense<0.000000e+00> : vector<64x72xf32>
    %37 = tpu.matmul %36, %33, %cst_14 {dimension_numbers = #tpu.dot_dimension_numbers<[1], [0], [0], [1], [0, 0, 1, 1], [], []>} : vector<64x8xbf16>, vector<8x72xbf16>, vector<64x72xf32> -> vector<64x72xf32>
    %cst_15 = arith.constant 0.000000e+00 : f32
    %38 = vector.broadcast %cst_15 : f32 to vector<16x72xf32>
    %39 = tpu.concatenate %38, %37, %38 in 0 : vector<16x72xf32>, vector<64x72xf32>, vector<16x72xf32> -> vector<96x72xf32>
    %40 = vector.extract_strided_slice %37 {offsets = [0, 32], sizes = [64, 8], strides = [1, 1]} : vector<64x72xf32> to vector<64x8xf32>
    %41 = vector.extract_strided_slice %39 {offsets = [7, 0], sizes = [64, 8], strides = [1, 1]} : vector<96x72xf32> to vector<64x8xf32>
    %c0_16 = arith.constant 0 : index
    %c0_17 = arith.constant 0 : index
    %c0_18 = arith.constant 0 : index
    %42 = vector.load %arg5[%c0_16, %c0_17, %c0_18] : memref<9x64x1xf32, #tpu.memory_space<vmem>>, vector<1x64x1xf32>
    %43 = vector.shape_cast %42 : vector<1x64x1xf32> to vector<64x1xf32>
    %44 = vector.broadcast %43 : vector<64x1xf32> to vector<64x8xf32>
    %45 = arith.mulf %44, %41 : vector<64x8xf32>
    %46 = arith.addf %40, %45 : vector<64x8xf32>
    %47 = vector.extract_strided_slice %39 {offsets = [8, 8], sizes = [64, 8], strides = [1, 1]} : vector<96x72xf32> to vector<64x8xf32>
    %c1 = arith.constant 1 : index
    %c0_19 = arith.constant 0 : index
    %c0_20 = arith.constant 0 : index
    %48 = vector.load %arg5[%c1, %c0_19, %c0_20] : memref<9x64x1xf32, #tpu.memory_space<vmem>>, vector<1x64x1xf32>
    %49 = vector.shape_cast %48 : vector<1x64x1xf32> to vector<64x1xf32>
    %50 = vector.broadcast %49 : vector<64x1xf32> to vector<64x8xf32>
    %51 = arith.mulf %50, %47 : vector<64x8xf32>
    %52 = arith.addf %46, %51 : vector<64x8xf32>
    %53 = vector.extract_strided_slice %39 {offsets = [9, 16], sizes = [64, 8], strides = [1, 1]} : vector<96x72xf32> to vector<64x8xf32>
    %c2 = arith.constant 2 : index
    %c0_21 = arith.constant 0 : index
    %c0_22 = arith.constant 0 : index
    %54 = vector.load %arg5[%c2, %c0_21, %c0_22] : memref<9x64x1xf32, #tpu.memory_space<vmem>>, vector<1x64x1xf32>
    %55 = vector.shape_cast %54 : vector<1x64x1xf32> to vector<64x1xf32>
    %56 = vector.broadcast %55 : vector<64x1xf32> to vector<64x8xf32>
    %57 = arith.mulf %56, %53 : vector<64x8xf32>
    %58 = arith.addf %52, %57 : vector<64x8xf32>
    %59 = vector.extract_strided_slice %39 {offsets = [15, 24], sizes = [64, 8], strides = [1, 1]} : vector<96x72xf32> to vector<64x8xf32>
    %c3 = arith.constant 3 : index
    %c0_23 = arith.constant 0 : index
    %c0_24 = arith.constant 0 : index
    %60 = vector.load %arg5[%c3, %c0_23, %c0_24] : memref<9x64x1xf32, #tpu.memory_space<vmem>>, vector<1x64x1xf32>
    %61 = vector.shape_cast %60 : vector<1x64x1xf32> to vector<64x1xf32>
    %62 = vector.broadcast %61 : vector<64x1xf32> to vector<64x8xf32>
    %63 = arith.mulf %62, %59 : vector<64x8xf32>
    %64 = arith.addf %58, %63 : vector<64x8xf32>
    %65 = vector.extract_strided_slice %39 {offsets = [17, 40], sizes = [64, 8], strides = [1, 1]} : vector<96x72xf32> to vector<64x8xf32>
    %c5 = arith.constant 5 : index
    %c0_25 = arith.constant 0 : index
    %c0_26 = arith.constant 0 : index
    %66 = vector.load %arg5[%c5, %c0_25, %c0_26] : memref<9x64x1xf32, #tpu.memory_space<vmem>>, vector<1x64x1xf32>
    %67 = vector.shape_cast %66 : vector<1x64x1xf32> to vector<64x1xf32>
    %68 = vector.broadcast %67 : vector<64x1xf32> to vector<64x8xf32>
    %69 = arith.mulf %68, %65 : vector<64x8xf32>
    %70 = arith.addf %64, %69 : vector<64x8xf32>
    %71 = vector.extract_strided_slice %39 {offsets = [23, 48], sizes = [64, 8], strides = [1, 1]} : vector<96x72xf32> to vector<64x8xf32>
    %c6 = arith.constant 6 : index
    %c0_27 = arith.constant 0 : index
    %c0_28 = arith.constant 0 : index
    %72 = vector.load %arg5[%c6, %c0_27, %c0_28] : memref<9x64x1xf32, #tpu.memory_space<vmem>>, vector<1x64x1xf32>
    %73 = vector.shape_cast %72 : vector<1x64x1xf32> to vector<64x1xf32>
    %74 = vector.broadcast %73 : vector<64x1xf32> to vector<64x8xf32>
    %75 = arith.mulf %74, %71 : vector<64x8xf32>
    %76 = arith.addf %70, %75 : vector<64x8xf32>
    %77 = vector.extract_strided_slice %39 {offsets = [24, 56], sizes = [64, 8], strides = [1, 1]} : vector<96x72xf32> to vector<64x8xf32>
    %c7 = arith.constant 7 : index
    %c0_29 = arith.constant 0 : index
    %c0_30 = arith.constant 0 : index
    %78 = vector.load %arg5[%c7, %c0_29, %c0_30] : memref<9x64x1xf32, #tpu.memory_space<vmem>>, vector<1x64x1xf32>
    %79 = vector.shape_cast %78 : vector<1x64x1xf32> to vector<64x1xf32>
    %80 = vector.broadcast %79 : vector<64x1xf32> to vector<64x8xf32>
    %81 = arith.mulf %80, %77 : vector<64x8xf32>
    %82 = arith.addf %76, %81 : vector<64x8xf32>
    %83 = vector.extract_strided_slice %39 {offsets = [25, 64], sizes = [64, 8], strides = [1, 1]} : vector<96x72xf32> to vector<64x8xf32>
    %c8 = arith.constant 8 : index
    %c0_31 = arith.constant 0 : index
    %c0_32 = arith.constant 0 : index
    %84 = vector.load %arg5[%c8, %c0_31, %c0_32] : memref<9x64x1xf32, #tpu.memory_space<vmem>>, vector<1x64x1xf32>
    %85 = vector.shape_cast %84 : vector<1x64x1xf32> to vector<64x1xf32>
    %86 = vector.broadcast %85 : vector<64x1xf32> to vector<64x8xf32>
    %87 = arith.mulf %86, %83 : vector<64x8xf32>
    %88 = arith.addf %82, %87 : vector<64x8xf32>
    %89 = vector.extract_strided_slice %35 {offsets = [0, 0], sizes = [1, 8], strides = [1, 1]} : vector<2x8xf32> to vector<1x8xf32>
    %90 = vector.broadcast %89 : vector<1x8xf32> to vector<64x8xf32>
    %91 = arith.mulf %88, %90 : vector<64x8xf32>
    %92 = vector.extract_strided_slice %35 {offsets = [1, 0], sizes = [1, 8], strides = [1, 1]} : vector<2x8xf32> to vector<1x8xf32>
    %93 = vector.broadcast %92 : vector<1x8xf32> to vector<64x8xf32>
    %94 = arith.addf %91, %93 : vector<64x8xf32>
    %cst_33 = arith.constant 0.000000e+00 : f32
    %95 = vector.broadcast %cst_33 : f32 to vector<64x8xf32>
    %96 = arith.maximumf %94, %95 : vector<64x8xf32>
    %c1_34 = arith.constant 1 : index
    %c0_35 = arith.constant 0 : index
    %c0_36 = arith.constant 0 : index
    %97 = vector.load %arg6[%c1_34, %c0_35, %c0_36] : memref<4x8x72xbf16, #tpu.memory_space<vmem>>, vector<1x8x72xbf16>
    %98 = vector.shape_cast %97 : vector<1x8x72xbf16> to vector<8x72xbf16>
    %c1_37 = arith.constant 1 : index
    %c0_38 = arith.constant 0 : index
    %c0_39 = arith.constant 0 : index
    %99 = vector.load %arg7[%c1_37, %c0_38, %c0_39] : memref<4x2x8xf32, #tpu.memory_space<vmem>>, vector<1x2x8xf32>
    %100 = vector.shape_cast %99 : vector<1x2x8xf32> to vector<2x8xf32>
    %101 = arith.truncf %96 : vector<64x8xf32> to vector<64x8xbf16>
    %cst_40 = arith.constant dense<0.000000e+00> : vector<64x72xf32>
    %102 = tpu.matmul %101, %98, %cst_40 {dimension_numbers = #tpu.dot_dimension_numbers<[1], [0], [0], [1], [0, 0, 1, 1], [], []>} : vector<64x8xbf16>, vector<8x72xbf16>, vector<64x72xf32> -> vector<64x72xf32>
    %cst_41 = arith.constant 0.000000e+00 : f32
    %103 = vector.broadcast %cst_41 : f32 to vector<16x72xf32>
    %104 = tpu.concatenate %103, %102, %103 in 0 : vector<16x72xf32>, vector<64x72xf32>, vector<16x72xf32> -> vector<96x72xf32>
    %105 = vector.extract_strided_slice %102 {offsets = [0, 32], sizes = [64, 8], strides = [1, 1]} : vector<64x72xf32> to vector<64x8xf32>
    %106 = vector.extract_strided_slice %104 {offsets = [7, 0], sizes = [64, 8], strides = [1, 1]} : vector<96x72xf32> to vector<64x8xf32>
    %c0_42 = arith.constant 0 : index
    %c0_43 = arith.constant 0 : index
    %c0_44 = arith.constant 0 : index
    %107 = vector.load %arg5[%c0_42, %c0_43, %c0_44] : memref<9x64x1xf32, #tpu.memory_space<vmem>>, vector<1x64x1xf32>
    %108 = vector.shape_cast %107 : vector<1x64x1xf32> to vector<64x1xf32>
    %109 = vector.broadcast %108 : vector<64x1xf32> to vector<64x8xf32>
    %110 = arith.mulf %109, %106 : vector<64x8xf32>
    %111 = arith.addf %105, %110 : vector<64x8xf32>
    %112 = vector.extract_strided_slice %104 {offsets = [8, 8], sizes = [64, 8], strides = [1, 1]} : vector<96x72xf32> to vector<64x8xf32>
    %c1_45 = arith.constant 1 : index
    %c0_46 = arith.constant 0 : index
    %c0_47 = arith.constant 0 : index
    %113 = vector.load %arg5[%c1_45, %c0_46, %c0_47] : memref<9x64x1xf32, #tpu.memory_space<vmem>>, vector<1x64x1xf32>
    %114 = vector.shape_cast %113 : vector<1x64x1xf32> to vector<64x1xf32>
    %115 = vector.broadcast %114 : vector<64x1xf32> to vector<64x8xf32>
    %116 = arith.mulf %115, %112 : vector<64x8xf32>
    %117 = arith.addf %111, %116 : vector<64x8xf32>
    %118 = vector.extract_strided_slice %104 {offsets = [9, 16], sizes = [64, 8], strides = [1, 1]} : vector<96x72xf32> to vector<64x8xf32>
    %c2_48 = arith.constant 2 : index
    %c0_49 = arith.constant 0 : index
    %c0_50 = arith.constant 0 : index
    %119 = vector.load %arg5[%c2_48, %c0_49, %c0_50] : memref<9x64x1xf32, #tpu.memory_space<vmem>>, vector<1x64x1xf32>
    %120 = vector.shape_cast %119 : vector<1x64x1xf32> to vector<64x1xf32>
    %121 = vector.broadcast %120 : vector<64x1xf32> to vector<64x8xf32>
    %122 = arith.mulf %121, %118 : vector<64x8xf32>
    %123 = arith.addf %117, %122 : vector<64x8xf32>
    %124 = vector.extract_strided_slice %104 {offsets = [15, 24], sizes = [64, 8], strides = [1, 1]} : vector<96x72xf32> to vector<64x8xf32>
    %c3_51 = arith.constant 3 : index
    %c0_52 = arith.constant 0 : index
    %c0_53 = arith.constant 0 : index
    %125 = vector.load %arg5[%c3_51, %c0_52, %c0_53] : memref<9x64x1xf32, #tpu.memory_space<vmem>>, vector<1x64x1xf32>
    %126 = vector.shape_cast %125 : vector<1x64x1xf32> to vector<64x1xf32>
    %127 = vector.broadcast %126 : vector<64x1xf32> to vector<64x8xf32>
    %128 = arith.mulf %127, %124 : vector<64x8xf32>
    %129 = arith.addf %123, %128 : vector<64x8xf32>
    %130 = vector.extract_strided_slice %104 {offsets = [17, 40], sizes = [64, 8], strides = [1, 1]} : vector<96x72xf32> to vector<64x8xf32>
    %c5_54 = arith.constant 5 : index
    %c0_55 = arith.constant 0 : index
    %c0_56 = arith.constant 0 : index
    %131 = vector.load %arg5[%c5_54, %c0_55, %c0_56] : memref<9x64x1xf32, #tpu.memory_space<vmem>>, vector<1x64x1xf32>
    %132 = vector.shape_cast %131 : vector<1x64x1xf32> to vector<64x1xf32>
    %133 = vector.broadcast %132 : vector<64x1xf32> to vector<64x8xf32>
    %134 = arith.mulf %133, %130 : vector<64x8xf32>
    %135 = arith.addf %129, %134 : vector<64x8xf32>
    %136 = vector.extract_strided_slice %104 {offsets = [23, 48], sizes = [64, 8], strides = [1, 1]} : vector<96x72xf32> to vector<64x8xf32>
    %c6_57 = arith.constant 6 : index
    %c0_58 = arith.constant 0 : index
    %c0_59 = arith.constant 0 : index
    %137 = vector.load %arg5[%c6_57, %c0_58, %c0_59] : memref<9x64x1xf32, #tpu.memory_space<vmem>>, vector<1x64x1xf32>
    %138 = vector.shape_cast %137 : vector<1x64x1xf32> to vector<64x1xf32>
    %139 = vector.broadcast %138 : vector<64x1xf32> to vector<64x8xf32>
    %140 = arith.mulf %139, %136 : vector<64x8xf32>
    %141 = arith.addf %135, %140 : vector<64x8xf32>
    %142 = vector.extract_strided_slice %104 {offsets = [24, 56], sizes = [64, 8], strides = [1, 1]} : vector<96x72xf32> to vector<64x8xf32>
    %c7_60 = arith.constant 7 : index
    %c0_61 = arith.constant 0 : index
    %c0_62 = arith.constant 0 : index
    %143 = vector.load %arg5[%c7_60, %c0_61, %c0_62] : memref<9x64x1xf32, #tpu.memory_space<vmem>>, vector<1x64x1xf32>
    %144 = vector.shape_cast %143 : vector<1x64x1xf32> to vector<64x1xf32>
    %145 = vector.broadcast %144 : vector<64x1xf32> to vector<64x8xf32>
    %146 = arith.mulf %145, %142 : vector<64x8xf32>
    %147 = arith.addf %141, %146 : vector<64x8xf32>
    %148 = vector.extract_strided_slice %104 {offsets = [25, 64], sizes = [64, 8], strides = [1, 1]} : vector<96x72xf32> to vector<64x8xf32>
    %c8_63 = arith.constant 8 : index
    %c0_64 = arith.constant 0 : index
    %c0_65 = arith.constant 0 : index
    %149 = vector.load %arg5[%c8_63, %c0_64, %c0_65] : memref<9x64x1xf32, #tpu.memory_space<vmem>>, vector<1x64x1xf32>
    %150 = vector.shape_cast %149 : vector<1x64x1xf32> to vector<64x1xf32>
    %151 = vector.broadcast %150 : vector<64x1xf32> to vector<64x8xf32>
    %152 = arith.mulf %151, %148 : vector<64x8xf32>
    %153 = arith.addf %147, %152 : vector<64x8xf32>
    %154 = vector.extract_strided_slice %100 {offsets = [0, 0], sizes = [1, 8], strides = [1, 1]} : vector<2x8xf32> to vector<1x8xf32>
    %155 = vector.broadcast %154 : vector<1x8xf32> to vector<64x8xf32>
    %156 = arith.mulf %153, %155 : vector<64x8xf32>
    %157 = vector.extract_strided_slice %100 {offsets = [1, 0], sizes = [1, 8], strides = [1, 1]} : vector<2x8xf32> to vector<1x8xf32>
    %158 = vector.broadcast %157 : vector<1x8xf32> to vector<64x8xf32>
    %159 = arith.addf %156, %158 : vector<64x8xf32>
    %160 = arith.addf %159, %31 : vector<64x8xf32>
    %cst_66 = arith.constant 0.000000e+00 : f32
    %161 = vector.broadcast %cst_66 : f32 to vector<64x8xf32>
    %162 = arith.maximumf %160, %161 : vector<64x8xf32>
    %c2_67 = arith.constant 2 : index
    %c0_68 = arith.constant 0 : index
    %c0_69 = arith.constant 0 : index
    %163 = vector.load %arg6[%c2_67, %c0_68, %c0_69] : memref<4x8x72xbf16, #tpu.memory_space<vmem>>, vector<1x8x72xbf16>
    %164 = vector.shape_cast %163 : vector<1x8x72xbf16> to vector<8x72xbf16>
    %c2_70 = arith.constant 2 : index
    %c0_71 = arith.constant 0 : index
    %c0_72 = arith.constant 0 : index
    %165 = vector.load %arg7[%c2_70, %c0_71, %c0_72] : memref<4x2x8xf32, #tpu.memory_space<vmem>>, vector<1x2x8xf32>
    %166 = vector.shape_cast %165 : vector<1x2x8xf32> to vector<2x8xf32>
    %167 = arith.truncf %162 : vector<64x8xf32> to vector<64x8xbf16>
    %cst_73 = arith.constant dense<0.000000e+00> : vector<64x72xf32>
    %168 = tpu.matmul %167, %164, %cst_73 {dimension_numbers = #tpu.dot_dimension_numbers<[1], [0], [0], [1], [0, 0, 1, 1], [], []>} : vector<64x8xbf16>, vector<8x72xbf16>, vector<64x72xf32> -> vector<64x72xf32>
    %cst_74 = arith.constant 0.000000e+00 : f32
    %169 = vector.broadcast %cst_74 : f32 to vector<16x72xf32>
    %170 = tpu.concatenate %169, %168, %169 in 0 : vector<16x72xf32>, vector<64x72xf32>, vector<16x72xf32> -> vector<96x72xf32>
    %171 = vector.extract_strided_slice %168 {offsets = [0, 32], sizes = [64, 8], strides = [1, 1]} : vector<64x72xf32> to vector<64x8xf32>
    %172 = vector.extract_strided_slice %170 {offsets = [7, 0], sizes = [64, 8], strides = [1, 1]} : vector<96x72xf32> to vector<64x8xf32>
    %c0_75 = arith.constant 0 : index
    %c0_76 = arith.constant 0 : index
    %c0_77 = arith.constant 0 : index
    %173 = vector.load %arg5[%c0_75, %c0_76, %c0_77] : memref<9x64x1xf32, #tpu.memory_space<vmem>>, vector<1x64x1xf32>
    %174 = vector.shape_cast %173 : vector<1x64x1xf32> to vector<64x1xf32>
    %175 = vector.broadcast %174 : vector<64x1xf32> to vector<64x8xf32>
    %176 = arith.mulf %175, %172 : vector<64x8xf32>
    %177 = arith.addf %171, %176 : vector<64x8xf32>
    %178 = vector.extract_strided_slice %170 {offsets = [8, 8], sizes = [64, 8], strides = [1, 1]} : vector<96x72xf32> to vector<64x8xf32>
    %c1_78 = arith.constant 1 : index
    %c0_79 = arith.constant 0 : index
    %c0_80 = arith.constant 0 : index
    %179 = vector.load %arg5[%c1_78, %c0_79, %c0_80] : memref<9x64x1xf32, #tpu.memory_space<vmem>>, vector<1x64x1xf32>
    %180 = vector.shape_cast %179 : vector<1x64x1xf32> to vector<64x1xf32>
    %181 = vector.broadcast %180 : vector<64x1xf32> to vector<64x8xf32>
    %182 = arith.mulf %181, %178 : vector<64x8xf32>
    %183 = arith.addf %177, %182 : vector<64x8xf32>
    %184 = vector.extract_strided_slice %170 {offsets = [9, 16], sizes = [64, 8], strides = [1, 1]} : vector<96x72xf32> to vector<64x8xf32>
    %c2_81 = arith.constant 2 : index
    %c0_82 = arith.constant 0 : index
    %c0_83 = arith.constant 0 : index
    %185 = vector.load %arg5[%c2_81, %c0_82, %c0_83] : memref<9x64x1xf32, #tpu.memory_space<vmem>>, vector<1x64x1xf32>
    %186 = vector.shape_cast %185 : vector<1x64x1xf32> to vector<64x1xf32>
    %187 = vector.broadcast %186 : vector<64x1xf32> to vector<64x8xf32>
    %188 = arith.mulf %187, %184 : vector<64x8xf32>
    %189 = arith.addf %183, %188 : vector<64x8xf32>
    %190 = vector.extract_strided_slice %170 {offsets = [15, 24], sizes = [64, 8], strides = [1, 1]} : vector<96x72xf32> to vector<64x8xf32>
    %c3_84 = arith.constant 3 : index
    %c0_85 = arith.constant 0 : index
    %c0_86 = arith.constant 0 : index
    %191 = vector.load %arg5[%c3_84, %c0_85, %c0_86] : memref<9x64x1xf32, #tpu.memory_space<vmem>>, vector<1x64x1xf32>
    %192 = vector.shape_cast %191 : vector<1x64x1xf32> to vector<64x1xf32>
    %193 = vector.broadcast %192 : vector<64x1xf32> to vector<64x8xf32>
    %194 = arith.mulf %193, %190 : vector<64x8xf32>
    %195 = arith.addf %189, %194 : vector<64x8xf32>
    %196 = vector.extract_strided_slice %170 {offsets = [17, 40], sizes = [64, 8], strides = [1, 1]} : vector<96x72xf32> to vector<64x8xf32>
    %c5_87 = arith.constant 5 : index
    %c0_88 = arith.constant 0 : index
    %c0_89 = arith.constant 0 : index
    %197 = vector.load %arg5[%c5_87, %c0_88, %c0_89] : memref<9x64x1xf32, #tpu.memory_space<vmem>>, vector<1x64x1xf32>
    %198 = vector.shape_cast %197 : vector<1x64x1xf32> to vector<64x1xf32>
    %199 = vector.broadcast %198 : vector<64x1xf32> to vector<64x8xf32>
    %200 = arith.mulf %199, %196 : vector<64x8xf32>
    %201 = arith.addf %195, %200 : vector<64x8xf32>
    %202 = vector.extract_strided_slice %170 {offsets = [23, 48], sizes = [64, 8], strides = [1, 1]} : vector<96x72xf32> to vector<64x8xf32>
    %c6_90 = arith.constant 6 : index
    %c0_91 = arith.constant 0 : index
    %c0_92 = arith.constant 0 : index
    %203 = vector.load %arg5[%c6_90, %c0_91, %c0_92] : memref<9x64x1xf32, #tpu.memory_space<vmem>>, vector<1x64x1xf32>
    %204 = vector.shape_cast %203 : vector<1x64x1xf32> to vector<64x1xf32>
    %205 = vector.broadcast %204 : vector<64x1xf32> to vector<64x8xf32>
    %206 = arith.mulf %205, %202 : vector<64x8xf32>
    %207 = arith.addf %201, %206 : vector<64x8xf32>
    %208 = vector.extract_strided_slice %170 {offsets = [24, 56], sizes = [64, 8], strides = [1, 1]} : vector<96x72xf32> to vector<64x8xf32>
    %c7_93 = arith.constant 7 : index
    %c0_94 = arith.constant 0 : index
    %c0_95 = arith.constant 0 : index
    %209 = vector.load %arg5[%c7_93, %c0_94, %c0_95] : memref<9x64x1xf32, #tpu.memory_space<vmem>>, vector<1x64x1xf32>
    %210 = vector.shape_cast %209 : vector<1x64x1xf32> to vector<64x1xf32>
    %211 = vector.broadcast %210 : vector<64x1xf32> to vector<64x8xf32>
    %212 = arith.mulf %211, %208 : vector<64x8xf32>
    %213 = arith.addf %207, %212 : vector<64x8xf32>
    %214 = vector.extract_strided_slice %170 {offsets = [25, 64], sizes = [64, 8], strides = [1, 1]} : vector<96x72xf32> to vector<64x8xf32>
    %c8_96 = arith.constant 8 : index
    %c0_97 = arith.constant 0 : index
    %c0_98 = arith.constant 0 : index
    %215 = vector.load %arg5[%c8_96, %c0_97, %c0_98] : memref<9x64x1xf32, #tpu.memory_space<vmem>>, vector<1x64x1xf32>
    %216 = vector.shape_cast %215 : vector<1x64x1xf32> to vector<64x1xf32>
    %217 = vector.broadcast %216 : vector<64x1xf32> to vector<64x8xf32>
    %218 = arith.mulf %217, %214 : vector<64x8xf32>
    %219 = arith.addf %213, %218 : vector<64x8xf32>
    %220 = vector.extract_strided_slice %166 {offsets = [0, 0], sizes = [1, 8], strides = [1, 1]} : vector<2x8xf32> to vector<1x8xf32>
    %221 = vector.broadcast %220 : vector<1x8xf32> to vector<64x8xf32>
    %222 = arith.mulf %219, %221 : vector<64x8xf32>
    %223 = vector.extract_strided_slice %166 {offsets = [1, 0], sizes = [1, 8], strides = [1, 1]} : vector<2x8xf32> to vector<1x8xf32>
    %224 = vector.broadcast %223 : vector<1x8xf32> to vector<64x8xf32>
    %225 = arith.addf %222, %224 : vector<64x8xf32>
    %cst_99 = arith.constant 0.000000e+00 : f32
    %226 = vector.broadcast %cst_99 : f32 to vector<64x8xf32>
    %227 = arith.maximumf %225, %226 : vector<64x8xf32>
    %c3_100 = arith.constant 3 : index
    %c0_101 = arith.constant 0 : index
    %c0_102 = arith.constant 0 : index
    %228 = vector.load %arg6[%c3_100, %c0_101, %c0_102] : memref<4x8x72xbf16, #tpu.memory_space<vmem>>, vector<1x8x72xbf16>
    %229 = vector.shape_cast %228 : vector<1x8x72xbf16> to vector<8x72xbf16>
    %c3_103 = arith.constant 3 : index
    %c0_104 = arith.constant 0 : index
    %c0_105 = arith.constant 0 : index
    %230 = vector.load %arg7[%c3_103, %c0_104, %c0_105] : memref<4x2x8xf32, #tpu.memory_space<vmem>>, vector<1x2x8xf32>
    %231 = vector.shape_cast %230 : vector<1x2x8xf32> to vector<2x8xf32>
    %232 = arith.truncf %227 : vector<64x8xf32> to vector<64x8xbf16>
    %cst_106 = arith.constant dense<0.000000e+00> : vector<64x72xf32>
    %233 = tpu.matmul %232, %229, %cst_106 {dimension_numbers = #tpu.dot_dimension_numbers<[1], [0], [0], [1], [0, 0, 1, 1], [], []>} : vector<64x8xbf16>, vector<8x72xbf16>, vector<64x72xf32> -> vector<64x72xf32>
    %cst_107 = arith.constant 0.000000e+00 : f32
    %234 = vector.broadcast %cst_107 : f32 to vector<16x72xf32>
    %235 = tpu.concatenate %234, %233, %234 in 0 : vector<16x72xf32>, vector<64x72xf32>, vector<16x72xf32> -> vector<96x72xf32>
    %236 = vector.extract_strided_slice %233 {offsets = [0, 32], sizes = [64, 8], strides = [1, 1]} : vector<64x72xf32> to vector<64x8xf32>
    %237 = vector.extract_strided_slice %235 {offsets = [7, 0], sizes = [64, 8], strides = [1, 1]} : vector<96x72xf32> to vector<64x8xf32>
    %c0_108 = arith.constant 0 : index
    %c0_109 = arith.constant 0 : index
    %c0_110 = arith.constant 0 : index
    %238 = vector.load %arg5[%c0_108, %c0_109, %c0_110] : memref<9x64x1xf32, #tpu.memory_space<vmem>>, vector<1x64x1xf32>
    %239 = vector.shape_cast %238 : vector<1x64x1xf32> to vector<64x1xf32>
    %240 = vector.broadcast %239 : vector<64x1xf32> to vector<64x8xf32>
    %241 = arith.mulf %240, %237 : vector<64x8xf32>
    %242 = arith.addf %236, %241 : vector<64x8xf32>
    %243 = vector.extract_strided_slice %235 {offsets = [8, 8], sizes = [64, 8], strides = [1, 1]} : vector<96x72xf32> to vector<64x8xf32>
    %c1_111 = arith.constant 1 : index
    %c0_112 = arith.constant 0 : index
    %c0_113 = arith.constant 0 : index
    %244 = vector.load %arg5[%c1_111, %c0_112, %c0_113] : memref<9x64x1xf32, #tpu.memory_space<vmem>>, vector<1x64x1xf32>
    %245 = vector.shape_cast %244 : vector<1x64x1xf32> to vector<64x1xf32>
    %246 = vector.broadcast %245 : vector<64x1xf32> to vector<64x8xf32>
    %247 = arith.mulf %246, %243 : vector<64x8xf32>
    %248 = arith.addf %242, %247 : vector<64x8xf32>
    %249 = vector.extract_strided_slice %235 {offsets = [9, 16], sizes = [64, 8], strides = [1, 1]} : vector<96x72xf32> to vector<64x8xf32>
    %c2_114 = arith.constant 2 : index
    %c0_115 = arith.constant 0 : index
    %c0_116 = arith.constant 0 : index
    %250 = vector.load %arg5[%c2_114, %c0_115, %c0_116] : memref<9x64x1xf32, #tpu.memory_space<vmem>>, vector<1x64x1xf32>
    %251 = vector.shape_cast %250 : vector<1x64x1xf32> to vector<64x1xf32>
    %252 = vector.broadcast %251 : vector<64x1xf32> to vector<64x8xf32>
    %253 = arith.mulf %252, %249 : vector<64x8xf32>
    %254 = arith.addf %248, %253 : vector<64x8xf32>
    %255 = vector.extract_strided_slice %235 {offsets = [15, 24], sizes = [64, 8], strides = [1, 1]} : vector<96x72xf32> to vector<64x8xf32>
    %c3_117 = arith.constant 3 : index
    %c0_118 = arith.constant 0 : index
    %c0_119 = arith.constant 0 : index
    %256 = vector.load %arg5[%c3_117, %c0_118, %c0_119] : memref<9x64x1xf32, #tpu.memory_space<vmem>>, vector<1x64x1xf32>
    %257 = vector.shape_cast %256 : vector<1x64x1xf32> to vector<64x1xf32>
    %258 = vector.broadcast %257 : vector<64x1xf32> to vector<64x8xf32>
    %259 = arith.mulf %258, %255 : vector<64x8xf32>
    %260 = arith.addf %254, %259 : vector<64x8xf32>
    %261 = vector.extract_strided_slice %235 {offsets = [17, 40], sizes = [64, 8], strides = [1, 1]} : vector<96x72xf32> to vector<64x8xf32>
    %c5_120 = arith.constant 5 : index
    %c0_121 = arith.constant 0 : index
    %c0_122 = arith.constant 0 : index
    %262 = vector.load %arg5[%c5_120, %c0_121, %c0_122] : memref<9x64x1xf32, #tpu.memory_space<vmem>>, vector<1x64x1xf32>
    %263 = vector.shape_cast %262 : vector<1x64x1xf32> to vector<64x1xf32>
    %264 = vector.broadcast %263 : vector<64x1xf32> to vector<64x8xf32>
    %265 = arith.mulf %264, %261 : vector<64x8xf32>
    %266 = arith.addf %260, %265 : vector<64x8xf32>
    %267 = vector.extract_strided_slice %235 {offsets = [23, 48], sizes = [64, 8], strides = [1, 1]} : vector<96x72xf32> to vector<64x8xf32>
    %c6_123 = arith.constant 6 : index
    %c0_124 = arith.constant 0 : index
    %c0_125 = arith.constant 0 : index
    %268 = vector.load %arg5[%c6_123, %c0_124, %c0_125] : memref<9x64x1xf32, #tpu.memory_space<vmem>>, vector<1x64x1xf32>
    %269 = vector.shape_cast %268 : vector<1x64x1xf32> to vector<64x1xf32>
    %270 = vector.broadcast %269 : vector<64x1xf32> to vector<64x8xf32>
    %271 = arith.mulf %270, %267 : vector<64x8xf32>
    %272 = arith.addf %266, %271 : vector<64x8xf32>
    %273 = vector.extract_strided_slice %235 {offsets = [24, 56], sizes = [64, 8], strides = [1, 1]} : vector<96x72xf32> to vector<64x8xf32>
    %c7_126 = arith.constant 7 : index
    %c0_127 = arith.constant 0 : index
    %c0_128 = arith.constant 0 : index
    %274 = vector.load %arg5[%c7_126, %c0_127, %c0_128] : memref<9x64x1xf32, #tpu.memory_space<vmem>>, vector<1x64x1xf32>
    %275 = vector.shape_cast %274 : vector<1x64x1xf32> to vector<64x1xf32>
    %276 = vector.broadcast %275 : vector<64x1xf32> to vector<64x8xf32>
    %277 = arith.mulf %276, %273 : vector<64x8xf32>
    %278 = arith.addf %272, %277 : vector<64x8xf32>
    %279 = vector.extract_strided_slice %235 {offsets = [25, 64], sizes = [64, 8], strides = [1, 1]} : vector<96x72xf32> to vector<64x8xf32>
    %c8_129 = arith.constant 8 : index
    %c0_130 = arith.constant 0 : index
    %c0_131 = arith.constant 0 : index
    %280 = vector.load %arg5[%c8_129, %c0_130, %c0_131] : memref<9x64x1xf32, #tpu.memory_space<vmem>>, vector<1x64x1xf32>
    %281 = vector.shape_cast %280 : vector<1x64x1xf32> to vector<64x1xf32>
    %282 = vector.broadcast %281 : vector<64x1xf32> to vector<64x8xf32>
    %283 = arith.mulf %282, %279 : vector<64x8xf32>
    %284 = arith.addf %278, %283 : vector<64x8xf32>
    %285 = vector.extract_strided_slice %231 {offsets = [0, 0], sizes = [1, 8], strides = [1, 1]} : vector<2x8xf32> to vector<1x8xf32>
    %286 = vector.broadcast %285 : vector<1x8xf32> to vector<64x8xf32>
    %287 = arith.mulf %284, %286 : vector<64x8xf32>
    %288 = vector.extract_strided_slice %231 {offsets = [1, 0], sizes = [1, 8], strides = [1, 1]} : vector<2x8xf32> to vector<1x8xf32>
    %289 = vector.broadcast %288 : vector<1x8xf32> to vector<64x8xf32>
    %290 = arith.addf %287, %289 : vector<64x8xf32>
    %291 = arith.addf %290, %162 : vector<64x8xf32>
    %cst_132 = arith.constant 0.000000e+00 : f32
    %292 = vector.broadcast %cst_132 : f32 to vector<64x8xf32>
    %293 = arith.maximumf %291, %292 : vector<64x8xf32>
    %294 = arith.truncf %293 : vector<64x8xf32> to vector<64x8xbf16>
    %c0_133 = arith.constant 0 : index
    %c0_134 = arith.constant 0 : index
    %c0_135 = arith.constant 0 : index
    %295 = vector.load %arg8[%c0_133, %c0_134, %c0_135] : memref<9x16x64xbf16, #tpu.memory_space<vmem>>, vector<1x16x64xbf16>
    %296 = vector.shape_cast %295 : vector<1x16x64xbf16> to vector<16x64xbf16>
    %cst_136 = arith.constant dense<0.000000e+00> : vector<16x8xf32>
    %297 = tpu.matmul %296, %294, %cst_136 {dimension_numbers = #tpu.dot_dimension_numbers<[1], [0], [0], [1], [0, 0, 1, 1], [], []>} : vector<16x64xbf16>, vector<64x8xbf16>, vector<16x8xf32> -> vector<16x8xf32>
    %298 = arith.truncf %297 : vector<16x8xf32> to vector<16x8xbf16>
    %c1_137 = arith.constant 1 : index
    %c0_138 = arith.constant 0 : index
    %c0_139 = arith.constant 0 : index
    %299 = vector.load %arg8[%c1_137, %c0_138, %c0_139] : memref<9x16x64xbf16, #tpu.memory_space<vmem>>, vector<1x16x64xbf16>
    %300 = vector.shape_cast %299 : vector<1x16x64xbf16> to vector<16x64xbf16>
    %cst_140 = arith.constant dense<0.000000e+00> : vector<16x8xf32>
    %301 = tpu.matmul %300, %294, %cst_140 {dimension_numbers = #tpu.dot_dimension_numbers<[1], [0], [0], [1], [0, 0, 1, 1], [], []>} : vector<16x64xbf16>, vector<64x8xbf16>, vector<16x8xf32> -> vector<16x8xf32>
    %302 = arith.truncf %301 : vector<16x8xf32> to vector<16x8xbf16>
    %c2_141 = arith.constant 2 : index
    %c0_142 = arith.constant 0 : index
    %c0_143 = arith.constant 0 : index
    %303 = vector.load %arg8[%c2_141, %c0_142, %c0_143] : memref<9x16x64xbf16, #tpu.memory_space<vmem>>, vector<1x16x64xbf16>
    %304 = vector.shape_cast %303 : vector<1x16x64xbf16> to vector<16x64xbf16>
    %cst_144 = arith.constant dense<0.000000e+00> : vector<16x8xf32>
    %305 = tpu.matmul %304, %294, %cst_144 {dimension_numbers = #tpu.dot_dimension_numbers<[1], [0], [0], [1], [0, 0, 1, 1], [], []>} : vector<16x64xbf16>, vector<64x8xbf16>, vector<16x8xf32> -> vector<16x8xf32>
    %306 = arith.truncf %305 : vector<16x8xf32> to vector<16x8xbf16>
    %c3_145 = arith.constant 3 : index
    %c0_146 = arith.constant 0 : index
    %c0_147 = arith.constant 0 : index
    %307 = vector.load %arg8[%c3_145, %c0_146, %c0_147] : memref<9x16x64xbf16, #tpu.memory_space<vmem>>, vector<1x16x64xbf16>
    %308 = vector.shape_cast %307 : vector<1x16x64xbf16> to vector<16x64xbf16>
    %cst_148 = arith.constant dense<0.000000e+00> : vector<16x8xf32>
    %309 = tpu.matmul %308, %294, %cst_148 {dimension_numbers = #tpu.dot_dimension_numbers<[1], [0], [0], [1], [0, 0, 1, 1], [], []>} : vector<16x64xbf16>, vector<64x8xbf16>, vector<16x8xf32> -> vector<16x8xf32>
    %310 = arith.truncf %309 : vector<16x8xf32> to vector<16x8xbf16>
    %c4 = arith.constant 4 : index
    %c0_149 = arith.constant 0 : index
    %c0_150 = arith.constant 0 : index
    %311 = vector.load %arg8[%c4, %c0_149, %c0_150] : memref<9x16x64xbf16, #tpu.memory_space<vmem>>, vector<1x16x64xbf16>
    %312 = vector.shape_cast %311 : vector<1x16x64xbf16> to vector<16x64xbf16>
    %cst_151 = arith.constant dense<0.000000e+00> : vector<16x8xf32>
    %313 = tpu.matmul %312, %294, %cst_151 {dimension_numbers = #tpu.dot_dimension_numbers<[1], [0], [0], [1], [0, 0, 1, 1], [], []>} : vector<16x64xbf16>, vector<64x8xbf16>, vector<16x8xf32> -> vector<16x8xf32>
    %314 = arith.truncf %313 : vector<16x8xf32> to vector<16x8xbf16>
    %c5_152 = arith.constant 5 : index
    %c0_153 = arith.constant 0 : index
    %c0_154 = arith.constant 0 : index
    %315 = vector.load %arg8[%c5_152, %c0_153, %c0_154] : memref<9x16x64xbf16, #tpu.memory_space<vmem>>, vector<1x16x64xbf16>
    %316 = vector.shape_cast %315 : vector<1x16x64xbf16> to vector<16x64xbf16>
    %cst_155 = arith.constant dense<0.000000e+00> : vector<16x8xf32>
    %317 = tpu.matmul %316, %294, %cst_155 {dimension_numbers = #tpu.dot_dimension_numbers<[1], [0], [0], [1], [0, 0, 1, 1], [], []>} : vector<16x64xbf16>, vector<64x8xbf16>, vector<16x8xf32> -> vector<16x8xf32>
    %318 = arith.truncf %317 : vector<16x8xf32> to vector<16x8xbf16>
    %c6_156 = arith.constant 6 : index
    %c0_157 = arith.constant 0 : index
    %c0_158 = arith.constant 0 : index
    %319 = vector.load %arg8[%c6_156, %c0_157, %c0_158] : memref<9x16x64xbf16, #tpu.memory_space<vmem>>, vector<1x16x64xbf16>
    %320 = vector.shape_cast %319 : vector<1x16x64xbf16> to vector<16x64xbf16>
    %cst_159 = arith.constant dense<0.000000e+00> : vector<16x8xf32>
    %321 = tpu.matmul %320, %294, %cst_159 {dimension_numbers = #tpu.dot_dimension_numbers<[1], [0], [0], [1], [0, 0, 1, 1], [], []>} : vector<16x64xbf16>, vector<64x8xbf16>, vector<16x8xf32> -> vector<16x8xf32>
    %322 = arith.truncf %321 : vector<16x8xf32> to vector<16x8xbf16>
    %c7_160 = arith.constant 7 : index
    %c0_161 = arith.constant 0 : index
    %c0_162 = arith.constant 0 : index
    %323 = vector.load %arg8[%c7_160, %c0_161, %c0_162] : memref<9x16x64xbf16, #tpu.memory_space<vmem>>, vector<1x16x64xbf16>
    %324 = vector.shape_cast %323 : vector<1x16x64xbf16> to vector<16x64xbf16>
    %cst_163 = arith.constant dense<0.000000e+00> : vector<16x8xf32>
    %325 = tpu.matmul %324, %294, %cst_163 {dimension_numbers = #tpu.dot_dimension_numbers<[1], [0], [0], [1], [0, 0, 1, 1], [], []>} : vector<16x64xbf16>, vector<64x8xbf16>, vector<16x8xf32> -> vector<16x8xf32>
    %326 = arith.truncf %325 : vector<16x8xf32> to vector<16x8xbf16>
    %c8_164 = arith.constant 8 : index
    %c0_165 = arith.constant 0 : index
    %c0_166 = arith.constant 0 : index
    %327 = vector.load %arg8[%c8_164, %c0_165, %c0_166] : memref<9x16x64xbf16, #tpu.memory_space<vmem>>, vector<1x16x64xbf16>
    %328 = vector.shape_cast %327 : vector<1x16x64xbf16> to vector<16x64xbf16>
    %cst_167 = arith.constant dense<0.000000e+00> : vector<16x8xf32>
    %329 = tpu.matmul %328, %294, %cst_167 {dimension_numbers = #tpu.dot_dimension_numbers<[1], [0], [0], [1], [0, 0, 1, 1], [], []>} : vector<16x64xbf16>, vector<64x8xbf16>, vector<16x8xf32> -> vector<16x8xf32>
    %330 = arith.truncf %329 : vector<16x8xf32> to vector<16x8xbf16>
    %c0_168 = arith.constant 0 : index
    %c0_169 = arith.constant 0 : index
    %c0_170 = arith.constant 0 : index
    %331 = vector.load %arg9[%c0_168, %c0_169, %c0_170] : memref<9x8x16xbf16, #tpu.memory_space<vmem>>, vector<1x8x16xbf16>
    %332 = vector.shape_cast %331 : vector<1x8x16xbf16> to vector<8x16xbf16>
    %cst_171 = arith.constant dense<0.000000e+00> : vector<16x16xf32>
    %333 = tpu.matmul %298, %332, %cst_171 {dimension_numbers = #tpu.dot_dimension_numbers<[1], [0], [0], [1], [0, 0, 1, 1], [], []>} : vector<16x8xbf16>, vector<8x16xbf16>, vector<16x16xf32> -> vector<16x16xf32>
    %c1_172 = arith.constant 1 : index
    %c0_173 = arith.constant 0 : index
    %c0_174 = arith.constant 0 : index
    %334 = vector.load %arg9[%c1_172, %c0_173, %c0_174] : memref<9x8x16xbf16, #tpu.memory_space<vmem>>, vector<1x8x16xbf16>
    %335 = vector.shape_cast %334 : vector<1x8x16xbf16> to vector<8x16xbf16>
    %cst_175 = arith.constant dense<0.000000e+00> : vector<16x16xf32>
    %336 = tpu.matmul %302, %335, %cst_175 {dimension_numbers = #tpu.dot_dimension_numbers<[1], [0], [0], [1], [0, 0, 1, 1], [], []>} : vector<16x8xbf16>, vector<8x16xbf16>, vector<16x16xf32> -> vector<16x16xf32>
    %337 = arith.addf %333, %336 : vector<16x16xf32>
    %c2_176 = arith.constant 2 : index
    %c0_177 = arith.constant 0 : index
    %c0_178 = arith.constant 0 : index
    %338 = vector.load %arg9[%c2_176, %c0_177, %c0_178] : memref<9x8x16xbf16, #tpu.memory_space<vmem>>, vector<1x8x16xbf16>
    %339 = vector.shape_cast %338 : vector<1x8x16xbf16> to vector<8x16xbf16>
    %cst_179 = arith.constant dense<0.000000e+00> : vector<16x16xf32>
    %340 = tpu.matmul %306, %339, %cst_179 {dimension_numbers = #tpu.dot_dimension_numbers<[1], [0], [0], [1], [0, 0, 1, 1], [], []>} : vector<16x8xbf16>, vector<8x16xbf16>, vector<16x16xf32> -> vector<16x16xf32>
    %341 = arith.addf %337, %340 : vector<16x16xf32>
    %c3_180 = arith.constant 3 : index
    %c0_181 = arith.constant 0 : index
    %c0_182 = arith.constant 0 : index
    %342 = vector.load %arg9[%c3_180, %c0_181, %c0_182] : memref<9x8x16xbf16, #tpu.memory_space<vmem>>, vector<1x8x16xbf16>
    %343 = vector.shape_cast %342 : vector<1x8x16xbf16> to vector<8x16xbf16>
    %cst_183 = arith.constant dense<0.000000e+00> : vector<16x16xf32>
    %344 = tpu.matmul %310, %343, %cst_183 {dimension_numbers = #tpu.dot_dimension_numbers<[1], [0], [0], [1], [0, 0, 1, 1], [], []>} : vector<16x8xbf16>, vector<8x16xbf16>, vector<16x16xf32> -> vector<16x16xf32>
    %345 = arith.addf %341, %344 : vector<16x16xf32>
    %c4_184 = arith.constant 4 : index
    %c0_185 = arith.constant 0 : index
    %c0_186 = arith.constant 0 : index
    %346 = vector.load %arg9[%c4_184, %c0_185, %c0_186] : memref<9x8x16xbf16, #tpu.memory_space<vmem>>, vector<1x8x16xbf16>
    %347 = vector.shape_cast %346 : vector<1x8x16xbf16> to vector<8x16xbf16>
    %cst_187 = arith.constant dense<0.000000e+00> : vector<16x16xf32>
    %348 = tpu.matmul %314, %347, %cst_187 {dimension_numbers = #tpu.dot_dimension_numbers<[1], [0], [0], [1], [0, 0, 1, 1], [], []>} : vector<16x8xbf16>, vector<8x16xbf16>, vector<16x16xf32> -> vector<16x16xf32>
    %349 = arith.addf %345, %348 : vector<16x16xf32>
    %c5_188 = arith.constant 5 : index
    %c0_189 = arith.constant 0 : index
    %c0_190 = arith.constant 0 : index
    %350 = vector.load %arg9[%c5_188, %c0_189, %c0_190] : memref<9x8x16xbf16, #tpu.memory_space<vmem>>, vector<1x8x16xbf16>
    %351 = vector.shape_cast %350 : vector<1x8x16xbf16> to vector<8x16xbf16>
    %cst_191 = arith.constant dense<0.000000e+00> : vector<16x16xf32>
    %352 = tpu.matmul %318, %351, %cst_191 {dimension_numbers = #tpu.dot_dimension_numbers<[1], [0], [0], [1], [0, 0, 1, 1], [], []>} : vector<16x8xbf16>, vector<8x16xbf16>, vector<16x16xf32> -> vector<16x16xf32>
    %353 = arith.addf %349, %352 : vector<16x16xf32>
    %c6_192 = arith.constant 6 : index
    %c0_193 = arith.constant 0 : index
    %c0_194 = arith.constant 0 : index
    %354 = vector.load %arg9[%c6_192, %c0_193, %c0_194] : memref<9x8x16xbf16, #tpu.memory_space<vmem>>, vector<1x8x16xbf16>
    %355 = vector.shape_cast %354 : vector<1x8x16xbf16> to vector<8x16xbf16>
    %cst_195 = arith.constant dense<0.000000e+00> : vector<16x16xf32>
    %356 = tpu.matmul %322, %355, %cst_195 {dimension_numbers = #tpu.dot_dimension_numbers<[1], [0], [0], [1], [0, 0, 1, 1], [], []>} : vector<16x8xbf16>, vector<8x16xbf16>, vector<16x16xf32> -> vector<16x16xf32>
    %357 = arith.addf %353, %356 : vector<16x16xf32>
    %c7_196 = arith.constant 7 : index
    %c0_197 = arith.constant 0 : index
    %c0_198 = arith.constant 0 : index
    %358 = vector.load %arg9[%c7_196, %c0_197, %c0_198] : memref<9x8x16xbf16, #tpu.memory_space<vmem>>, vector<1x8x16xbf16>
    %359 = vector.shape_cast %358 : vector<1x8x16xbf16> to vector<8x16xbf16>
    %cst_199 = arith.constant dense<0.000000e+00> : vector<16x16xf32>
    %360 = tpu.matmul %326, %359, %cst_199 {dimension_numbers = #tpu.dot_dimension_numbers<[1], [0], [0], [1], [0, 0, 1, 1], [], []>} : vector<16x8xbf16>, vector<8x16xbf16>, vector<16x16xf32> -> vector<16x16xf32>
    %361 = arith.addf %357, %360 : vector<16x16xf32>
    %c8_200 = arith.constant 8 : index
    %c0_201 = arith.constant 0 : index
    %c0_202 = arith.constant 0 : index
    %362 = vector.load %arg9[%c8_200, %c0_201, %c0_202] : memref<9x8x16xbf16, #tpu.memory_space<vmem>>, vector<1x8x16xbf16>
    %363 = vector.shape_cast %362 : vector<1x8x16xbf16> to vector<8x16xbf16>
    %cst_203 = arith.constant dense<0.000000e+00> : vector<16x16xf32>
    %364 = tpu.matmul %330, %363, %cst_203 {dimension_numbers = #tpu.dot_dimension_numbers<[1], [0], [0], [1], [0, 0, 1, 1], [], []>} : vector<16x8xbf16>, vector<8x16xbf16>, vector<16x16xf32> -> vector<16x16xf32>
    %365 = arith.addf %361, %364 : vector<16x16xf32>
    %c0_204 = arith.constant 0 : index
    %c0_205 = arith.constant 0 : index
    %366 = vector.load %arg10[%c0_204, %c0_205] : memref<2x16xf32, #tpu.memory_space<vmem>>, vector<2x16xf32>
    %367 = vector.extract_strided_slice %366 {offsets = [0, 0], sizes = [1, 16], strides = [1, 1]} : vector<2x16xf32> to vector<1x16xf32>
    %368 = vector.broadcast %367 : vector<1x16xf32> to vector<16x16xf32>
    %369 = arith.mulf %365, %368 : vector<16x16xf32>
    %370 = vector.extract_strided_slice %366 {offsets = [1, 0], sizes = [1, 16], strides = [1, 1]} : vector<2x16xf32> to vector<1x16xf32>
    %371 = vector.broadcast %370 : vector<1x16xf32> to vector<16x16xf32>
    %372 = arith.addf %369, %371 : vector<16x16xf32>
    %cst_206 = arith.constant 0.000000e+00 : f32
    %373 = vector.broadcast %cst_206 : f32 to vector<16x16xf32>
    %374 = arith.maximumf %372, %373 : vector<16x16xf32>
    %c0_207 = arith.constant 0 : index
    %c0_208 = arith.constant 0 : index
    %375 = vector.load %arg11[%c0_207, %c0_208] : memref<8x16xbf16, #tpu.memory_space<vmem>>, vector<8x16xbf16>
    %cst_209 = arith.constant dense<0.000000e+00> : vector<16x16xf32>
    %376 = tpu.matmul %314, %375, %cst_209 {dimension_numbers = #tpu.dot_dimension_numbers<[1], [0], [0], [1], [0, 0, 1, 1], [], []>} : vector<16x8xbf16>, vector<8x16xbf16>, vector<16x16xf32> -> vector<16x16xf32>
    %c0_210 = arith.constant 0 : index
    %c0_211 = arith.constant 0 : index
    %377 = vector.load %arg12[%c0_210, %c0_211] : memref<2x16xf32, #tpu.memory_space<vmem>>, vector<2x16xf32>
    %378 = vector.extract_strided_slice %377 {offsets = [0, 0], sizes = [1, 16], strides = [1, 1]} : vector<2x16xf32> to vector<1x16xf32>
    %379 = vector.broadcast %378 : vector<1x16xf32> to vector<16x16xf32>
    %380 = arith.mulf %376, %379 : vector<16x16xf32>
    %381 = vector.extract_strided_slice %377 {offsets = [1, 0], sizes = [1, 16], strides = [1, 1]} : vector<2x16xf32> to vector<1x16xf32>
    %382 = vector.broadcast %381 : vector<1x16xf32> to vector<16x16xf32>
    %383 = arith.addf %380, %382 : vector<16x16xf32>
    %c0_212 = arith.constant 0 : index
    %c0_213 = arith.constant 0 : index
    %c0_214 = arith.constant 0 : index
    %384 = vector.load %arg14[%c0_212, %c0_213, %c0_214] : memref<3x16x144xbf16, #tpu.memory_space<vmem>>, vector<1x16x144xbf16>
    %385 = vector.shape_cast %384 : vector<1x16x144xbf16> to vector<16x144xbf16>
    %c0_215 = arith.constant 0 : index
    %c0_216 = arith.constant 0 : index
    %c0_217 = arith.constant 0 : index
    %386 = vector.load %arg15[%c0_215, %c0_216, %c0_217] : memref<3x2x16xf32, #tpu.memory_space<vmem>>, vector<1x2x16xf32>
    %387 = vector.shape_cast %386 : vector<1x2x16xf32> to vector<2x16xf32>
    %388 = arith.truncf %374 : vector<16x16xf32> to vector<16x16xbf16>
    %cst_218 = arith.constant dense<0.000000e+00> : vector<16x144xf32>
    %389 = tpu.matmul %388, %385, %cst_218 {dimension_numbers = #tpu.dot_dimension_numbers<[1], [0], [0], [1], [0, 0, 1, 1], [], []>} : vector<16x16xbf16>, vector<16x144xbf16>, vector<16x144xf32> -> vector<16x144xf32>
    %cst_219 = arith.constant 0.000000e+00 : f32
    %390 = vector.broadcast %cst_219 : f32 to vector<16x144xf32>
    %391 = tpu.concatenate %390, %389, %390 in 0 : vector<16x144xf32>, vector<16x144xf32>, vector<16x144xf32> -> vector<48x144xf32>
    %392 = vector.extract_strided_slice %389 {offsets = [0, 64], sizes = [16, 16], strides = [1, 1]} : vector<16x144xf32> to vector<16x16xf32>
    %393 = vector.extract_strided_slice %391 {offsets = [11, 0], sizes = [16, 16], strides = [1, 1]} : vector<48x144xf32> to vector<16x16xf32>
    %c0_220 = arith.constant 0 : index
    %c0_221 = arith.constant 0 : index
    %c0_222 = arith.constant 0 : index
    %394 = vector.load %arg13[%c0_220, %c0_221, %c0_222] : memref<9x16x1xf32, #tpu.memory_space<vmem>>, vector<1x16x1xf32>
    %395 = vector.shape_cast %394 : vector<1x16x1xf32> to vector<16x1xf32>
    %396 = vector.broadcast %395 : vector<16x1xf32> to vector<16x16xf32>
    %397 = arith.mulf %396, %393 : vector<16x16xf32>
    %398 = arith.addf %392, %397 : vector<16x16xf32>
    %399 = vector.extract_strided_slice %391 {offsets = [12, 16], sizes = [16, 16], strides = [1, 1]} : vector<48x144xf32> to vector<16x16xf32>
    %c1_223 = arith.constant 1 : index
    %c0_224 = arith.constant 0 : index
    %c0_225 = arith.constant 0 : index
    %400 = vector.load %arg13[%c1_223, %c0_224, %c0_225] : memref<9x16x1xf32, #tpu.memory_space<vmem>>, vector<1x16x1xf32>
    %401 = vector.shape_cast %400 : vector<1x16x1xf32> to vector<16x1xf32>
    %402 = vector.broadcast %401 : vector<16x1xf32> to vector<16x16xf32>
    %403 = arith.mulf %402, %399 : vector<16x16xf32>
    %404 = arith.addf %398, %403 : vector<16x16xf32>
    %405 = vector.extract_strided_slice %391 {offsets = [13, 32], sizes = [16, 16], strides = [1, 1]} : vector<48x144xf32> to vector<16x16xf32>
    %c2_226 = arith.constant 2 : index
    %c0_227 = arith.constant 0 : index
    %c0_228 = arith.constant 0 : index
    %406 = vector.load %arg13[%c2_226, %c0_227, %c0_228] : memref<9x16x1xf32, #tpu.memory_space<vmem>>, vector<1x16x1xf32>
    %407 = vector.shape_cast %406 : vector<1x16x1xf32> to vector<16x1xf32>
    %408 = vector.broadcast %407 : vector<16x1xf32> to vector<16x16xf32>
    %409 = arith.mulf %408, %405 : vector<16x16xf32>
    %410 = arith.addf %404, %409 : vector<16x16xf32>
    %411 = vector.extract_strided_slice %391 {offsets = [15, 48], sizes = [16, 16], strides = [1, 1]} : vector<48x144xf32> to vector<16x16xf32>
    %c3_229 = arith.constant 3 : index
    %c0_230 = arith.constant 0 : index
    %c0_231 = arith.constant 0 : index
    %412 = vector.load %arg13[%c3_229, %c0_230, %c0_231] : memref<9x16x1xf32, #tpu.memory_space<vmem>>, vector<1x16x1xf32>
    %413 = vector.shape_cast %412 : vector<1x16x1xf32> to vector<16x1xf32>
    %414 = vector.broadcast %413 : vector<16x1xf32> to vector<16x16xf32>
    %415 = arith.mulf %414, %411 : vector<16x16xf32>
    %416 = arith.addf %410, %415 : vector<16x16xf32>
    %417 = vector.extract_strided_slice %391 {offsets = [17, 80], sizes = [16, 16], strides = [1, 1]} : vector<48x144xf32> to vector<16x16xf32>
    %c5_232 = arith.constant 5 : index
    %c0_233 = arith.constant 0 : index
    %c0_234 = arith.constant 0 : index
    %418 = vector.load %arg13[%c5_232, %c0_233, %c0_234] : memref<9x16x1xf32, #tpu.memory_space<vmem>>, vector<1x16x1xf32>
    %419 = vector.shape_cast %418 : vector<1x16x1xf32> to vector<16x1xf32>
    %420 = vector.broadcast %419 : vector<16x1xf32> to vector<16x16xf32>
    %421 = arith.mulf %420, %417 : vector<16x16xf32>
    %422 = arith.addf %416, %421 : vector<16x16xf32>
    %423 = vector.extract_strided_slice %391 {offsets = [19, 96], sizes = [16, 16], strides = [1, 1]} : vector<48x144xf32> to vector<16x16xf32>
    %c6_235 = arith.constant 6 : index
    %c0_236 = arith.constant 0 : index
    %c0_237 = arith.constant 0 : index
    %424 = vector.load %arg13[%c6_235, %c0_236, %c0_237] : memref<9x16x1xf32, #tpu.memory_space<vmem>>, vector<1x16x1xf32>
    %425 = vector.shape_cast %424 : vector<1x16x1xf32> to vector<16x1xf32>
    %426 = vector.broadcast %425 : vector<16x1xf32> to vector<16x16xf32>
    %427 = arith.mulf %426, %423 : vector<16x16xf32>
    %428 = arith.addf %422, %427 : vector<16x16xf32>
    %429 = vector.extract_strided_slice %391 {offsets = [20, 112], sizes = [16, 16], strides = [1, 1]} : vector<48x144xf32> to vector<16x16xf32>
    %c7_238 = arith.constant 7 : index
    %c0_239 = arith.constant 0 : index
    %c0_240 = arith.constant 0 : index
    %430 = vector.load %arg13[%c7_238, %c0_239, %c0_240] : memref<9x16x1xf32, #tpu.memory_space<vmem>>, vector<1x16x1xf32>
    %431 = vector.shape_cast %430 : vector<1x16x1xf32> to vector<16x1xf32>
    %432 = vector.broadcast %431 : vector<16x1xf32> to vector<16x16xf32>
    %433 = arith.mulf %432, %429 : vector<16x16xf32>
    %434 = arith.addf %428, %433 : vector<16x16xf32>
    %435 = vector.extract_strided_slice %391 {offsets = [21, 128], sizes = [16, 16], strides = [1, 1]} : vector<48x144xf32> to vector<16x16xf32>
    %c8_241 = arith.constant 8 : index
    %c0_242 = arith.constant 0 : index
    %c0_243 = arith.constant 0 : index
    %436 = vector.load %arg13[%c8_241, %c0_242, %c0_243] : memref<9x16x1xf32, #tpu.memory_space<vmem>>, vector<1x16x1xf32>
    %437 = vector.shape_cast %436 : vector<1x16x1xf32> to vector<16x1xf32>
    %438 = vector.broadcast %437 : vector<16x1xf32> to vector<16x16xf32>
    %439 = arith.mulf %438, %435 : vector<16x16xf32>
    %440 = arith.addf %434, %439 : vector<16x16xf32>
    %441 = vector.extract_strided_slice %387 {offsets = [0, 0], sizes = [1, 16], strides = [1, 1]} : vector<2x16xf32> to vector<1x16xf32>
    %442 = vector.broadcast %441 : vector<1x16xf32> to vector<16x16xf32>
    %443 = arith.mulf %440, %442 : vector<16x16xf32>
    %444 = vector.extract_strided_slice %387 {offsets = [1, 0], sizes = [1, 16], strides = [1, 1]} : vector<2x16xf32> to vector<1x16xf32>
    %445 = vector.broadcast %444 : vector<1x16xf32> to vector<16x16xf32>
    %446 = arith.addf %443, %445 : vector<16x16xf32>
    %447 = arith.addf %446, %383 : vector<16x16xf32>
    %cst_244 = arith.constant 0.000000e+00 : f32
    %448 = vector.broadcast %cst_244 : f32 to vector<16x16xf32>
    %449 = arith.maximumf %447, %448 : vector<16x16xf32>
    %c1_245 = arith.constant 1 : index
    %c0_246 = arith.constant 0 : index
    %c0_247 = arith.constant 0 : index
    %450 = vector.load %arg14[%c1_245, %c0_246, %c0_247] : memref<3x16x144xbf16, #tpu.memory_space<vmem>>, vector<1x16x144xbf16>
    %451 = vector.shape_cast %450 : vector<1x16x144xbf16> to vector<16x144xbf16>
    %c1_248 = arith.constant 1 : index
    %c0_249 = arith.constant 0 : index
    %c0_250 = arith.constant 0 : index
    %452 = vector.load %arg15[%c1_248, %c0_249, %c0_250] : memref<3x2x16xf32, #tpu.memory_space<vmem>>, vector<1x2x16xf32>
    %453 = vector.shape_cast %452 : vector<1x2x16xf32> to vector<2x16xf32>
    %454 = arith.truncf %449 : vector<16x16xf32> to vector<16x16xbf16>
    %cst_251 = arith.constant dense<0.000000e+00> : vector<16x144xf32>
    %455 = tpu.matmul %454, %451, %cst_251 {dimension_numbers = #tpu.dot_dimension_numbers<[1], [0], [0], [1], [0, 0, 1, 1], [], []>} : vector<16x16xbf16>, vector<16x144xbf16>, vector<16x144xf32> -> vector<16x144xf32>
    %cst_252 = arith.constant 0.000000e+00 : f32
    %456 = vector.broadcast %cst_252 : f32 to vector<16x144xf32>
    %457 = tpu.concatenate %456, %455, %456 in 0 : vector<16x144xf32>, vector<16x144xf32>, vector<16x144xf32> -> vector<48x144xf32>
    %458 = vector.extract_strided_slice %455 {offsets = [0, 64], sizes = [16, 16], strides = [1, 1]} : vector<16x144xf32> to vector<16x16xf32>
    %459 = vector.extract_strided_slice %457 {offsets = [11, 0], sizes = [16, 16], strides = [1, 1]} : vector<48x144xf32> to vector<16x16xf32>
    %c0_253 = arith.constant 0 : index
    %c0_254 = arith.constant 0 : index
    %c0_255 = arith.constant 0 : index
    %460 = vector.load %arg13[%c0_253, %c0_254, %c0_255] : memref<9x16x1xf32, #tpu.memory_space<vmem>>, vector<1x16x1xf32>
    %461 = vector.shape_cast %460 : vector<1x16x1xf32> to vector<16x1xf32>
    %462 = vector.broadcast %461 : vector<16x1xf32> to vector<16x16xf32>
    %463 = arith.mulf %462, %459 : vector<16x16xf32>
    %464 = arith.addf %458, %463 : vector<16x16xf32>
    %465 = vector.extract_strided_slice %457 {offsets = [12, 16], sizes = [16, 16], strides = [1, 1]} : vector<48x144xf32> to vector<16x16xf32>
    %c1_256 = arith.constant 1 : index
    %c0_257 = arith.constant 0 : index
    %c0_258 = arith.constant 0 : index
    %466 = vector.load %arg13[%c1_256, %c0_257, %c0_258] : memref<9x16x1xf32, #tpu.memory_space<vmem>>, vector<1x16x1xf32>
    %467 = vector.shape_cast %466 : vector<1x16x1xf32> to vector<16x1xf32>
    %468 = vector.broadcast %467 : vector<16x1xf32> to vector<16x16xf32>
    %469 = arith.mulf %468, %465 : vector<16x16xf32>
    %470 = arith.addf %464, %469 : vector<16x16xf32>
    %471 = vector.extract_strided_slice %457 {offsets = [13, 32], sizes = [16, 16], strides = [1, 1]} : vector<48x144xf32> to vector<16x16xf32>
    %c2_259 = arith.constant 2 : index
    %c0_260 = arith.constant 0 : index
    %c0_261 = arith.constant 0 : index
    %472 = vector.load %arg13[%c2_259, %c0_260, %c0_261] : memref<9x16x1xf32, #tpu.memory_space<vmem>>, vector<1x16x1xf32>
    %473 = vector.shape_cast %472 : vector<1x16x1xf32> to vector<16x1xf32>
    %474 = vector.broadcast %473 : vector<16x1xf32> to vector<16x16xf32>
    %475 = arith.mulf %474, %471 : vector<16x16xf32>
    %476 = arith.addf %470, %475 : vector<16x16xf32>
    %477 = vector.extract_strided_slice %457 {offsets = [15, 48], sizes = [16, 16], strides = [1, 1]} : vector<48x144xf32> to vector<16x16xf32>
    %c3_262 = arith.constant 3 : index
    %c0_263 = arith.constant 0 : index
    %c0_264 = arith.constant 0 : index
    %478 = vector.load %arg13[%c3_262, %c0_263, %c0_264] : memref<9x16x1xf32, #tpu.memory_space<vmem>>, vector<1x16x1xf32>
    %479 = vector.shape_cast %478 : vector<1x16x1xf32> to vector<16x1xf32>
    %480 = vector.broadcast %479 : vector<16x1xf32> to vector<16x16xf32>
    %481 = arith.mulf %480, %477 : vector<16x16xf32>
    %482 = arith.addf %476, %481 : vector<16x16xf32>
    %483 = vector.extract_strided_slice %457 {offsets = [17, 80], sizes = [16, 16], strides = [1, 1]} : vector<48x144xf32> to vector<16x16xf32>
    %c5_265 = arith.constant 5 : index
    %c0_266 = arith.constant 0 : index
    %c0_267 = arith.constant 0 : index
    %484 = vector.load %arg13[%c5_265, %c0_266, %c0_267] : memref<9x16x1xf32, #tpu.memory_space<vmem>>, vector<1x16x1xf32>
    %485 = vector.shape_cast %484 : vector<1x16x1xf32> to vector<16x1xf32>
    %486 = vector.broadcast %485 : vector<16x1xf32> to vector<16x16xf32>
    %487 = arith.mulf %486, %483 : vector<16x16xf32>
    %488 = arith.addf %482, %487 : vector<16x16xf32>
    %489 = vector.extract_strided_slice %457 {offsets = [19, 96], sizes = [16, 16], strides = [1, 1]} : vector<48x144xf32> to vector<16x16xf32>
    %c6_268 = arith.constant 6 : index
    %c0_269 = arith.constant 0 : index
    %c0_270 = arith.constant 0 : index
    %490 = vector.load %arg13[%c6_268, %c0_269, %c0_270] : memref<9x16x1xf32, #tpu.memory_space<vmem>>, vector<1x16x1xf32>
    %491 = vector.shape_cast %490 : vector<1x16x1xf32> to vector<16x1xf32>
    %492 = vector.broadcast %491 : vector<16x1xf32> to vector<16x16xf32>
    %493 = arith.mulf %492, %489 : vector<16x16xf32>
    %494 = arith.addf %488, %493 : vector<16x16xf32>
    %495 = vector.extract_strided_slice %457 {offsets = [20, 112], sizes = [16, 16], strides = [1, 1]} : vector<48x144xf32> to vector<16x16xf32>
    %c7_271 = arith.constant 7 : index
    %c0_272 = arith.constant 0 : index
    %c0_273 = arith.constant 0 : index
    %496 = vector.load %arg13[%c7_271, %c0_272, %c0_273] : memref<9x16x1xf32, #tpu.memory_space<vmem>>, vector<1x16x1xf32>
    %497 = vector.shape_cast %496 : vector<1x16x1xf32> to vector<16x1xf32>
    %498 = vector.broadcast %497 : vector<16x1xf32> to vector<16x16xf32>
    %499 = arith.mulf %498, %495 : vector<16x16xf32>
    %500 = arith.addf %494, %499 : vector<16x16xf32>
    %501 = vector.extract_strided_slice %457 {offsets = [21, 128], sizes = [16, 16], strides = [1, 1]} : vector<48x144xf32> to vector<16x16xf32>
    %c8_274 = arith.constant 8 : index
    %c0_275 = arith.constant 0 : index
    %c0_276 = arith.constant 0 : index
    %502 = vector.load %arg13[%c8_274, %c0_275, %c0_276] : memref<9x16x1xf32, #tpu.memory_space<vmem>>, vector<1x16x1xf32>
    %503 = vector.shape_cast %502 : vector<1x16x1xf32> to vector<16x1xf32>
    %504 = vector.broadcast %503 : vector<16x1xf32> to vector<16x16xf32>
    %505 = arith.mulf %504, %501 : vector<16x16xf32>
    %506 = arith.addf %500, %505 : vector<16x16xf32>
    %507 = vector.extract_strided_slice %453 {offsets = [0, 0], sizes = [1, 16], strides = [1, 1]} : vector<2x16xf32> to vector<1x16xf32>
    %508 = vector.broadcast %507 : vector<1x16xf32> to vector<16x16xf32>
    %509 = arith.mulf %506, %508 : vector<16x16xf32>
    %510 = vector.extract_strided_slice %453 {offsets = [1, 0], sizes = [1, 16], strides = [1, 1]} : vector<2x16xf32> to vector<1x16xf32>
    %511 = vector.broadcast %510 : vector<1x16xf32> to vector<16x16xf32>
    %512 = arith.addf %509, %511 : vector<16x16xf32>
    %cst_277 = arith.constant 0.000000e+00 : f32
    %513 = vector.broadcast %cst_277 : f32 to vector<16x16xf32>
    %514 = arith.maximumf %512, %513 : vector<16x16xf32>
    %c2_278 = arith.constant 2 : index
    %c0_279 = arith.constant 0 : index
    %c0_280 = arith.constant 0 : index
    %515 = vector.load %arg14[%c2_278, %c0_279, %c0_280] : memref<3x16x144xbf16, #tpu.memory_space<vmem>>, vector<1x16x144xbf16>
    %516 = vector.shape_cast %515 : vector<1x16x144xbf16> to vector<16x144xbf16>
    %c2_281 = arith.constant 2 : index
    %c0_282 = arith.constant 0 : index
    %c0_283 = arith.constant 0 : index
    %517 = vector.load %arg15[%c2_281, %c0_282, %c0_283] : memref<3x2x16xf32, #tpu.memory_space<vmem>>, vector<1x2x16xf32>
    %518 = vector.shape_cast %517 : vector<1x2x16xf32> to vector<2x16xf32>
    %519 = arith.truncf %514 : vector<16x16xf32> to vector<16x16xbf16>
    %cst_284 = arith.constant dense<0.000000e+00> : vector<16x144xf32>
    %520 = tpu.matmul %519, %516, %cst_284 {dimension_numbers = #tpu.dot_dimension_numbers<[1], [0], [0], [1], [0, 0, 1, 1], [], []>} : vector<16x16xbf16>, vector<16x144xbf16>, vector<16x144xf32> -> vector<16x144xf32>
    %cst_285 = arith.constant 0.000000e+00 : f32
    %521 = vector.broadcast %cst_285 : f32 to vector<16x144xf32>
    %522 = tpu.concatenate %521, %520, %521 in 0 : vector<16x144xf32>, vector<16x144xf32>, vector<16x144xf32> -> vector<48x144xf32>
    %523 = vector.extract_strided_slice %520 {offsets = [0, 64], sizes = [16, 16], strides = [1, 1]} : vector<16x144xf32> to vector<16x16xf32>
    %524 = vector.extract_strided_slice %522 {offsets = [11, 0], sizes = [16, 16], strides = [1, 1]} : vector<48x144xf32> to vector<16x16xf32>
    %c0_286 = arith.constant 0 : index
    %c0_287 = arith.constant 0 : index
    %c0_288 = arith.constant 0 : index
    %525 = vector.load %arg13[%c0_286, %c0_287, %c0_288] : memref<9x16x1xf32, #tpu.memory_space<vmem>>, vector<1x16x1xf32>
    %526 = vector.shape_cast %525 : vector<1x16x1xf32> to vector<16x1xf32>
    %527 = vector.broadcast %526 : vector<16x1xf32> to vector<16x16xf32>
    %528 = arith.mulf %527, %524 : vector<16x16xf32>
    %529 = arith.addf %523, %528 : vector<16x16xf32>
    %530 = vector.extract_strided_slice %522 {offsets = [12, 16], sizes = [16, 16], strides = [1, 1]} : vector<48x144xf32> to vector<16x16xf32>
    %c1_289 = arith.constant 1 : index
    %c0_290 = arith.constant 0 : index
    %c0_291 = arith.constant 0 : index
    %531 = vector.load %arg13[%c1_289, %c0_290, %c0_291] : memref<9x16x1xf32, #tpu.memory_space<vmem>>, vector<1x16x1xf32>
    %532 = vector.shape_cast %531 : vector<1x16x1xf32> to vector<16x1xf32>
    %533 = vector.broadcast %532 : vector<16x1xf32> to vector<16x16xf32>
    %534 = arith.mulf %533, %530 : vector<16x16xf32>
    %535 = arith.addf %529, %534 : vector<16x16xf32>
    %536 = vector.extract_strided_slice %522 {offsets = [13, 32], sizes = [16, 16], strides = [1, 1]} : vector<48x144xf32> to vector<16x16xf32>
    %c2_292 = arith.constant 2 : index
    %c0_293 = arith.constant 0 : index
    %c0_294 = arith.constant 0 : index
    %537 = vector.load %arg13[%c2_292, %c0_293, %c0_294] : memref<9x16x1xf32, #tpu.memory_space<vmem>>, vector<1x16x1xf32>
    %538 = vector.shape_cast %537 : vector<1x16x1xf32> to vector<16x1xf32>
    %539 = vector.broadcast %538 : vector<16x1xf32> to vector<16x16xf32>
    %540 = arith.mulf %539, %536 : vector<16x16xf32>
    %541 = arith.addf %535, %540 : vector<16x16xf32>
    %542 = vector.extract_strided_slice %522 {offsets = [15, 48], sizes = [16, 16], strides = [1, 1]} : vector<48x144xf32> to vector<16x16xf32>
    %c3_295 = arith.constant 3 : index
    %c0_296 = arith.constant 0 : index
    %c0_297 = arith.constant 0 : index
    %543 = vector.load %arg13[%c3_295, %c0_296, %c0_297] : memref<9x16x1xf32, #tpu.memory_space<vmem>>, vector<1x16x1xf32>
    %544 = vector.shape_cast %543 : vector<1x16x1xf32> to vector<16x1xf32>
    %545 = vector.broadcast %544 : vector<16x1xf32> to vector<16x16xf32>
    %546 = arith.mulf %545, %542 : vector<16x16xf32>
    %547 = arith.addf %541, %546 : vector<16x16xf32>
    %548 = vector.extract_strided_slice %522 {offsets = [17, 80], sizes = [16, 16], strides = [1, 1]} : vector<48x144xf32> to vector<16x16xf32>
    %c5_298 = arith.constant 5 : index
    %c0_299 = arith.constant 0 : index
    %c0_300 = arith.constant 0 : index
    %549 = vector.load %arg13[%c5_298, %c0_299, %c0_300] : memref<9x16x1xf32, #tpu.memory_space<vmem>>, vector<1x16x1xf32>
    %550 = vector.shape_cast %549 : vector<1x16x1xf32> to vector<16x1xf32>
    %551 = vector.broadcast %550 : vector<16x1xf32> to vector<16x16xf32>
    %552 = arith.mulf %551, %548 : vector<16x16xf32>
    %553 = arith.addf %547, %552 : vector<16x16xf32>
    %554 = vector.extract_strided_slice %522 {offsets = [19, 96], sizes = [16, 16], strides = [1, 1]} : vector<48x144xf32> to vector<16x16xf32>
    %c6_301 = arith.constant 6 : index
    %c0_302 = arith.constant 0 : index
    %c0_303 = arith.constant 0 : index
    %555 = vector.load %arg13[%c6_301, %c0_302, %c0_303] : memref<9x16x1xf32, #tpu.memory_space<vmem>>, vector<1x16x1xf32>
    %556 = vector.shape_cast %555 : vector<1x16x1xf32> to vector<16x1xf32>
    %557 = vector.broadcast %556 : vector<16x1xf32> to vector<16x16xf32>
    %558 = arith.mulf %557, %554 : vector<16x16xf32>
    %559 = arith.addf %553, %558 : vector<16x16xf32>
    %560 = vector.extract_strided_slice %522 {offsets = [20, 112], sizes = [16, 16], strides = [1, 1]} : vector<48x144xf32> to vector<16x16xf32>
    %c7_304 = arith.constant 7 : index
    %c0_305 = arith.constant 0 : index
    %c0_306 = arith.constant 0 : index
    %561 = vector.load %arg13[%c7_304, %c0_305, %c0_306] : memref<9x16x1xf32, #tpu.memory_space<vmem>>, vector<1x16x1xf32>
    %562 = vector.shape_cast %561 : vector<1x16x1xf32> to vector<16x1xf32>
    %563 = vector.broadcast %562 : vector<16x1xf32> to vector<16x16xf32>
    %564 = arith.mulf %563, %560 : vector<16x16xf32>
    %565 = arith.addf %559, %564 : vector<16x16xf32>
    %566 = vector.extract_strided_slice %522 {offsets = [21, 128], sizes = [16, 16], strides = [1, 1]} : vector<48x144xf32> to vector<16x16xf32>
    %c8_307 = arith.constant 8 : index
    %c0_308 = arith.constant 0 : index
    %c0_309 = arith.constant 0 : index
    %567 = vector.load %arg13[%c8_307, %c0_308, %c0_309] : memref<9x16x1xf32, #tpu.memory_space<vmem>>, vector<1x16x1xf32>
    %568 = vector.shape_cast %567 : vector<1x16x1xf32> to vector<16x1xf32>
    %569 = vector.broadcast %568 : vector<16x1xf32> to vector<16x16xf32>
    %570 = arith.mulf %569, %566 : vector<16x16xf32>
    %571 = arith.addf %565, %570 : vector<16x16xf32>
    %572 = vector.extract_strided_slice %518 {offsets = [0, 0], sizes = [1, 16], strides = [1, 1]} : vector<2x16xf32> to vector<1x16xf32>
    %573 = vector.broadcast %572 : vector<1x16xf32> to vector<16x16xf32>
    %574 = arith.mulf %571, %573 : vector<16x16xf32>
    %575 = vector.extract_strided_slice %518 {offsets = [1, 0], sizes = [1, 16], strides = [1, 1]} : vector<2x16xf32> to vector<1x16xf32>
    %576 = vector.broadcast %575 : vector<1x16xf32> to vector<16x16xf32>
    %577 = arith.addf %574, %576 : vector<16x16xf32>
    %578 = arith.addf %577, %449 : vector<16x16xf32>
    %cst_310 = arith.constant 0.000000e+00 : f32
    %579 = vector.broadcast %cst_310 : f32 to vector<16x16xf32>
    %580 = arith.maximumf %578, %579 : vector<16x16xf32>
    %c0_311 = arith.constant 0 : index
    %c0_312 = arith.constant 0 : index
    %c0_313 = arith.constant 0 : index
    %581 = vector.load %arg16[%c0_311, %c0_312, %c0_313] : memref<1x16x16xf32, #tpu.memory_space<vmem>>, vector<1x16x16xf32>
    %582 = vector.shape_cast %581 : vector<1x16x16xf32> to vector<16x16xf32>
    %583 = vector.shape_cast %580 : vector<16x16xf32> to vector<1x16x16xf32>
    tpu.vector_store %arg16[%c0_311, %c0_312, %c0_313], %583 {strides = array<i32>} : memref<1x16x16xf32, #tpu.memory_space<vmem>>, vector<1x16x16xf32>,
    return
  }
  func.func @transform_0(%arg0: i32) -> (i32, i32) {
    %c0_i32 = arith.constant 0 : i32
    %c0_i32_0 = arith.constant 0 : i32
    return %arg0, %c0_i32 : i32, i32
  }
  func.func @transform_1(%arg0: i32) -> (i32, i32) {
    %c0_i32 = arith.constant 0 : i32
    %c0_i32_0 = arith.constant 0 : i32
    %c0_i32_1 = arith.constant 0 : i32
    return %c0_i32, %c0_i32_0 : i32, i32
  }
  func.func @transform_2(%arg0: i32) -> (i32, i32) {
    %c0_i32 = arith.constant 0 : i32
    %c0_i32_0 = arith.constant 0 : i32
    %c0_i32_1 = arith.constant 0 : i32
    return %c0_i32, %c0_i32_0 : i32, i32
  }
  func.func @transform_3(%arg0: i32) -> (i32, i32) {
    %c0_i32 = arith.constant 0 : i32
    %c0_i32_0 = arith.constant 0 : i32
    %c0_i32_1 = arith.constant 0 : i32
    return %c0_i32, %c0_i32_0 : i32, i32
  }
  func.func @transform_4(%arg0: i32) -> (i32, i32, i32) {
    %c0_i32 = arith.constant 0 : i32
    %c0_i32_0 = arith.constant 0 : i32
    %c0_i32_1 = arith.constant 0 : i32
    %c0_i32_2 = arith.constant 0 : i32
    return %c0_i32, %c0_i32_0, %c0_i32_1 : i32, i32, i32
  }
  func.func @transform_5(%arg0: i32) -> (i32, i32, i32) {
    %c0_i32 = arith.constant 0 : i32
    %c0_i32_0 = arith.constant 0 : i32
    %c0_i32_1 = arith.constant 0 : i32
    %c0_i32_2 = arith.constant 0 : i32
    return %c0_i32, %c0_i32_0, %c0_i32_1 : i32, i32, i32
  }
  func.func @transform_6(%arg0: i32) -> (i32, i32, i32) {
    %c0_i32 = arith.constant 0 : i32
    %c0_i32_0 = arith.constant 0 : i32
    %c0_i32_1 = arith.constant 0 : i32
    %c0_i32_2 = arith.constant 0 : i32
    return %c0_i32, %c0_i32_0, %c0_i32_1 : i32, i32, i32
  }
  func.func @transform_7(%arg0: i32) -> (i32, i32, i32) {
    %c0_i32 = arith.constant 0 : i32
    %c0_i32_0 = arith.constant 0 : i32
    %c0_i32_1 = arith.constant 0 : i32
    %c0_i32_2 = arith.constant 0 : i32
    return %c0_i32, %c0_i32_0, %c0_i32_1 : i32, i32, i32
  }
  func.func @transform_8(%arg0: i32) -> (i32, i32, i32) {
    %c0_i32 = arith.constant 0 : i32
    %c0_i32_0 = arith.constant 0 : i32
    %c0_i32_1 = arith.constant 0 : i32
    %c0_i32_2 = arith.constant 0 : i32
    return %c0_i32, %c0_i32_0, %c0_i32_1 : i32, i32, i32
  }
  func.func @transform_9(%arg0: i32) -> (i32, i32) {
    %c0_i32 = arith.constant 0 : i32
    %c0_i32_0 = arith.constant 0 : i32
    %c0_i32_1 = arith.constant 0 : i32
    return %c0_i32, %c0_i32_0 : i32, i32
  }
  func.func @transform_10(%arg0: i32) -> (i32, i32) {
    %c0_i32 = arith.constant 0 : i32
    %c0_i32_0 = arith.constant 0 : i32
    %c0_i32_1 = arith.constant 0 : i32
    return %c0_i32, %c0_i32_0 : i32, i32
  }
  func.func @transform_11(%arg0: i32) -> (i32, i32) {
    %c0_i32 = arith.constant 0 : i32
    %c0_i32_0 = arith.constant 0 : i32
    %c0_i32_1 = arith.constant 0 : i32
    return %c0_i32, %c0_i32_0 : i32, i32
  }
  func.func @transform_12(%arg0: i32) -> (i32, i32, i32) {
    %c0_i32 = arith.constant 0 : i32
    %c0_i32_0 = arith.constant 0 : i32
    %c0_i32_1 = arith.constant 0 : i32
    %c0_i32_2 = arith.constant 0 : i32
    return %c0_i32, %c0_i32_0, %c0_i32_1 : i32, i32, i32
  }
  func.func @transform_13(%arg0: i32) -> (i32, i32, i32) {
    %c0_i32 = arith.constant 0 : i32
    %c0_i32_0 = arith.constant 0 : i32
    %c0_i32_1 = arith.constant 0 : i32
    %c0_i32_2 = arith.constant 0 : i32
    return %c0_i32, %c0_i32_0, %c0_i32_1 : i32, i32, i32
  }
  func.func @transform_14(%arg0: i32) -> (i32, i32, i32) {
    %c0_i32 = arith.constant 0 : i32
    %c0_i32_0 = arith.constant 0 : i32
    %c0_i32_1 = arith.constant 0 : i32
    %c0_i32_2 = arith.constant 0 : i32
    return %c0_i32, %c0_i32_0, %c0_i32_1 : i32, i32, i32
  }
  func.func @transform_15(%arg0: i32) -> (i32, i32, i32) {
    %c0_i32 = arith.constant 0 : i32
    %c0_i32_0 = arith.constant 0 : i32
    %c0_i32_1 = arith.constant 0 : i32
    return %arg0, %c0_i32, %c0_i32_0 : i32, i32, i32
  }
}

</mosaic_0001>

<bundles_post_ra>
// kernel: net_forward.1
= control target key start
LH: loop header
LB: loop body
LE: loop exit
PB: predicated region body
PF: predicated region fallthrough
CT: control target
= control target key end

     0   :  { %20 = vsyncpa [#allocation3], 0  ;;  %s11822_s0 = inlined_call_operand.vmem [shape: bf16[1152,147], index: 0, kind: input, shape index: {}]   ;;  %s11823_s1 = inlined_call_operand.vmem [shape: f32[576,1], index: 1, kind: input, shape index: {}]   ;;  %s11824_s2 = inlined_call_operand.vmem [shape: bf16[147,8], index: 2, kind: input, shape index: {}]   ;;  %s11825_s3 = inlined_call_operand.vmem [shape: f32[2,8], index: 3, kind: input, shape index: {}]   ;;  %s11826_s4 = inlined_call_operand.vmem [shape: f32[9,64,1], index: 4, kind: input, shape index: {}]   ;;  %s11827_s5 = inlined_call_operand.vmem [shape: bf16[4,8,72], index: 5, kind: input, shape index: {}]   ;;  %s11828_s6 = inlined_call_operand.vmem [shape: f32[4,2,8], index: 6, kind: input, shape index: {}]   ;;  %s11829_s7 = inlined_call_operand.vmem [shape: bf16[9,16,64], index: 7, kind: input, shape index: {}]   ;;  %s11830_s8 = inlined_call_operand.vmem [shape: bf16[9,8,16], index: 8, kind: input, shape index: {}]   ;;  %s11831_s9 = inlined_call_operand.vmem [shape: f32[2,16], index: 9, kind: input, shape index: {}]   ;;  %s11832_s10 = inlined_call_operand.vmem [shape: bf16[8,16], index: 10, kind: input, shape index: {}]   ;;  %s11833_s11 = inlined_call_operand.vmem [shape: f32[2,16], index: 11, kind: input, shape index: {}]   ;;  %s11834_s12 = inlined_call_operand.vmem [shape: f32[9,16,1], index: 12, kind: input, shape index: {}]   ;;  %s11835_s13 = inlined_call_operand.vmem [shape: bf16[3,16,144], index: 13, kind: input, shape index: {}]   ;;  %s11836_s14 = inlined_call_operand.vmem [shape: f32[3,2,16], index: 14, kind: input, shape index: {}]   ;;  %s11837_s15 = inlined_call_operand.hbm [shape: f32[2,16,16], index: 15, kind: output, shape index: {}]  }
   0x1   :  { %22 = vsyncpa [#allocation3 + $0x1], 0  ;;  %s8264_s18 = smov 0   ;;  %s8266_s19 = smov 0  }
   0x2   :  { %s8268_s20 = smov 0   ;;  %s8270_s21 = smov 0  }
   0x3 LB: > { %11996 = sst [smem:[#allocation5_spill]] %s8153_s18  ;;  %s8285_s22 = sadd.s32 4294967295, %s8165_s21   ;;  %s8165_s21 = sphi %s8270_s21, %s12440_s21   ;;  %s8161_s20 = sphi %s8268_s20, %s12442_s20   ;;  %s8157_s19 = sphi %s8266_s19, %s12444_s19   ;;  %s8153_s18 = sphi %s8264_s18, %s12443_s18  }
   0x4   : > { %11997 = sst [smem:[#allocation6_spill]] %s8161_s20  ;;  %s7323_s23 = sadd.s32 4294967294, %s8165_s21  }
   0x5   : > { %s8289_s24 = sadd.s32 1, %s8165_s21   ;;  %s355_s25 = sadd.s32 1, %s8161_s20 }
   0x6   : > { %11998 = sst [smem:[#allocation7_spill]] %s8289_s24  ;;  %s352_s26 = ssub.s32 %s8165_s21, %s8289_s24 }
   0x7   : > { %p365_p0 = scmp.ne.s32.totalorder %s8161_s20, %s8157_s19  ;;  %p353_p1 = scmp.eq.s32.totalorder %s352_s26, 0 }
   0x8   : > { %p366_p2 = scmp.eq.s32.totalorder %s8285_s22, 1  ;;  %p371_p3 = scmp.ne.s32.totalorder %s8157_s19, %s8153_s18 }
   0x9   : > { %p372_p4 = scmp.eq.s32.totalorder %s7323_s23, 1  ;;  %p7326_p7 = scmp.ge.s32.totalorder %s8165_s21, 1 }
   0xa   : > { %s8300_s27 = scalar_select %p353_p1, %s8161_s20, %s355_s25  }
   0xb   : > { %p8302_p5 = por %p366_p2, %p365_p0  ;;  %p8306_p6 = por %p372_p4, %p371_p3 }
   0xc   : > { %11999 = sst [smem:[#allocation8_spill]] %s8300_s27  ;;  %p442_p8 = scmp.lt.s32.totalorder %s8165_s21, 3 }
   0xd   : > { %s12001_s29 = scalar_select %p8306_p6, 1, 0 }
   0xe   : > { %p443_p9 = pnand %p7326_p7, %p442_p8 }
   0xf   : > { %12002 = sst [smem:[#allocation9_spill]] %s12001_s29 }
  0x10   : > { %446 = sbr.rel (%p443_p9) target bundleno = 5483 (0x156b), region = 80 }
  0x15   : > { %v7968_v0 = vld [vmem:[%s11824_s2 + $0x38] sm:$0xff]   ;;  %v11843_v1 = vmov 0   ;;  %v1665_v2 = vld [vmem:[%s11823_s1 + $0x100] sm:$0xff]  ;;  %v7969_v3 = vld [vmem:[%s11824_s2 + $0x30] sm:$0xff]   ;;  %s491_s30 = smul.u32 72, %s8285_s22  ;;  %vm971_vm0 = vcmask 154624  }
  0x16   : > { %1087 = vmatprep.subr.bf16.mxu0 %v11843_v1  ;;  %7967 = vset.pattern.permute.xlu1 %v11843_v1  ;;  %v1633_v4 = vld [vmem:[%s11823_s1] sm:$0xff]  ;;  %v1666_v5 = vld [vmem:[%s11823_s1 + $0x108] sm:$0xff]  ;;  %v1636_v8 = vld [vmem:[%s11823_s1 + $0x18] sm:$0xff]  ;;  %vm1080_vm1 = vcmask 1040384   ;;  %vm1081_vm2 = vcmask 1041408   ;;  %v8168_v22 = vmov 65535  }
  0x17   : > { %1088 = vmatpush1.bf16.msra.mxu0 %v7968_v0  ;;  %1867 = vperm.xlu1 %7967, %v1665_v2   ;;  %p492_p10 = scmp.lt.s32.totalorder %s491_s30, 143  ;;  %v1634_v6 = vld [vmem:[%s11823_s1 + $0x8] sm:$0xff]  ;;  %v1635_v9 = vld [vmem:[%s11823_s1 + $0x10] sm:$0xff]  ;;  %v7971_v10 = vld [vmem:[%s11824_s2 + $0x20] sm:$0xff]   ;;  %v1082_v23 = vsel %vm1080_vm1, 4294967295, %v8168_v22  ;;  %s11988_s17 = smov 64  }
  0x18   : > { %1089 = vmatprep.subr.bf16.mxu0 %v11843_v1  ;;  %7966 = vset.pattern.permute.xlu0 %v11843_v1  ;;  %v7970_v7 = vld [vmem:[%s11824_s2 + $0x28] sm:$0xff]   ;;  %v1668_v11 = vld [vmem:[%s11823_s1 + $0x118] sm:$0xff]  ;;  %v1667_v12 = vld [vmem:[%s11823_s1 + $0x110] sm:$0xff]  ;;  %v1083_v28 = vsel %vm1081_vm2, %v1082_v23, 0  ;;  %s11990_s23 = smov 32   ;;  %vm2220_vm3 = vcmask 1043456  }
  0x19   : > { %1707 = vperm.xlu0 %7966, %v1633_v4   ;;  %s12446_s30 = smov (!%p492_p10, %s491_s30), 143  ;;  %v7972_v13 = vld [vmem:[%s11824_s2 + $0x18] sm:$0xff]   ;;  %v1642_v14 = vld [vmem:[%s11823_s1 + $0x48] sm:$0xff]  ;;  %v1641_v15 = vld [vmem:[%s11823_s1 + $0x40] sm:$0xff]  ;;  %s8173_s26 = smov 104   ;;  %vm2207_vm4 = vcmask 64512  }
  0x1a   : > { %s7612_s27 = sshll.u32 %s12446_s30, 3  ;;  %v7973_v17 = vld [vmem:[%s11824_s2 + $0x10] sm:$0xff]   ;;  %v1644_v18 = vld [vmem:[%s11823_s1 + $0x58] sm:$0xff]  ;;  %v7974_v20 = vld [vmem:[%s11824_s2 + $0x8] sm:$0xff]   ;;  %s8172_s30 = smov 24   ;;  %vm2564_vm5 = vcmask 1046528  }
  0x1b   : > { %1090 = vmatpush1.bf16.msra.mxu0 %v7969_v3  ;;  %1872 = vperm.xlu1 %7967, %v1666_v5   ;;  %s8361_s18 = scalar_lea.vmem %s11822_s0, %s7612_s27  ;;  %v1643_v19 = vld [vmem:[%s11823_s1 + $0x50] sm:$0xff]  ;;  %v1650_v21 = vld [vmem:[%s11823_s1 + $0x88] sm:$0xff]  ;;  %v1649_v24 = vld [vmem:[%s11823_s1 + $0x80] sm:$0xff]  ;;  %s8174_s16 = smov 112   ;;  %vm8178_vm6 = vmmov 0   ;;  %vm5365_vm7 = vcmask 523264  }
  0x1c   : > { %1091 = vmatprep.subr.bf16.mxu0 %v11843_v1  ;;  %v7980_v16 = vld [vmem:[%s8361_s18 + $0x4] ss:$8 sps:$4 sm:$0xff]   ;;  %v7976_v26 = vld [vmem:[%s11824_s2 + $0x48] ss:$0 sps:$4 sm:$0x33]   ;;  %v1652_v27 = vld [vmem:[%s11823_s1 + $0x98] sm:$0xff] }
  0x1d   : > { %1712 = vperm.xlu0 %7966, %v1634_v6   ;;  %7412 = vmatprep.mubr.msk.bf16.mxu0 %vm971_vm0, %v7980_v16  ;;  %v7975_v25 = vld [vmem:[%s11824_s2] sm:$0xff]   ;;  %v1651_v29 = vld [vmem:[%s11823_s1 + $0x90] sm:$0xff]  ;;  %v1085_v30 = vand.u32 %v7976_v26, %v1083_v28  ;;  %v1658_v31 = vld [vmem:[%s11823_s1 + $0xc8] sm:$0xff]  ;;  %s11992_s25 = smov 80   ;;  %s11994_s24 = smov 96   ;;  %vm6376_vm8 = vcmask 130048  }
  0x1e   : > { %v1657_v32 = vld [vmem:[%s11823_s1 + $0xc0] sm:$0xff]  ;;  %v1660_v34 = vld [vmem:[%s11823_s1 + $0xd8] sm:$0xff]  ;;  %v1659_v36 = vld [vmem:[%s11823_s1 + $0xd0] sm:$0xff]  ;;  %vm6506_vm9 = vcmask 1042432   ;;  %vm6437_vm10 = vcmask 1044480   ;;  %s7613_s20 = sshll.u32 %s8285_s22, 8 }
  0x1f   : > { %1092 = vmatpush1.bf16.msra.mxu0 %v7970_v7  ;;  %1722 = vperm.xlu1 %7967, %v1636_v8   ;;  %v7977_v33 = vld [vmem:[%s11824_s2 + $0x40] sm:$0xff]   ;;  %v7981_v37 = vld [vmem:[%s8361_s18 + $0x14] ss:$8 sps:$4 sm:$0xff]   ;;  %v1638_v38 = vld [vmem:[%s11823_s1 + $0x28] sm:$0xff]  ;;  %s11778_s29 = scalar_lea.hbm %s11837_s15, %s7613_s20  ;;  %s8181_s22 = smov [#allocation2]  }
  0x20   : > { %1093 = vmatprep.subr.bf16.mxu0 %v11843_v1  ;;  %v7978_v35 = vld [vmem:[%s8361_s18] ss:$8 sps:$4 sm:$0xff]   ;;  %v7983_v41 = vld [vmem:[%s8361_s18 + $0x10] ss:$8 sps:$4 sm:$0xff]   ;;  %v7984_v43 = vld [vmem:[%s8361_s18 + $0x24] ss:$8 sps:$4 sm:$0xff]  }
  0x21   : > { %1717 = vperm.xlu0 %7966, %v1635_v9   ;;  %v1637_v39 = vld [vmem:[%s11823_s1 + $0x20] sm:$0xff]  ;;  %v1670_v40 = vld [vmem:[%s11823_s1 + $0x128] sm:$0xff]  ;;  %v1640_v46 = vld [vmem:[%s11823_s1 + $0x38] sm:$0xff] }
  0x22   : > { %v1669_v42 = vld [vmem:[%s11823_s1 + $0x120] sm:$0xff]  ;;  %v1674_v44 = vld [vmem:[%s11823_s1 + $0x148] sm:$0xff]  ;;  %v1639_v48 = vld [vmem:[%s11823_s1 + $0x30] sm:$0xff] }
  0x23   : > { %1094 = vmatpush1.bf16.msra.mxu0 %v7971_v10  ;;  %1882 = vperm.xlu1 %7967, %v1668_v11   ;;  %v1673_v45 = vld [vmem:[%s11823_s1 + $0x140] sm:$0xff]  ;;  %v7987_v49 = vld [vmem:[%s8361_s18 + $0x34] ss:$8 sps:$4 sm:$0xff]   ;;  %v7989_v53 = vld [vmem:[%s8361_s18 + $0x30] ss:$8 sps:$4 sm:$0xff]  }
  0x24   : > { %1095 = vmatprep.subr.bf16.mxu0 %v11843_v1  ;;  %v7986_v47 = vld [vmem:[%s8361_s18 + $0x20] ss:$8 sps:$4 sm:$0xff]   ;;  %v1672_v50 = vld [vmem:[%s11823_s1 + $0x138] sm:$0xff]  ;;  %v1671_v51 = vld [vmem:[%s11823_s1 + $0x130] sm:$0xff] }
  0x25   : > { %1877 = vperm.xlu0 %7966, %v1667_v12   ;;  %v1676_v52 = vld [vmem:[%s11823_s1 + $0x158] sm:$0xff]  ;;  %v1675_v54 = vld [vmem:[%s11823_s1 + $0x150] sm:$0xff]  ;;  %v7990_v55 = vld [vmem:[%s8361_s18 + $0x44] ss:$8 sps:$4 sm:$0xff]  }
  0x26   : > { %v1646_v56 = vld [vmem:[%s11823_s1 + $0x68] sm:$0xff]  ;;  %v1645_v57 = vld [vmem:[%s11823_s1 + $0x60] sm:$0xff]  ;;  %v1648_v61 = vld [vmem:[%s11823_s1 + $0x78] sm:$0xff] }
  0x27   : > { %1096 = vmatpush1.bf16.msra.mxu0 %v7972_v13  ;;  %1752 = vperm.xlu1 %7967, %v1642_v14   ;;  %v1682_v58 = vld [vmem:[%s11823_s1 + $0x188] sm:$0xff]  ;;  %v1681_v60 = vld [vmem:[%s11823_s1 + $0x180] sm:$0xff]  ;;  %v7993_v62 = vld [vmem:[%s8361_s18 + $0x54] ss:$8 sps:$4 sm:$0xff]  }
  0x28   : > { %1097 = vmatprep.subr.bf16.mxu0 %v11843_v1  ;;  %v7992_v59 = vld [vmem:[%s8361_s18 + $0x40] ss:$8 sps:$4 sm:$0xff]   ;;  %v1647_v63 = vld [vmem:[%s11823_s1 + $0x70] sm:$0xff]  ;;  %v1684_v0 = vld [vmem:[%s11823_s1 + $0x198] sm:$0xff] }
  0x29   : > { %1747 = vperm.xlu0 %7966, %v1641_v15   ;;  %v7995_v2 = vld [vmem:[%s8361_s18 + $0x50] ss:$8 sps:$4 sm:$0xff]   ;;  %v1654_v4 = vld [vmem:[%s11823_s1 + $0xa8] sm:$0xff]  ;;  %v1653_v6 = vld [vmem:[%s11823_s1 + $0xa0] sm:$0xff] }
  0x2a   : > { %v1683_v3 = vld [vmem:[%s11823_s1 + $0x190] sm:$0xff]  ;;  %v7996_v5 = vld [vmem:[%s8361_s18 + $0x64] ss:$8 sps:$4 sm:$0xff]   ;;  %v7998_v8 = vld [vmem:[%s8361_s18 + $0x60] ss:$8 sps:$4 sm:$0xff]  }
  0x2b   : > { %1098 = vmatpush1.bf16.msra.mxu0 %v7973_v17  ;;  %1762 = vperm.xlu1 %7967, %v1644_v18   ;;  %v1690_v7 = vld [vmem:[%s11823_s1 + $0x1c8] sm:$0xff]  ;;  %v1689_v9 = vld [vmem:[%s11823_s1 + $0x1c0] sm:$0xff]  ;;  %v1656_v10 = vld [vmem:[%s11823_s1 + $0xb8] sm:$0xff] }
  0x2c   : > { %1099 = vmatprep.subr.bf16.mxu0 %v11843_v1  ;;  %v7999_v11 = vld [vmem:[%s8361_s18 + $0x74] ss:$8 sps:$4 sm:$0xff]   ;;  %v8001_v14 = vld [vmem:[%s8361_s18 + $0x70] ss:$8 sps:$4 sm:$0xff]   ;;  %v8002_v16 = vld [vmem:[%s8361_s18 + $0x84] ss:$8 sps:$4 sm:$0xff]  }
  0x2d   : > { %1757 = vperm.xlu0 %7966, %v1643_v19   ;;  %v1655_v12 = vld [vmem:[%s11823_s1 + $0xb0] sm:$0xff]  ;;  %v1692_v13 = vld [vmem:[%s11823_s1 + $0x1d8] sm:$0xff]  ;;  %v1662_v17 = vld [vmem:[%s11823_s1 + $0xe8] sm:$0xff] }
  0x2e   : > { %v1691_v15 = vld [vmem:[%s11823_s1 + $0x1d0] sm:$0xff]  ;;  %v1661_v18 = vld [vmem:[%s11823_s1 + $0xe0] sm:$0xff]  ;;  %v1698_v19 = vld [vmem:[%s11823_s1 + $0x208] sm:$0xff] }
  0x2f   : > { %1100 = vmatpush1.bf16.msra.mxu0 %v7974_v20  ;;  %1792 = vperm.xlu1 %7967, %v1650_v21   ;;  %v8004_v20 = vld [vmem:[%s8361_s18 + $0x80] ss:$8 sps:$4 sm:$0xff]   ;;  %v8005_v22 = vld [vmem:[%s8361_s18 + $0x94] ss:$8 sps:$4 sm:$0xff]   ;;  %v8007_v26 = vld [vmem:[%s8361_s18 + $0x90] ss:$8 sps:$4 sm:$0xff]  }
  0x30   : > { %1101 = vmatprep.subr.bf16.mxu0 %v11843_v1  ;;  %v1697_v21 = vld [vmem:[%s11823_s1 + $0x200] sm:$0xff]  ;;  %v1664_v23 = vld [vmem:[%s11823_s1 + $0xf8] sm:$0xff] }
  0x31   : > { %1787 = vperm.xlu0 %7966, %v1649_v24   ;;  %v1663_v24 = vld [vmem:[%s11823_s1 + $0xf0] sm:$0xff]  ;;  %v8008_v28 = vld [vmem:[%s8361_s18 + $0xa4] ss:$8 sps:$4 sm:$0xff]  }
  0x33   : > { %1102 = vmatpush1.bf16.msra.mxu0 %v7975_v25  ;;  %1802 = vperm.xlu1 %7967, %v1652_v27   ;;  %v1700_v25 = vld [vmem:[%s11823_s1 + $0x218] sm:$0xff]  ;;  %v1699_v27 = vld [vmem:[%s11823_s1 + $0x210] sm:$0xff] }
  0x34   : > { %1115 = vmatprep.subr.bf16.mxu0 %v11843_v1 }
  0x35   : > { %1797 = vperm.xlu0 %7966, %v1651_v29   ;;  %v1678_v29 = vld [vmem:[%s11823_s1 + $0x168] sm:$0xff] }
  0x37   : > { %1116 = vmatpush2.bf16.msra.mxu0 %v1085_v30  ;;  %1832 = vperm.xlu1 %7967, %v1658_v31   ;;  %v1677_v30 = vld [vmem:[%s11823_s1 + $0x160] sm:$0xff]  ;;  %v1680_v31 = vld [vmem:[%s11823_s1 + $0x178] sm:$0xff] }
  0x38   : > { %1117 = vmatprep.subr.bf16.mxu0 %v11843_v1 }
  0x39   : > { %1827 = vperm.xlu0 %7966, %v1657_v32   ;;  %v8010_v32 = vld [vmem:[%s8361_s18 + $0xa0] ss:$8 sps:$4 sm:$0xff]  }
  0x3b   : > { %1118 = vmatpush2.bf16.msra.mxu0 %v7977_v33  ;;  %1842 = vperm.xlu1 %7967, %v1660_v34   ;;  %v1679_v33 = vld [vmem:[%s11823_s1 + $0x170] sm:$0xff] }
  0x3c   : > { %v8011_v34 = vld [vmem:[%s8361_s18 + $0xb4] ss:$8 sps:$4 sm:$0xff]  }
  0x3d   : > { %1837 = vperm.xlu0 %7966, %v1659_v36   ;;  %v1685_v36 = vld [vmem:[%s11823_s1 + $0x1a0] sm:$0xff] }
  0x3e   : > { %1120 = vmatmul.mubr.bf16.vlgmr.msra.gmra.mxu0 %v7978_v35  ;;  %v1686_v35 = vld [vmem:[%s11823_s1 + $0x1a8] sm:$0xff] }
  0x3f   : > { %1732 = vperm.xlu1 %7967, %v1638_v38   ;;  %7413 = vmatprep.mubr.msk.bf16.mxu0 %vm971_vm0, %v7981_v37  ;;  %v1688_v37 = vld [vmem:[%s11823_s1 + $0x1b8] sm:$0xff] }
  0x41   : > { %1727 = vperm.xlu0 %7966, %v1637_v39   ;;  %v8013_v39 = vld [vmem:[%s8361_s18 + $0xb0] ss:$8 sps:$4 sm:$0xff]  }
  0x43   : > { %1892 = vperm.xlu1 %7967, %v1670_v40   ;;  %v1687_v40 = vld [vmem:[%s11823_s1 + $0x1b0] sm:$0xff] }
  0x45   : > { %1887 = vperm.xlu0 %7966, %v1669_v42  }
  0x46   : > { %1128 = vmatmul.mubr.bf16.gmra.mxu0 %v7983_v41  ;;  %v8014_v41 = vld [vmem:[%s8361_s18 + $0xc4] ss:$8 sps:$4 sm:$0xff]  }
  0x47   : > { %1912 = vperm.xlu1 %7967, %v1674_v44   ;;  %7414 = vmatprep.mubr.msk.bf16.mxu0 %vm971_vm0, %v7984_v43  ;;  %v1694_v43 = vld [vmem:[%s11823_s1 + $0x1e8] sm:$0xff] }
  0x49   : > { %1907 = vperm.xlu0 %7966, %v1673_v45   ;;  %v1693_v45 = vld [vmem:[%s11823_s1 + $0x1e0] sm:$0xff] }
  0x4b   : > { %1742 = vperm.xlu1 %7967, %v1640_v46  }
  0x4d   : > { %1737 = vperm.xlu0 %7966, %v1639_v48  }
  0x4e   : > { %1136 = vmatmul.mubr.bf16.gmra.mxu0 %v7986_v47  ;;  %v1696_v47 = vld [vmem:[%s11823_s1 + $0x1f8] sm:$0xff] }
  0x4f   : > { %1902 = vperm.xlu1 %7967, %v1672_v50   ;;  %7415 = vmatprep.mubr.msk.bf16.mxu0 %vm971_vm0, %v7987_v49  ;;  %v8016_v49 = vld [vmem:[%s8361_s18 + $0xc0] ss:$8 sps:$4 sm:$0xff]   ;;  %v1695_v50 = vld [vmem:[%s11823_s1 + $0x1f0] sm:$0xff] }
  0x51   : > { %1897 = vperm.xlu0 %7966, %v1671_v51   ;;  %v8017_v51 = vld [vmem:[%s8361_s18 + $0xd4] ss:$8 sps:$4 sm:$0xff]  }
  0x53   : > { %1922 = vperm.xlu1 %7967, %v1676_v52  }
  0x55   : > { %1917 = vperm.xlu0 %7966, %v1675_v54  }
  0x56   : > { %1144 = vmatmul.mubr.bf16.gmra.mxu0 %v7989_v53  ;;  %v1702_v53 = vld [vmem:[%s11823_s1 + $0x228] sm:$0xff] }
  0x57   : > { %1772 = vperm.xlu1 %7967, %v1646_v56   ;;  %7416 = vmatprep.mubr.msk.bf16.mxu0 %vm971_vm0, %v7990_v55  ;;  %v1701_v55 = vld [vmem:[%s11823_s1 + $0x220] sm:$0xff] }
  0x59   : > { %1767 = vperm.xlu0 %7966, %v1645_v57   ;;  %v1704_v57 = vld [vmem:[%s11823_s1 + $0x238] sm:$0xff] }
  0x5b   : > { %1952 = vperm.xlu1 %7967, %v1682_v58  }
  0x5d   : > { %1947 = vperm.xlu0 %7966, %v1681_v60   ;;  %v1703_v60 = vld [vmem:[%s11823_s1 + $0x230] sm:$0xff] }
  0x5e   : > { %1152 = vmatmul.mubr.bf16.gmra.mxu0 %v7992_v59  ;;  %v8019_v59 = vld [vmem:[%s8361_s18 + $0xd0] ss:$8 sps:$4 sm:$0xff]  }
  0x5f   : > { %1782 = vperm.xlu1 %7967, %v1648_v61   ;;  %7417 = vmatprep.mubr.msk.bf16.mxu0 %vm971_vm0, %v7993_v62  ;;  %v8020_v61 = vld [vmem:[%s8361_s18 + $0xe4] ss:$8 sps:$4 sm:$0xff]  }
  0x61   : > { %1777 = vperm.xlu0 %7966, %v1647_v63   ;;  %v2290_v63 = vld [vmem:[%s11826_s4 + $0x8] sm:$0xff] }
  0x63   : > { %1962 = vperm.xlu1 %7967, %v1684_v0  }
  0x65   : > { %1957 = vperm.xlu0 %7966, %v1683_v3  }
  0x66   : > { %1160 = vmatmul.mubr.bf16.gmra.mxu0 %v7995_v2  ;;  %v2289_v2 = vld [vmem:[%s11826_s4] sm:$0xff] }
  0x67   : > { %1812 = vperm.xlu1 %7967, %v1654_v4   ;;  %7418 = vmatprep.mubr.msk.bf16.mxu0 %vm971_vm0, %v7996_v5  ;;  %v2292_v4 = vld [vmem:[%s11826_s4 + $0x18] sm:$0xff] }
  0x69   : > { %1807 = vperm.xlu0 %7966, %v1653_v6   ;;  %v8022_v6 = vld [vmem:[%s8361_s18 + $0xe0] ss:$8 sps:$4 sm:$0xff]  }
  0x6b   : > { %1992 = vperm.xlu1 %7967, %v1690_v7   ;;  %v2291_v7 = vld [vmem:[%s11826_s4 + $0x10] sm:$0xff] }
  0x6d   : > { %1987 = vperm.xlu0 %7966, %v1689_v9  }
  0x6e   : > { %1168 = vmatmul.mubr.bf16.gmra.mxu0 %v7998_v8  ;;  %v8023_v8 = vld [vmem:[%s8361_s18 + $0xf4] ss:$8 sps:$4 sm:$0xff]  }
  0x6f   : > { %1822 = vperm.xlu1 %7967, %v1656_v10   ;;  %7419 = vmatprep.mubr.msk.bf16.mxu0 %vm971_vm0, %v7999_v11  ;;  %v7453_v10 = vld [vmem:[%s11826_s4 + $0x48] sm:$0xff] }
  0x71   : > { %1817 = vperm.xlu0 %7966, %v1655_v12   ;;  %v7452_v12 = vld [vmem:[%s11826_s4 + $0x40] sm:$0xff] }
  0x73   : > { %2002 = vperm.xlu1 %7967, %v1692_v13  }
  0x75   : > { %1997 = vperm.xlu0 %7966, %v1691_v15  }
  0x76   : > { %1176 = vmatmul.mubr.bf16.gmra.mxu0 %v8001_v14  ;;  %v7455_v14 = vld [vmem:[%s11826_s4 + $0x58] sm:$0xff] }
  0x77   : > { %1852 = vperm.xlu1 %7967, %v1662_v17   ;;  %7420 = vmatprep.mubr.msk.bf16.mxu0 %vm971_vm0, %v8002_v16  ;;  %v8025_v16 = vld [vmem:[%s8361_s18 + $0xf0] ss:$8 sps:$4 sm:$0xff]  }
  0x78   : > { %v7454_v17 = vld [vmem:[%s11826_s4 + $0x50] sm:$0xff] }
  0x79   : > { %1847 = vperm.xlu0 %7966, %v1661_v18   ;;  %v8026_v18 = vld [vmem:[%s8361_s18 + $0x104] ss:$8 sps:$4 sm:$0xff]  }
  0x7b   : > { %2032 = vperm.xlu1 %7967, %v1698_v19  }
  0x7d   : > { %2027 = vperm.xlu0 %7966, %v1697_v21  }
  0x7e   : > { %1184 = vmatmul.mubr.bf16.gmra.mxu0 %v8004_v20  ;;  %v7461_v20 = vld [vmem:[%s11826_s4 + $0x88] sm:$0xff] }
  0x7f   : > { %1862 = vperm.xlu1 %7967, %v1664_v23   ;;  %7421 = vmatprep.mubr.msk.bf16.mxu0 %vm971_vm0, %v8005_v22  ;;  %v7460_v22 = vld [vmem:[%s11826_s4 + $0x80] sm:$0xff] }
  0x81   : > { %1857 = vperm.xlu0 %7966, %v1663_v24   ;;  %v7463_v24 = vld [vmem:[%s11826_s4 + $0x98] sm:$0xff] }
  0x83   : > { %2042 = vperm.xlu1 %7967, %v1700_v25  }
  0x85   : > { %2037 = vperm.xlu0 %7966, %v1699_v27   ;;  %v7462_v27 = vld [vmem:[%s11826_s4 + $0x90] sm:$0xff] }
  0x86   : > { %1192 = vmatmul.mubr.bf16.gmra.mxu0 %v8007_v26  ;;  %v8028_v26 = vld [vmem:[%s8361_s18 + $0x100] ss:$8 sps:$4 sm:$0xff]  }
  0x87   : > { %1932 = vperm.xlu1 %7967, %v1678_v29   ;;  %7422 = vmatprep.mubr.msk.bf16.mxu0 %vm971_vm0, %v8008_v28  ;;  %v8029_v28 = vld [vmem:[%s8361_s18 + $0x114] ss:$8 sps:$4 sm:$0xff]  }
  0x89   : > { %1927 = vperm.xlu0 %7966, %v1677_v30   ;;  %v7469_v30 = vld [vmem:[%s11826_s4 + $0xc8] sm:$0xff] }
  0x8b   : > { %1942 = vperm.xlu1 %7967, %v1680_v31  }
  0x8d   : > { %1937 = vperm.xlu0 %7966, %v1679_v33  }
  0x8e   : > { %1200 = vmatmul.mubr.bf16.gmra.mxu0 %v8010_v32  ;;  %v7468_v32 = vld [vmem:[%s11826_s4 + $0xc0] sm:$0xff] }
  0x8f   : > { %1972 = vperm.xlu1 %7967, %v1686_v35   ;;  %7423 = vmatprep.mubr.msk.bf16.mxu0 %vm971_vm0, %v8011_v34  ;;  %v7471_v34 = vld [vmem:[%s11826_s4 + $0xd8] sm:$0xff] }
  0x91   : > { %1967 = vperm.xlu0 %7966, %v1685_v36   ;;  %v8031_v36 = vld [vmem:[%s8361_s18 + $0x110] ss:$8 sps:$4 sm:$0xff]  }
  0x92   : > { %v8585_v38 = vpop.permute.xlu1 %1867 }
  0x93   : > { %1982 = vperm.xlu1 %7967, %v1688_v37   ;;  %v7470_v37 = vld [vmem:[%s11826_s4 + $0xd0] sm:$0xff] }
  0x94   : > { %v8592_v42 = vpop.permute.xlu0 %1707 }
  0x95   : > { %1977 = vperm.xlu0 %7966, %v1687_v40  }
  0x96   : > { %1208 = vmatmul.mubr.bf16.gmra.mxu0 %v8013_v39  ;;  %v8597_v44 = vpop.permute.xlu1 %1872  ;;  %v8032_v39 = vld [vmem:[%s8361_s18 + $0x124] ss:$8 sps:$4 sm:$0xff]  }
  0x97   : > { %2012 = vperm.xlu1 %7967, %v1694_v43   ;;  %7424 = vmatprep.mubr.msk.bf16.mxu0 %vm971_vm0, %v8014_v41  ;;  %v2294_v41 = vld [vmem:[%s11826_s4 + $0x28] sm:$0xff] }
  0x98   : > { %v8603_v46 = vpop.permute.xlu0 %1712 }
  0x99   : > { %2007 = vperm.xlu0 %7966, %v1693_v45   ;;  %v2293_v45 = vld [vmem:[%s11826_s4 + $0x20] sm:$0xff] }
  0x9a   : > { %v8608_v48 = vpop.permute.xlu1 %1722 }
  0x9b   : > { %2022 = vperm.xlu1 %7967, %v1696_v47  }
  0x9c   : > { %v8615_v52 = vpop.permute.xlu0 %1717 }
  0x9d   : > { %2017 = vperm.xlu0 %7966, %v1695_v50  }
  0x9e   : > { %1216 = vmatmul.mubr.bf16.gmra.mxu0 %v8016_v49  ;;  %v8620_v54 = vpop.permute.xlu1 %1882  ;;  %v7477_v49 = vld [vmem:[%s11826_s4 + $0x148] sm:$0xff] }
  0x9f   : > { %2052 = vperm.xlu1 %7967, %v1702_v53   ;;  %7425 = vmatprep.mubr.msk.bf16.mxu0 %vm971_vm0, %v8017_v51  ;;  %v8034_v51 = vld [vmem:[%s8361_s18 + $0x120] ss:$8 sps:$4 sm:$0xff]  }
  0xa0   : > { %v8626_v56 = vpop.permute.xlu0 %1877  ;;  %v7476_v53 = vld [vmem:[%s11826_s4 + $0x140] sm:$0xff] }
  0xa1   : > { %2047 = vperm.xlu0 %7966, %v1701_v55   ;;  %v8035_v55 = vld [vmem:[%s8361_s18 + $0x134] ss:$8 sps:$4 sm:$0xff]  }
  0xa2   : > { %v8631_v58 = vpop.permute.xlu1 %1752 }
  0xa3   : > { %2062 = vperm.xlu1 %7967, %v1704_v57  }
  0xa4   : > { %v8638_v62 = vpop.permute.xlu0 %1747 }
  0xa5   : > { %2057 = vperm.xlu0 %7966, %v1703_v60  }
  0xa6   : > { %1224 = vmatmul.mubr.bf16.gmra.mxu0 %v8019_v59  ;;  %v8643_v0 = vpop.permute.xlu1 %1762  ;;  %v2296_v59 = vld [vmem:[%s11826_s4 + $0x38] sm:$0xff] }
  0xa7   : > { %2304 = vperm.xlu1 %7967, %v2290_v63   ;;  %7426 = vmatprep.mubr.msk.bf16.mxu0 %vm971_vm0, %v8020_v61  ;;  %v2295_v61 = vld [vmem:[%s11826_s4 + $0x30] sm:$0xff] }
  0xa8   : > { %v8649_v3 = vpop.permute.xlu0 %1757 }
  0xa9   : > { %2299 = vperm.xlu0 %7966, %v2289_v2   ;;  %v7479_v2 = vld [vmem:[%s11826_s4 + $0x158] sm:$0xff] }
  0xaa   : > { %v8654_v5 = vpop.permute.xlu1 %1792 }
  0xab   : > { %2314 = vperm.xlu1 %7967, %v2292_v4  }
  0xac   : > { %v8661_v9 = vpop.permute.xlu0 %1787 }
  0xad   : > { %2309 = vperm.xlu0 %7966, %v2291_v7   ;;  %v7478_v7 = vld [vmem:[%s11826_s4 + $0x150] sm:$0xff] }
  0xae   : > { %1232 = vmatmul.mubr.bf16.gmra.mxu0 %v8022_v6  ;;  %v8666_v11 = vpop.permute.xlu1 %1802  ;;  %v8037_v6 = vld [vmem:[%s8361_s18 + $0x130] ss:$8 sps:$4 sm:$0xff]  }
  0xaf   : > { %2433 = vperm.xlu1 %7967, %v7453_v10   ;;  %7427 = vmatprep.mubr.msk.bf16.mxu0 %vm971_vm0, %v8023_v8  ;;  %v8038_v8 = vld [vmem:[%s8361_s18 + $0x144] ss:$8 sps:$4 sm:$0xff]  }
  0xb0   : > { %v8672_v13 = vpop.permute.xlu0 %1797 }
  0xb1   : > { %2428 = vperm.xlu0 %7966, %v7452_v12   ;;  %v7457_v12 = vld [vmem:[%s11826_s4 + $0x68] sm:$0xff] }
  0xb2   : > { %v8677_v15 = vpop.permute.xlu1 %1832 }
  0xb3   : > { %2443 = vperm.xlu1 %7967, %v7455_v14  }
  0xb4   : > { %v8684_v19 = vpop.permute.xlu0 %1827 }
  0xb5   : > { %2438 = vperm.xlu0 %7966, %v7454_v17  }
  0xb6   : > { %1240 = vmatmul.mubr.bf16.gmra.mxu0 %v8025_v16  ;;  %v8689_v21 = vpop.permute.xlu1 %1842  ;;  %v7456_v16 = vld [vmem:[%s11826_s4 + $0x60] sm:$0xff] }
  0xb7   : > { %12003 = vst [vmem:[#allocation10_spill] sm:$0xff] %v8689_v21  ;;  %2530 = vperm.xlu1 %7967, %v7461_v20   ;;  %7428 = vmatprep.mubr.msk.bf16.mxu0 %vm971_vm0, %v8026_v18  ;;  %v7485_v18 = vld [vmem:[%s11826_s4 + $0x188] sm:$0xff] }
  0xb8   : > { %v8695_v23 = vpop.permute.xlu0 %1837 }
  0xb9   : > { %2525 = vperm.xlu0 %7966, %v7460_v22   ;;  %v8040_v22 = vld [vmem:[%s8361_s18 + $0x140] ss:$8 sps:$4 sm:$0xff]  }
  0xba   : > { %v8700_v25 = vpop.permute.xlu1 %1732 }
  0xbb   : > { %2540 = vperm.xlu1 %7967, %v7463_v24   ;;  %v7484_v24 = vld [vmem:[%s11826_s4 + $0x180] sm:$0xff] }
  0xbc   : > { %v8707_v29 = vpop.permute.xlu0 %1727 }
  0xbd   : > { %2535 = vperm.xlu0 %7966, %v7462_v27  }
  0xbe   : > { %1248 = vmatmul.mubr.bf16.gmra.mxu0 %v8028_v26  ;;  %v8712_v31 = vpop.permute.xlu1 %1892  ;;  %v8041_v26 = vld [vmem:[%s8361_s18 + $0x154] ss:$8 sps:$4 sm:$0xff]  }
  0xbf   : > { %12004 = vst [vmem:[#allocation11_spill] sm:$0xff] %v8712_v31  ;;  %2670 = vperm.xlu1 %7967, %v7469_v30   ;;  %7429 = vmatprep.mubr.msk.bf16.mxu0 %vm971_vm0, %v8029_v28  ;;  %v7459_v28 = vld [vmem:[%s11826_s4 + $0x78] sm:$0xff] }
  0xc0   : > { %v8718_v33 = vpop.permute.xlu0 %1887 }
  0xc1   : > { %12005 = vst [vmem:[#allocation12_spill] sm:$0xff] %v8718_v33  ;;  %2665 = vperm.xlu0 %7966, %v7468_v32   ;;  %v7458_v32 = vld [vmem:[%s11826_s4 + $0x70] sm:$0xff] }
  0xc2   : > { %v8723_v35 = vpop.permute.xlu1 %1912 }
  0xc3   : > { %12006 = vst [vmem:[#allocation13_spill] sm:$0xff] %v8723_v35  ;;  %2680 = vperm.xlu1 %7967, %v7471_v34   ;;  %v2202_v35 = vld [vmem:[%s11828_s6] sm:$0x3] }
  0xc4   : > { %v8730_v40 = vpop.permute.xlu0 %1907 }
  0xc5   : > { %12007 = vst [vmem:[#allocation14_spill] sm:$0xff] %v8730_v40  ;;  %2675 = vperm.xlu0 %7966, %v7470_v37  }
  0xc6   : > { %1256 = vmatmul.mubr.bf16.gmra.mxu0 %v8031_v36  ;;  %v8735_v43 = vpop.permute.xlu1 %1742  ;;  %v7487_v36 = vld [vmem:[%s11826_s4 + $0x198] sm:$0xff] }
  0xc7   : > { %12008 = vst [vmem:[#allocation15_spill] sm:$0xff] %v8735_v43  ;;  %2324 = vperm.xlu1 %7967, %v2294_v41   ;;  %7430 = vmatprep.mubr.msk.bf16.mxu0 %vm971_vm0, %v8032_v39  ;;  %v8043_v39 = vld [vmem:[%s8361_s18 + $0x150] ss:$8 sps:$4 sm:$0xff]   ;;  %v8083_v43 = vld [vmem:[%s8361_s18 + $0x234] ss:$8 sps:$4 sm:$0xff]  }
  0xc8   : > { %v8741_v47 = vpop.permute.xlu0 %1737  ;;  %v7486_v41 = vld [vmem:[%s11826_s4 + $0x190] sm:$0xff] }
  0xc9   : > { %2319 = vperm.xlu0 %7966, %v2293_v45   ;;  %v8044_v45 = vld [vmem:[%s8361_s18 + $0x164] ss:$8 sps:$4 sm:$0xff]  }
  0xca   : > { %v8746_v50 = vpop.permute.xlu1 %1902 }
  0xcb   : > { %12009 = vst [vmem:[#allocation16_spill] sm:$0xff] %v8746_v50  ;;  %2793 = vperm.xlu1 %7967, %v7477_v49  }
  0xcc   : > { %v8753_v57 = vpop.permute.xlu0 %1897 }
  0xcd   : > { %12010 = vst [vmem:[#allocation17_spill] sm:$0xff] %v8753_v57  ;;  %2788 = vperm.xlu0 %7966, %v7476_v53  }
  0xce   : > { %1264 = vmatmul.mubr.bf16.gmra.mxu0 %v8034_v51  ;;  %v8758_v60 = vpop.permute.xlu1 %1922  ;;  %v7465_v51 = vld [vmem:[%s11826_s4 + $0xa8] sm:$0xff] }
  0xcf   : > { %12011 = vst [vmem:[#allocation18_spill] sm:$0xff] %v8758_v60  ;;  %2334 = vperm.xlu1 %7967, %v2296_v59   ;;  %7431 = vmatprep.mubr.msk.bf16.mxu0 %vm971_vm0, %v8035_v55  ;;  %v7464_v55 = vld [vmem:[%s11826_s4 + $0xa0] sm:$0xff]  ;;  %v8067_v60 = vld [vmem:[%s8361_s18 + $0x1d0] ss:$8 sps:$4 sm:$0xff]  }
  0xd0   : > { %v8764_v63 = vpop.permute.xlu0 %1917 }
  0xd1   : > { %12012 = vst [vmem:[#allocation19_spill] sm:$0xff] %v8764_v63  ;;  %2329 = vperm.xlu0 %7966, %v2295_v61   ;;  %v7493_v61 = vld [vmem:[%s11826_s4 + $0x1c8] sm:$0xff] }
  0xd2   : > { %v8769_v4 = vpop.permute.xlu1 %1772 }
  0xd3   : > { %2803 = vperm.xlu1 %7967, %v7479_v2  }
  0xd4   : > { %v8776_v10 = vpop.permute.xlu0 %1767 }
  0xd5   : > { %2798 = vperm.xlu0 %7966, %v7478_v7   ;;  %v7492_v7 = vld [vmem:[%s11826_s4 + $0x1c0] sm:$0xff] }
  0xd6   : > { %1272 = vmatmul.mubr.bf16.gmra.mxu0 %v8037_v6  ;;  %v8781_v14 = vpop.permute.xlu1 %1952  ;;  %v8046_v6 = vld [vmem:[%s8361_s18 + $0x160] ss:$8 sps:$4 sm:$0xff]  }
  0xd7   : > { %12013 = vst [vmem:[#allocation20_spill] sm:$0xff] %v8781_v14  ;;  %2453 = vperm.xlu1 %7967, %v7457_v12   ;;  %7432 = vmatprep.mubr.msk.bf16.mxu0 %vm971_vm0, %v8038_v8  ;;  %v8047_v8 = vld [vmem:[%s8361_s18 + $0x174] ss:$8 sps:$4 sm:$0xff]  }
  0xd8   : > { %v8787_v17 = vpop.permute.xlu0 %1947 }
  0xd9   : > { %12014 = vst [vmem:[#allocation21_spill] sm:$0xff] %v8787_v17  ;;  %2448 = vperm.xlu0 %7966, %v7456_v16   ;;  %v7467_v16 = vld [vmem:[%s11826_s4 + $0xb8] sm:$0xff] }
  0xda   : > { %v8792_v20 = vpop.permute.xlu1 %1782 }
  0xdb   : > { %12015 = vst [vmem:[#allocation22_spill] sm:$0xff] %v8792_v20  ;;  %2915 = vperm.xlu1 %7967, %v7485_v18  }
  0xdc   : > { %v8799_v27 = vpop.permute.xlu0 %1777 }
  0xdd   : > { %12016 = vst [vmem:[#allocation23_spill] sm:$0xff] %v8799_v27  ;;  %2910 = vperm.xlu0 %7966, %v7484_v24  }
  0xde   : > { %1280 = vmatmul.mubr.bf16.gmra.mxu0 %v8040_v22  ;;  %v8804_v30 = vpop.permute.xlu1 %1962  ;;  %v7466_v22 = vld [vmem:[%s11826_s4 + $0xb0] sm:$0xff] }
  0xdf   : > { %12017 = vst [vmem:[#allocation24_spill] sm:$0xff] %v8804_v30  ;;  %2463 = vperm.xlu1 %7967, %v7459_v28   ;;  %7433 = vmatprep.mubr.msk.bf16.mxu0 %vm971_vm0, %v8041_v26  ;;  %v7495_v26 = vld [vmem:[%s11826_s4 + $0x1d8] sm:$0xff] }
  0xe0   : > { %v8810_v34 = vpop.permute.xlu0 %1957 }
  0xe1   : > { %12018 = vst [vmem:[#allocation25_spill] sm:$0xff] %v8810_v34  ;;  %2458 = vperm.xlu0 %7966, %v7458_v32   ;;  %v8049_v32 = vld [vmem:[%s8361_s18 + $0x170] ss:$8 sps:$4 sm:$0xff]  }
  0xe2   : > { %v8815_v37 = vpop.permute.xlu1 %1812  ;;  %v7490_v34 = vld [vmem:[%s11826_s4 + $0x1b0] sm:$0xff] }
  0xe3   : > { %12019 = vst [vmem:[#allocation26_spill] sm:$0xff] %v8815_v37  ;;  %2925 = vperm.xlu1 %7967, %v7487_v36   ;;  %v7494_v36 = vld [vmem:[%s11826_s4 + $0x1d0] sm:$0xff] }
  0xe4   : > { %v8822_v49 = vpop.permute.xlu0 %1807 }
  0xe5   : > { %12020 = vst [vmem:[#allocation27_spill] sm:$0xff] %v8822_v49  ;;  %2920 = vperm.xlu0 %7966, %v7486_v41  }
  0xe6   : > { %1288 = vmatmul.mubr.bf16.gmra.mxu0 %v8043_v39  ;;  %v8827_v53 = vpop.permute.xlu1 %1992  ;;  %v8050_v39 = vld [vmem:[%s8361_s18 + $0x184] ss:$8 sps:$4 sm:$0xff]  }
  0xe7   : > { %12021 = vst [vmem:[#allocation28_spill] sm:$0xff] %v8827_v53  ;;  %2550 = vperm.xlu1 %7967, %v7465_v51   ;;  %7434 = vmatprep.mubr.msk.bf16.mxu0 %vm971_vm0, %v8044_v45  ;;  %v7473_v45 = vld [vmem:[%s11826_s4 + $0xe8] sm:$0xff]  ;;  %v7482_v53 = vld [vmem:[%s11826_s4 + $0x170] sm:$0xff] }
  0xe8   : > { %v8833_v59 = vpop.permute.xlu0 %1987 }
  0xe9   : > { %12022 = vst [vmem:[#allocation29_spill] sm:$0xff] %v8833_v59  ;;  %2545 = vperm.xlu0 %7966, %v7464_v55   ;;  %v7472_v55 = vld [vmem:[%s11826_s4 + $0xe0] sm:$0xff]  ;;  %v7489_v59 = vld [vmem:[%s11826_s4 + $0x1a8] sm:$0xff] }
  0xea   : > { %v8838_v2 = vpop.permute.xlu1 %1822 }
  0xeb   : > { %12023 = vst [vmem:[#allocation30_spill] sm:$0xff] %v8838_v2  ;;  %3037 = vperm.xlu1 %7967, %v7493_v61  }
  0xec   : > { %v8845_v12 = vpop.permute.xlu0 %1817 }
  0xed   : > { %12024 = vst [vmem:[#allocation31_spill] sm:$0xff] %v8845_v12  ;;  %3032 = vperm.xlu0 %7966, %v7492_v7   ;;  %v8080_v12 = vld [vmem:[%s8361_s18 + $0x224] ss:$8 sps:$4 sm:$0xff]  }
  0xee   : > { %1296 = vmatmul.mubr.bf16.gmra.mxu0 %v8046_v6  ;;  %v8850_v18 = vpop.permute.xlu1 %2002  ;;  %v7501_v6 = vld [vmem:[%s11826_s4 + $0x208] sm:$0xff] }
  0xef   : > { %12025 = vst [vmem:[#allocation32_spill] sm:$0xff] %v8850_v18  ;;  %2560 = vperm.xlu1 %7967, %v7467_v16   ;;  %7435 = vmatprep.mubr.msk.bf16.mxu0 %vm971_vm0, %v8047_v8  ;;  %v8052_v8 = vld [vmem:[%s8361_s18 + $0x180] ss:$8 sps:$4 sm:$0xff]   ;;  %v7502_v18 = vld [vmem:[%s11826_s4 + $0x210] sm:$0xff] }
  0xf0   : > { %v8856_v24 = vpop.permute.xlu0 %1997  ;;  %v7500_v16 = vld [vmem:[%s11826_s4 + $0x200] sm:$0xff] }
  0xf1   : > { %12026 = vst [vmem:[#allocation33_spill] sm:$0xff] %v8856_v24  ;;  %2555 = vperm.xlu0 %7966, %v7466_v22   ;;  %v8053_v22 = vld [vmem:[%s8361_s18 + $0x194] ss:$8 sps:$4 sm:$0xff]  }
  0xf2   : > { %v8861_v28 = vpop.permute.xlu1 %1852 }
  0xf3   : > { %12027 = vst [vmem:[#allocation34_spill] sm:$0xff] %v8861_v28  ;;  %3047 = vperm.xlu1 %7967, %v7495_v26  }
  0xf4   : > { %v8868_v41 = vpop.permute.xlu0 %1847 }
  0xf5   : > { %12028 = vst [vmem:[#allocation35_spill] sm:$0xff] %v8868_v41  ;;  %3042 = vperm.xlu0 %7966, %v7494_v36  }
  0xf6   : > { %1304 = vmatmul.mubr.bf16.gmra.mxu0 %v8049_v32  ;;  %v8873_v51 = vpop.permute.xlu1 %2032  ;;  %v7475_v32 = vld [vmem:[%s11826_s4 + $0xf8] sm:$0xff] }
  0xf7   : > { %12029 = vst [vmem:[#allocation36_spill] sm:$0xff] %v8873_v51  ;;  %2690 = vperm.xlu1 %7967, %v7473_v45   ;;  %7436 = vmatprep.mubr.msk.bf16.mxu0 %vm971_vm0, %v8050_v39  ;;  %v7474_v45 = vld [vmem:[%s11826_s4 + $0xf0] sm:$0xff] }
  0xf8   : > { %v8879_v61 = vpop.permute.xlu0 %2027 }
  0xf9   : > { %12030 = vst [vmem:[#allocation37_spill] sm:$0xff] %v8879_v61  ;;  %2685 = vperm.xlu0 %7966, %v7472_v55   ;;  %v8058_v61 = vld [vmem:[%s8361_s18 + $0x1a0] ss:$8 sps:$4 sm:$0xff]  }
  0xfa   : > { %v8884_v7 = vpop.permute.xlu1 %1862 }
  0xfb   : > { %12031 = vst [vmem:[#allocation38_spill] sm:$0xff] %v8884_v7  ;;  %3134 = vperm.xlu1 %7967, %v7501_v6  }
  0xfc   : > { %v8891_v26 = vpop.permute.xlu0 %1857 }
  0xfd   : > { %12032 = vst [vmem:[#allocation39_spill] sm:$0xff] %v8891_v26  ;;  %3129 = vperm.xlu0 %7966, %v7500_v16   ;;  %v7503_v16 = vld [vmem:[%s11826_s4 + $0x218] sm:$0xff] }
  0xfe   : > { %v8896_v36 = vpop.f32.mrf.mxu0  ;;  %1312 = vmatmul.mubr.bf16.gmra.mxu0 %v8052_v8  ;;  %v8898_v39 = vpop.permute.xlu1 %2042  ;;  %v8077_v26 = vld [vmem:[%s8361_s18 + $0x214] ss:$8 sps:$4 sm:$0xff]  }
  0xff   : > { %12033 = vst [vmem:[#allocation40_spill] sm:$0xff] %v8898_v39  ;;  %2700 = vperm.xlu1 %7967, %v7475_v32   ;;  %7437 = vmatprep.mubr.msk.bf16.mxu0 %vm971_vm0, %v8053_v22  ;;  %v8055_v39 = vld [vmem:[%s8361_s18 + $0x190] ss:$8 sps:$4 sm:$0xff]   ;;  %v8056_v32 = vld [vmem:[%s8361_s18 + $0x1a4] ss:$8 sps:$4 sm:$0xff]  }
 0x100   : > { %v1123_v55 = vpop.f32.mrf.mxu0  ;;  %v8904_v6 = vpop.permute.xlu0 %2037 }
 0x101   : > { %12034 = vst [vmem:[#allocation41_spill] sm:$0xff] %v8904_v6  ;;  %2695 = vperm.xlu0 %7966, %v7474_v45   ;;  %v7481_v6 = vld [vmem:[%s11826_s4 + $0x168] sm:$0xff] }
 0x102   : > { %v8909_v1 = vpop.f32.mrf.mxu0  ;;  %v8911_v8 = vpop.permute.xlu1 %1932 }
 0x103   : > { %12035 = vst [vmem:[#allocation42_spill] sm:$0xff] %v8911_v8  ;;  %3144 = vperm.xlu1 %7967, %v7503_v16   ;;  %v7480_v16 = vld [vmem:[%s11826_s4 + $0x160] sm:$0xff] }
 0x104   : > { %v1126_v22 = vpop.f32.mrf.mxu0  ;;  %v8918_v55 = vpop.permute.xlu0 %1927 }
 0x105   : > { %12036 = vst [vmem:[#allocation43_spill] sm:$0xff] %v8918_v55  ;;  %3139 = vperm.xlu0 %7966, %v7502_v18   ;;  %v7483_v18 = vld [vmem:[%s11826_s4 + $0x178] sm:$0xff] }
 0x106   : > { %v8923_v45 = vpop.f32.mrf.mxu0  ;;  %1320 = vmatmul.mubr.bf16.gmra.mxu0 %v8055_v39  ;;  %v8925_v24 = vpop.permute.xlu1 %1942 }
 0x107   : > { %12037 = vst [vmem:[#allocation44_spill] sm:$0xff] %v8925_v24  ;;  %2813 = vperm.xlu1 %7967, %v7481_v6   ;;  %7438 = vmatprep.mubr.msk.bf16.mxu0 %vm971_vm0, %v8056_v32  ;;  %v8059_v6 = vld [vmem:[%s8361_s18 + $0x1b4] ss:$8 sps:$4 sm:$0xff]  }
 0x108   : > { %v1131_v22 = vpop.f32.mrf.mxu0  ;;  %v8931_v30 = vpop.permute.xlu0 %1937  ;;  %v7498_v24 = vld [vmem:[%s11826_s4 + $0x1f0] sm:$0xff] }
 0x109   : > { %12038 = vst [vmem:[#allocation45_spill] sm:$0xff] %v8931_v30  ;;  %2808 = vperm.xlu0 %7966, %v7480_v16   ;;  %v7504_v30 = vld [vmem:[%s11826_s4 + $0x220] sm:$0xff] }
 0x10a   : > { %v8936_v51 = vpop.f32.mrf.mxu0  ;;  %v8938_v39 = vpop.permute.xlu1 %1972 }
 0x10b   : > { %12039 = vst [vmem:[#allocation46_spill] sm:$0xff] %v8938_v39  ;;  %2823 = vperm.xlu1 %7967, %v7483_v18   ;;  %v7488_v18 = vld [vmem:[%s11826_s4 + $0x1a0] sm:$0xff] }
 0x10c   : > { %v1134_v32 = vpop.f32.mrf.mxu0  ;;  %v8945_v22 = vpop.permute.xlu0 %1967 }
 0x10d   : > { %12040 = vst [vmem:[#allocation47_spill] sm:$0xff] %v8945_v22  ;;  %2818 = vperm.xlu0 %7966, %v7482_v53   ;;  %v7491_v53 = vld [vmem:[%s11826_s4 + $0x1b8] sm:$0xff] }
 0x10e   : > { %v8950_v16 = vpop.f32.mrf.mxu0  ;;  %1328 = vmatmul.mubr.bf16.gmra.mxu0 %v8058_v61  ;;  %v8952_v39 = vpop.permute.xlu1 %1982 }
 0x10f   : > { %12041 = vst [vmem:[#allocation48_spill] sm:$0xff] %v8952_v39  ;;  %2935 = vperm.xlu1 %7967, %v7489_v59   ;;  %7439 = vmatprep.mubr.msk.bf16.mxu0 %vm971_vm0, %v8059_v6  ;;  %v8061_v39 = vld [vmem:[%s8361_s18 + $0x1b0] ss:$8 sps:$4 sm:$0xff]   ;;  %v8062_v59 = vld [vmem:[%s8361_s18 + $0x1c4] ss:$8 sps:$4 sm:$0xff]  }
 0x110   : > { %v1139_v32 = vpop.f32.mrf.mxu0  ;;  %v8958_v14 = vpop.permute.xlu0 %1977 }
 0x111   : > { %12042 = vst [vmem:[#allocation49_spill] sm:$0xff] %v8958_v14  ;;  %2930 = vperm.xlu0 %7966, %v7488_v18   ;;  %v7497_v14 = vld [vmem:[%s11826_s4 + $0x1e8] sm:$0xff] }
 0x112   : > { %v8963_v22 = vpop.f32.mrf.mxu0  ;;  %v8965_v61 = vpop.permute.xlu1 %2012 }
 0x113   : > { %12043 = vst [vmem:[#allocation50_spill] sm:$0xff] %v8965_v61  ;;  %2945 = vperm.xlu1 %7967, %v7491_v53   ;;  %v7496_v53 = vld [vmem:[%s11826_s4 + $0x1e0] sm:$0xff] }
 0x114   : > { %v1142_v6 = vpop.f32.mrf.mxu0  ;;  %v8972_v32 = vpop.permute.xlu0 %2007 }
 0x115   : > { %12044 = vst [vmem:[#allocation51_spill] sm:$0xff] %v8972_v32  ;;  %2940 = vperm.xlu0 %7966, %v7490_v34   ;;  %v7499_v34 = vld [vmem:[%s11826_s4 + $0x1f8] sm:$0xff] }
 0x116   : > { %v8977_v18 = vpop.f32.mrf.mxu0  ;;  %1336 = vmatmul.mubr.bf16.gmra.mxu0 %v8061_v39  ;;  %v8979_v61 = vpop.permute.xlu1 %2022 }
 0x117   : > { %12045 = vst [vmem:[#allocation52_spill] sm:$0xff] %v8979_v61  ;;  %3057 = vperm.xlu1 %7967, %v7497_v14   ;;  %7440 = vmatprep.mubr.msk.bf16.mxu0 %vm971_vm0, %v8062_v59  ;;  %v8064_v61 = vld [vmem:[%s8361_s18 + $0x1c0] ss:$8 sps:$4 sm:$0xff]   ;;  %v8065_v14 = vld [vmem:[%s8361_s18 + $0x1d4] ss:$8 sps:$4 sm:$0xff]  }
 0x118   : > { %v1147_v6 = vpop.f32.mrf.mxu0  ;;  %v8985_v32 = vpop.permute.xlu0 %2017 }
 0x119   : > { %12046 = vst [vmem:[#allocation53_spill] sm:$0xff] %v8985_v32  ;;  %3052 = vperm.xlu0 %7966, %v7496_v53   ;;  %v7505_v32 = vld [vmem:[%s11826_s4 + $0x228] sm:$0xff] }
 0x11a   : > { %v8990_v17 = vpop.f32.mrf.mxu0  ;;  %v8992_v39 = vpop.permute.xlu1 %2052 }
 0x11b   : > { %12047 = vst [vmem:[#allocation54_spill] sm:$0xff] %v8992_v39  ;;  %3067 = vperm.xlu1 %7967, %v7499_v34   ;;  %v1409_v34 = vlaneseq }
 0x11c   : > { %v1150_v59 = vpop.f32.mrf.mxu0  ;;  %v8999_v6 = vpop.permute.xlu0 %2047 }
 0x11d   : > { %12048 = vst [vmem:[#allocation55_spill] sm:$0xff] %v8999_v6  ;;  %3062 = vperm.xlu0 %7966, %v7498_v24   ;;  %v7507_v24 = vld [vmem:[%s11826_s4 + $0x238] sm:$0xff] }
 0x11e   : > { %v9004_v53 = vpop.f32.mrf.mxu0  ;;  %1344 = vmatmul.mubr.bf16.gmra.mxu0 %v8064_v61  ;;  %v9006_v39 = vpop.permute.xlu1 %2062  ;;  %v11846_v61 = vmov 0.0  }
 0x11f   : > { %12049 = vst [vmem:[#allocation56_spill] sm:$0xff] %v9006_v39  ;;  %3154 = vperm.xlu1 %7967, %v7505_v32   ;;  %7441 = vmatprep.mubr.msk.bf16.mxu0 %vm971_vm0, %v8065_v14  ;;  %v9018_v39 = vrot.slane %v11846_v61, 7  ;;  %v7506_v32 = vld [vmem:[%s11826_s4 + $0x230] sm:$0xff]  ;;  %v9028_v14 = vshrl.u32 %v1409_v34, 7 }
 0x120   : > { %v1155_v59 = vpop.f32.mrf.mxu0  ;;  %v9012_v6 = vpop.permute.xlu0 %2057 }
 0x121   : > { %12050 = vst [vmem:[#allocation57_spill] sm:$0xff] %v9012_v6  ;;  %3149 = vperm.xlu0 %7966, %v7504_v30   ;;  %12051 = vst [vmem:[#allocation58_spill] sm:$0xff] %v9018_v39  ;;  %v8068_v59 = vld [vmem:[%s8361_s18 + $0x1e4] ss:$8 sps:$4 sm:$0xff]   ;;  %v9032_v6 = vrot.slane %v11846_v61, 1 }
 0x122   : > { %v9020_v8 = vpop.f32.mrf.mxu0  ;;  %v9022_v55 = vpop.permute.xlu1 %2304 }
 0x123   : > { %12052 = vst [vmem:[#allocation59_spill] sm:$0xff] %v9022_v55  ;;  %3164 = vperm.xlu1 %7967, %v7507_v24   ;;  %12053 = vst [vmem:[#allocation60_spill] sm:$0xff] %v9032_v6  ;;  %v9038_v55 = vsub.s32 1, %v9028_v14 }
 0x124   : > { %v1158_v30 = vpop.f32.mrf.mxu0  ;;  %v2300_v63 = vpop.permute.xlu0 %2299 }
 0x125   : > { %12054 = vst [vmem:[#allocation61_spill] sm:$0xff] %v9038_v55  ;;  %v2369_v7 = vmul.f32 %v9018_v39, %v2300_v63  ;;  %3159 = vperm.xlu0 %7966, %v7506_v32   ;;  %v3259_v30 = vrot.slane %v2202_v35, %v9038_v55 }
 0x126   : > { %v9041_v34 = vpop.f32.mrf.mxu0  ;;  %1352 = vmatmul.mubr.bf16.gmra.mxu0 %v8067_v60  ;;  %v9043_v24 = vpop.permute.xlu1 %2314  ;;  %v8070_v60 = vld [vmem:[%s8361_s18 + $0x1e0] ss:$8 sps:$4 sm:$0xff]  }
 0x127   : > { %12055 = vst [vmem:[#allocation62_spill] sm:$0xff] %v9043_v24  ;;  %7442 = vmatprep.mubr.msk.bf16.mxu0 %vm971_vm0, %v8068_v59  ;;  %3182 = vrot.lane.b32.xlu1 %v9032_v6, %s11988_s17  ;;  %v8071_v59 = vld [vmem:[%s8361_s18 + $0x1f4] ss:$8 sps:$4 sm:$0xff]  }
 0x128   : > { %v1163_v61 = vpop.f32.mrf.mxu0  ;;  %v9049_v40 = vpop.permute.xlu0 %2309 }
 0x129   : > { %12056 = vst [vmem:[#allocation63_spill] sm:$0xff] %v9049_v40  ;;  %2385 = vrot.lane.b32.xlu0 %v2369_v7, %s11990_s23 }
 0x12a   : > { %v9052_v63 = vpop.f32.mrf.mxu0  ;;  %v9054_v32 = vpop.permute.xlu1 %2433 }
 0x12b   : > { %12057 = vst [vmem:[#allocation64_spill] sm:$0xff] %v9054_v32  ;;  %3261 = vrot.lane.b32.xlu1 %v3259_v30, %s11990_s23  ;;  %v8074_v30 = vld [vmem:[%s8361_s18 + $0x204] ss:$8 sps:$4 sm:$0xff]  }
 0x12c   : > { %v1166_v24 = vpop.f32.mrf.mxu0  ;;  %v2429_v39 = vpop.permute.xlu0 %2428 }
 0x12d   : > { %v2466_v6 = vmul.f32 0.0, %v2429_v39  ;;  %v8073_v24 = vld [vmem:[%s8361_s18 + $0x1f0] ss:$8 sps:$4 sm:$0xff]  }
 0x12e   : > { %v9059_v35 = vpop.f32.mrf.mxu0  ;;  %1360 = vmatmul.mubr.bf16.gmra.mxu0 %v8070_v60  ;;  %v9061_v61 = vpop.permute.xlu1 %2443 }
 0x12f   : > { %12058 = vst [vmem:[#allocation65_spill] sm:$0xff] %v9061_v61  ;;  %7443 = vmatprep.mubr.msk.bf16.mxu0 %vm971_vm0, %v8071_v59  ;;  %2482 = vrot.lane.b32.xlu0 %v2466_v6, %s8172_s30 }
 0x130   : > { %v1171_v7 = vpop.f32.mrf.mxu0 }
 0x131   : > { %v8076_v7 = vld [vmem:[%s8361_s18 + $0x200] ss:$8 sps:$4 sm:$0xff]  }
 0x132   : > { %v9065_v40 = vpop.f32.mrf.mxu0  ;;  %v9067_v32 = vpop.permute.xlu1 %2530 }
 0x133   : > { %12059 = vst [vmem:[#allocation66_spill] sm:$0xff] %v9067_v32 }
 0x134   : > { %v1174_v39 = vpop.f32.mrf.mxu0 }
 0x136   : > { %v9071_v2 = vpop.f32.mrf.mxu0  ;;  %1368 = vmatmul.mubr.bf16.gmra.mxu0 %v8073_v24  ;;  %v9073_v60 = vpop.permute.xlu1 %2540 }
 0x137   : > { %12060 = vst [vmem:[#allocation67_spill] sm:$0xff] %v9073_v60  ;;  %7444 = vmatprep.mubr.msk.bf16.mxu0 %vm971_vm0, %v8074_v30 }
 0x138   : > { %v1179_v59 = vpop.f32.mrf.mxu0 }
 0x139   : > { %v8079_v59 = vld [vmem:[%s8361_s18 + $0x210] ss:$8 sps:$4 sm:$0xff]  }
 0x13a   : > { %v9076_v61 = vpop.f32.mrf.mxu0  ;;  %v9078_v6 = vpop.permute.xlu1 %2670 }
 0x13b   : > { %12061 = vst [vmem:[#allocation68_spill] sm:$0xff] %v9078_v6 }
 0x13c   : > { %v1182_v32 = vpop.f32.mrf.mxu0 }
 0x13e   : > { %v9082_v20 = vpop.f32.mrf.mxu0  ;;  %1376 = vmatmul.mubr.bf16.gmra.mxu0 %v8076_v7  ;;  %v9084_v39 = vpop.permute.xlu1 %2680 }
 0x13f   : > { %12062 = vst [vmem:[#allocation69_spill] sm:$0xff] %v9084_v39  ;;  %7445 = vmatprep.mubr.msk.bf16.mxu0 %vm971_vm0, %v8077_v26 }
 0x140   : > { %v1187_v24 = vpop.f32.mrf.mxu0 }
 0x141   : > { %v8082_v24 = vld [vmem:[%s8361_s18 + $0x220] ss:$8 sps:$4 sm:$0xff]  }
 0x142   : > { %v9087_v60 = vpop.f32.mrf.mxu0  ;;  %v9089_v30 = vpop.permute.xlu1 %2324 }
 0x143   : > { %12063 = vst [vmem:[#allocation70_spill] sm:$0xff] %v9089_v30 }
 0x144   : > { %v1190_v6 = vpop.f32.mrf.mxu0 }
 0x146   : > { %v9093_v50 = vpop.f32.mrf.mxu0  ;;  %1384 = vmatmul.mubr.bf16.gmra.mxu0 %v8079_v59  ;;  %v9095_v32 = vpop.permute.xlu1 %2793 }
 0x147   : > { %12064 = vst [vmem:[#allocation71_spill] sm:$0xff] %v9095_v32  ;;  %7446 = vmatprep.mubr.msk.bf16.mxu0 %vm971_vm0, %v8080_v12  ;;  %v8085_v12 = vld [vmem:[%s8361_s18 + $0x230] ss:$8 sps:$4 sm:$0xff]   ;;  %s8175_s18 = smov 88  }
 0x148   : > { %v1195_v7 = vpop.f32.mrf.mxu0 }
 0x14a   : > { %v9098_v39 = vpop.f32.mrf.mxu0  ;;  %v9100_v26 = vpop.permute.xlu1 %2334 }
 0x14b   : > { %12065 = vst [vmem:[#allocation72_spill] sm:$0xff] %v9100_v26 }
 0x14c   : > { %v1198_v28 = vpop.f32.mrf.mxu0 }
 0x14e   : > { %v9104_v30 = vpop.f32.mrf.mxu0  ;;  %1392 = vmatmul.mubr.bf16.gmra.mxu0 %v8082_v24  ;;  %v9106_v6 = vpop.permute.xlu1 %2803 }
 0x14f   : > { %12066 = vst [vmem:[#allocation73_spill] sm:$0xff] %v9106_v6  ;;  %7447 = vmatprep.mubr.msk.bf16.mxu0 %vm971_vm0, %v8083_v43 }
 0x150   : > { %v1203_v59 = vpop.f32.mrf.mxu0 }
 0x152   : > { %v9109_v57 = vpop.f32.mrf.mxu0  ;;  %v9111_v32 = vpop.permute.xlu1 %2453 }
 0x153   : > { %12067 = vst [vmem:[#allocation74_spill] sm:$0xff] %v9111_v32 }
 0x154   : > { %v1206_v7 = vpop.f32.mrf.mxu0 }
 0x156   : > { %v9114_v37 = vpop.f32.mrf.mxu0  ;;  %1400 = vmatmul.mubr.bf16.gmra.mxu0 %v8085_v12  ;;  %v9116_v26 = vpop.permute.xlu1 %2915  ;;  %v9131_v12 = vsub.s32 0, %v9028_v14 }
 0x157   : > { %12068 = vst [vmem:[#allocation75_spill] sm:$0xff] %v9114_v37  ;;  %12069 = vst [vmem:[#allocation76_spill] sm:$0xff] %v9116_v26 }
 0x158   : > { %v1211_v28 = vpop.f32.mrf.mxu0  ;;  %12074 = vst [vmem:[#allocation81_spill] sm:$0xff] %v9131_v12 }
 0x15a   : > { %v9118_v27 = vpop.f32.mrf.mxu0  ;;  %v9120_v24 = vpop.permute.xlu1 %2463 }
 0x15b   : > { %12070 = vst [vmem:[#allocation77_spill] sm:$0xff] %v9118_v27  ;;  %12071 = vst [vmem:[#allocation78_spill] sm:$0xff] %v9120_v24 }
 0x15c   : > { %v1214_v6 = vpop.f32.mrf.mxu0 }
 0x15d   : > { %v1408_v6 = vld [vmem:[%s11825_s3] sm:$0x3] }
 0x15e   : > { %v9122_v41 = vpop.f32.mrf.mxu0  ;;  %v9124_v43 = vpop.permute.xlu1 %2925 }
 0x15f   : > { %12072 = vst [vmem:[#allocation79_spill] sm:$0xff] %v9124_v43  ;;  %v9141_v43 = vrot.slane %v1408_v6, %v9131_v12 }
 0x160   : > { %v1219_v59 = vpop.f32.mrf.mxu0 }
 0x161   : > { %v1413_v14 = vmul.f32 %v9141_v43, %v8896_v36  ;;  %v1415_v12 = vmul.f32 %v9141_v43, %v8923_v45  ;;  %v1417_v36 = vmul.f32 %v9141_v43, %v8950_v16  ;;  %v1418_v45 = vmul.f32 %v9141_v43, %v8963_v22 }
 0x162   : > { %v9126_v31 = vpop.f32.mrf.mxu0  ;;  %v9128_v32 = vpop.permute.xlu1 %2550  ;;  %v1422_v37 = vmul.f32 %v9141_v43, %v9020_v8 }
 0x163   : > { %12073 = vst [vmem:[#allocation80_spill] sm:$0xff] %v9128_v32  ;;  %v9150_v32 = vrot.slane %v1408_v6, %v9038_v55 }
 0x164   : > { %v1222_v7 = vpop.f32.mrf.mxu0 }
 0x166   : > { %v9133_v26 = vpop.f32.mrf.mxu0  ;;  %v9135_v28 = vpop.permute.xlu1 %3037 }
 0x167   : > { %12075 = vst [vmem:[#allocation82_spill] sm:$0xff] %v9135_v28 }
 0x168   : > { %v1227_v24 = vpop.f32.mrf.mxu0 }
 0x169   : > { %v1414_v24 = vmul.f32 %v9141_v43, %v8909_v1  ;;  %v1491_v1 = vadd.f32 %v9150_v32, %v1415_v12  ;;  %v1423_v12 = vmul.f32 %v9141_v43, %v9041_v34  ;;  %v1425_v34 = vmul.f32 %v9141_v43, %v9059_v35 }
 0x16a   : > { %v9143_v59 = vpop.f32.mrf.mxu0  ;;  %v9145_v21 = vpop.permute.xlu1 %2560 }
 0x16b   : > { %12076 = vst [vmem:[#allocation83_spill] sm:$0xff] %v9145_v21  ;;  %v1489_v21 = vadd.f32 %v9150_v32, %v1413_v14 }
 0x16c   : > { %v1230_v7 = vpop.f32.mrf.mxu0 }
 0x16d   : > { %v1416_v7 = vmul.f32 %v9141_v43, %v8936_v51  ;;  %v1421_v51 = vmul.f32 %v9141_v43, %v9004_v53  ;;  %v1494_v53 = vadd.f32 %v9150_v32, %v1418_v45 }
 0x16e   : > { %v9152_v28 = vpop.f32.mrf.mxu0  ;;  %v9154_v27 = vpop.permute.xlu1 %3047 }
 0x16f   : > { %12077 = vst [vmem:[#allocation84_spill] sm:$0xff] %v9154_v27  ;;  %v1490_v27 = vadd.f32 %v9150_v32, %v1414_v24  ;;  %v1492_v16 = vadd.f32 %v9150_v32, %v1416_v7  ;;  %v1493_v24 = vadd.f32 %v9150_v32, %v1417_v36  ;;  %v1424_v7 = vmul.f32 %v9141_v43, %v9052_v63 }
 0x170   : > { %v1235_v33 = vpop.f32.mrf.mxu0  ;;  %v1497_v8 = vadd.f32 %v9150_v32, %v1421_v51 }
 0x171   : > { %v1419_v33 = vmul.f32 %v9141_v43, %v8977_v18  ;;  %v1562_v18 = vmax.f32 %v1490_v27, 0.0  ;;  %v1498_v27 = vadd.f32 %v9150_v32, %v1422_v37  ;;  %v1565_v63 = vmax.f32 %v1493_v24, 0.0 }
 0x172   : > { %v9165_v6 = vpop.f32.mrf.mxu0  ;;  %v9167_v55 = vpop.permute.xlu1 %2690  ;;  %v1566_v37 = vmax.f32 %v1494_v53, 0.0  ;;  %v1501_v24 = vadd.f32 %v9150_v32, %v1425_v34  ;;  %v1430_v53 = vmul.f32 %v9141_v43, %v9087_v60 }
 0x173   : > { %12078 = vst [vmem:[#allocation85_spill] sm:$0xff] %v9165_v6  ;;  %12079 = vst [vmem:[#allocation86_spill] sm:$0xff] %v9167_v55  ;;  %v1561_v55 = vmax.f32 %v1489_v21, 0.0  ;;  %v1563_v6 = vmax.f32 %v1491_v1, 0.0  ;;  %v1420_v21 = vmul.f32 %v9141_v43, %v8990_v17  ;;  %v1426_v1 = vmul.f32 %v9141_v43, %v9065_v40 }
 0x174   : > { %v1238_v14 = vpop.f32.mrf.mxu0  ;;  %v9208_v51 = vmul.f32 %v8603_v46, %v1562_v18 }
 0x175   : > { %v1495_v14 = vadd.f32 %v9150_v32, %v1419_v33  ;;  %v9200_v45 = vmul.f32 %v8592_v42, %v1561_v55  ;;  %v1499_v33 = vadd.f32 %v9150_v32, %v1423_v12  ;;  %v9211_v35 = vmul.f32 %v8615_v52, %v1563_v6 }
 0x176   : > { %v9183_v49 = vpop.f32.mrf.mxu0  ;;  %v9185_v22 = vpop.permute.xlu1 %3134  ;;  %v9215_v42 = vadd.f32 %v9150_v32, %v1420_v21  ;;  %v1569_v55 = vmax.f32 %v1497_v8, 0.0  ;;  %v1502_v46 = vadd.f32 %v9150_v32, %v1426_v1  ;;  %v1429_v52 = vmul.f32 %v9141_v43, %v9082_v20 }
 0x177   : > { %12080 = vst [vmem:[#allocation87_spill] sm:$0xff] %v9183_v49  ;;  %12081 = vst [vmem:[#allocation88_spill] sm:$0xff] %v9185_v22  ;;  %v1564_v49 = vmax.f32 %v1492_v16, 0.0  ;;  %v1500_v16 = vadd.f32 %v9150_v32, %v1424_v7  ;;  %v1567_v40 = vmax.f32 %v1495_v14, 0.0  ;;  %v9225_v6 = vmul.f32 %v8707_v29, %v1565_v63 }
 0x178   : > { %v1243_v36 = vpop.f32.mrf.mxu0  ;;  %v1571_v18 = vmax.f32 %v1499_v33, 0.0  ;;  %v1437_v7 = vmul.f32 %v9141_v43, %v9122_v41  ;;  %v1427_v20 = vmul.f32 %v9141_v43, %v9071_v2  ;;  %v1568_v60 = vmax.f32 %v9215_v42, 0.0 }
 0x179   : > { %v9219_v36 = vmul.f32 %v8608_v48, %v1564_v49  ;;  %v9234_v48 = vmul.f32 %v8700_v25, %v1566_v37  ;;  %v1572_v49 = vmax.f32 %v1500_v16, 0.0  ;;  %v9240_v8 = vmul.f32 %v8741_v47, %v1567_v40 }
 0x17a   : > { %v9203_v22 = vpop.f32.mrf.mxu0  ;;  %v9205_v17 = vpop.permute.xlu1 %2700  ;;  %v2073_v34 = vmul.f32 %v8638_v62, %v1569_v55  ;;  %v1573_v41 = vmax.f32 %v1501_v24, 0.0  ;;  %v1574_v63 = vmax.f32 %v1502_v46, 0.0  ;;  %v1505_v25 = vadd.f32 %v9150_v32, %v1429_v52 }
 0x17b   : > { %12082 = vst [vmem:[#allocation89_spill] sm:$0xff] %v9205_v17  ;;  %v1570_v17 = vmax.f32 %v1498_v27, 0.0  ;;  %v9248_v2 = vmul.f32 %v8649_v3, %v1571_v18  ;;  %v1506_v37 = vadd.f32 %v9150_v32, %v1430_v53  ;;  %v1513_v47 = vadd.f32 %v9150_v32, %v1437_v7 }
 0x17c   : > { %v1246_v12 = vpop.f32.mrf.mxu0  ;;  %v1438_v16 = vmul.f32 %v9141_v43, %v9126_v31  ;;  %v9264_v24 = vmul.f32 %v8776_v10, %v1573_v41  ;;  %v1431_v31 = vmul.f32 %v9141_v43, %v9093_v50  ;;  %v1432_v46 = vmul.f32 %v9141_v43, %v9098_v39 }
 0x17d   : > { %v2074_v1 = vmul.f32 %v8631_v58, %v1570_v17  ;;  %v9257_v58 = vmul.f32 %v8643_v0, %v1572_v49  ;;  %v9260_v17 = vadd.f32 %v9150_v32, %v1427_v20  ;;  %v1428_v12 = vmul.f32 %v9141_v43, %v9076_v61 }
 0x17e   : > { %v1249_v14 = vpop.f32.mrf.mxu0  ;;  %v9231_v21 = vpop.permute.xlu1 %3144  ;;  %v9273_v52 = vmul.f32 %v8769_v4, %v1574_v63  ;;  %v1577_v18 = vmax.f32 %v1505_v25, 0.0  ;;  %v1578_v10 = vmax.f32 %v1506_v37, 0.0  ;;  %v1514_v49 = vadd.f32 %v9150_v32, %v1438_v16 }
 0x17f   : > { %12083 = vst [vmem:[#allocation90_spill] sm:$0xff] %v9231_v21  ;;  %v1445_v29 = vmul.f32 %v9141_v43, %v1249_v14  ;;  %v1585_v14 = vmax.f32 %v1513_v47, 0.0  ;;  %v1439_v61 = vmul.f32 %v9141_v43, %v9133_v26  ;;  %v1575_v39 = vmax.f32 %v9260_v17, 0.0 }
 0x180   : > { %v1251_v27 = vpop.f32.mrf.mxu0  ;;  %v1508_v63 = vadd.f32 %v9150_v32, %v1432_v46  ;;  %v1433_v26 = vmul.f32 %v9141_v43, %v9104_v30  ;;  %v2082_v16 = vmul.f32 %v8654_v5, %v1578_v10  ;;  %v1440_v5 = vmul.f32 %v9141_v43, %v9143_v59 }
 0x181   : > { %v1521_v33 = vadd.f32 %v9150_v32, %v1445_v29  ;;  %v1507_v27 = vadd.f32 %v9150_v32, %v1431_v31 }
 0x182   : > { %v1252_v62 = vpop.f32.mrf.mxu0  ;;  %v9254_v40 = vpop.permute.xlu1 %2813 }
 0x183   : > { %12084 = vst [vmem:[#allocation91_spill] sm:$0xff] %v9254_v40  ;;  %v1593_v55 = vmax.f32 %v1521_v33, 0.0  ;;  %v1446_v3 = vmul.f32 %v9141_v43, %v1252_v62  ;;  %v2081_v33 = vmul.f32 %v8661_v9, %v1577_v18  ;;  %v2089_v62 = vmul.f32 %v8684_v19, %v1585_v14 }
 0x184   : > { %v1254_v0 = vpop.f32.mrf.mxu0  ;;  %v1509_v18 = vadd.f32 %v9150_v32, %v1433_v26 }
 0x185   : > { %v2097_v53 = vmul.f32 %v8585_v38, %v1593_v55  ;;  %v1522_v7 = vadd.f32 %v9150_v32, %v1446_v3  ;;  %v9286_v38 = vadd.f32 %v9150_v32, %v1428_v12  ;;  %v1586_v55 = vmax.f32 %v1514_v49, 0.0 }
 0x186   : > { %v1257_v50 = vpop.f32.mrf.mxu0  ;;  %v9280_v20 = vpop.permute.xlu1 %2823  ;;  %v1515_v3 = vadd.f32 %v9150_v32, %v1439_v61  ;;  %v1579_v0 = vmax.f32 %v1507_v27, 0.0 }
 0x187   : > { %12085 = vst [vmem:[#allocation92_spill] sm:$0xff] %v9280_v20  ;;  %v2137_v4 = vmax.f32 %v2097_v53, %v9200_v45  ;;  %v1594_v29 = vmax.f32 %v1522_v7, 0.0  ;;  %v1447_v41 = vmul.f32 %v9141_v43, %v1257_v50  ;;  %v2090_v49 = vmul.f32 %v8677_v15, %v1586_v55 }
 0x188   : > { %v1259_v25 = vpop.f32.mrf.mxu0  ;;  %v1587_v61 = vmax.f32 %v1515_v3, 0.0  ;;  %v1441_v50 = vmul.f32 %v9141_v43, %v9152_v28  ;;  %v2083_v27 = vmul.f32 %v8672_v13, %v1579_v0  ;;  %v1516_v15 = vadd.f32 %v9150_v32, %v1440_v5 }
 0x189   : > { %v2145_v37 = vmax.f32 %v2137_v4, %v2073_v34  ;;  %v2098_v47 = vmul.f32 %v8597_v44, %v1594_v29  ;;  %v1523_v45 = vadd.f32 %v9150_v32, %v1447_v41  ;;  %v1580_v44 = vmax.f32 %v1508_v63, 0.0 }
 0x18a   : > { %v1260_v12 = vpop.f32.mrf.mxu0  ;;  %v9298_v31 = vpop.permute.xlu1 %2935  ;;  %v1517_v13 = vadd.f32 %v9150_v32, %v1441_v50 }
 0x18b   : > { %12086 = vst [vmem:[#allocation93_spill] sm:$0xff] %v9298_v31  ;;  %v2138_v30 = vmax.f32 %v2098_v47, %v9208_v51  ;;  %v1595_v46 = vmax.f32 %v1523_v45, 0.0  ;;  %v1448_v9 = vmul.f32 %v9141_v43, %v1260_v12  ;;  %v2153_v34 = vmax.f32 %v2145_v37, %v2081_v33  ;;  %v12088_v45 = vld [vmem:[#allocation85_spill] sm:$0xff]  ;;  %v2201_v12 = vld [vmem:[%s11827_s5] sm:$0xf] }
 0x18c   : > { %v1262_v19 = vpop.f32.mrf.mxu0  ;;  %v1434_v51 = vmul.f32 %v9141_v43, %v9109_v57  ;;  %v2084_v63 = vmul.f32 %v8666_v11, %v1580_v44  ;;  %v1581_v57 = vmax.f32 %v1509_v18, 0.0  ;;  %v2091_v47 = vmul.f32 %v8695_v23, %v1587_v61  ;;  %v12092_v18 = vld [vmem:[#allocation12_spill] sm:$0xff]  ;;  %7907 = vmatprep.subr.msk.bf16.mxu1 %vm2220_vm3, %v2201_v12 }
 0x18d   : > { %v2146_v53 = vmax.f32 %v2138_v30, %v2074_v1  ;;  %v2099_v7 = vmul.f32 %v8626_v56, %v1595_v46  ;;  %v1524_v10 = vadd.f32 %v9150_v32, %v1448_v9  ;;  %v9307_v14 = vmax.f32 %v2153_v34, %v2089_v62  ;;  %v12090_v30 = vld [vmem:[#allocation27_spill] sm:$0xff] }
 0x18e   : > { %v1265_v4 = vpop.f32.mrf.mxu0  ;;  %v9314_v29 = vpop.permute.xlu1 %2945  ;;  %v1442_v11 = vmul.f32 %v9141_v43, %v12088_v45  ;;  %v2085_v23 = vmul.f32 %v12090_v30, %v1581_v57  ;;  %v12091_v46 = vld [vmem:[#allocation75_spill] sm:$0xff]  ;;  %v1588_v34 = vmax.f32 %v1516_v15, 0.0  ;;  %v2222_v61 = vsel %vm2220_vm3, %v2201_v12, 0 }
 0x18f   : > { %12087 = vst [vmem:[#allocation94_spill] sm:$0xff] %v9314_v29  ;;  %v2139_v59 = vmax.f32 %v2099_v7, %v9211_v35  ;;  %v1596_v1 = vmax.f32 %v1524_v10, 0.0  ;;  %v1449_v56 = vmul.f32 %v9141_v43, %v1265_v4  ;;  %v2154_v41 = vmax.f32 %v2146_v53, %v2082_v16  ;;  %7700 = vmatpush3.bf16.msra.mxu1 %v2222_v61  ;;  %v12095_v57 = vld [vmem:[#allocation87_spill] sm:$0xff] }
 0x190   : > { %v1267_v26 = vpop.f32.mrf.mxu0  ;;  %v1510_v35 = vadd.f32 %v9150_v32, %v1434_v51  ;;  %v1435_v9 = vmul.f32 %v9141_v43, %v12091_v46  ;;  %v1589_v7 = vmax.f32 %v1517_v13, 0.0  ;;  %v1518_v10 = vadd.f32 %v9150_v32, %v1442_v11  ;;  %v12097_v13 = vld [vmem:[#allocation35_spill] sm:$0xff]  ;;  %v12099_v46 = vld [vmem:[#allocation26_spill] sm:$0xff] }
 0x191   : > { %v2147_v25 = vmax.f32 %v2139_v59, %v9248_v2  ;;  %v2100_v28 = vmul.f32 %v8620_v54, %v1596_v1  ;;  %v1525_v33 = vadd.f32 %v9150_v32, %v1449_v56  ;;  %v9324_v37 = vmax.f32 %v2154_v41, %v2090_v49  ;;  %v12093_v1 = vld [vmem:[#allocation77_spill] sm:$0xff]  ;;  %v12094_v41 = vld [vmem:[#allocation10_spill] sm:$0xff]  ;;  %v12098_v12 = vld [vmem:[#allocation23_spill] sm:$0xff] }
 0x192   : > { %v1268_v16 = vpop.f32.mrf.mxu0  ;;  %v9331_v62 = vpop.permute.xlu1 %3057  ;;  %v1582_v53 = vmax.f32 %v1510_v35, 0.0  ;;  %v1436_v56 = vmul.f32 %v9141_v43, %v12093_v1  ;;  %v1443_v15 = vmul.f32 %v9141_v43, %v12095_v57  ;;  %v2093_v45 = vmul.f32 %v12097_v13, %v1589_v7  ;;  %v12101_v7 = vld [vmem:[#allocation34_spill] sm:$0xff] }
 0x193   : > { %12089 = vst [vmem:[#allocation85_spill] sm:$0xff] %v9331_v62  ;;  %v2140_v2 = vmax.f32 %v2100_v28, %v9219_v36  ;;  %v1597_v55 = vmax.f32 %v1525_v33, 0.0  ;;  %v1450_v54 = vmul.f32 %v9141_v43, %v1268_v16  ;;  %v2155_v3 = vmax.f32 %v2147_v25, %v2083_v27 }
 0x194   : > { %v1270_v0 = vpop.f32.mrf.mxu0  ;;  %v2092_v27 = vmul.f32 %v12094_v41, %v1588_v34  ;;  %v1511_v28 = vadd.f32 %v9150_v32, %v1435_v9  ;;  %v1590_v11 = vmax.f32 %v1518_v10, 0.0  ;;  %v1444_v16 = vmul.f32 %v9141_v43, %v9203_v22 }
 0x195   : > { %v2148_v44 = vmax.f32 %v2140_v2, %v9257_v58  ;;  %v2101_v36 = vmul.f32 %v12092_v18, %v1597_v55  ;;  %v1526_v5 = vadd.f32 %v9150_v32, %v1450_v54  ;;  %v9344_v19 = vmax.f32 %v2155_v3, %v2091_v47  ;;  %v12100_v18 = vld [vmem:[#allocation17_spill] sm:$0xff] }
 0x196   : > { %v1273_v51 = vpop.f32.mrf.mxu0  ;;  %v3068_v49 = vpop.permute.xlu1 %3067  ;;  %v2079_v30 = vmul.f32 %v12098_v12, %v1575_v39  ;;  %v2086_v9 = vmul.f32 %v12099_v46, %v1582_v53  ;;  %v1512_v34 = vadd.f32 %v9150_v32, %v1436_v56  ;;  %v1519_v0 = vadd.f32 %v9150_v32, %v1443_v15  ;;  %v12103_v56 = vld [vmem:[#allocation16_spill] sm:$0xff]  ;;  %v12104_v15 = vld [vmem:[#allocation31_spill] sm:$0xff] }
 0x197   : > { %v2141_v50 = vmax.f32 %v2101_v36, %v9225_v6  ;;  %v1598_v4 = vmax.f32 %v1526_v5, 0.0  ;;  %v1451_v58 = vmul.f32 %v9141_v43, %v1273_v51  ;;  %v3077_v59 = vmul.f32 0.0, %v3068_v49  ;;  %v12096_v6 = vld [vmem:[#allocation11_spill] sm:$0xff] }
 0x198   : > { %v1275_v26 = vpop.f32.mrf.mxu0  ;;  %v2156_v25 = vmax.f32 %v2148_v44, %v2084_v63  ;;  %v1583_v17 = vmax.f32 %v1511_v28, 0.0  ;;  %v2094_v39 = vmul.f32 %v12101_v7, %v1590_v11  ;;  %v1520_v53 = vadd.f32 %v9150_v32, %v1444_v16  ;;  %v12105_v28 = vld [vmem:[#allocation22_spill] sm:$0xff] }
 0x199   : > { %v2149_v33 = vmax.f32 %v2141_v50, %v9264_v24  ;;  %v2102_v35 = vmul.f32 %v12096_v6, %v1598_v4  ;;  %v1527_v47 = vadd.f32 %v9150_v32, %v1451_v58  ;;  %3100 = vrot.lane.b32.xlu1 %v3077_v59, %s8173_s26  ;;  %v12102_v50 = vld [vmem:[#allocation15_spill] sm:$0xff]  ;;  %v1584_v58 = vmax.f32 %v1512_v34, 0.0  ;;  %v12107_v11 = vld [vmem:[#allocation30_spill] sm:$0xff] }
 0x19a   : > { %v1276_v2 = vpop.f32.mrf.mxu0  ;;  %v9364_v55 = vmax.f32 %v2156_v25, %v2092_v27  ;;  %v2072_v4 = vmul.f32 %v12102_v50, %v1568_v60  ;;  %v1591_v59 = vmax.f32 %v1519_v0, 0.0  ;;  %v1592_v26 = vmax.f32 %v1520_v53, 0.0 }
 0x19b   : > { %v2142_v63 = vmax.f32 %v2102_v35, %v9234_v48  ;;  %v1599_v54 = vmax.f32 %v1527_v47, 0.0  ;;  %v1452_v24 = vmul.f32 %v9141_v43, %v1276_v2  ;;  %v2157_v3 = vmax.f32 %v2149_v33, %v2085_v23  ;;  %v12106_v35 = vld [vmem:[#allocation39_spill] sm:$0xff] }
 0x19c   : > { %v1278_v22 = vpop.f32.mrf.mxu0  ;;  %v1576_v23 = vmax.f32 %v9286_v38, 0.0  ;;  %v2095_v47 = vmul.f32 %v12106_v35, %v1591_v59  ;;  %v2088_v16 = vmul.f32 %v12107_v11, %v1584_v58  ;;  %v12112_v59 = vld [vmem:[#allocation18_spill] sm:$0xff] }
 0x19d   : > { %v2150_v44 = vmax.f32 %v2142_v63, %v9273_v52  ;;  %v2103_v36 = vmul.f32 %v12100_v18, %v1599_v54  ;;  %v1528_v48 = vadd.f32 %v9150_v32, %v1452_v24  ;;  %v9377_v5 = vmax.f32 %v2157_v3, %v2093_v45  ;;  %v12108_v63 = vld [vmem:[#allocation14_spill] sm:$0xff]  ;;  %v12110_v18 = vld [vmem:[#allocation13_spill] sm:$0xff] }
 0x19e   : > { %v1281_v10 = vpop.f32.mrf.mxu0  ;;  %v2080_v33 = vmul.f32 %v12105_v28, %v1576_v23  ;;  %v12109_v3 = vld [vmem:[#allocation38_spill] sm:$0xff] }
 0x19f   : > { %v2143_v51 = vmax.f32 %v2103_v36, %v9240_v8  ;;  %v1600_v49 = vmax.f32 %v1528_v48, 0.0  ;;  %v1453_v61 = vmul.f32 %v9141_v43, %v1281_v10  ;;  %v2158_v52 = vmax.f32 %v2150_v44, %v2086_v9  ;;  %v12111_v10 = vld [vmem:[#allocation19_spill] sm:$0xff]  ;;  %v12114_v35 = vld [vmem:[#allocation42_spill] sm:$0xff] }
 0x1a0   : > { %v1283_v1 = vpop.f32.mrf.mxu0  ;;  %v2087_v8 = vmul.f32 %v12104_v15, %v1583_v17  ;;  %v2096_v12 = vmul.f32 %v12109_v3, %v1592_v26  ;;  %v12113_v26 = vld [vmem:[#allocation43_spill] sm:$0xff] }
 0x1a1   : > { %v2151_v38 = vmax.f32 %v2143_v51, %v2079_v30  ;;  %v2104_v41 = vmul.f32 %v12103_v56, %v1600_v49  ;;  %v1529_v27 = vadd.f32 %v9150_v32, %v1453_v61  ;;  %v9389_v57 = vmax.f32 %v2158_v52, %v2094_v39 }
 0x1a2   : > { %v1284_v25 = vpop.f32.mrf.mxu0 }
 0x1a3   : > { %v2144_v6 = vmax.f32 %v2104_v41, %v2072_v4  ;;  %v1601_v42 = vmax.f32 %v1529_v27, 0.0  ;;  %v1454_v60 = vmul.f32 %v9141_v43, %v1284_v25  ;;  %v2159_v45 = vmax.f32 %v2151_v38, %v2087_v8 }
 0x1a4   : > { %v1286_v13 = vpop.f32.mrf.mxu0 }
 0x1a5   : > { %v2152_v2 = vmax.f32 %v2144_v6, %v2080_v33  ;;  %v2105_v54 = vmul.f32 %v12108_v63, %v1601_v42  ;;  %v1530_v24 = vadd.f32 %v9150_v32, %v1454_v60  ;;  %v9399_v46 = vmax.f32 %v2159_v45, %v2095_v47 }
 0x1a6   : > { %v1289_v30 = vpop.f32.mrf.mxu0 }
 0x1a7   : > { %v2169_v9 = vmax.f32 %v9307_v14, %v2105_v54  ;;  %v1602_v34 = vmax.f32 %v1530_v24, 0.0  ;;  %v1455_v0 = vmul.f32 %v9141_v43, %v1289_v30  ;;  %v2160_v22 = vmax.f32 %v2152_v2, %v2088_v16  ;;  %v12115_v54 = vld [vmem:[#allocation45_spill] sm:$0xff] }
 0x1a8   : > { %v1291_v44 = vpop.f32.mrf.mxu0 }
 0x1a9   : > { %v9404_v36 = vmul.f32 %v12110_v18, %v1602_v34  ;;  %v1531_v48 = vadd.f32 %v9150_v32, %v1455_v0  ;;  %v9407_v23 = vmax.f32 %v2160_v22, %v2096_v12  ;;  %v12116_v22 = vld [vmem:[#allocation44_spill] sm:$0xff] }
 0x1aa   : > { %v1292_v17 = vpop.f32.mrf.mxu0 }
 0x1ab   : > { %v2170_v7 = vmax.f32 %v9324_v37, %v9404_v36  ;;  %v1603_v39 = vmax.f32 %v1531_v48, 0.0  ;;  %v1456_v53 = vmul.f32 %v9141_v43, %v1292_v17  ;;  %v12126_v36 = vld [vmem:[#allocation24_spill] sm:$0xff] }
 0x1ac   : > { %v1294_v14 = vpop.f32.mrf.mxu0 }
 0x1ad   : > { %v2107_v51 = vmul.f32 %v12111_v10, %v1603_v39  ;;  %v1532_v49 = vadd.f32 %v9150_v32, %v1456_v53  ;;  %v12117_v14 = vld [vmem:[#allocation21_spill] sm:$0xff] }
 0x1ae   : > { %v1297_v61 = vpop.f32.mrf.mxu0 }
 0x1af   : > { %v2171_v52 = vmax.f32 %v9344_v19, %v2107_v51  ;;  %v1604_v50 = vmax.f32 %v1532_v49, 0.0  ;;  %v1457_v4 = vmul.f32 %v9141_v43, %v1297_v61 }
 0x1b0   : > { %v1299_v58 = vpop.f32.mrf.mxu0 }
 0x1b1   : > { %v9417_v1 = vmul.f32 %v12112_v59, %v1604_v50  ;;  %v1533_v38 = vadd.f32 %v9150_v32, %v1457_v4 }
 0x1b2   : > { %v1300_v56 = vpop.f32.mrf.mxu0 }
 0x1b3   : > { %v2172_v41 = vmax.f32 %v9364_v55, %v9417_v1  ;;  %v1605_v27 = vmax.f32 %v1533_v38, 0.0  ;;  %v1458_v15 = vmul.f32 %v9141_v43, %v1300_v56  ;;  %v12118_v38 = vld [vmem:[#allocation25_spill] sm:$0xff] }
 0x1b4   : > { %v1302_v8 = vpop.f32.mrf.mxu0 }
 0x1b5   : > { %v2109_v25 = vmul.f32 %v12113_v26, %v1605_v27  ;;  %v1534_v19 = vadd.f32 %v9150_v32, %v1458_v15 }
 0x1b6   : > { %v1305_v28 = vpop.f32.mrf.mxu0 }
 0x1b7   : > { %v2173_v33 = vmax.f32 %v9377_v5, %v2109_v25  ;;  %v1606_v6 = vmax.f32 %v1534_v19, 0.0  ;;  %v1459_v42 = vmul.f32 %v9141_v43, %v1305_v28 }
 0x1b8   : > { %v1307_v60 = vpop.f32.mrf.mxu0 }
 0x1b9   : > { %v9428_v47 = vmul.f32 %v12114_v35, %v1606_v6  ;;  %v1535_v13 = vadd.f32 %v9150_v32, %v1459_v42  ;;  %v12119_v6 = vld [vmem:[#allocation47_spill] sm:$0xff] }
 0x1ba   : > { %v1308_v45 = vpop.f32.mrf.mxu0 }
 0x1bb   : > { %v2174_v11 = vmax.f32 %v9389_v57, %v9428_v47  ;;  %v1607_v16 = vmax.f32 %v1535_v13, 0.0  ;;  %v1460_v2 = vmul.f32 %v9141_v43, %v1308_v45  ;;  %v12136_v47 = vld [vmem:[#allocation48_spill] sm:$0xff] }
 0x1bc   : > { %v1310_v63 = vpop.f32.mrf.mxu0 }
 0x1bd   : > { %v2111_v24 = vmul.f32 %v12115_v54, %v1607_v16  ;;  %v1536_v5 = vadd.f32 %v9150_v32, %v1460_v2  ;;  %v12120_v54 = vld [vmem:[#allocation49_spill] sm:$0xff] }
 0x1be   : > { %v1313_v3 = vpop.f32.mrf.mxu0 }
 0x1bf   : > { %v2175_v12 = vmax.f32 %v9399_v46, %v2111_v24  ;;  %v1608_v30 = vmax.f32 %v1536_v5, 0.0  ;;  %v1461_v34 = vmul.f32 %v9141_v43, %v1313_v3 }
 0x1c0   : > { %v1315_v0 = vpop.f32.mrf.mxu0 }
 0x1c1   : > { %v9439_v44 = vmul.f32 %v12116_v22, %v1608_v30  ;;  %v1537_v18 = vadd.f32 %v9150_v32, %v1461_v34 }
 0x1c2   : > { %v1316_v48 = vpop.f32.mrf.mxu0 }
 0x1c3   : > { %v2176_v17 = vmax.f32 %v9407_v23, %v9439_v44  ;;  %v1609_v39 = vmax.f32 %v1537_v18, 0.0  ;;  %v8104_v23 = vld [vmem:[%s11828_s6] sm:$0x3]  ;;  %v12145_v44 = vld [vmem:[#allocation81_spill] sm:$0xff] }
 0x1c4   : > { %v1318_v53 = vpop.f32.mrf.mxu0 }
 0x1c5   : > { %v2113_v10 = vmul.f32 %v12117_v14, %v1609_v39 }
 0x1c6   : > { %v1321_v51 = vpop.f32.mrf.mxu0 }
 0x1c7   : > { %v9445_v49 = vmax.f32 %v2169_v9, %v2113_v10  ;;  %v1463_v46 = vmul.f32 %v9141_v43, %v1321_v51 }
 0x1c8   : > { %v1323_v61 = vpop.f32.mrf.mxu0 }
 0x1c9   : > { %v1539_v50 = vadd.f32 %v9150_v32, %v1463_v46  ;;  %v1462_v61 = vmul.f32 %v9141_v43, %v1316_v48 }
 0x1ca   : > { %v1324_v4 = vpop.f32.mrf.mxu0 }
 0x1cb   : > { %v1611_v58 = vmax.f32 %v1539_v50, 0.0 }
 0x1cc   : > { %v1326_v59 = vpop.f32.mrf.mxu0 }
 0x1cd   : > { %v2115_v56 = vmul.f32 %v12118_v38, %v1611_v58  ;;  %v1538_v38 = vadd.f32 %v9150_v32, %v1462_v61 }
 0x1ce   : > { %v1329_v27 = vpop.f32.mrf.mxu0 }
 0x1cf   : > { %v9450_v15 = vmax.f32 %v2171_v52, %v2115_v56  ;;  %v1465_v8 = vmul.f32 %v9141_v43, %v1329_v27 }
 0x1d0   : > { %v1331_v26 = vpop.f32.mrf.mxu0 }
 0x1d1   : > { %v1541_v25 = vadd.f32 %v9150_v32, %v1465_v8  ;;  %v1464_v26 = vmul.f32 %v9141_v43, %v1324_v4 }
 0x1d2   : > { %v1332_v9 = vpop.f32.mrf.mxu0 }
 0x1d3   : > { %v1613_v19 = vmax.f32 %v1541_v25, 0.0 }
 0x1d4   : > { %v1334_v28 = vpop.f32.mrf.mxu0 }
 0x1d5   : > { %v2117_v42 = vmul.f32 %v12119_v6, %v1613_v19  ;;  %v1610_v19 = vmax.f32 %v1538_v38, 0.0 }
 0x1d6   : > { %v1337_v60 = vpop.f32.mrf.mxu0 }
 0x1d7   : > { %v9455_v35 = vmax.f32 %v2173_v33, %v2117_v42  ;;  %v1467_v13 = vmul.f32 %v9141_v43, %v1337_v60 }
 0x1d8   : > { %v1339_v45 = vpop.f32.mrf.mxu0 }
 0x1d9   : > { %v1543_v16 = vadd.f32 %v9150_v32, %v1467_v13 }
 0x1da   : > { %v9459_v52 = vpop.f32.mrf.mxu0 }
 0x1db   : > { %v1615_v2 = vmax.f32 %v1543_v16, 0.0  ;;  %v1540_v16 = vadd.f32 %v9150_v32, %v1464_v26 }
 0x1dc   : > { %v1342_v63 = vpop.f32.mrf.mxu0 }
 0x1dd   : > { %v2119_v24 = vmul.f32 %v12120_v54, %v1615_v2  ;;  %v12121_v63 = vld [vmem:[#allocation20_spill] sm:$0xff] }
 0x1de   : > { %v1345_v5 = vpop.f32.mrf.mxu0  ;;  %v2114_v54 = vmul.f32 %v12121_v63, %v1610_v19  ;;  %v12128_v63 = vld [vmem:[#allocation32_spill] sm:$0xff] }
 0x1df   : > { %v9462_v3 = vmax.f32 %v2175_v12, %v2119_v24  ;;  %v1469_v58 = vmul.f32 %v9141_v43, %v1345_v5 }
 0x1e0   : > { %v1347_v30 = vpop.f32.mrf.mxu0 }
 0x1e1   : > { %v1545_v27 = vadd.f32 %v9150_v32, %v1469_v58  ;;  %v12124_v58 = vld [vmem:[#allocation37_spill] sm:$0xff] }
 0x1e2   : > { %v1348_v34 = vpop.f32.mrf.mxu0 }
 0x1e3   : > { %v1470_v12 = vmul.f32 %v9141_v43, %v1348_v34  ;;  %v1617_v60 = vmax.f32 %v1545_v27, 0.0 }
 0x1e4   : > { %v1350_v0 = vpop.f32.mrf.mxu0 }
 0x1e5   : > { %v1546_v8 = vadd.f32 %v9150_v32, %v1470_v12  ;;  %v12122_v0 = vld [vmem:[#allocation29_spill] sm:$0xff] }
 0x1e6   : > { %v1353_v22 = vpop.f32.mrf.mxu0 }
 0x1e7   : > { %v1471_v28 = vmul.f32 %v9141_v43, %v1353_v22  ;;  %v1618_v13 = vmax.f32 %v1546_v8, 0.0  ;;  %v2121_v22 = vmul.f32 %v12122_v0, %v1617_v60 }
 0x1e8   : > { %v1355_v33 = vpop.f32.mrf.mxu0 }
 0x1e9   : > { %v1547_v5 = vadd.f32 %v9150_v32, %v1471_v28  ;;  %v12123_v33 = vld [vmem:[#allocation28_spill] sm:$0xff] }
 0x1ea   : > { %v1356_v18 = vpop.f32.mrf.mxu0 }
 0x1eb   : > { %v1472_v6 = vmul.f32 %v9141_v43, %v1356_v18  ;;  %v2122_v18 = vmul.f32 %v12123_v33, %v1618_v13  ;;  %v1619_v27 = vmax.f32 %v1547_v5, 0.0 }
 0x1ec   : > { %v1358_v39 = vpop.f32.mrf.mxu0 }
 0x1ed   : > { %v1548_v30 = vadd.f32 %v9150_v32, %v1472_v6  ;;  %v2185_v6 = vmax.f32 %v9445_v49, %v2121_v22  ;;  %v1468_v22 = vmul.f32 %v9141_v43, %v9459_v52 }
 0x1ee   : > { %v1361_v53 = vpop.f32.mrf.mxu0 }
 0x1ef   : > { %v1620_v8 = vmax.f32 %v1548_v30, 0.0  ;;  %v1473_v26 = vmul.f32 %v9141_v43, %v1361_v53 }
 0x1f0   : > { %v1363_v14 = vpop.f32.mrf.mxu0 }
 0x1f1   : > { %v1612_v14 = vmax.f32 %v1540_v16, 0.0  ;;  %v12127_v16 = vld [vmem:[#allocation33_spill] sm:$0xff]  ;;  %v1549_v49 = vadd.f32 %v9150_v32, %v1473_v26  ;;  %v1544_v26 = vadd.f32 %v9150_v32, %v1468_v22 }
 0x1f2   : > { %v1364_v10 = vpop.f32.mrf.mxu0 }
 0x1f4   : > { %v1366_v51 = vpop.f32.mrf.mxu0 }
 0x1f5   : > { %v1466_v51 = vmul.f32 %v9141_v43, %v1332_v9 }
 0x1f6   : > { %v9464_v46 = vpop.f32.mrf.mxu0 }
 0x1f7   : > { %v1475_v55 = vmul.f32 %v9141_v43, %v9464_v46  ;;  %v12132_v46 = vld [vmem:[#allocation51_spill] sm:$0xff] }
 0x1f8   : > { %v1371_v50 = vpop.f32.mrf.mxu0 }
 0x1f9   : > { %v2178_v50 = vmax.f32 %v2170_v7, %v2114_v54  ;;  %v2116_v7 = vmul.f32 %v12126_v36, %v1612_v14  ;;  %v2124_v54 = vmul.f32 %v12128_v63, %v1620_v8  ;;  %v1551_v36 = vadd.f32 %v9150_v32, %v1475_v55 }
 0x1fa   : > { %v9469_v59 = vpop.f32.mrf.mxu0 }
 0x1fb   : > { %v2186_v37 = vmax.f32 %v2178_v50, %v2122_v18  ;;  %v12129_v18 = vld [vmem:[#allocation41_spill] sm:$0xff]  ;;  %v1476_v1 = vmul.f32 %v9141_v43, %v9469_v59 }
 0x1fc   : > { %v1374_v56 = vpop.f32.mrf.mxu0 }
 0x1fe   : > { %v1377_v25 = vpop.f32.mrf.mxu0 }
 0x1ff   : > { %v1477_v48 = vmul.f32 %v9141_v43, %v1377_v25  ;;  %v1474_v25 = vmul.f32 %v9141_v43, %v1364_v10 }
 0x200   : > { %v1379_v42 = vpop.f32.mrf.mxu0 }
 0x201   : > { %v1553_v45 = vadd.f32 %v9150_v32, %v1477_v48  ;;  %v12125_v48 = vld [vmem:[#allocation36_spill] sm:$0xff]  ;;  %v1542_v42 = vadd.f32 %v9150_v32, %v1466_v51 }
 0x202   : > { %v1380_v2 = vpop.f32.mrf.mxu0 }
 0x203   : > { %v1625_v24 = vmax.f32 %v1553_v45, 0.0  ;;  %v1478_v4 = vmul.f32 %v9141_v43, %v1380_v2  ;;  %v2123_v2 = vmul.f32 %v12127_v16, %v1619_v27  ;;  %v1614_v0 = vmax.f32 %v1542_v42, 0.0  ;;  %v12131_v27 = vld [vmem:[#allocation46_spill] sm:$0xff] }
 0x204   : > { %v1382_v34 = vpop.f32.mrf.mxu0 }
 0x205   : > { %v1554_v39 = vadd.f32 %v9150_v32, %v1478_v4  ;;  %v2129_v12 = vmul.f32 %v12124_v58, %v1625_v24  ;;  %v1550_v24 = vadd.f32 %v9150_v32, %v1474_v25  ;;  %v2180_v34 = vmax.f32 %v2172_v41, %v2116_v7  ;;  %v12130_v41 = vld [vmem:[#allocation40_spill] sm:$0xff] }
 0x206   : > { %v1385_v61 = vpop.f32.mrf.mxu0  ;;  %v1621_v58 = vmax.f32 %v1549_v49, 0.0  ;;  %v2118_v8 = vmul.f32 %v12131_v27, %v1614_v0  ;;  %v1552_v7 = vadd.f32 %v9150_v32, %v1476_v1  ;;  %v12135_v0 = vld [vmem:[#allocation54_spill] sm:$0xff] }
 0x207   : > { %v1626_v38 = vmax.f32 %v1554_v39, 0.0  ;;  %v1479_v56 = vmul.f32 %v9141_v43, %v1385_v61  ;;  %v9501_v53 = vmax.f32 %v2185_v6, %v2129_v12  ;;  %v2187_v61 = vmax.f32 %v9450_v15, %v2123_v2  ;;  %v12133_v6 = vld [vmem:[#allocation50_spill] sm:$0xff]  ;;  %v12134_v2 = vld [vmem:[#allocation55_spill] sm:$0xff] }
 0x208   : > { %v1387_v19 = vpop.f32.mrf.mxu0  ;;  %v2188_v50 = vmax.f32 %v2180_v34, %v2124_v54  ;;  %v1622_v12 = vmax.f32 %v1550_v24, 0.0  ;;  %v1624_v34 = vmax.f32 %v1552_v7, 0.0 }
 0x209   : > { %v2130_v28 = vmul.f32 %v12125_v48, %v1626_v38  ;;  %v1555_v9 = vadd.f32 %v9150_v32, %v1479_v56 }
 0x20a   : > { %v1388_v60 = vpop.f32.mrf.mxu0  ;;  %v2126_v59 = vmul.f32 %v12133_v6, %v1622_v12 }
 0x20b   : > { %v1627_v13 = vmax.f32 %v1555_v9, 0.0  ;;  %v1480_v45 = vmul.f32 %v9141_v43, %v1388_v60  ;;  %v9503_v10 = vmax.f32 %v2186_v37, %v2130_v28  ;;  %v2125_v9 = vmul.f32 %v12132_v46, %v1621_v58  ;;  %v12140_v58 = vld [vmem:[#allocation52_spill] sm:$0xff] }
 0x20c   : > { %v1390_v4 = vpop.f32.mrf.mxu0  ;;  %v2128_v12 = vmul.f32 %v12140_v58, %v1624_v34 }
 0x20d   : > { %v1556_v5 = vadd.f32 %v9150_v32, %v1480_v45  ;;  %v2203_v30 = vpack.c.bf16 %v9503_v10, %v9501_v53  ;;  %v2131_v39 = vmul.f32 %v12129_v18, %v1627_v13  ;;  %v2182_v13 = vmax.f32 %v2174_v11, %v2118_v8  ;;  %v12142_v8 = vld [vmem:[#allocation56_spill] sm:$0xff] }
 0x20e   : > { %v1393_v33 = vpop.f32.mrf.mxu0  ;;  %v1616_v45 = vmax.f32 %v1544_v26, 0.0  ;;  %v2189_v24 = vmax.f32 %v9455_v35, %v2125_v9  ;;  %v12139_v35 = vld [vmem:[#allocation53_spill] sm:$0xff] }
 0x20f   : > { %v1628_v14 = vmax.f32 %v1556_v5, 0.0  ;;  %v1481_v51 = vmul.f32 %v9141_v43, %v1393_v33  ;;  %7701 = vmatprep.mubr.msk.bf16.mxu1 %vm2207_vm4, %v2203_v30  ;;  %v9529_v15 = vmax.f32 %v2187_v61, %v2131_v39  ;;  %v2190_v4 = vmax.f32 %v2182_v13, %v2126_v59 }
 0x210   : > { %v1395_v38 = vpop.f32.mrf.mxu0  ;;  %v1623_v30 = vmax.f32 %v1551_v36, 0.0  ;;  %v2120_v11 = vmul.f32 %v12136_v47, %v1616_v45 }
 0x211   : > { %v2132_v52 = vmul.f32 %v12130_v41, %v1628_v14  ;;  %v1557_v56 = vadd.f32 %v9150_v32, %v1481_v51  ;;  %v12141_v41 = vld [vmem:[#allocation57_spill] sm:$0xff] }
 0x212   : > { %v1396_v25 = vpop.f32.mrf.mxu0  ;;  %v2184_v1 = vmax.f32 %v2176_v17, %v2120_v11  ;;  %v3243_v17 = vrot.slane %v8104_v23, %v12145_v44  ;;  %v12165_v11 = vld [vmem:[#allocation64_spill] sm:$0xff] }
 0x213   : > { %v9531_v19 = vmax.f32 %v2188_v50, %v2132_v52  ;;  %v1629_v48 = vmax.f32 %v1557_v56, 0.0  ;;  %v1482_v28 = vmul.f32 %v9141_v43, %v1396_v25  ;;  %v2127_v50 = vmul.f32 %v12139_v35, %v1623_v30  ;;  %v12162_v30 = vld [vmem:[#allocation60_spill] sm:$0xff] }
 0x214   : > { %v1398_v37 = vpop.f32.mrf.mxu0  ;;  %v2192_v27 = vmax.f32 %v2184_v1, %v2128_v12  ;;  %3245 = vrot.lane.b32.xlu0 %v3243_v17, %s11990_s23 }
 0x215   : > { %v1558_v42 = vadd.f32 %v9150_v32, %v1482_v28  ;;  %v2204_v60 = vpack.c.bf16 %v9531_v19, %v9529_v15  ;;  %v2133_v63 = vmul.f32 %v12134_v2, %v1629_v48 }
 0x216   : > { %v1401_v16 = vpop.f32.mrf.mxu0 }
 0x217   : > { %v1630_v54 = vmax.f32 %v1558_v42, 0.0  ;;  %v1483_v49 = vmul.f32 %v9141_v43, %v1401_v16  ;;  %7702 = vmatmul.mubr.msk.bf16.vlgmr.msra.gmra.mxu1 %vm2207_vm4, %v2204_v60  ;;  %v9551_v18 = vmax.f32 %v2189_v24, %v2133_v63  ;;  %v12160_v63 = vld [vmem:[#allocation65_spill] sm:$0xff] }
 0x218   : > { %v1403_v5 = vpop.f32.mrf.mxu0 }
 0x219   : > { %v2134_v22 = vmul.f32 %v12135_v0, %v1630_v54  ;;  %v1559_v57 = vadd.f32 %v9150_v32, %v1483_v49  ;;  %12137 = vst [vmem:[#allocation27_spill] sm:$0xff] %v9551_v18  ;;  %v12163_v0 = vld [vmem:[#allocation82_spill] sm:$0xff] }
 0x21a   : > { %v1404_v33 = vpop.f32.mrf.mxu0 }
 0x21b   : > { %v9553_v39 = vmax.f32 %v2190_v4, %v2134_v22  ;;  %v1631_v14 = vmax.f32 %v1559_v57, 0.0  ;;  %v1484_v51 = vmul.f32 %v9141_v43, %v1404_v33  ;;  %v2191_v43 = vmax.f32 %v9462_v3, %v2127_v50  ;;  %v9580_v3 = vpop.permute.xlu0 %2438 }
 0x21c   : > { %v1406_v61 = vpop.f32.mrf.mxu0  ;;  %12146 = vst [vmem:[#allocation10_spill] sm:$0xff] %v9580_v3 }
 0x21d   : > { %12138 = vst [vmem:[#allocation75_spill] sm:$0xff] %v9553_v39  ;;  %v1560_v38 = vadd.f32 %v9150_v32, %v1484_v51  ;;  %v2205_v55 = vpack.c.bf16 %v9553_v39, %v9551_v18  ;;  %v2135_v52 = vmul.f32 %v12141_v41, %v1631_v14  ;;  %v12166_v14 = vld [vmem:[#allocation58_spill] sm:$0xff] }
 0x21f   : > { %v1632_v56 = vmax.f32 %v1560_v38, 0.0  ;;  %7705 = vmatprep.mubr.msk.bf16.mxu1 %vm2207_vm4, %v2205_v55  ;;  %v9568_v25 = vmax.f32 %v2191_v43, %v2135_v52  ;;  %v9582_v28 = vpop.permute.xlu0 %2525  ;;  %v12169_v43 = vld [vmem:[#allocation59_spill] sm:$0xff] }
 0x220   : > { %12147 = vst [vmem:[#allocation87_spill] sm:$0xff] %v9582_v28 }
 0x221   : > { %v2136_v26 = vmul.f32 %v12142_v8, %v1632_v56  ;;  %12143 = vst [vmem:[#allocation12_spill] sm:$0xff] %v9568_v25 }
 0x223   : > { %v9570_v32 = vmax.f32 %v2192_v27, %v2136_v26  ;;  %v9584_v46 = vpop.permute.xlu0 %2535 }
 0x224   : > { %12148 = vst [vmem:[#allocation11_spill] sm:$0xff] %v9584_v46 }
 0x225   : > { %12144 = vst [vmem:[#allocation77_spill] sm:$0xff] %v9570_v32  ;;  %v2206_v48 = vpack.c.bf16 %v9570_v32, %v9568_v25 }
 0x227   : > { %7706 = vmatmul.mubr.msk.bf16.gmra.mxu1 %vm2207_vm4, %v2206_v48  ;;  %v9586_v9 = vpop.permute.xlu0 %2665 }
 0x228   : > { %12149 = vst [vmem:[#allocation35_spill] sm:$0xff] %v9586_v9 }
 0x22b   : > { %v9588_v6 = vpop.permute.xlu0 %2675 }
 0x22c   : > { %12150 = vst [vmem:[#allocation23_spill] sm:$0xff] %v9588_v6 }
 0x22f   : > { %v9590_v59 = vpop.permute.xlu0 %2319 }
 0x230   : > { %12151 = vst [vmem:[#allocation26_spill] sm:$0xff] %v9590_v59 }
 0x233   : > { %v9592_v37 = vpop.permute.xlu0 %2788 }
 0x234   : > { %12152 = vst [vmem:[#allocation17_spill] sm:$0xff] %v9592_v37 }
 0x237   : > { %v9594_v36 = vpop.permute.xlu0 %2329 }
 0x238   : > { %12153 = vst [vmem:[#allocation34_spill] sm:$0xff] %v9594_v36 }
 0x23b   : > { %v9596_v7 = vpop.permute.xlu0 %2798 }
 0x23c   : > { %12154 = vst [vmem:[#allocation15_spill] sm:$0xff] %v9596_v7 }
 0x23f   : > { %v9598_v42 = vpop.permute.xlu0 %2448 }
 0x240   : > { %12155 = vst [vmem:[#allocation16_spill] sm:$0xff] %v9598_v42 }
 0x243   : > { %v9600_v60 = vpop.permute.xlu0 %2910 }
 0x244   : > { %12156 = vst [vmem:[#allocation31_spill] sm:$0xff] %v9600_v60 }
 0x247   : > { %v9602_v13 = vpop.permute.xlu0 %2458 }
 0x248   : > { %12157 = vst [vmem:[#allocation22_spill] sm:$0xff] %v9602_v13 }
 0x24b   : > { %v9604_v45 = vpop.permute.xlu0 %2920 }
 0x24c   : > { %12158 = vst [vmem:[#allocation39_spill] sm:$0xff] %v9604_v45 }
 0x24f   : > { %v9606_v16 = vpop.permute.xlu0 %2545 }
 0x250   : > { %12159 = vst [vmem:[#allocation30_spill] sm:$0xff] %v9606_v16 }
 0x253   : > { %v9614_v24 = vpop.permute.xlu0 %3032 }
 0x254   : > { %12161 = vst [vmem:[#allocation14_spill] sm:$0xff] %v9614_v24 }
 0x257   : > { %v9627_v47 = vpop.permute.xlu0 %2555 }
 0x258   : > { %12164 = vst [vmem:[#allocation38_spill] sm:$0xff] %v9627_v47 }
 0x25b   : > { %v9644_v38 = vpop.permute.xlu0 %3042 }
 0x25c   : > { %12167 = vst [vmem:[#allocation13_spill] sm:$0xff] %v9644_v38 }
 0x25f   : > { %v9655_v52 = vpop.permute.xlu0 %2685 }
 0x260   : > { %12168 = vst [vmem:[#allocation19_spill] sm:$0xff] %v9655_v52 }
 0x263   : > { %v9664_v26 = vpop.permute.xlu0 %3129 }
 0x264   : > { %12170 = vst [vmem:[#allocation18_spill] sm:$0xff] %v9664_v26 }
 0x2d7   : > { %v9608_v2 = vpop.f32.mrf.mxu1 }
 0x2d8   : > { %v2469_v54 = vmul.f32 %v9608_v2, %v12160_v63  ;;  %v3071_v22 = vmul.f32 %v9608_v2, %v12163_v0  ;;  %v2570_v50 = vrot.slane %v9608_v2, 1  ;;  %v2351_v1 = vrot.slane %v9608_v2, 7  ;;  %v12202_v63 = vld [vmem:[#allocation83_spill] sm:$0xff] }
 0x2d9   : > { %v9612_v49 = vpop.f32.mrf.mxu1 }
 0x2da   : > { %v2566_v4 = vrot.slane %v9612_v49, 1  ;;  %2488 = vrot.lane.b32.xlu1 %v2469_v54, %s8172_s30  ;;  %v2347_v5 = vrot.slane %v9612_v49, 7  ;;  %v2467_v33 = vmul.f32 %v12165_v11, %v9612_v49 }
 0x2db   : > { %v9624_v57 = vpop.f32.mrf.mxu1 }
 0x2dc   : > { %v2567_v34 = vsel %vm2564_vm5, %v12162_v30, %v2566_v4  ;;  %v2348_v51 = vsel %vm1080_vm1, %v12166_v14, %v2347_v5  ;;  %v11880_v61 = vrot.slane %v9624_v57, 1  ;;  %v2470_v35 = vmul.f32 %v9624_v57, %v9598_v42 }
 0x2dd   : > { %2582 = vrot.lane.b32.xlu0 %v2567_v34, %s8174_s16  ;;  %v11879_v12 = vrot.slane %v9624_v57, 7  ;;  %v3072_v55 = vmul.f32 %v9624_v57, %v9644_v38  ;;  %v9658_v56 = vpop.f32.mrf.mxu1  ;;  %v2370_v27 = vmul.f32 %v2348_v51, %v12169_v43  ;;  %v9675_v34 = vpop.permute.xlu0 %2695 }
 0x2de   : > { %3088 = vrot.lane.b32.xlu1 %v3071_v22, %s8173_s26  ;;  %v2573_v58 = vsel %vm2564_vm5, %v2570_v50, %v11880_v61  ;;  %v2568_v8 = vrot.slane %v9658_v56, 1  ;;  %v2468_v48 = vmul.f32 %v9580_v3, %v9658_v56  ;;  %v2349_v17 = vrot.slane %v9658_v56, 7  ;;  %12171 = vst [vmem:[#allocation43_spill] sm:$0xff] %v9675_v34 }
 0x2df   : > { %v2354_v41 = vsel %vm1080_vm1, %v2351_v1, %v11879_v12  ;;  %v3070_v54 = vmul.f32 %v9614_v24, %v9658_v56  ;;  %v12180_v12 = vld [vmem:[#allocation84_spill] sm:$0xff] }
 0x2e0   : > { %v2569_v23 = vsel %vm2564_vm5, %v2566_v4, %v2568_v8  ;;  %v2350_v22 = vsel %vm1080_vm1, %v2347_v5, %v2349_v17 }
 0x2e1   : > { %2705 = vrot.lane.b32.xlu0 %v2348_v51, %s8173_s26  ;;  %v9682_v4 = vpop.permute.xlu0 %3139  ;;  %v2352_v51 = vsel %vm1080_vm1, %v2349_v17, %v2351_v1 }
 0x2e2   : > { %2484 = vrot.lane.b32.xlu1 %v2467_v33, %s8172_s30  ;;  %v2571_v33 = vsel %vm2564_vm5, %v2568_v8, %v2570_v50  ;;  %12172 = vst [vmem:[#allocation42_spill] sm:$0xff] %v9682_v4  ;;  %v12175_v50 = vld [vmem:[#allocation78_spill] sm:$0xff] }
 0x2e5   : > { %2490 = vrot.lane.b32.xlu0 %v2470_v35, %s8172_s30  ;;  %v9688_v35 = vpop.permute.xlu0 %2808 }
 0x2e6   : > { %2588 = vrot.lane.b32.xlu1 %v2573_v58, %s8174_s16  ;;  %12173 = vst [vmem:[#allocation45_spill] sm:$0xff] %v9688_v35 }
 0x2e9   : > { %3090 = vrot.lane.b32.xlu0 %v3072_v55, %s8173_s26  ;;  %v9691_v55 = vpop.f32.mrf.mxu1  ;;  %v9698_v1 = vpop.permute.xlu0 %2818 }
 0x2ea   : > { %2711 = vrot.lane.b32.xlu1 %v2354_v41, %s8173_s26  ;;  %12176 = vst [vmem:[#allocation44_spill] sm:$0xff] %v9698_v1  ;;  %v3075_v8 = vmul.f32 %v9691_v55, %v9331_v62 }
 0x2ed   : > { %2831 = vrot.lane.b32.xlu0 %v2573_v58, %s8175_s18  ;;  %v9708_v17 = vpop.permute.xlu0 %2930 }
 0x2ee   : > { %3170 = vrot.lane.b32.xlu1 %v2573_v58, %s11988_s17  ;;  %v12174_v58 = vld [vmem:[#allocation62_spill] sm:$0xff]  ;;  %12177 = vst [vmem:[#allocation21_spill] sm:$0xff] %v9708_v17 }
 0x2ef   : > { %v2372_v5 = vmul.f32 %v2352_v51, %v12174_v58 }
 0x2f1   : > { %2953 = vrot.lane.b32.xlu0 %v2354_v41, %s11992_s25 }
 0x2f2   : > { %2387 = vrot.lane.b32.xlu1 %v2370_v27, %s11990_s23  ;;  %v2473_v27 = vmul.f32 %v9691_v55, %v12175_v50  ;;  %v12187_v50 = vld [vmem:[#allocation70_spill] sm:$0xff] }
 0x2f5   : > { %2486 = vrot.lane.b32.xlu0 %v2468_v48, %s8172_s30  ;;  %v9703_v48 = vpop.f32.mrf.mxu1 }
 0x2f6   : > { %2584 = vrot.lane.b32.xlu1 %v2569_v23, %s8174_s16  ;;  %v3073_v61 = vmul.f32 %v12180_v12, %v9703_v48 }
 0x2f9   : > { %3086 = vrot.lane.b32.xlu0 %v3070_v54, %s8173_s26  ;;  %v12178_v54 = vld [vmem:[#allocation74_spill] sm:$0xff] }
 0x2fa   : > { %2707 = vrot.lane.b32.xlu1 %v2350_v22, %s8173_s26 }
 0x2fd   : > { %2586 = vrot.lane.b32.xlu0 %v2571_v33, %s8174_s16 }
 0x2fe   : > { %2829 = vrot.lane.b32.xlu1 %v2571_v33, %s8175_s18 }
 0x301   : > { %2709 = vrot.lane.b32.xlu0 %v2352_v51, %s8173_s26 }
 0x302   : > { %2951 = vrot.lane.b32.xlu1 %v2352_v51, %s11992_s25  ;;  %v2471_v51 = vmul.f32 %v12178_v54, %v9703_v48  ;;  %v2359_v54 = vrot.slane %v9691_v55, 7 }
 0x305   : > { %2827 = vrot.lane.b32.xlu0 %v2569_v23, %s8175_s18  ;;  %v2373_v23 = vmul.f32 %v2354_v41, %v9590_v59  ;;  %v12182_v41 = vrot.slane %v9624_v57, 1 }
 0x306   : > { %2391 = vrot.lane.b32.xlu1 %v2372_v5, %s11990_s23  ;;  %v12179_v5 = vld [vmem:[#allocation63_spill] sm:$0xff] }
 0x309   : > { %2949 = vrot.lane.b32.xlu0 %v2350_v22, %s11992_s25 }
 0x30a   : > { %2496 = vrot.lane.b32.xlu1 %v2473_v27, %s8172_s30  ;;  %v2371_v27 = vmul.f32 %v2350_v22, %v12179_v5  ;;  %v9727_v22 = vpop.f32.mrf.mxu1 }
 0x30b   : > { %v2703_v25 = vrot.slane %v9727_v22, 7 }
 0x30c   : > { %v9759_v58 = vpop.f32.mrf.mxu1 }
 0x30d   : > { %3168 = vrot.lane.b32.xlu0 %v2571_v33, %s11988_s17  ;;  %v2574_v33 = vrot.slane %v9703_v48, 1  ;;  %v2704_v62 = vsel %vm1080_vm1, %v2359_v54, %v2703_v25 }
 0x30e   : > { %3096 = vrot.lane.b32.xlu1 %v3075_v8, %s8173_s26  ;;  %v9719_v8 = vpop.permute.xlu0 %2940 }
 0x30f   : > { %12181 = vst [vmem:[#allocation25_spill] sm:$0xff] %v9719_v8  ;;  %v2575_v32 = vsel %vm2564_vm5, %v12182_v41, %v2574_v33  ;;  %v2578_v41 = vrot.slane %v9691_v55, 1 }
 0x311   : > { %2393 = vrot.lane.b32.xlu0 %v2373_v23, %s11990_s23  ;;  %v2355_v23 = vrot.slane %v9703_v48, 7 }
 0x312   : > { %2492 = vrot.lane.b32.xlu1 %v2471_v51, %s8172_s30  ;;  %v9730_v51 = vpop.permute.xlu0 %3052 }
 0x313   : > { %12183 = vst [vmem:[#allocation47_spill] sm:$0xff] %v9730_v51 }
 0x315   : > { %2389 = vrot.lane.b32.xlu0 %v2371_v27, %s11990_s23  ;;  %v12184_v27 = vrot.slane %v9624_v57, 7 }
 0x316   : > { %3092 = vrot.lane.b32.xlu1 %v3073_v61, %s8173_s26  ;;  %v2580_v61 = vrot.slane %v9727_v22, 1  ;;  %v9742_v12 = vpop.permute.xlu0 %3062 }
 0x317   : > { %v2356_v39 = vsel %vm1080_vm1, %v12184_v27, %v2355_v23  ;;  %12185 = vst [vmem:[#allocation49_spill] sm:$0xff] %v9742_v12  ;;  %v3076_v27 = vmul.f32 %v9727_v22, %v9742_v12  ;;  %v2948_v12 = vsel %vm1080_vm1, %v2703_v25, %v12166_v14  ;;  %v3074_v25 = vmul.f32 %v9730_v51, %v9759_v58 }
 0x318   : > { %v2581_v18 = vsel %vm2564_vm5, %v2578_v41, %v2580_v61  ;;  %v2374_v59 = vmul.f32 %v2356_v39, %v12187_v50 }
 0x319   : > { %2590 = vrot.lane.b32.xlu0 %v2575_v32, %s8174_s16 }
 0x31a   : > { %2833 = vrot.lane.b32.xlu1 %v2575_v32, %s8175_s18  ;;  %v9768_v5 = vpop.permute.xlu0 %3149 }
 0x31b   : > { %12188 = vst [vmem:[#allocation29_spill] sm:$0xff] %v9768_v5 }
 0x31d   : > { %2713 = vrot.lane.b32.xlu0 %v2356_v39, %s8173_s26 }
 0x31e   : > { %2955 = vrot.lane.b32.xlu1 %v2356_v39, %s11992_s25  ;;  %v9781_v39 = vpop.permute.xlu0 %3159 }
 0x31f   : > { %12189 = vst [vmem:[#allocation28_spill] sm:$0xff] %v9781_v39 }
 0x321   : > { %3172 = vrot.lane.b32.xlu0 %v2575_v32, %s11988_s17  ;;  %v2826_v32 = vsel %vm2564_vm5, %v2580_v61, %v12162_v30  ;;  %v2472_v61 = vmul.f32 %v9602_v13, %v9759_v58 }
 0x322   : > { %2596 = vrot.lane.b32.xlu1 %v2581_v18, %s8174_s16  ;;  %v9789_v51 = vpop.permute.xlu0 %2385 }
 0x323   : > { %12190 = vst [vmem:[#allocation37_spill] sm:$0xff] %v9789_v51 }
 0x325   : > { %3098 = vrot.lane.b32.xlu0 %v3076_v27, %s8173_s26  ;;  %v9762_v27 = vpop.permute.xlu1 %3154 }
 0x326   : > { %2719 = vrot.lane.b32.xlu1 %v2704_v62, %s8173_s26  ;;  %12186 = vst [vmem:[#allocation20_spill] sm:$0xff] %v9762_v27  ;;  %v9796_v50 = vpop.permute.xlu0 %2482 }
 0x327   : > { %12191 = vst [vmem:[#allocation36_spill] sm:$0xff] %v9796_v50 }
 0x329   : > { %2839 = vrot.lane.b32.xlu0 %v2581_v18, %s8175_s18 }
 0x32a   : > { %2841 = vrot.lane.b32.xlu1 %v2826_v32, %s8175_s18 }
 0x32d   : > { %2961 = vrot.lane.b32.xlu0 %v2704_v62, %s11992_s25  ;;  %v2576_v62 = vrot.slane %v9759_v58, 1 }
 0x32e   : > { %2963 = vrot.lane.b32.xlu1 %v2948_v12, %s11992_s25  ;;  %v9775_v12 = vpop.permute.xlu1 %3164 }
 0x331   : > { %3180 = vrot.lane.b32.xlu0 %v2826_v32, %s11988_s17  ;;  %v2357_v32 = vrot.slane %v9759_v58, 7 }
 0x332   : > { %3178 = vrot.lane.b32.xlu1 %v2581_v18, %s11988_s17  ;;  %v2577_v18 = vsel %vm2564_vm5, %v2574_v33, %v2576_v62  ;;  %v9786_v13 = vpop.permute.xlu1 %3182 }
 0x333   : > { %v2360_v33 = vsel %vm1080_vm1, %v2357_v32, %v2359_v54  ;;  %v12192_v54 = vld [vmem:[#allocation72_spill] sm:$0xff] }
 0x335   : > { %2494 = vrot.lane.b32.xlu0 %v2472_v61, %s8172_s30  ;;  %v2579_v61 = vsel %vm2564_vm5, %v2576_v62, %v2578_v41  ;;  %v9803_v41 = vpop.permute.xlu0 %3245  ;;  %v2376_v62 = vmul.f32 %v2360_v33, %v12192_v54 }
 0x336   : > { %2395 = vrot.lane.b32.xlu1 %v2374_v59, %s11990_s23  ;;  %v2358_v59 = vsel %vm1080_vm1, %v2355_v23, %v2357_v32 }
 0x339   : > { %3094 = vrot.lane.b32.xlu0 %v3074_v25, %s8173_s26  ;;  %v9793_v25 = vpop.permute.xlu1 %3261 }
 0x33a   : > { %2592 = vrot.lane.b32.xlu1 %v2577_v18, %s8174_s16 }
 0x33d   : > { %2594 = vrot.lane.b32.xlu0 %v2579_v61, %s8174_s16  ;;  %v9800_v23 = vpop.permute.xlu1 %3100 }
 0x33e   : > { %2715 = vrot.lane.b32.xlu1 %v2358_v59, %s8173_s26 }
 0x341   : > { %2717 = vrot.lane.b32.xlu0 %v2360_v33, %s8173_s26 }
 0x342   : > { %3174 = vrot.lane.b32.xlu1 %v2577_v18, %s11988_s17 }
 0x345   : > { %2835 = vrot.lane.b32.xlu0 %v2577_v18, %s8175_s18  ;;  %v2375_v18 = vmul.f32 %v2358_v59, %v9594_v36 }
 0x346   : > { %2837 = vrot.lane.b32.xlu1 %v2579_v61, %s8175_s18 }
 0x349   : > { %2957 = vrot.lane.b32.xlu0 %v2358_v59, %s11992_s25 }
 0x34a   : > { %2959 = vrot.lane.b32.xlu1 %v2360_v33, %s11992_s25 }
 0x34c   : > { %v9807_v32 = vpop.permute.xlu1 %2488 }
 0x34d   : > { %3176 = vrot.lane.b32.xlu0 %v2579_v61, %s11988_s17 }
 0x34e   : > { %2399 = vrot.lane.b32.xlu1 %v2376_v62, %s11990_s23  ;;  %v12193_v62 = vld [vmem:[#allocation67_spill] sm:$0xff] }
 0x34f   : > { %v2583_v24 = vpop.permute.xlu0 %2582 }
 0x350   : > { %v9812_v3 = vpop.permute.xlu1 %3088  ;;  %v2606_v43 = vmul.f32 %v2583_v24, %v9582_v28  ;;  %v12194_v24 = vld [vmem:[#allocation69_spill] sm:$0xff] }
 0x351   : > { %2397 = vrot.lane.b32.xlu0 %v2375_v18, %s11990_s23 }
 0x353   : > { %v2706_v14 = vpop.permute.xlu0 %2705 }
 0x354   : > { %v9816_v30 = vpop.permute.xlu1 %2484  ;;  %v2729_v33 = vmul.f32 %v2706_v14, %v9586_v9  ;;  %v12195_v9 = vld [vmem:[#allocation88_spill] sm:$0xff] }
 0x355   : > { %2622 = vrot.lane.b32.xlu0 %v2606_v43, %s11990_s23 }
 0x357   : > { %v9820_v54 = vpop.permute.xlu0 %2490 }
 0x358   : > { %v2589_v61 = vpop.permute.xlu1 %2588 }
 0x359   : > { %v2609_v38 = vmul.f32 %v2589_v61, %v12193_v62  ;;  %2745 = vrot.lane.b32.xlu0 %v2729_v33, %s11990_s23 }
 0x35b   : > { %v9824_v59 = vpop.permute.xlu0 %3090  ;;  %2628 = vrot.lane.b32.xlu1 %v2609_v38, %s11990_s23 }
 0x35c   : > { %v2712_v18 = vpop.permute.xlu1 %2711 }
 0x35d   : > { %v2732_v28 = vmul.f32 %v2712_v18, %v12194_v24 }
 0x35f   : > { %v2832_v36 = vpop.permute.xlu0 %2831  ;;  %2751 = vrot.lane.b32.xlu1 %v2732_v28, %s11990_s23  ;;  %v12196_v28 = vld [vmem:[#allocation66_spill] sm:$0xff] }
 0x360   : > { %v2853_v43 = vmul.f32 %v2832_v36, %v9596_v7  ;;  %v3171_v14 = vpop.permute.xlu1 %3170 }
 0x361   : > { %v3193_v11 = vmul.f32 %v3171_v14, %v12195_v9 }
 0x362   : > { %2871 = vrot.lane.b32.xlu0 %v2853_v43, %s11990_s23  ;;  %v12197_v43 = vld [vmem:[#allocation68_spill] sm:$0xff] }
 0x363   : > { %v2954_v61 = vpop.permute.xlu0 %2953  ;;  %3210 = vrot.lane.b32.xlu1 %v3193_v11, %s11990_s23 }
 0x364   : > { %v2975_v33 = vmul.f32 %v2954_v61, %v9604_v45  ;;  %v9834_v62 = vpop.permute.xlu1 %2387  ;;  %v12198_v45 = vld [vmem:[#allocation71_spill] sm:$0xff] }
 0x366   : > { %2993 = vrot.lane.b32.xlu0 %v2975_v33, %s11990_s23 }
 0x367   : > { %v9837_v38 = vpop.permute.xlu0 %2486 }
 0x368   : > { %v2585_v18 = vpop.permute.xlu1 %2584 }
 0x369   : > { %v2607_v24 = vmul.f32 %v2585_v18, %v12196_v28 }
 0x36b   : > { %v9840_v36 = vpop.permute.xlu0 %3086  ;;  %2624 = vrot.lane.b32.xlu1 %v2607_v24, %s11990_s23  ;;  %v12199_v24 = vld [vmem:[#allocation76_spill] sm:$0xff] }
 0x36c   : > { %v2708_v14 = vpop.permute.xlu1 %2707 }
 0x36d   : > { %v2730_v7 = vmul.f32 %v2708_v14, %v12197_v43 }
 0x36f   : > { %v2587_v9 = vpop.permute.xlu0 %2586  ;;  %2747 = vrot.lane.b32.xlu1 %v2730_v7, %s11990_s23 }
 0x370   : > { %v2608_v11 = vmul.f32 %v2587_v9, %v9584_v46  ;;  %v2830_v61 = vpop.permute.xlu1 %2829 }
 0x371   : > { %v2852_v33 = vmul.f32 %v2830_v61, %v12198_v45 }
 0x372   : > { %2626 = vrot.lane.b32.xlu0 %v2608_v11, %s11990_s23 }
 0x373   : > { %v2710_v42 = vpop.permute.xlu0 %2709  ;;  %2869 = vrot.lane.b32.xlu1 %v2852_v33, %s11990_s23 }
 0x374   : > { %v2731_v18 = vmul.f32 %v2710_v42, %v9588_v6  ;;  %v2952_v28 = vpop.permute.xlu1 %2951 }
 0x375   : > { %v2974_v0 = vmul.f32 %v2952_v28, %v12199_v24 }
 0x376   : > { %2749 = vrot.lane.b32.xlu0 %v2731_v18, %s11990_s23 }
 0x377   : > { %v2828_v14 = vpop.permute.xlu0 %2827  ;;  %2991 = vrot.lane.b32.xlu1 %v2974_v0, %s11990_s23 }
 0x378   : > { %v2851_v9 = vmul.f32 %v2828_v14, %v9592_v37  ;;  %v9854_v7 = vpop.permute.xlu1 %2391  ;;  %v12201_v37 = vld [vmem:[#allocation79_spill] sm:$0xff] }
 0x37a   : > { %2867 = vrot.lane.b32.xlu0 %v2851_v9, %s11990_s23 }
 0x37b   : > { %v2950_v11 = vpop.permute.xlu0 %2949 }
 0x37c   : > { %v2973_v61 = vmul.f32 %v2950_v11, %v9600_v60  ;;  %v9858_v33 = vpop.permute.xlu1 %2496 }
 0x37e   : > { %2989 = vrot.lane.b32.xlu0 %v2973_v61, %s11990_s23  ;;  %v12200_v61 = vld [vmem:[#allocation73_spill] sm:$0xff] }
 0x37f   : > { %v3169_v42 = vpop.permute.xlu0 %3168 }
 0x380   : > { %v3192_v28 = vmul.f32 %v3169_v42, %v9664_v26  ;;  %v9862_v18 = vpop.permute.xlu1 %3096 }
 0x382   : > { %3208 = vrot.lane.b32.xlu0 %v3192_v28, %s11990_s23 }
 0x383   : > { %v9865_v0 = vpop.permute.xlu0 %2393 }
 0x384   : > { %v9867_v14 = vpop.permute.xlu1 %2492 }
 0x387   : > { %v9869_v24 = vpop.permute.xlu0 %2389 }
 0x388   : > { %v9871_v9 = vpop.permute.xlu1 %3092 }
 0x38b   : > { %v2591_v11 = vpop.permute.xlu0 %2590 }
 0x38c   : > { %v2610_v45 = vmul.f32 %v2591_v11, %v9606_v16  ;;  %v2834_v60 = vpop.permute.xlu1 %2833 }
 0x38d   : > { %v2854_v43 = vmul.f32 %v2834_v60, %v12200_v61 }
 0x38e   : > { %2630 = vrot.lane.b32.xlu0 %v2610_v45, %s11990_s23 }
 0x38f   : > { %v2714_v42 = vpop.permute.xlu0 %2713  ;;  %2873 = vrot.lane.b32.xlu1 %v2854_v43, %s11990_s23 }
 0x390   : > { %v2733_v28 = vmul.f32 %v2714_v42, %v9655_v52  ;;  %v2956_v26 = vpop.permute.xlu1 %2955  ;;  %v12203_v42 = vld [vmem:[#allocation89_spill] sm:$0xff] }
 0x391   : > { %v2976_v6 = vmul.f32 %v2956_v26, %v12201_v37 }
 0x392   : > { %2753 = vrot.lane.b32.xlu0 %v2733_v28, %s11990_s23 }
 0x393   : > { %v3173_v46 = vpop.permute.xlu0 %3172  ;;  %2995 = vrot.lane.b32.xlu1 %v2976_v6, %s11990_s23 }
 0x394   : > { %v3194_v11 = vmul.f32 %v3173_v46, %v9682_v4  ;;  %v2597_v16 = vpop.permute.xlu1 %2596 }
 0x395   : > { %v2613_v60 = vmul.f32 %v2597_v16, %v12202_v63 }
 0x396   : > { %3212 = vrot.lane.b32.xlu0 %v3194_v11, %s11990_s23 }
 0x397   : > { %v9884_v45 = vpop.permute.xlu0 %3098  ;;  %2636 = vrot.lane.b32.xlu1 %v2613_v60, %s11990_s23 }
 0x398   : > { %v2720_v43 = vpop.permute.xlu1 %2719 }
 0x399   : > { %v2736_v52 = vmul.f32 %v2720_v43, %v12203_v42 }
 0x39b   : > { %v2840_v26 = vpop.permute.xlu0 %2839  ;;  %2759 = vrot.lane.b32.xlu1 %v2736_v52, %s11990_s23 }
 0x39c   : > { %v2857_v28 = vmul.f32 %v2840_v26, %v9698_v1  ;;  %v2842_v6 = vpop.permute.xlu1 %2841  ;;  %v12204_v1 = vld [vmem:[#allocation80_spill] sm:$0xff] }
 0x39d   : > { %v2858_v46 = vmul.f32 %v2842_v6, %v9280_v20 }
 0x39f   : > { %v2962_v4 = vpop.permute.xlu0 %2961  ;;  %2879 = vrot.lane.b32.xlu1 %v2857_v28, %s11990_s23  ;;  %2881 = vrot.lane.b32.xlu0 %v2858_v46, %s11990_s23 }
 0x3a0   : > { %v2979_v16 = vmul.f32 %v2962_v4, %v9719_v8  ;;  %v2964_v11 = vpop.permute.xlu1 %2963  ;;  %v12205_v8 = vld [vmem:[#allocation86_spill] sm:$0xff] }
 0x3a1   : > { %v2980_v60 = vmul.f32 %v2964_v11, %v9314_v29 }
 0x3a3   : > { %v3181_v63 = vpop.permute.xlu0 %3180  ;;  %3003 = vrot.lane.b32.xlu1 %v2980_v60, %s11990_s23  ;;  %3001 = vrot.lane.b32.xlu0 %v2979_v16, %s11990_s23 }
 0x3a4   : > { %v3179_v52 = vpop.permute.xlu1 %3178 }
 0x3a7   : > { %v9897_v43 = vpop.permute.xlu0 %2494 }
 0x3a8   : > { %v9899_v26 = vpop.permute.xlu1 %2395 }
 0x3ab   : > { %v9901_v6 = vpop.permute.xlu0 %3094 }
 0x3ac   : > { %v2593_v28 = vpop.permute.xlu1 %2592 }
 0x3ad   : > { %v2611_v46 = vmul.f32 %v2593_v28, %v12204_v1 }
 0x3af   : > { %v2595_v20 = vpop.permute.xlu0 %2594  ;;  %2632 = vrot.lane.b32.xlu1 %v2611_v46, %s11990_s23 }
 0x3b0   : > { %v2612_v4 = vmul.f32 %v2595_v20, %v9627_v47  ;;  %v2716_v11 = vpop.permute.xlu1 %2715 }
 0x3b1   : > { %v2734_v60 = vmul.f32 %v2716_v11, %v12205_v8 }
 0x3b2   : > { %2634 = vrot.lane.b32.xlu0 %v2612_v4, %s11990_s23 }
 0x3b3   : > { %v2718_v16 = vpop.permute.xlu0 %2717  ;;  %2755 = vrot.lane.b32.xlu1 %v2734_v60, %s11990_s23 }
 0x3b4   : > { %v2735_v29 = vmul.f32 %v2718_v16, %v9675_v34  ;;  %v3175_v42 = vpop.permute.xlu1 %3174 }
 0x3b5   : > { %v3195_v37 = vmul.f32 %v3175_v42, %v9231_v21 }
 0x3b6   : > { %2757 = vrot.lane.b32.xlu0 %v2735_v29, %s11990_s23 }
 0x3b7   : > { %v2836_v28 = vpop.permute.xlu0 %2835  ;;  %3214 = vrot.lane.b32.xlu1 %v3195_v37, %s11990_s23  ;;  %v3197_v37 = vmul.f32 %v3179_v52, %v9762_v27 }
 0x3b8   : > { %v2855_v20 = vmul.f32 %v2836_v28, %v9688_v35  ;;  %v2838_v46 = vpop.permute.xlu1 %2837  ;;  %v3199_v28 = vmul.f32 %v9786_v13, %v9775_v12  ;;  %v2410_v13 = vadd.f32 %v9834_v62, %v9658_v56 }
 0x3b9   : > { %v2856_v11 = vmul.f32 %v2838_v46, %v9254_v40 }
 0x3ba   : > { %2875 = vrot.lane.b32.xlu0 %v2855_v20, %s11990_s23  ;;  %v3198_v20 = vmul.f32 %v3181_v63, %v9781_v39 }
 0x3bb   : > { %v2958_v4 = vpop.permute.xlu0 %2957  ;;  %2877 = vrot.lane.b32.xlu1 %v2856_v11, %s11990_s23 }
 0x3bc   : > { %v2977_v60 = vmul.f32 %v2958_v4, %v9708_v17  ;;  %v2960_v16 = vpop.permute.xlu1 %2959 }
 0x3bd   : > { %v2978_v42 = vmul.f32 %v2960_v16, %v9298_v31 }
 0x3bf   : > { %v3177_v21 = vpop.permute.xlu0 %3176  ;;  %2997 = vrot.lane.b32.xlu1 %v2977_v60, %s11990_s23  ;;  %2999 = vrot.lane.b32.xlu0 %v2978_v42, %s11990_s23 }
 0x3c0   : > { %v3196_v29 = vmul.f32 %v3177_v21, %v9768_v5  ;;  %v9930_v46 = vpop.permute.xlu1 %2399  ;;  %v2409_v5 = vadd.f32 %v9789_v51, %v9612_v49  ;;  %v7508_v49 = vld [vmem:[%s11827_s5 + $0x4] sm:$0xf] }
 0x3c1   : > { %7908 = vmatprep.subr.msk.bf16.mxu1 %vm2220_vm3, %v7508_v49 }
 0x3c2   : > { %v2506_v40 = vadd.f32 %v9796_v50, %v2409_v5 }
 0x3c3   : > { %3218 = vrot.lane.b32.xlu1 %v3197_v37, %s11990_s23  ;;  %3216 = vrot.lane.b32.xlu0 %v3196_v29, %s11990_s23  ;;  %v9932_v11 = vpop.permute.xlu0 %2397  ;;  %v2507_v37 = vadd.f32 %v9816_v30, %v2410_v13 }
 0x3c7   : > { %3222 = vrot.lane.b32.xlu1 %v3199_v28, %s11990_s23  ;;  %3220 = vrot.lane.b32.xlu0 %v3198_v20, %s11990_s23  ;;  %v2623_v52 = vpop.permute.xlu0 %2622 }
 0x3c8   : > { %v2646_v34 = vadd.f32 %v2623_v52, %v2506_v40  ;;  %v3313_v40 = vsel %vm2220_vm3, %v7508_v49, 0  ;;  %v2412_v49 = vadd.f32 %v9624_v57, %v9854_v7 }
 0x3c9   : > { %7710 = vmatpush3.bf16.msra.mxu1 %v3313_v40 }
 0x3ca   : > { %v2509_v40 = vadd.f32 %v9807_v32, %v2412_v49  ;;  %v2413_v32 = vadd.f32 %v9865_v0, %v9703_v48 }
 0x3cb   : > { %v2746_v60 = vpop.permute.xlu0 %2745 }
 0x3cc   : > { %v2769_v1 = vadd.f32 %v2746_v60, %v2646_v34 }
 0x3cd   : > { %v9934_v21 = vpop.permute.xlu1 %2628 }
 0x3d1   : > { %v2752_v4 = vpop.permute.xlu1 %2751 }
 0x3d4   : > { %v2872_v42 = vpop.permute.xlu0 %2871 }
 0x3d5   : > { %v3211_v16 = vpop.permute.xlu1 %3210 }
 0x3d8   : > { %v2994_v63 = vpop.permute.xlu0 %2993 }
 0x3dd   : > { %v2625_v29 = vpop.permute.xlu1 %2624 }
 0x3de   : > { %v2647_v28 = vadd.f32 %v2625_v29, %v2507_v37 }
 0x3e1   : > { %v2748_v12 = vpop.permute.xlu1 %2747 }
 0x3e2   : > { %v2770_v27 = vadd.f32 %v2748_v12, %v2647_v28  ;;  %v2411_v12 = vadd.f32 %v9608_v2, %v9869_v24 }
 0x3e4   : > { %v2627_v20 = vpop.permute.xlu0 %2626  ;;  %v2508_v28 = vadd.f32 %v9837_v38, %v2411_v12 }
 0x3e5   : > { %v2870_v39 = vpop.permute.xlu1 %2869 }
 0x3e6   : > { %v2892_v31 = vadd.f32 %v2870_v39, %v2770_v27 }
 0x3e8   : > { %v2750_v17 = vpop.permute.xlu0 %2749 }
 0x3e9   : > { %v2992_v35 = vpop.permute.xlu1 %2991 }
 0x3ea   : > { %v3014_v8 = vadd.f32 %v2992_v35, %v2892_v31 }
 0x3ec   : > { %v3111_v56 = vadd.f32 %v9812_v3, %v3014_v8  ;;  %v2868_v62 = vpop.permute.xlu0 %2867 }
 0x3ed   : > { %v2891_v30 = vadd.f32 %v2868_v62, %v2769_v1  ;;  %v2648_v62 = vadd.f32 %v2627_v20, %v2508_v28 }
 0x3ee   : > { %v3233_v47 = vadd.f32 %v3211_v16, %v3111_v56 }
 0x3f0   : > { %v2990_v29 = vpop.permute.xlu0 %2989  ;;  %v3249_v27 = vmul.f32 %v9803_v41, %v3233_v47 }
 0x3f1   : > { %v3013_v13 = vadd.f32 %v2990_v29, %v2891_v30  ;;  %v2771_v30 = vadd.f32 %v2750_v17, %v2648_v62 }
 0x3f2   : > { %v3265_v34 = vadd.f32 %v9793_v25, %v3249_v27 }
 0x3f3   : > { %v3110_v39 = vadd.f32 %v9840_v36, %v3013_v13  ;;  %v2893_v27 = vadd.f32 %v2872_v42, %v2771_v30  ;;  %v2414_v42 = vadd.f32 %v9899_v26, %v9759_v58 }
 0x3f4   : > { %v3209_v31 = vpop.permute.xlu0 %3208  ;;  %v3273_v8 = vmax.f32 %v3265_v34, 0.0  ;;  %v2649_v34 = vadd.f32 %v9934_v21, %v2509_v40  ;;  %v2416_v21 = vadd.f32 %v9727_v22, %v9930_v46 }
 0x3f5   : > { %v3232_v3 = vadd.f32 %v3209_v31, %v3110_v39  ;;  %v3015_v31 = vadd.f32 %v2994_v63, %v2893_v27 }
 0x3f6   : > { %v2772_v2 = vadd.f32 %v2752_v4, %v2649_v34  ;;  %v2513_v58 = vadd.f32 %v9858_v33, %v2416_v21 }
 0x3f7   : > { %v3248_v35 = vmul.f32 %v9803_v41, %v3232_v3  ;;  %v3112_v38 = vadd.f32 %v9824_v59, %v3015_v31 }
 0x3f9   : > { %v3264_v1 = vadd.f32 %v9793_v25, %v3248_v35 }
 0x3fb   : > { %v3272_v5 = vmax.f32 %v3264_v1, 0.0  ;;  %v2415_v1 = vadd.f32 %v9691_v55, %v9932_v11  ;;  %v2510_v11 = vadd.f32 %v9820_v54, %v2413_v32 }
 0x3fd   : > { %v3284_v52 = vpack.c.bf16 %v3273_v8, %v3272_v5  ;;  %v2512_v4 = vadd.f32 %v9897_v43, %v2415_v1 }
 0x3ff   : > { %3292 = vrot.lane.b32.xlu0 %v3284_v52, %s11994_s24  ;;  %v2511_v52 = vadd.f32 %v9867_v14, %v2414_v42 }
 0x400   : > { %v2631_v60 = vpop.permute.xlu0 %2630 }
 0x401   : > { %v2874_v47 = vpop.permute.xlu1 %2873  ;;  %v2650_v26 = vadd.f32 %v2631_v60, %v2510_v11 }
 0x402   : > { %v2894_v20 = vadd.f32 %v2874_v47, %v2772_v2 }
 0x404   : > { %v2754_v37 = vpop.permute.xlu0 %2753 }
 0x405   : > { %v2996_v36 = vpop.permute.xlu1 %2995 }
 0x406   : > { %v3016_v5 = vadd.f32 %v2996_v36, %v2894_v20 }
 0x408   : > { %v3213_v29 = vpop.permute.xlu0 %3212  ;;  %v3113_v8 = vadd.f32 %v9871_v9, %v3016_v5  ;;  %v2773_v9 = vadd.f32 %v2754_v37, %v2650_v26 }
 0x409   : > { %v2637_v16 = vpop.permute.xlu1 %2636  ;;  %v3234_v17 = vadd.f32 %v3213_v29, %v3112_v38 }
 0x40a   : > { %v2653_v12 = vadd.f32 %v2637_v16, %v2513_v58 }
 0x40b   : > { %v3250_v59 = vmul.f32 %v9803_v41, %v3234_v17 }
 0x40d   : > { %v2760_v56 = vpop.permute.xlu1 %2759  ;;  %v3266_v0 = vadd.f32 %v9793_v25, %v3250_v59 }
 0x40e   : > { %v2776_v14 = vadd.f32 %v2760_v56, %v2653_v12 }
 0x40f   : > { %v3274_v30 = vmax.f32 %v3266_v0, 0.0 }
 0x411   : > { %v2880_v13 = vpop.permute.xlu1 %2879  ;;  %v2882_v39 = vpop.permute.xlu0 %2881 }
 0x412   : > { %v2898_v60 = vadd.f32 %v2882_v39, %v2776_v14 }
 0x415   : > { %v3004_v3 = vpop.permute.xlu1 %3003  ;;  %v3002_v24 = vpop.permute.xlu0 %3001 }
 0x421   : > { %v2633_v35 = vpop.permute.xlu1 %2632 }
 0x422   : > { %v2651_v22 = vadd.f32 %v2633_v35, %v2511_v52  ;;  %v3020_v35 = vadd.f32 %v3004_v3, %v2898_v60 }
 0x424   : > { %v2635_v57 = vpop.permute.xlu0 %2634  ;;  %v3117_v5 = vadd.f32 %v9800_v23, %v3020_v35 }
 0x425   : > { %v2756_v7 = vpop.permute.xlu1 %2755  ;;  %v2652_v47 = vadd.f32 %v2635_v57, %v2512_v4 }
 0x426   : > { %v2774_v62 = vadd.f32 %v2756_v7, %v2651_v22 }
 0x428   : > { %v2758_v63 = vpop.permute.xlu0 %2757 }
 0x429   : > { %v3215_v55 = vpop.permute.xlu1 %3214  ;;  %v2775_v46 = vadd.f32 %v2758_v63, %v2652_v47  ;;  %v12206_v47 = vld [vmem:[#allocation61_spill] sm:$0xff] }
 0x42a   : > { %v3235_v48 = vadd.f32 %v3215_v55, %v3113_v8 }
 0x42b   : > { %v2897_v29 = vadd.f32 %v2880_v13, %v2775_v46 }
 0x42c   : > { %v3251_v36 = vmul.f32 %v9803_v41, %v3235_v48  ;;  %v2876_v43 = vpop.permute.xlu0 %2875 }
 0x42d   : > { %v2878_v28 = vpop.permute.xlu1 %2877  ;;  %v2895_v27 = vadd.f32 %v2876_v43, %v2773_v9  ;;  %v3019_v20 = vadd.f32 %v3002_v24, %v2897_v29  ;;  %v12208_v43 = vld [vmem:[#allocation82_spill] sm:$0xff] }
 0x42e   : > { %v3267_v54 = vadd.f32 %v9793_v25, %v3251_v36  ;;  %v2896_v40 = vadd.f32 %v2878_v28, %v2774_v62  ;;  %v12209_v28 = vld [vmem:[#allocation16_spill] sm:$0xff] }
 0x42f   : > { %v3116_v7 = vadd.f32 %v9884_v45, %v3019_v20  ;;  %v7509_v45 = vld [vmem:[%s11828_s6 + $0x2] sm:$0x3]  ;;  %v12210_v62 = vld [vmem:[#allocation64_spill] sm:$0xff]  ;;  %v12214_v20 = vld [vmem:[#allocation59_spill] sm:$0xff] }
 0x430   : > { %v3275_v49 = vmax.f32 %v3267_v54, 0.0  ;;  %v3929_v48 = vrot.slane %v7509_v45, %v12206_v47 }
 0x431   : > { %v2998_v31 = vpop.permute.xlu1 %2997  ;;  %v3000_v33 = vpop.permute.xlu0 %2999 }
 0x432   : > { %v3017_v34 = vadd.f32 %v2998_v31, %v2895_v27  ;;  %v3018_v2 = vadd.f32 %v3000_v33, %v2896_v40  ;;  %v3285_v38 = vpack.c.bf16 %v3275_v49, %v3274_v30  ;;  %v12211_v30 = vld [vmem:[#allocation13_spill] sm:$0xff]  ;;  %v12212_v31 = vld [vmem:[#allocation60_spill] sm:$0xff] }
 0x434   : > { %3294 = vrot.lane.b32.xlu1 %v3285_v38, %s11994_s24  ;;  %v3115_v16 = vadd.f32 %v9862_v18, %v3018_v2  ;;  %v3114_v37 = vadd.f32 %v9901_v6, %v3017_v34  ;;  %v12213_v38 = vld [vmem:[#allocation58_spill] sm:$0xff] }
 0x435   : > { %v3219_v17 = vpop.permute.xlu1 %3218  ;;  %v3217_v56 = vpop.permute.xlu0 %3216 }
 0x436   : > { %v3237_v13 = vadd.f32 %v3219_v17, %v3115_v16  ;;  %v3236_v1 = vadd.f32 %v3217_v56, %v3114_v37 }
 0x438   : > { %v3253_v57 = vmul.f32 %v9803_v41, %v3237_v13  ;;  %v3252_v39 = vmul.f32 %v9803_v41, %v3236_v1  ;;  %v12215_v13 = vld [vmem:[#allocation10_spill] sm:$0xff] }
 0x439   : > { %v9986_v3 = vpop.permute.xlu1 %3222  ;;  %v3221_v32 = vpop.permute.xlu0 %3220 }
 0x43a   : > { %v3269_v18 = vadd.f32 %v9793_v25, %v3253_v57  ;;  %v3268_v6 = vadd.f32 %v9793_v25, %v3252_v39  ;;  %v3239_v24 = vadd.f32 %v9986_v3, %v3117_v5  ;;  %v3238_v42 = vadd.f32 %v3221_v32, %v3116_v7  ;;  %v12216_v39 = vld [vmem:[#allocation14_spill] sm:$0xff] }
 0x43c   : > { %v3277_v21 = vmax.f32 %v3269_v18, 0.0  ;;  %v3276_v59 = vmax.f32 %v3268_v6, 0.0  ;;  %v3255_v4 = vmul.f32 %v9803_v41, %v3239_v24  ;;  %v3254_v63 = vmul.f32 %v9803_v41, %v3238_v42  ;;  %v12217_v24 = vld [vmem:[#allocation63_spill] sm:$0xff] }
 0x43d   : > { %v3913_v41 = vrot.slane %v7509_v45, %v12145_v44 }
 0x43e   : > { %v3270_v8 = vadd.f32 %v9793_v25, %v3254_v63  ;;  %v3286_v55 = vpack.c.bf16 %v3277_v21, %v3276_v59  ;;  %v3271_v11 = vadd.f32 %v9793_v25, %v3255_v4  ;;  %v12218_v59 = vld [vmem:[#allocation26_spill] sm:$0xff] }
 0x43f   : > { %v12219_v63 = vld [vmem:[#allocation78_spill] sm:$0xff] }
 0x440   : > { %v3278_v52 = vmax.f32 %v3270_v8, 0.0  ;;  %3296 = vrot.lane.b32.xlu0 %v3286_v55, %s11994_s24  ;;  %v3279_v0 = vmax.f32 %v3271_v11, 0.0  ;;  %v12220_v55 = vld [vmem:[#allocation62_spill] sm:$0xff] }
 0x442   : > { %v3287_v58 = vpack.c.bf16 %v3279_v0, %v3278_v52  ;;  %v12221_v52 = vld [vmem:[#allocation85_spill] sm:$0xff] }
 0x444   : > { %3931 = vrot.lane.b32.xlu0 %v3929_v48, %s11990_s23  ;;  %3298 = vrot.lane.b32.xlu1 %v3287_v58, %s11994_s24  ;;  %v12222_v58 = vld [vmem:[#allocation74_spill] sm:$0xff] }
 0x448   : > { %3952 = vrot.lane.b32.xlu0 %v9503_v10, %s11990_s23  ;;  %3915 = vrot.lane.b32.xlu1 %v3913_v41, %s11990_s23 }
 0x44c   : > { %3954 = vrot.lane.b32.xlu0 %v9529_v15, %s11990_s23  ;;  %3950 = vrot.lane.b32.xlu1 %v9501_v53, %s11990_s23  ;;  %v12207_v15 = vld [vmem:[#allocation65_spill] sm:$0xff] }
 0x450   : > { %3956 = vrot.lane.b32.xlu1 %v9531_v19, %s11990_s23 }
 0x471   : > { %v3293_v25 = vpop.permute.xlu0 %3292 }
 0x472   : > { %7711 = vmatprep.mubr.msk.bf16.mxu1 %vm2207_vm4, %v3293_v25 }
 0x4a6   : > { %v3295_v26 = vpop.permute.xlu1 %3294 }
 0x4a7   : > { %7712 = vmatmul.mubr.msk.bf16.vlgmr.msra.gmra.mxu1 %vm2207_vm4, %v3295_v26 }
 0x4b2   : > { %v3297_v22 = vpop.permute.xlu0 %3296 }
 0x4b3   : > { %7715 = vmatprep.mubr.msk.bf16.mxu1 %vm2207_vm4, %v3297_v22  ;;  %v12223_v22 = vld [vmem:[#allocation84_spill] sm:$0xff] }
 0x4b6   : > { %v3299_v10 = vpop.permute.xlu1 %3298 }
 0x4b7   : > { %7716 = vmatmul.mubr.msk.bf16.gmra.mxu1 %vm2207_vm4, %v3299_v10 }
 0x567   : > { %v10016_v46 = vpop.f32.mrf.mxu1 }
 0x568   : > { %v3453_v53 = vmul.f32 %v10016_v46, %v12207_v15  ;;  %v3804_v12 = vmul.f32 %v10016_v46, %v12208_v43  ;;  %v3499_v27 = vrot.slane %v10016_v46, 1  ;;  %v3391_v2 = vrot.slane %v10016_v46, 7 }
 0x569   : > { %v10020_v36 = vpop.f32.mrf.mxu1 }
 0x56a   : > { %3469 = vrot.lane.b32.xlu0 %v3453_v53, %s8172_s30  ;;  %v3451_v54 = vmul.f32 %v10020_v36, %v12210_v62  ;;  %v3495_v29 = vrot.slane %v10020_v36, 1  ;;  %v3387_v40 = vrot.slane %v10020_v36, 7 }
 0x56b   : > { %v10023_v19 = vpop.f32.mrf.mxu1 }
 0x56c   : > { %v3454_v9 = vmul.f32 %v10023_v19, %v12209_v28  ;;  %v3805_v14 = vmul.f32 %v10023_v19, %v12211_v30  ;;  %v3501_v49 = vrot.slane %v10023_v19, 1  ;;  %v3496_v33 = vsel %vm2564_vm5, %v12212_v31, %v3495_v29 }
 0x56d   : > { %v3393_v34 = vrot.slane %v10023_v19, 7  ;;  %v3388_v35 = vsel %vm1080_vm1, %v12213_v38, %v3387_v40  ;;  %v10053_v37 = vpop.f32.mrf.mxu1 }
 0x56e   : > { %3819 = vrot.lane.b32.xlu0 %v3804_v12, %s8173_s26  ;;  %3471 = vrot.lane.b32.xlu1 %v3454_v9, %s8172_s30  ;;  %v3502_v60 = vsel %vm2564_vm5, %v3499_v27, %v3501_v49  ;;  %v3408_v17 = vmul.f32 %v3388_v35, %v12214_v20  ;;  %v3497_v56 = vrot.slane %v10053_v37, 1  ;;  %v3452_v1 = vmul.f32 %v10053_v37, %v12215_v13  ;;  %v12224_v9 = vld [vmem:[#allocation49_spill] sm:$0xff] }
 0x56f   : > { %v3394_v16 = vsel %vm1080_vm1, %v3391_v2, %v3393_v34  ;;  %v3389_v57 = vrot.slane %v10053_v37, 7  ;;  %v3803_v7 = vmul.f32 %v10053_v37, %v12216_v39  ;;  %v12260_v39 = vld [vmem:[#allocation45_spill] sm:$0xff] }
 0x570   : > { %v3500_v5 = vsel %vm2564_vm5, %v3497_v56, %v3499_v27  ;;  %v3498_v18 = vsel %vm2564_vm5, %v3495_v29, %v3497_v56  ;;  %v3411_v4 = vmul.f32 %v3394_v16, %v12218_v59  ;;  %v12259_v59 = vld [vmem:[#allocation86_spill] sm:$0xff] }
 0x571   : > { %v3392_v32 = vsel %vm1080_vm1, %v3389_v57, %v3391_v2  ;;  %v3390_v6 = vsel %vm1080_vm1, %v3387_v40, %v3389_v57 }
 0x572   : > { %3465 = vrot.lane.b32.xlu0 %v3451_v54, %s8172_s30  ;;  %3821 = vrot.lane.b32.xlu1 %v3805_v14, %s8173_s26  ;;  %v3409_v42 = vmul.f32 %v3390_v6, %v12217_v24  ;;  %v3410_v11 = vmul.f32 %v3392_v32, %v12220_v55 }
 0x576   : > { %3511 = vrot.lane.b32.xlu0 %v3496_v33, %s8174_s16  ;;  %3517 = vrot.lane.b32.xlu1 %v3502_v60, %s8174_s16 }
 0x577   : > { %v10081_v21 = vpop.f32.mrf.mxu1 }
 0x578   : > { %v3457_v45 = vmul.f32 %v10081_v21, %v12219_v63  ;;  %v3808_v48 = vmul.f32 %v10081_v21, %v12221_v52  ;;  %v3507_v29 = vrot.slane %v10081_v21, 1  ;;  %v3399_v40 = vrot.slane %v10081_v21, 7  ;;  %v12251_v52 = vld [vmem:[#allocation42_spill] sm:$0xff] }
 0x579   : > { %v10088_v8 = vpop.f32.mrf.mxu1 }
 0x57a   : > { %3585 = vrot.lane.b32.xlu0 %v3388_v35, %s8173_s26  ;;  %3591 = vrot.lane.b32.xlu1 %v3394_v16, %s8173_s26  ;;  %v3503_v0 = vrot.slane %v10088_v8, 1  ;;  %v3455_v41 = vmul.f32 %v10088_v8, %v12222_v58  ;;  %v3395_v26 = vrot.slane %v10088_v8, 7  ;;  %v3806_v10 = vmul.f32 %v10088_v8, %v12223_v22  ;;  %v12225_v35 = vld [vmem:[#allocation70_spill] sm:$0xff]  ;;  %v12248_v22 = vld [vmem:[#allocation83_spill] sm:$0xff] }
 0x57b   : > { %v10106_v53 = vpop.f32.mrf.mxu1 }
 0x57c   : > { %v3504_v25 = vsel %vm2564_vm5, %v3501_v49, %v3503_v0  ;;  %v3396_v12 = vsel %vm1080_vm1, %v3393_v34, %v3395_v26  ;;  %v3809_v54 = vmul.f32 %v10106_v53, %v12224_v9  ;;  %v3509_v14 = vrot.slane %v10106_v53, 1 }
 0x57d   : > { %v3583_v49 = vrot.slane %v10106_v53, 7  ;;  %v10133_v2 = vpop.f32.mrf.mxu1 }
 0x57e   : > { %3662 = vrot.lane.b32.xlu0 %v3502_v60, %s8175_s18  ;;  %3848 = vrot.lane.b32.xlu1 %v3502_v60, %s11988_s17  ;;  %v3510_v27 = vsel %vm2564_vm5, %v3507_v29, %v3509_v14  ;;  %v3657_v60 = vsel %vm2564_vm5, %v3509_v14, %v12212_v31 }
 0x57f   : > { %v3584_v33 = vsel %vm1080_vm1, %v3399_v40, %v3583_v49  ;;  %v3730_v34 = vsel %vm1080_vm1, %v3583_v49, %v12213_v38 }
 0x582   : > { %3735 = vrot.lane.b32.xlu0 %v3394_v16, %s11992_s25  ;;  %3422 = vrot.lane.b32.xlu1 %v3408_v17, %s11990_s23  ;;  %v3412_v16 = vmul.f32 %v3396_v12, %v12225_v35  ;;  %v12226_v17 = vld [vmem:[#allocation22_spill] sm:$0xff] }
 0x583   : > { %v3456_v56 = vmul.f32 %v10133_v2, %v12226_v17 }
 0x586   : > { %3515 = vrot.lane.b32.xlu0 %v3500_v5, %s8174_s16  ;;  %3467 = vrot.lane.b32.xlu1 %v3452_v1, %s8172_s30  ;;  %v3505_v1 = vrot.slane %v10133_v2, 1 }
 0x58a   : > { %3817 = vrot.lane.b32.xlu1 %v3803_v7, %s8173_s26  ;;  %3589 = vrot.lane.b32.xlu0 %v3392_v32, %s8173_s26  ;;  %v3508_v7 = vsel %vm2564_vm5, %v3505_v1, %v3507_v29 }
 0x58e   : > { %3513 = vrot.lane.b32.xlu1 %v3498_v18, %s8174_s16  ;;  %3658 = vrot.lane.b32.xlu0 %v3498_v18, %s8175_s18  ;;  %v10149_v18 = vpop.permute.xlu0 %3931 }
 0x592   : > { %3731 = vrot.lane.b32.xlu0 %v3390_v6, %s11992_s25  ;;  %3587 = vrot.lane.b32.xlu1 %v3390_v6, %s8173_s26  ;;  %v3506_v6 = vsel %vm2564_vm5, %v3503_v0, %v3505_v1 }
 0x596   : > { %3846 = vrot.lane.b32.xlu0 %v3500_v5, %s11988_s17  ;;  %3660 = vrot.lane.b32.xlu1 %v3500_v5, %s8175_s18  ;;  %v12227_v5 = vld [vmem:[#allocation47_spill] sm:$0xff] }
 0x597   : > { %v3807_v57 = vmul.f32 %v10133_v2, %v12227_v5 }
 0x59a   : > { %3733 = vrot.lane.b32.xlu1 %v3392_v32, %s11992_s25  ;;  %3424 = vrot.lane.b32.xlu0 %v3409_v42, %s11990_s23  ;;  %v3397_v32 = vrot.slane %v10133_v2, 7 }
 0x59c   : > { %v3400_v42 = vsel %vm1080_vm1, %v3397_v32, %v3399_v40 }
 0x59e   : > { %3428 = vrot.lane.b32.xlu1 %v3411_v4, %s11990_s23  ;;  %3477 = vrot.lane.b32.xlu0 %v3457_v45, %s8172_s30  ;;  %v10155_v4 = vpop.permute.xlu1 %3915  ;;  %v3398_v45 = vsel %vm1080_vm1, %v3395_v26, %v3397_v32 }
 0x5a2   : > { %3426 = vrot.lane.b32.xlu1 %v3410_v11, %s11990_s23  ;;  %3827 = vrot.lane.b32.xlu0 %v3808_v48, %s8173_s26  ;;  %v10158_v11 = vpop.permute.xlu0 %3952  ;;  %v10162_v48 = vpop.permute.xlu1 %3950 }
 0x5a6   : > { %3664 = vrot.lane.b32.xlu1 %v3504_v25, %s8175_s18  ;;  %3473 = vrot.lane.b32.xlu0 %v3455_v41, %s8172_s30  ;;  %v10166_v0 = vpop.permute.xlu0 %3954  ;;  %v10170_v41 = vpop.permute.xlu1 %3956 }
 0x5aa   : > { %3823 = vrot.lane.b32.xlu0 %v3806_v10, %s8173_s26  ;;  %3737 = vrot.lane.b32.xlu1 %v3396_v12, %s11992_s25 }
 0x5ae   : > { %3519 = vrot.lane.b32.xlu0 %v3504_v25, %s8174_s16  ;;  %3829 = vrot.lane.b32.xlu1 %v3809_v54, %s8173_s26 }
 0x5b2   : > { %3593 = vrot.lane.b32.xlu0 %v3396_v12, %s8173_s26  ;;  %3525 = vrot.lane.b32.xlu1 %v3510_v27, %s8174_s16  ;;  %v12229_v12 = vld [vmem:[#allocation34_spill] sm:$0xff] }
 0x5b3   : > { %v3413_v54 = vmul.f32 %v3398_v45, %v12229_v12 }
 0x5b6   : > { %3850 = vrot.lane.b32.xlu0 %v3504_v25, %s11988_s17  ;;  %3599 = vrot.lane.b32.xlu1 %v3584_v33, %s8173_s26  ;;  %v12228_v25 = vld [vmem:[#allocation72_spill] sm:$0xff] }
 0x5b7   : > { %v3414_v26 = vmul.f32 %v3400_v42, %v12228_v25  ;;  %v12242_v25 = vld [vmem:[#allocation31_spill] sm:$0xff] }
 0x5ba   : > { %3670 = vrot.lane.b32.xlu0 %v3510_v27, %s8175_s18  ;;  %3672 = vrot.lane.b32.xlu1 %v3657_v60, %s8175_s18 }
 0x5be   : > { %3743 = vrot.lane.b32.xlu0 %v3584_v33, %s11992_s25  ;;  %3745 = vrot.lane.b32.xlu1 %v3730_v34, %s11992_s25 }
 0x5c2   : > { %3858 = vrot.lane.b32.xlu0 %v3657_v60, %s11988_s17  ;;  %3856 = vrot.lane.b32.xlu1 %v3510_v27, %s11988_s17  ;;  %v12230_v60 = vld [vmem:[#allocation67_spill] sm:$0xff] }
 0x5c6   : > { %3430 = vrot.lane.b32.xlu0 %v3412_v16, %s11990_s23  ;;  %3475 = vrot.lane.b32.xlu1 %v3456_v56, %s8172_s30  ;;  %v12231_v16 = vld [vmem:[#allocation87_spill] sm:$0xff] }
 0x5ca   : > { %3523 = vrot.lane.b32.xlu0 %v3508_v7, %s8174_s16  ;;  %3825 = vrot.lane.b32.xlu1 %v3807_v57, %s8173_s26 }
 0x5ce   : > { %3521 = vrot.lane.b32.xlu1 %v3506_v6, %s8174_s16  ;;  %3597 = vrot.lane.b32.xlu0 %v3400_v42, %s8173_s26 }
 0x5d2   : > { %3666 = vrot.lane.b32.xlu0 %v3506_v6, %s8175_s18  ;;  %3595 = vrot.lane.b32.xlu1 %v3398_v45, %s8173_s26 }
 0x5d6   : > { %3739 = vrot.lane.b32.xlu0 %v3398_v45, %s11992_s25  ;;  %3852 = vrot.lane.b32.xlu1 %v3506_v6, %s11988_s17  ;;  %v12233_v6 = vld [vmem:[#allocation35_spill] sm:$0xff] }
 0x5da   : > { %3854 = vrot.lane.b32.xlu0 %v3508_v7, %s11988_s17  ;;  %3668 = vrot.lane.b32.xlu1 %v3508_v7, %s8175_s18  ;;  %v12232_v7 = vld [vmem:[#allocation69_spill] sm:$0xff] }
 0x5dc   : > { %v10173_v10 = vpop.permute.xlu0 %3469 }
 0x5de   : > { %3434 = vrot.lane.b32.xlu0 %v3414_v26, %s11990_s23  ;;  %3741 = vrot.lane.b32.xlu1 %v3400_v42, %s11992_s25 }
 0x5e0   : > { %v10178_v14 = vpop.permute.xlu1 %3471  ;;  %v10180_v29 = vpop.permute.xlu0 %3819 }
 0x5e2   : > { %3432 = vrot.lane.b32.xlu1 %v3413_v54, %s11990_s23  ;;  %v12234_v54 = vld [vmem:[#allocation88_spill] sm:$0xff] }
 0x5e4   : > { %v10183_v49 = vpop.permute.xlu1 %3821  ;;  %v10185_v27 = vpop.permute.xlu0 %3465 }
 0x5e8   : > { %v3518_v40 = vpop.permute.xlu1 %3517  ;;  %v3512_v33 = vpop.permute.xlu0 %3511 }
 0x5e9   : > { %v3538_v34 = vmul.f32 %v3518_v40, %v12230_v60  ;;  %v3535_v56 = vmul.f32 %v3512_v33, %v12231_v16  ;;  %v12235_v60 = vld [vmem:[#allocation15_spill] sm:$0xff]  ;;  %v12239_v16 = vld [vmem:[#allocation66_spill] sm:$0xff] }
 0x5eb   : > { %3557 = vrot.lane.b32.xlu0 %v3538_v34, %s11990_s23  ;;  %3551 = vrot.lane.b32.xlu1 %v3535_v56, %s11990_s23 }
 0x5ec   : > { %v3592_v1 = vpop.permute.xlu1 %3591  ;;  %v3586_v57 = vpop.permute.xlu0 %3585 }
 0x5ed   : > { %v3612_v32 = vmul.f32 %v3592_v1, %v12232_v7  ;;  %v3609_v42 = vmul.f32 %v3586_v57, %v12233_v6  ;;  %v12236_v1 = vld [vmem:[#allocation39_spill] sm:$0xff] }
 0x5ef   : > { %3631 = vrot.lane.b32.xlu0 %v3612_v32, %s11990_s23  ;;  %3625 = vrot.lane.b32.xlu1 %v3609_v42, %s11990_s23  ;;  %v12237_v42 = vld [vmem:[#allocation11_spill] sm:$0xff] }
 0x5f0   : > { %v3849_v45 = vpop.permute.xlu1 %3848  ;;  %v3663_v26 = vpop.permute.xlu0 %3662 }
 0x5f1   : > { %v3868_v40 = vmul.f32 %v3849_v45, %v12234_v54  ;;  %v3684_v33 = vmul.f32 %v3663_v26, %v12235_v60 }
 0x5f3   : > { %3883 = vrot.lane.b32.xlu0 %v3868_v40, %s11990_s23  ;;  %3702 = vrot.lane.b32.xlu1 %v3684_v33, %s11990_s23  ;;  %v12238_v40 = vld [vmem:[#allocation23_spill] sm:$0xff] }
 0x5f4   : > { %v10199_v34 = vpop.permute.xlu1 %3422  ;;  %v3736_v56 = vpop.permute.xlu0 %3735 }
 0x5f5   : > { %v3757_v7 = vmul.f32 %v3736_v56, %v12236_v1  ;;  %v12240_v1 = vld [vmem:[#allocation17_spill] sm:$0xff] }
 0x5f7   : > { %3775 = vrot.lane.b32.xlu1 %v3757_v7, %s11990_s23 }
 0x5f8   : > { %v10203_v57 = vpop.permute.xlu1 %3467  ;;  %v3516_v32 = vpop.permute.xlu0 %3515 }
 0x5f9   : > { %v3537_v6 = vmul.f32 %v3516_v32, %v12237_v42 }
 0x5fb   : > { %3555 = vrot.lane.b32.xlu1 %v3537_v6, %s11990_s23  ;;  %v12241_v6 = vld [vmem:[#allocation68_spill] sm:$0xff] }
 0x5fc   : > { %v10207_v45 = vpop.permute.xlu1 %3817  ;;  %v3590_v26 = vpop.permute.xlu0 %3589 }
 0x5fd   : > { %v3611_v54 = vmul.f32 %v3590_v26, %v12238_v40  ;;  %v12243_v40 = vld [vmem:[#allocation71_spill] sm:$0xff] }
 0x5ff   : > { %3629 = vrot.lane.b32.xlu1 %v3611_v54, %s11990_s23 }
 0x600   : > { %v3514_v33 = vpop.permute.xlu1 %3513  ;;  %v3659_v60 = vpop.permute.xlu0 %3658 }
 0x601   : > { %v3536_v56 = vmul.f32 %v3514_v33, %v12239_v16  ;;  %v3682_v7 = vmul.f32 %v3659_v60, %v12240_v1  ;;  %v12244_v16 = vld [vmem:[#allocation18_spill] sm:$0xff] }
 0x602   : > { %v12247_v1 = vld [vmem:[#allocation30_spill] sm:$0xff] }
 0x603   : > { %3553 = vrot.lane.b32.xlu0 %v3536_v56, %s11990_s23  ;;  %3698 = vrot.lane.b32.xlu1 %v3682_v7, %s11990_s23 }
 0x604   : > { %v3588_v32 = vpop.permute.xlu1 %3587  ;;  %v3732_v42 = vpop.permute.xlu0 %3731 }
 0x605   : > { %v3610_v12 = vmul.f32 %v3588_v32, %v12241_v6  ;;  %v3755_v5 = vmul.f32 %v3732_v42, %v12242_v25  ;;  %v12245_v32 = vld [vmem:[#allocation76_spill] sm:$0xff] }
 0x607   : > { %3627 = vrot.lane.b32.xlu0 %v3610_v12, %s11990_s23  ;;  %3771 = vrot.lane.b32.xlu1 %v3755_v5, %s11990_s23 }
 0x608   : > { %v3661_v54 = vpop.permute.xlu1 %3660  ;;  %v3847_v26 = vpop.permute.xlu0 %3846 }
 0x609   : > { %v3683_v33 = vmul.f32 %v3661_v54, %v12243_v40  ;;  %v3867_v60 = vmul.f32 %v3847_v26, %v12244_v16 }
 0x60b   : > { %3700 = vrot.lane.b32.xlu0 %v3683_v33, %s11990_s23  ;;  %3881 = vrot.lane.b32.xlu1 %v3867_v60, %s11990_s23 }
 0x60c   : > { %v3734_v56 = vpop.permute.xlu1 %3733  ;;  %v10223_v7 = vpop.permute.xlu0 %3424 }
 0x60d   : > { %v3756_v6 = vmul.f32 %v3734_v56, %v12245_v32  ;;  %v12246_v56 = vld [vmem:[#allocation79_spill] sm:$0xff] }
 0x60f   : > { %3773 = vrot.lane.b32.xlu0 %v3756_v6, %s11990_s23 }
 0x610   : > { %v10227_v12 = vpop.permute.xlu1 %3428  ;;  %v10229_v5 = vpop.permute.xlu0 %3477 }
 0x614   : > { %v10231_v42 = vpop.permute.xlu1 %3426  ;;  %v10233_v54 = vpop.permute.xlu0 %3827 }
 0x618   : > { %v3665_v26 = vpop.permute.xlu1 %3664  ;;  %v10235_v40 = vpop.permute.xlu0 %3473 }
 0x619   : > { %v3685_v33 = vmul.f32 %v3665_v26, %v12200_v61  ;;  %v12249_v61 = vld [vmem:[#allocation19_spill] sm:$0xff] }
 0x61b   : > { %3704 = vrot.lane.b32.xlu0 %v3685_v33, %s11990_s23 }
 0x61c   : > { %v3738_v60 = vpop.permute.xlu1 %3737  ;;  %v10239_v16 = vpop.permute.xlu0 %3823 }
 0x61d   : > { %v3758_v6 = vmul.f32 %v3738_v60, %v12246_v56 }
 0x61f   : > { %3777 = vrot.lane.b32.xlu0 %v3758_v6, %s11990_s23  ;;  %v12250_v6 = vld [vmem:[#allocation89_spill] sm:$0xff] }
 0x620   : > { %v10243_v32 = vpop.permute.xlu1 %3829  ;;  %v3520_v25 = vpop.permute.xlu0 %3519 }
 0x621   : > { %v3539_v17 = vmul.f32 %v3520_v25, %v12247_v1  ;;  %v12252_v1 = vld [vmem:[#allocation92_spill] sm:$0xff] }
 0x623   : > { %3559 = vrot.lane.b32.xlu1 %v3539_v17, %s11990_s23 }
 0x624   : > { %v3526_v35 = vpop.permute.xlu1 %3525  ;;  %v3594_v9 = vpop.permute.xlu0 %3593 }
 0x625   : > { %v3542_v26 = vmul.f32 %v3526_v35, %v12248_v22  ;;  %v3613_v33 = vmul.f32 %v3594_v9, %v12249_v61  ;;  %v12253_v22 = vld [vmem:[#allocation44_spill] sm:$0xff]  ;;  %v12254_v61 = vld [vmem:[#allocation94_spill] sm:$0xff] }
 0x627   : > { %3565 = vrot.lane.b32.xlu0 %v3542_v26, %s11990_s23  ;;  %3633 = vrot.lane.b32.xlu1 %v3613_v33, %s11990_s23 }
 0x628   : > { %v3600_v60 = vpop.permute.xlu1 %3599  ;;  %v3851_v56 = vpop.permute.xlu0 %3850 }
 0x629   : > { %v3616_v58 = vmul.f32 %v3600_v60, %v12250_v6  ;;  %v3869_v55 = vmul.f32 %v3851_v56, %v12251_v52  ;;  %v12255_v6 = vld [vmem:[#allocation25_spill] sm:$0xff] }
 0x62b   : > { %3639 = vrot.lane.b32.xlu0 %v3616_v58, %s11990_s23  ;;  %3885 = vrot.lane.b32.xlu1 %v3869_v55, %s11990_s23 }
 0x62c   : > { %v3673_v17 = vpop.permute.xlu1 %3672  ;;  %v3671_v25 = vpop.permute.xlu0 %3670 }
 0x62d   : > { %v3689_v35 = vmul.f32 %v3673_v17, %v12252_v1  ;;  %v3688_v9 = vmul.f32 %v3671_v25, %v12253_v22 }
 0x62f   : > { %3712 = vrot.lane.b32.xlu1 %v3689_v35, %s11990_s23  ;;  %3710 = vrot.lane.b32.xlu0 %v3688_v9, %s11990_s23  ;;  %v12256_v9 = vld [vmem:[#allocation38_spill] sm:$0xff] }
 0x630   : > { %v3746_v26 = vpop.permute.xlu1 %3745  ;;  %v3744_v33 = vpop.permute.xlu0 %3743 }
 0x631   : > { %v3762_v60 = vmul.f32 %v3746_v26, %v12254_v61  ;;  %v3761_v56 = vmul.f32 %v3744_v33, %v12255_v6  ;;  %v12257_v33 = vld [vmem:[#allocation80_spill] sm:$0xff] }
 0x633   : > { %3785 = vrot.lane.b32.xlu0 %v3762_v60, %s11990_s23  ;;  %3783 = vrot.lane.b32.xlu1 %v3761_v56, %s11990_s23  ;;  %v12258_v60 = vld [vmem:[#allocation43_spill] sm:$0xff] }
 0x634   : > { %v3857_v55 = vpop.permute.xlu1 %3856  ;;  %v3859_v58 = vpop.permute.xlu0 %3858 }
 0x638   : > { %v10263_v52 = vpop.permute.xlu1 %3475  ;;  %v10265_v17 = vpop.permute.xlu0 %3430 }
 0x63c   : > { %v10267_v25 = vpop.permute.xlu1 %3825  ;;  %v3524_v35 = vpop.permute.xlu0 %3523 }
 0x63d   : > { %v3541_v1 = vmul.f32 %v3524_v35, %v12256_v9  ;;  %v12261_v35 = vld [vmem:[#allocation90_spill] sm:$0xff] }
 0x63f   : > { %3563 = vrot.lane.b32.xlu1 %v3541_v1, %s11990_s23 }
 0x640   : > { %v3522_v26 = vpop.permute.xlu1 %3521  ;;  %v3598_v61 = vpop.permute.xlu0 %3597 }
 0x641   : > { %v3540_v6 = vmul.f32 %v3522_v26, %v12257_v33  ;;  %v3615_v22 = vmul.f32 %v3598_v61, %v12258_v60  ;;  %v12262_v26 = vld [vmem:[#allocation91_spill] sm:$0xff]  ;;  %v12263_v60 = vld [vmem:[#allocation21_spill] sm:$0xff] }
 0x643   : > { %3561 = vrot.lane.b32.xlu0 %v3540_v6, %s11990_s23  ;;  %3637 = vrot.lane.b32.xlu1 %v3615_v22, %s11990_s23 }
 0x644   : > { %v3596_v56 = vpop.permute.xlu1 %3595  ;;  %v3667_v63 = vpop.permute.xlu0 %3666 }
 0x645   : > { %v3614_v24 = vmul.f32 %v3596_v56, %v12259_v59  ;;  %v3686_v13 = vmul.f32 %v3667_v63, %v12260_v39  ;;  %v12264_v59 = vld [vmem:[#allocation93_spill] sm:$0xff] }
 0x647   : > { %3635 = vrot.lane.b32.xlu0 %v3614_v24, %s11990_s23  ;;  %3706 = vrot.lane.b32.xlu1 %v3686_v13, %s11990_s23  ;;  %v12265_v13 = vld [vmem:[#allocation20_spill] sm:$0xff] }
 0x648   : > { %v3853_v1 = vpop.permute.xlu1 %3852  ;;  %v3740_v33 = vpop.permute.xlu0 %3739  ;;  %v3872_v24 = vmul.f32 %v3857_v55, %v12265_v13  ;;  %v12270_v55 = vld [vmem:[#allocation75_spill] sm:$0xff] }
 0x649   : > { %v3870_v9 = vmul.f32 %v3853_v1, %v12261_v35  ;;  %v3759_v56 = vmul.f32 %v3740_v33, %v12263_v60  ;;  %v12266_v1 = vld [vmem:[#allocation28_spill] sm:$0xff]  ;;  %v12268_v33 = vld [vmem:[#allocation27_spill] sm:$0xff] }
 0x64a   : > { %v3873_v35 = vmul.f32 %v3859_v58, %v12266_v1 }
 0x64b   : > { %3887 = vrot.lane.b32.xlu0 %v3870_v9, %s11990_s23 }
 0x64c   : > { %v3669_v61 = vpop.permute.xlu1 %3668  ;;  %v3855_v9 = vpop.permute.xlu0 %3854 }
 0x64d   : > { %v3687_v6 = vmul.f32 %v3669_v61, %v12262_v26  ;;  %v12267_v61 = vld [vmem:[#allocation29_spill] sm:$0xff] }
 0x64f   : > { %3708 = vrot.lane.b32.xlu0 %v3687_v6, %s11990_s23  ;;  %v3871_v6 = vmul.f32 %v3855_v9, %v12267_v61  ;;  %v3443_v61 = vadd.f32 %v10020_v36, %v9789_v51 }
 0x650   : > { %v3742_v22 = vpop.permute.xlu1 %3741  ;;  %v10301_v58 = vpop.permute.xlu0 %3434 }
 0x651   : > { %v3760_v63 = vmul.f32 %v3742_v22, %v12264_v59 }
 0x653   : > { %3781 = vrot.lane.b32.xlu1 %v3760_v63, %s11990_s23  ;;  %3779 = vrot.lane.b32.xlu0 %v3759_v56, %s11990_s23  ;;  %v12269_v56 = vld [vmem:[#allocation12_spill] sm:$0xff] }
 0x654   : > { %v10292_v26 = vpop.permute.xlu1 %3432 }
 0x657   : > { %3891 = vrot.lane.b32.xlu1 %v3872_v24, %s11990_s23  ;;  %3893 = vrot.lane.b32.xlu0 %v3873_v35, %s11990_s23  ;;  %v12271_v35 = vld [vmem:[#allocation77_spill] sm:$0xff] }
 0x65b   : > { %3958 = vrot.lane.b32.xlu1 %v12268_v33, %s11990_s23  ;;  %3889 = vrot.lane.b32.xlu0 %v3871_v6, %s11990_s23 }
 0x65d   : > { %v3552_v22 = vpop.permute.xlu1 %3551  ;;  %v10305_v24 = vpop.permute.xlu0 %3557 }
 0x65f   : > { %3962 = vrot.lane.b32.xlu1 %v12269_v56, %s11990_s23  ;;  %3960 = vrot.lane.b32.xlu0 %v12270_v55, %s11990_s23  ;;  %v3486_v55 = vadd.f32 %v3443_v61, %v9796_v50 }
 0x661   : > { %v3626_v63 = vpop.permute.xlu1 %3625  ;;  %v10307_v33 = vpop.permute.xlu0 %3631  ;;  %v3575_v59 = vadd.f32 %v3552_v22, %v3486_v55 }
 0x663   : > { %3964 = vrot.lane.b32.xlu0 %v12271_v35, %s11990_s23  ;;  %v3444_v35 = vadd.f32 %v10199_v34, %v10053_v37  ;;  %v3649_v20 = vadd.f32 %v3626_v63, %v3575_v59 }
 0x665   : > { %v3703_v9 = vpop.permute.xlu1 %3702  ;;  %v3884_v56 = vpop.permute.xlu0 %3883  ;;  %v3487_v62 = vadd.f32 %v10185_v27, %v3444_v35 }
 0x669   : > { %v3776_v1 = vpop.permute.xlu1 %3775 }
 0x66d   : > { %v3556_v6 = vpop.permute.xlu1 %3555 }
 0x671   : > { %v3630_v13 = vpop.permute.xlu1 %3629 }
 0x675   : > { %v3699_v60 = vpop.permute.xlu1 %3698  ;;  %v3554_v39 = vpop.permute.xlu0 %3553 }
 0x676   : > { %v3722_v38 = vadd.f32 %v3699_v60, %v3649_v20  ;;  %v3576_v43 = vadd.f32 %v3554_v39, %v3487_v62  ;;  %v7514_v20 = vld [vmem:[%s11827_s5 + $0x8] sm:$0xf] }
 0x677   : > { %7909 = vmatprep.subr.msk.bf16.mxu1 %vm2220_vm3, %v7514_v20 }
 0x679   : > { %v3772_v31 = vpop.permute.xlu1 %3771  ;;  %v3628_v30 = vpop.permute.xlu0 %3627 }
 0x67a   : > { %v3795_v28 = vadd.f32 %v3772_v31, %v3722_v38  ;;  %v3650_v44 = vadd.f32 %v3628_v30, %v3576_v43 }
 0x67c   : > { %v3838_v36 = vadd.f32 %v10207_v45, %v3795_v28  ;;  %v4023_v28 = vsel %vm2220_vm3, %v7514_v20, 0 }
 0x67d   : > { %v3882_v51 = vpop.permute.xlu1 %3881  ;;  %v3701_v15 = vpop.permute.xlu0 %3700  ;;  %7720 = vmatpush3.bf16.msra.mxu1 %v4023_v28 }
 0x67e   : > { %v3902_v61 = vadd.f32 %v3882_v51, %v3838_v36  ;;  %v3723_v22 = vadd.f32 %v3701_v15, %v3650_v44  ;;  %v3446_v36 = vadd.f32 %v10023_v19, %v10231_v42  ;;  %v3450_v19 = vadd.f32 %v10106_v53, %v10301_v58 }
 0x680   : > { %v3918_v50 = vmul.f32 %v10155_v4, %v3902_v61 }
 0x681   : > { %v3774_v55 = vpop.permute.xlu0 %3773 }
 0x682   : > { %v3796_v47 = vadd.f32 %v3774_v55, %v3723_v22  ;;  %v3934_v31 = vadd.f32 %v10149_v18, %v3918_v50  ;;  %v3489_v55 = vadd.f32 %v10173_v10, %v3446_v36 }
 0x684   : > { %v3839_v37 = vadd.f32 %v10180_v29, %v3796_v47  ;;  %v10326_v51 = vadd.f32 %v10162_v48, %v3934_v31  ;;  %v3578_v31 = vadd.f32 %v10305_v24, %v3489_v55  ;;  %v3448_v24 = vadd.f32 %v10265_v17, %v10133_v2 }
 0x686   : > { %v3903_v62 = vadd.f32 %v3884_v56, %v3839_v37  ;;  %12272 = vst [vmem:[#allocation24_spill] sm:$0xff] %v10326_v51  ;;  %v11968_v43 = vmax.f32 %v10326_v51, 0.0  ;;  %v12310_v51 = vld [vmem:[#allocation88_spill] sm:$0xff] }
 0x688   : > { %v3919_v44 = vmul.f32 %v10155_v4, %v3903_v62 }
 0x68a   : > { %v3935_v15 = vadd.f32 %v10149_v18, %v3919_v44 }
 0x68c   : > { %v10330_v47 = vadd.f32 %v10158_v11, %v3935_v15  ;;  %v3445_v11 = vadd.f32 %v10016_v46, %v10223_v7  ;;  %v3652_v7 = vadd.f32 %v10307_v33, %v3578_v31  ;;  %v3493_v33 = vadd.f32 %v10229_v5, %v3450_v19 }
 0x68d   : > { %v3705_v38 = vpop.permute.xlu0 %3704 }
 0x68e   : > { %12273 = vst [vmem:[#allocation33_spill] sm:$0xff] %v10330_v47  ;;  %v11967_v50 = vmax.f32 %v10330_v47, 0.0  ;;  %v3488_v34 = vadd.f32 %v10203_v57, %v3445_v11  ;;  %v3449_v57 = vadd.f32 %v10081_v21, %v10292_v26  ;;  %v3725_v62 = vadd.f32 %v3705_v38, %v3652_v7  ;;  %v12309_v47 = vld [vmem:[#allocation15_spill] sm:$0xff] }
 0x690   : > { %v3994_v30 = vpack.c.bf16 %v11967_v50, %v11968_v43  ;;  %v3577_v60 = vadd.f32 %v3556_v6, %v3488_v34  ;;  %v3492_v10 = vadd.f32 %v10263_v52, %v3449_v57  ;;  %v12305_v50 = vld [vmem:[#allocation87_spill] sm:$0xff] }
 0x691   : > { %v3778_v59 = vpop.permute.xlu0 %3777 }
 0x692   : > { %4002 = vrot.lane.b32.xlu1 %v3994_v30, %s11994_s24  ;;  %v3651_v63 = vadd.f32 %v3630_v13, %v3577_v60  ;;  %v3798_v42 = vadd.f32 %v3778_v59, %v3725_v62  ;;  %v3491_v30 = vadd.f32 %v10235_v40, %v3448_v24 }
 0x694   : > { %v3724_v61 = vadd.f32 %v3703_v9, %v3651_v63  ;;  %v3841_v15 = vadd.f32 %v10239_v16, %v3798_v42 }
 0x695   : > { %v3560_v39 = vpop.permute.xlu1 %3559 }
 0x696   : > { %v3797_v37 = vadd.f32 %v3776_v1, %v3724_v61 }
 0x698   : > { %v3840_v13 = vadd.f32 %v10183_v49, %v3797_v37  ;;  %v3447_v49 = vadd.f32 %v10227_v12, %v10088_v8 }
 0x699   : > { %v3634_v48 = vpop.permute.xlu1 %3633  ;;  %v3566_v29 = vpop.permute.xlu0 %3565 }
 0x69a   : > { %v3582_v53 = vadd.f32 %v3566_v29, %v3493_v33  ;;  %v3490_v2 = vadd.f32 %v10178_v14, %v3447_v49 }
 0x69c   : > { %v3579_v12 = vadd.f32 %v3560_v39, %v3490_v2  ;;  %v12280_v2 = vld [vmem:[#allocation61_spill] sm:$0xff] }
 0x69d   : > { %v3886_v27 = vpop.permute.xlu1 %3885  ;;  %v3640_v45 = vpop.permute.xlu0 %3639 }
 0x69e   : > { %v3904_v28 = vadd.f32 %v3886_v27, %v3840_v13  ;;  %v3656_v59 = vadd.f32 %v3640_v45, %v3582_v53  ;;  %v3653_v40 = vadd.f32 %v3634_v48, %v3579_v12 }
 0x6a0   : > { %v3920_v21 = vmul.f32 %v10155_v4, %v3904_v28 }
 0x6a1   : > { %v3713_v56 = vpop.permute.xlu1 %3712  ;;  %v3711_v35 = vpop.permute.xlu0 %3710 }
 0x6a2   : > { %v3936_v52 = vadd.f32 %v10149_v18, %v3920_v21  ;;  %v3729_v27 = vadd.f32 %v3713_v56, %v3656_v59 }
 0x6a4   : > { %v10365_v16 = vadd.f32 %v10166_v0, %v3936_v52  ;;  %v7515_v52 = vld [vmem:[%s11828_s6 + $0x4] sm:$0x3] }
 0x6a5   : > { %v3784_v22 = vpop.permute.xlu1 %3783  ;;  %v3786_v20 = vpop.permute.xlu0 %3785 }
 0x6a6   : > { %12274 = vst [vmem:[#allocation32_spill] sm:$0xff] %v10365_v16  ;;  %v3802_v63 = vadd.f32 %v3786_v20, %v3729_v27  ;;  %v11970_v56 = vmax.f32 %v10365_v16, 0.0 }
 0x6a8   : > { %v3845_v0 = vadd.f32 %v3802_v63, %v9800_v23 }
 0x6aa   : > { %v3909_v13 = vadd.f32 %v3845_v0, %v9986_v3 }
 0x6b1   : > { %v3564_v46 = vpop.permute.xlu1 %3563 }
 0x6b2   : > { %v3581_v26 = vadd.f32 %v3564_v46, %v3492_v10 }
 0x6b5   : > { %v3562_v6 = vpop.permute.xlu0 %3561  ;;  %v3638_v1 = vpop.permute.xlu1 %3637 }
 0x6b6   : > { %v3655_v44 = vadd.f32 %v3638_v1, %v3581_v26  ;;  %v3580_v11 = vadd.f32 %v3562_v6, %v3491_v30  ;;  %v3925_v1 = vmul.f32 %v10155_v4, %v3909_v13 }
 0x6b8   : > { %v3728_v17 = vadd.f32 %v3711_v35, %v3655_v44  ;;  %v3941_v44 = vadd.f32 %v10149_v18, %v3925_v1 }
 0x6b9   : > { %v3636_v9 = vpop.permute.xlu0 %3635  ;;  %v3707_v34 = vpop.permute.xlu1 %3706 }
 0x6ba   : > { %v3654_v29 = vadd.f32 %v3636_v9, %v3580_v11  ;;  %v3801_v35 = vadd.f32 %v3784_v22, %v3728_v17  ;;  %v3726_v55 = vadd.f32 %v3707_v34, %v3653_v40  ;;  %v4639_v17 = vrot.slane %v7515_v52, %v12280_v2 }
 0x6bc   : > { %v3844_v48 = vadd.f32 %v10243_v32, %v3801_v35  ;;  %v12283_v35 = vld [vmem:[#allocation82_spill] sm:$0xff] }
 0x6bd   : > { %v3888_v58 = vpop.permute.xlu0 %3887 }
 0x6be   : > { %v3905_v38 = vadd.f32 %v3888_v58, %v3841_v15 }
 0x6c0   : > { %v3921_v5 = vmul.f32 %v10155_v4, %v3905_v38 }
 0x6c1   : > { %v3709_v8 = vpop.permute.xlu0 %3708 }
 0x6c2   : > { %v3937_v60 = vadd.f32 %v10149_v18, %v3921_v5  ;;  %v3727_v14 = vadd.f32 %v3709_v8, %v3654_v29  ;;  %v12281_v8 = vld [vmem:[#allocation81_spill] sm:$0xff] }
 0x6c3   : > { %v4623_v12 = vrot.slane %v7515_v52, %v12281_v8 }
 0x6c4   : > { %v10369_v45 = vadd.f32 %v10170_v41, %v3937_v60  ;;  %v12282_v60 = vld [vmem:[#allocation65_spill] sm:$0xff] }
 0x6c5   : > { %v3782_v36 = vpop.permute.xlu1 %3781  ;;  %v3780_v61 = vpop.permute.xlu0 %3779 }
 0x6c6   : > { %12275 = vst [vmem:[#allocation41_spill] sm:$0xff] %v10369_v45  ;;  %v11969_v39 = vmax.f32 %v10369_v45, 0.0  ;;  %v3800_v37 = vadd.f32 %v3782_v36, %v3727_v14  ;;  %v3799_v31 = vadd.f32 %v3780_v61, %v3726_v55  ;;  %v12284_v61 = vld [vmem:[#allocation16_spill] sm:$0xff] }
 0x6c8   : > { %v3843_v46 = vadd.f32 %v10233_v54, %v3800_v37  ;;  %v3995_v41 = vpack.c.bf16 %v11969_v39, %v11970_v56  ;;  %v3842_v62 = vadd.f32 %v10267_v25, %v3799_v31  ;;  %v12285_v37 = vld [vmem:[#allocation64_spill] sm:$0xff]  ;;  %v12286_v31 = vld [vmem:[#allocation13_spill] sm:$0xff]  ;;  %v12306_v39 = vld [vmem:[#allocation67_spill] sm:$0xff] }
 0x6c9   : > { %v3892_v22 = vpop.permute.xlu1 %3891  ;;  %v3894_v20 = vpop.permute.xlu0 %3893  ;;  %v12307_v56 = vld [vmem:[#allocation35_spill] sm:$0xff] }
 0x6ca   : > { %v3907_v57 = vadd.f32 %v3892_v22, %v3843_v46  ;;  %v3908_v7 = vadd.f32 %v3894_v20, %v3844_v48  ;;  %4004 = vrot.lane.b32.xlu0 %v3995_v41, %s11994_s24 }
 0x6cc   : > { %v3923_v6 = vmul.f32 %v10155_v4, %v3907_v57  ;;  %v3924_v32 = vmul.f32 %v10155_v4, %v3908_v7  ;;  %v12287_v57 = vld [vmem:[#allocation60_spill] sm:$0xff] }
 0x6cd   : > { %v3959_v54 = vpop.permute.xlu1 %3958  ;;  %v3890_v28 = vpop.permute.xlu0 %3889 }
 0x6ce   : > { %v3906_v19 = vadd.f32 %v3890_v28, %v3842_v62  ;;  %v3939_v10 = vadd.f32 %v10149_v18, %v3923_v6  ;;  %v3940_v26 = vadd.f32 %v10149_v18, %v3924_v32 }
 0x6d0   : > { %v3922_v42 = vmul.f32 %v10155_v4, %v3906_v19 }
 0x6d1   : > { %v3963_v9 = vpop.permute.xlu1 %3962  ;;  %v3961_v24 = vpop.permute.xlu0 %3960 }
 0x6d2   : > { %v3938_v21 = vadd.f32 %v10149_v18, %v3922_v42  ;;  %v10390_v33 = vadd.f32 %v3961_v24, %v3939_v10  ;;  %v10392_v25 = vadd.f32 %v3963_v9, %v3940_v26  ;;  %v12289_v42 = vld [vmem:[#allocation59_spill] sm:$0xff]  ;;  %v12290_v9 = vld [vmem:[#allocation10_spill] sm:$0xff] }
 0x6d4   : > { %12276 = vst [vmem:[#allocation40_spill] sm:$0xff] %v10390_v33  ;;  %12277 = vst [vmem:[#allocation46_spill] sm:$0xff] %v10392_v25  ;;  %v10394_v49 = vadd.f32 %v3959_v54, %v3938_v21  ;;  %v11972_v58 = vmax.f32 %v10390_v33, 0.0  ;;  %v11973_v30 = vmax.f32 %v10392_v25, 0.0  ;;  %v12288_v54 = vld [vmem:[#allocation58_spill] sm:$0xff]  ;;  %v12314_v25 = vld [vmem:[#allocation17_spill] sm:$0xff] }
 0x6d5   : > { %v3965_v15 = vpop.permute.xlu0 %3964 }
 0x6d6   : > { %12278 = vst [vmem:[#allocation51_spill] sm:$0xff] %v10394_v49  ;;  %v11971_v53 = vmax.f32 %v10394_v49, 0.0  ;;  %v10399_v4 = vadd.f32 %v3965_v15, %v3941_v44  ;;  %v12291_v44 = vld [vmem:[#allocation14_spill] sm:$0xff] }
 0x6d8   : > { %12279 = vst [vmem:[#allocation50_spill] sm:$0xff] %v10399_v4  ;;  %v3996_v38 = vpack.c.bf16 %v11972_v58, %v11971_v53  ;;  %v11974_v18 = vmax.f32 %v10399_v4, 0.0  ;;  %v12308_v58 = vld [vmem:[#allocation69_spill] sm:$0xff]  ;;  %v12315_v4 = vld [vmem:[#allocation66_spill] sm:$0xff] }
 0x6da   : > { %v3997_v59 = vpack.c.bf16 %v11974_v18, %v11973_v30  ;;  %4006 = vrot.lane.b32.xlu1 %v3996_v38, %s11994_s24 }
 0x6dc   : > { %4008 = vrot.lane.b32.xlu0 %v3997_v59, %s11994_s24 }
 0x6de   : > { %4641 = vrot.lane.b32.xlu1 %v4639_v17, %s11990_s23  ;;  %v12292_v17 = vld [vmem:[#allocation63_spill] sm:$0xff] }
 0x6e0   : > { %4625 = vrot.lane.b32.xlu0 %v4623_v12, %s11990_s23  ;;  %v12294_v12 = vld [vmem:[#allocation78_spill] sm:$0xff] }
 0x704   : > { %v4003_v11 = vpop.permute.xlu1 %4002 }
 0x705   : > { %7721 = vmatprep.mubr.msk.bf16.mxu1 %vm2207_vm4, %v4003_v11 }
 0x73c   : > { %v4005_v5 = vpop.permute.xlu0 %4004 }
 0x73d   : > { %7722 = vmatmul.mubr.msk.bf16.vlgmr.msra.gmra.mxu1 %vm2207_vm4, %v4005_v5 }
 0x74c   : > { %v4007_v27 = vpop.permute.xlu1 %4006 }
 0x74d   : > { %7725 = vmatprep.mubr.msk.bf16.mxu1 %vm2207_vm4, %v4007_v27  ;;  %v12293_v27 = vld [vmem:[#allocation26_spill] sm:$0xff] }
 0x74e   : > { %v4009_v34 = vpop.permute.xlu0 %4008 }
 0x74f   : > { %7726 = vmatmul.mubr.msk.bf16.gmra.mxu1 %vm2207_vm4, %v4009_v34 }
 0x7fd   : > { %v10424_v29 = vpop.f32.mrf.mxu1 }
 0x7fe   : > { %v4163_v63 = vmul.f32 %v10424_v29, %v12282_v60  ;;  %v4514_v36 = vmul.f32 %v10424_v29, %v12283_v35  ;;  %v4209_v22 = vrot.slane %v10424_v29, 1  ;;  %v4101_v62 = vrot.slane %v10424_v29, 7  ;;  %v12317_v35 = vld [vmem:[#allocation68_spill] sm:$0xff] }
 0x7ff   : > { %v10428_v40 = vpop.f32.mrf.mxu1 }
 0x800   : > { %4179 = vrot.lane.b32.xlu1 %v4163_v63, %s8172_s30  ;;  %v4161_v0 = vmul.f32 %v10428_v40, %v12285_v37  ;;  %v4205_v48 = vrot.slane %v10428_v40, 1  ;;  %v4097_v20 = vrot.slane %v10428_v40, 7 }
 0x801   : > { %v10431_v14 = vpop.f32.mrf.mxu1 }
 0x802   : > { %v4164_v55 = vmul.f32 %v10431_v14, %v12284_v61  ;;  %v4515_v46 = vmul.f32 %v10431_v14, %v12286_v31  ;;  %v4211_v41 = vrot.slane %v10431_v14, 1  ;;  %v4206_v7 = vsel %vm2564_vm5, %v12287_v57, %v4205_v48 }
 0x803   : > { %v4103_v6 = vrot.slane %v10431_v14, 7  ;;  %v4098_v28 = vsel %vm1080_vm1, %v12288_v54, %v4097_v20  ;;  %v10461_v19 = vpop.f32.mrf.mxu1 }
 0x804   : > { %4529 = vrot.lane.b32.xlu1 %v4514_v36, %s8173_s26  ;;  %4181 = vrot.lane.b32.xlu0 %v4164_v55, %s8172_s30  ;;  %v4212_v13 = vsel %vm2564_vm5, %v4209_v22, %v4211_v41  ;;  %v4118_v10 = vmul.f32 %v4098_v28, %v12289_v42  ;;  %v4207_v1 = vrot.slane %v10461_v19, 1  ;;  %v4162_v24 = vmul.f32 %v10461_v19, %v12290_v9  ;;  %v12295_v55 = vld [vmem:[#allocation62_spill] sm:$0xff] }
 0x805   : > { %v4104_v32 = vsel %vm1080_vm1, %v4101_v62, %v4103_v6  ;;  %v4099_v26 = vrot.slane %v10461_v19, 7  ;;  %v4513_v15 = vmul.f32 %v10461_v19, %v12291_v44 }
 0x806   : > { %v4210_v21 = vsel %vm2564_vm5, %v4207_v1, %v4209_v22  ;;  %v4208_v38 = vsel %vm2564_vm5, %v4205_v48, %v4207_v1  ;;  %v4121_v34 = vmul.f32 %v4104_v32, %v12293_v27 }
 0x807   : > { %v4102_v52 = vsel %vm1080_vm1, %v4099_v26, %v4101_v62  ;;  %v4100_v59 = vsel %vm1080_vm1, %v4097_v20, %v4099_v26  ;;  %v12297_v20 = vld [vmem:[#allocation74_spill] sm:$0xff] }
 0x808   : > { %4175 = vrot.lane.b32.xlu1 %v4161_v0, %s8172_s30  ;;  %4531 = vrot.lane.b32.xlu0 %v4515_v46, %s8173_s26  ;;  %v4119_v11 = vmul.f32 %v4100_v59, %v12292_v17  ;;  %v4120_v0 = vmul.f32 %v4102_v52, %v12295_v55  ;;  %v12296_v46 = vld [vmem:[#allocation85_spill] sm:$0xff] }
 0x80c   : > { %4221 = vrot.lane.b32.xlu1 %v4206_v7, %s8174_s16  ;;  %4227 = vrot.lane.b32.xlu0 %v4212_v13, %s8174_s16 }
 0x80f   : > { %v10489_v5 = vpop.f32.mrf.mxu1 }
 0x810   : > { %4295 = vrot.lane.b32.xlu1 %v4098_v28, %s8173_s26  ;;  %4301 = vrot.lane.b32.xlu0 %v4104_v32, %s8173_s26  ;;  %v4167_v63 = vmul.f32 %v10489_v5, %v12294_v12  ;;  %v4518_v48 = vmul.f32 %v10489_v5, %v12296_v46  ;;  %v12298_v28 = vld [vmem:[#allocation84_spill] sm:$0xff]  ;;  %v4217_v26 = vrot.slane %v10489_v5, 1 }
 0x811   : > { %v10496_v36 = vpop.f32.mrf.mxu1 }
 0x812   : > { %v4213_v22 = vrot.slane %v10496_v36, 1  ;;  %v4165_v7 = vmul.f32 %v10496_v36, %v12297_v20  ;;  %v4105_v62 = vrot.slane %v10496_v36, 7 }
 0x814   : > { %4372 = vrot.lane.b32.xlu1 %v4212_v13, %s8175_s18  ;;  %4558 = vrot.lane.b32.xlu0 %v4212_v13, %s11988_s17  ;;  %v4214_v13 = vsel %vm2564_vm5, %v4211_v41, %v4213_v22  ;;  %v4106_v1 = vsel %vm1080_vm1, %v4103_v6, %v4105_v62  ;;  %v4109_v6 = vrot.slane %v10489_v5, 7 }
 0x818   : > { %4445 = vrot.lane.b32.xlu1 %v4104_v32, %s11992_s25  ;;  %4132 = vrot.lane.b32.xlu0 %v4118_v10, %s11990_s23  ;;  %v4516_v32 = vmul.f32 %v10496_v36, %v12298_v28  ;;  %v10514_v10 = vpop.f32.mrf.mxu1 }
 0x81c   : > { %4225 = vrot.lane.b32.xlu1 %v4210_v21, %s8174_s16  ;;  %4177 = vrot.lane.b32.xlu0 %v4162_v24, %s8172_s30  ;;  %v12299_v24 = vld [vmem:[#allocation49_spill] sm:$0xff] }
 0x81d   : > { %v4519_v41 = vmul.f32 %v10514_v10, %v12299_v24  ;;  %v12336_v24 = vld [vmem:[#allocation86_spill] sm:$0xff] }
 0x820   : > { %4527 = vrot.lane.b32.xlu0 %v4513_v15, %s8173_s26  ;;  %4299 = vrot.lane.b32.xlu1 %v4102_v52, %s8173_s26  ;;  %v4293_v15 = vrot.slane %v10514_v10, 7 }
 0x824   : > { %4223 = vrot.lane.b32.xlu0 %v4208_v38, %s8174_s16  ;;  %4368 = vrot.lane.b32.xlu1 %v4208_v38, %s8175_s18  ;;  %v4294_v38 = vsel %vm1080_vm1, %v4109_v6, %v4293_v15 }
 0x828   : > { %4441 = vrot.lane.b32.xlu1 %v4100_v59, %s11992_s25  ;;  %4297 = vrot.lane.b32.xlu0 %v4100_v59, %s8173_s26 }
 0x82c   : > { %4556 = vrot.lane.b32.xlu1 %v4210_v21, %s11988_s17  ;;  %4370 = vrot.lane.b32.xlu0 %v4210_v21, %s8175_s18  ;;  %v4219_v21 = vrot.slane %v10514_v10, 1 }
 0x82e   : > { %v4367_v59 = vsel %vm2564_vm5, %v4219_v21, %v12287_v57 }
 0x830   : > { %4443 = vrot.lane.b32.xlu0 %v4102_v52, %s11992_s25  ;;  %4134 = vrot.lane.b32.xlu1 %v4119_v11, %s11990_s23  ;;  %v4220_v52 = vsel %vm2564_vm5, %v4217_v26, %v4219_v21  ;;  %v4440_v11 = vsel %vm1080_vm1, %v4293_v15, %v12288_v54 }
 0x834   : > { %4138 = vrot.lane.b32.xlu0 %v4121_v34, %s11990_s23  ;;  %4187 = vrot.lane.b32.xlu1 %v4167_v63, %s8172_s30  ;;  %v10541_v34 = vpop.f32.mrf.mxu1  ;;  %v12300_v63 = vld [vmem:[#allocation70_spill] sm:$0xff] }
 0x835   : > { %v4107_v15 = vrot.slane %v10541_v34, 7 }
 0x838   : > { %4136 = vrot.lane.b32.xlu0 %v4120_v0, %s11990_s23  ;;  %4537 = vrot.lane.b32.xlu1 %v4518_v48, %s8173_s26  ;;  %v4122_v0 = vmul.f32 %v4106_v1, %v12300_v63  ;;  %v12301_v48 = vld [vmem:[#allocation22_spill] sm:$0xff]  ;;  %v12335_v63 = vld [vmem:[#allocation45_spill] sm:$0xff] }
 0x83c   : > { %4374 = vrot.lane.b32.xlu0 %v4214_v13, %s8175_s18  ;;  %4183 = vrot.lane.b32.xlu1 %v4165_v7, %s8172_s30  ;;  %v4166_v7 = vmul.f32 %v10541_v34, %v12301_v48 }
 0x840   : > { %4533 = vrot.lane.b32.xlu1 %v4516_v32, %s8173_s26  ;;  %4447 = vrot.lane.b32.xlu0 %v4106_v1, %s11992_s25  ;;  %v12302_v32 = vld [vmem:[#allocation47_spill] sm:$0xff] }
 0x844   : > { %4229 = vrot.lane.b32.xlu1 %v4214_v13, %s8174_s16  ;;  %4539 = vrot.lane.b32.xlu0 %v4519_v41, %s8173_s26  ;;  %v4517_v41 = vmul.f32 %v10541_v34, %v12302_v32 }
 0x848   : > { %4303 = vrot.lane.b32.xlu1 %v4106_v1, %s8173_s26  ;;  %4235 = vrot.lane.b32.xlu0 %v4220_v52, %s8174_s16 }
 0x84c   : > { %4560 = vrot.lane.b32.xlu1 %v4214_v13, %s11988_s17  ;;  %4309 = vrot.lane.b32.xlu0 %v4294_v38, %s8173_s26  ;;  %v4215_v13 = vrot.slane %v10541_v34, 1 }
 0x84e   : > { %v4218_v21 = vsel %vm2564_vm5, %v4215_v13, %v4217_v26  ;;  %v4216_v1 = vsel %vm2564_vm5, %v4213_v22, %v4215_v13  ;;  %v10566_v26 = vpop.permute.xlu1 %4641  ;;  %v10570_v22 = vpop.permute.xlu0 %4625 }
 0x850   : > { %4380 = vrot.lane.b32.xlu1 %v4220_v52, %s8175_s18  ;;  %4382 = vrot.lane.b32.xlu0 %v4367_v59, %s8175_s18 }
 0x854   : > { %4453 = vrot.lane.b32.xlu1 %v4294_v38, %s11992_s25  ;;  %4455 = vrot.lane.b32.xlu0 %v4440_v11, %s11992_s25  ;;  %v4108_v38 = vsel %vm1080_vm1, %v4105_v62, %v4107_v15  ;;  %v12304_v62 = vld [vmem:[#allocation34_spill] sm:$0xff] }
 0x858   : > { %4568 = vrot.lane.b32.xlu1 %v4367_v59, %s11988_s17  ;;  %4566 = vrot.lane.b32.xlu0 %v4220_v52, %s11988_s17  ;;  %v4110_v52 = vsel %vm1080_vm1, %v4107_v15, %v4109_v6  ;;  %v12303_v6 = vld [vmem:[#allocation72_spill] sm:$0xff] }
 0x859   : > { %v4124_v59 = vmul.f32 %v4110_v52, %v12303_v6 }
 0x85c   : > { %4140 = vrot.lane.b32.xlu1 %v4122_v0, %s11990_s23  ;;  %4185 = vrot.lane.b32.xlu0 %v4166_v7, %s8172_s30  ;;  %v4123_v0 = vmul.f32 %v4108_v38, %v12304_v62  ;;  %v12327_v62 = vld [vmem:[#allocation89_spill] sm:$0xff] }
 0x860   : > { %4233 = vrot.lane.b32.xlu1 %v4218_v21, %s8174_s16  ;;  %4535 = vrot.lane.b32.xlu0 %v4517_v41, %s8173_s26 }
 0x864   : > { %4231 = vrot.lane.b32.xlu0 %v4216_v1, %s8174_s16  ;;  %4307 = vrot.lane.b32.xlu1 %v4110_v52, %s8173_s26 }
 0x868   : > { %4376 = vrot.lane.b32.xlu1 %v4216_v1, %s8175_s18  ;;  %4305 = vrot.lane.b32.xlu0 %v4108_v38, %s8173_s26 }
 0x86c   : > { %4449 = vrot.lane.b32.xlu1 %v4108_v38, %s11992_s25  ;;  %4562 = vrot.lane.b32.xlu0 %v4216_v1, %s11988_s17 }
 0x870   : > { %4564 = vrot.lane.b32.xlu1 %v4218_v21, %s11988_s17  ;;  %4378 = vrot.lane.b32.xlu0 %v4218_v21, %s8175_s18 }
 0x872   : > { %v10573_v11 = vpop.permute.xlu1 %4179 }
 0x874   : > { %4144 = vrot.lane.b32.xlu1 %v4124_v59, %s11990_s23  ;;  %4451 = vrot.lane.b32.xlu0 %v4110_v52, %s11992_s25 }
 0x876   : > { %v10578_v7 = vpop.permute.xlu1 %4529  ;;  %v10580_v13 = vpop.permute.xlu0 %4181 }
 0x878   : > { %4142 = vrot.lane.b32.xlu0 %v4123_v0, %s11990_s23 }
 0x87a   : > { %v10583_v41 = vpop.permute.xlu1 %4175  ;;  %v10585_v21 = vpop.permute.xlu0 %4531 }
 0x87e   : > { %v4222_v15 = vpop.permute.xlu1 %4221  ;;  %v4228_v1 = vpop.permute.xlu0 %4227 }
 0x87f   : > { %v4245_v43 = vmul.f32 %v4222_v15, %v12305_v50  ;;  %v4248_v59 = vmul.f32 %v4228_v1, %v12306_v39 }
 0x881   : > { %4261 = vrot.lane.b32.xlu0 %v4245_v43, %s11990_s23  ;;  %4267 = vrot.lane.b32.xlu1 %v4248_v59, %s11990_s23 }
 0x882   : > { %v4296_v52 = vpop.permute.xlu1 %4295  ;;  %v4302_v38 = vpop.permute.xlu0 %4301 }
 0x883   : > { %v4319_v53 = vmul.f32 %v4296_v52, %v12307_v56  ;;  %v4322_v0 = vmul.f32 %v4302_v38, %v12308_v58  ;;  %v12311_v52 = vld [vmem:[#allocation39_spill] sm:$0xff] }
 0x884   : > { %v12324_v56 = vld [vmem:[#allocation19_spill] sm:$0xff] }
 0x885   : > { %4335 = vrot.lane.b32.xlu0 %v4319_v53, %s11990_s23  ;;  %4341 = vrot.lane.b32.xlu1 %v4322_v0, %s11990_s23  ;;  %v12312_v0 = vld [vmem:[#allocation11_spill] sm:$0xff] }
 0x886   : > { %v4373_v30 = vpop.permute.xlu1 %4372  ;;  %v4559_v18 = vpop.permute.xlu0 %4558 }
 0x887   : > { %v4394_v15 = vmul.f32 %v4373_v30, %v12309_v47  ;;  %v4578_v1 = vmul.f32 %v4559_v18, %v12310_v51 }
 0x889   : > { %4412 = vrot.lane.b32.xlu0 %v4394_v15, %s11990_s23  ;;  %4593 = vrot.lane.b32.xlu1 %v4578_v1, %s11990_s23  ;;  %v12313_v15 = vld [vmem:[#allocation23_spill] sm:$0xff] }
 0x88a   : > { %v4446_v43 = vpop.permute.xlu1 %4445  ;;  %v10599_v59 = vpop.permute.xlu0 %4132 }
 0x88b   : > { %v4467_v45 = vmul.f32 %v4446_v43, %v12311_v52 }
 0x88d   : > { %4485 = vrot.lane.b32.xlu0 %v4467_v45, %s11990_s23 }
 0x88e   : > { %v4226_v53 = vpop.permute.xlu1 %4225  ;;  %v10603_v38 = vpop.permute.xlu0 %4177 }
 0x88f   : > { %v4247_v16 = vmul.f32 %v4226_v53, %v12312_v0 }
 0x891   : > { %4265 = vrot.lane.b32.xlu0 %v4247_v16, %s11990_s23  ;;  %v12316_v16 = vld [vmem:[#allocation31_spill] sm:$0xff] }
 0x892   : > { %v4300_v30 = vpop.permute.xlu1 %4299  ;;  %v10607_v18 = vpop.permute.xlu0 %4527 }
 0x893   : > { %v4321_v49 = vmul.f32 %v4300_v30, %v12313_v15  ;;  %v12318_v15 = vld [vmem:[#allocation18_spill] sm:$0xff] }
 0x895   : > { %4339 = vrot.lane.b32.xlu0 %v4321_v49, %s11990_s23 }
 0x896   : > { %v4369_v1 = vpop.permute.xlu1 %4368  ;;  %v4224_v33 = vpop.permute.xlu0 %4223 }
 0x897   : > { %v4392_v43 = vmul.f32 %v4369_v1, %v12314_v25  ;;  %v4246_v45 = vmul.f32 %v4224_v33, %v12315_v4  ;;  %v12319_v25 = vld [vmem:[#allocation71_spill] sm:$0xff] }
 0x899   : > { %4408 = vrot.lane.b32.xlu0 %v4392_v43, %s11990_s23  ;;  %4263 = vrot.lane.b32.xlu1 %v4246_v45, %s11990_s23 }
 0x89a   : > { %v4442_v53 = vpop.permute.xlu1 %4441  ;;  %v4298_v51 = vpop.permute.xlu0 %4297 }
 0x89b   : > { %v4465_v44 = vmul.f32 %v4442_v53, %v12316_v16  ;;  %v4320_v0 = vmul.f32 %v4298_v51, %v12317_v35  ;;  %v12320_v53 = vld [vmem:[#allocation76_spill] sm:$0xff]  ;;  %v12323_v35 = vld [vmem:[#allocation30_spill] sm:$0xff] }
 0x89d   : > { %4481 = vrot.lane.b32.xlu0 %v4465_v44, %s11990_s23  ;;  %4337 = vrot.lane.b32.xlu1 %v4320_v0, %s11990_s23 }
 0x89e   : > { %v4557_v49 = vpop.permute.xlu1 %4556  ;;  %v4371_v30 = vpop.permute.xlu0 %4370 }
 0x89f   : > { %v4577_v1 = vmul.f32 %v4557_v49, %v12318_v15  ;;  %v4393_v33 = vmul.f32 %v4371_v30, %v12319_v25  ;;  %v12321_v15 = vld [vmem:[#allocation73_spill] sm:$0xff] }
 0x8a1   : > { %4591 = vrot.lane.b32.xlu0 %v4577_v1, %s11990_s23  ;;  %4410 = vrot.lane.b32.xlu1 %v4393_v33, %s11990_s23 }
 0x8a2   : > { %v10623_v43 = vpop.permute.xlu1 %4134  ;;  %v4444_v45 = vpop.permute.xlu0 %4443 }
 0x8a3   : > { %v4466_v16 = vmul.f32 %v4444_v45, %v12320_v53  ;;  %v12322_v53 = vld [vmem:[#allocation79_spill] sm:$0xff] }
 0x8a5   : > { %4483 = vrot.lane.b32.xlu1 %v4466_v16, %s11990_s23 }
 0x8a6   : > { %v10627_v51 = vpop.permute.xlu1 %4187  ;;  %v10629_v44 = vpop.permute.xlu0 %4138 }
 0x8aa   : > { %v10631_v0 = vpop.permute.xlu1 %4537  ;;  %v10633_v49 = vpop.permute.xlu0 %4136 }
 0x8ae   : > { %v10635_v30 = vpop.permute.xlu1 %4183  ;;  %v4375_v1 = vpop.permute.xlu0 %4374 }
 0x8af   : > { %v4395_v33 = vmul.f32 %v4375_v1, %v12321_v15  ;;  %v12325_v15 = vld [vmem:[#allocation83_spill] sm:$0xff] }
 0x8b1   : > { %4414 = vrot.lane.b32.xlu1 %v4395_v33, %s11990_s23 }
 0x8b2   : > { %v10639_v25 = vpop.permute.xlu1 %4533  ;;  %v4448_v45 = vpop.permute.xlu0 %4447 }
 0x8b3   : > { %v4468_v16 = vmul.f32 %v4448_v45, %v12322_v53 }
 0x8b5   : > { %4487 = vrot.lane.b32.xlu1 %v4468_v16, %s11990_s23  ;;  %v12326_v16 = vld [vmem:[#allocation42_spill] sm:$0xff] }
 0x8b6   : > { %v4230_v4 = vpop.permute.xlu1 %4229  ;;  %v10643_v52 = vpop.permute.xlu0 %4539 }
 0x8b7   : > { %v4249_v47 = vmul.f32 %v4230_v4, %v12323_v35  ;;  %v12328_v35 = vld [vmem:[#allocation44_spill] sm:$0xff] }
 0x8b9   : > { %4269 = vrot.lane.b32.xlu0 %v4249_v47, %s11990_s23 }
 0x8ba   : > { %v4304_v58 = vpop.permute.xlu1 %4303  ;;  %v4236_v39 = vpop.permute.xlu0 %4235 }
 0x8bb   : > { %v4323_v1 = vmul.f32 %v4304_v58, %v12324_v56  ;;  %v4252_v33 = vmul.f32 %v4236_v39, %v12325_v15  ;;  %v12329_v56 = vld [vmem:[#allocation92_spill] sm:$0xff]  ;;  %v12330_v15 = vld [vmem:[#allocation25_spill] sm:$0xff] }
 0x8bd   : > { %4343 = vrot.lane.b32.xlu0 %v4323_v1, %s11990_s23  ;;  %4275 = vrot.lane.b32.xlu1 %v4252_v33, %s11990_s23 }
 0x8be   : > { %v4561_v45 = vpop.permute.xlu1 %4560  ;;  %v4310_v53 = vpop.permute.xlu0 %4309 }
 0x8bf   : > { %v4579_v50 = vmul.f32 %v4561_v45, %v12326_v16  ;;  %v4326_v6 = vmul.f32 %v4310_v53, %v12327_v62  ;;  %v12331_v16 = vld [vmem:[#allocation94_spill] sm:$0xff] }
 0x8c1   : > { %4595 = vrot.lane.b32.xlu0 %v4579_v50, %s11990_s23  ;;  %4349 = vrot.lane.b32.xlu1 %v4326_v6, %s11990_s23 }
 0x8c2   : > { %v4381_v47 = vpop.permute.xlu1 %4380  ;;  %v4383_v4 = vpop.permute.xlu0 %4382 }
 0x8c3   : > { %v4398_v58 = vmul.f32 %v4381_v47, %v12328_v35  ;;  %v4399_v39 = vmul.f32 %v4383_v4, %v12329_v56 }
 0x8c5   : > { %4420 = vrot.lane.b32.xlu1 %v4398_v58, %s11990_s23  ;;  %4422 = vrot.lane.b32.xlu0 %v4399_v39, %s11990_s23  ;;  %v12332_v39 = vld [vmem:[#allocation38_spill] sm:$0xff] }
 0x8c6   : > { %v4454_v1 = vpop.permute.xlu1 %4453  ;;  %v4456_v33 = vpop.permute.xlu0 %4455 }
 0x8c7   : > { %v4471_v45 = vmul.f32 %v4454_v1, %v12330_v15  ;;  %v4472_v53 = vmul.f32 %v4456_v33, %v12331_v16  ;;  %v12333_v33 = vld [vmem:[#allocation43_spill] sm:$0xff] }
 0x8c9   : > { %4493 = vrot.lane.b32.xlu0 %v4471_v45, %s11990_s23  ;;  %4495 = vrot.lane.b32.xlu1 %v4472_v53, %s11990_s23  ;;  %v12334_v45 = vld [vmem:[#allocation80_spill] sm:$0xff] }
 0x8ca   : > { %v4569_v50 = vpop.permute.xlu1 %4568  ;;  %v4567_v6 = vpop.permute.xlu0 %4566 }
 0x8ce   : > { %v10663_v62 = vpop.permute.xlu1 %4140  ;;  %v10665_v47 = vpop.permute.xlu0 %4185 }
 0x8d2   : > { %v4234_v4 = vpop.permute.xlu1 %4233  ;;  %v10667_v58 = vpop.permute.xlu0 %4535 }
 0x8d3   : > { %v4251_v56 = vmul.f32 %v4234_v4, %v12332_v39  ;;  %v12337_v4 = vld [vmem:[#allocation90_spill] sm:$0xff] }
 0x8d5   : > { %4273 = vrot.lane.b32.xlu0 %v4251_v56, %s11990_s23 }
 0x8d6   : > { %v4308_v1 = vpop.permute.xlu1 %4307  ;;  %v4232_v15 = vpop.permute.xlu0 %4231 }
 0x8d7   : > { %v4325_v16 = vmul.f32 %v4308_v1, %v12333_v33  ;;  %v4250_v35 = vmul.f32 %v4232_v15, %v12334_v45  ;;  %v12339_v45 = vld [vmem:[#allocation21_spill] sm:$0xff] }
 0x8d9   : > { %4347 = vrot.lane.b32.xlu0 %v4325_v16, %s11990_s23  ;;  %4271 = vrot.lane.b32.xlu1 %v4250_v35, %s11990_s23  ;;  %v12338_v16 = vld [vmem:[#allocation91_spill] sm:$0xff] }
 0x8da   : > { %v4377_v53 = vpop.permute.xlu1 %4376  ;;  %v4306_v32 = vpop.permute.xlu0 %4305 }
 0x8db   : > { %v4396_v48 = vmul.f32 %v4377_v53, %v12335_v63  ;;  %v4324_v17 = vmul.f32 %v4306_v32, %v12336_v24  ;;  %v12340_v63 = vld [vmem:[#allocation93_spill] sm:$0xff] }
 0x8dd   : > { %4416 = vrot.lane.b32.xlu0 %v4396_v48, %s11990_s23  ;;  %4345 = vrot.lane.b32.xlu1 %v4324_v17, %s11990_s23  ;;  %v12341_v17 = vld [vmem:[#allocation20_spill] sm:$0xff] }
 0x8de   : > { %v4563_v56 = vpop.permute.xlu0 %4562  ;;  %v4450_v15 = vpop.permute.xlu1 %4449  ;;  %v4582_v48 = vmul.f32 %v4567_v6, %v12341_v17  ;;  %v12345_v17 = vld [vmem:[#allocation36_spill] sm:$0xff] }
 0x8df   : > { %v4580_v39 = vmul.f32 %v4563_v56, %v12337_v4  ;;  %v4469_v53 = vmul.f32 %v4450_v15, %v12339_v45  ;;  %v12342_v56 = vld [vmem:[#allocation29_spill] sm:$0xff] }
 0x8e1   : > { %4597 = vrot.lane.b32.xlu1 %v4580_v39, %s11990_s23 }
 0x8e2   : > { %v4379_v1 = vpop.permute.xlu0 %4378  ;;  %v4565_v24 = vpop.permute.xlu1 %4564 }
 0x8e3   : > { %v4397_v33 = vmul.f32 %v4379_v1, %v12338_v16  ;;  %v4581_v39 = vmul.f32 %v4565_v24, %v12342_v56  ;;  %v12343_v1 = vld [vmem:[#allocation28_spill] sm:$0xff]  ;;  %v12344_v24 = vld [vmem:[#allocation37_spill] sm:$0xff] }
 0x8e5   : > { %4418 = vrot.lane.b32.xlu1 %v4397_v33, %s11990_s23  ;;  %v4583_v33 = vmul.f32 %v4569_v50, %v12343_v1 }
 0x8e6   : > { %v4452_v35 = vpop.permute.xlu0 %4451 }
 0x8e7   : > { %v4470_v32 = vmul.f32 %v4452_v35, %v12340_v63  ;;  %v10695_v35 = vpop.permute.xlu1 %4144 }
 0x8e9   : > { %4489 = vrot.lane.b32.xlu1 %v4469_v53, %s11990_s23  ;;  %4491 = vrot.lane.b32.xlu0 %v4470_v32, %s11990_s23 }
 0x8ea   : > { %v10692_v4 = vpop.permute.xlu0 %4142 }
 0x8ed   : > { %4599 = vrot.lane.b32.xlu1 %v4581_v39, %s11990_s23  ;;  %4601 = vrot.lane.b32.xlu0 %v4582_v48, %s11990_s23  ;;  %v4153_v39 = vadd.f32 %v10428_v40, %v12344_v24 }
 0x8ef   : > { %v4196_v50 = vadd.f32 %v4153_v39, %v12345_v17 }
 0x8f1   : > { %4603 = vrot.lane.b32.xlu1 %v4583_v33, %s11990_s23  ;;  %v4154_v33 = vadd.f32 %v10599_v59, %v10461_v19  ;;  %v7520_v19 = vld [vmem:[%s11827_s5 + $0xc] sm:$0xf] }
 0x8f2   : > { %7910 = vmatprep.subr.msk.bf16.mxu1 %vm2220_vm3, %v7520_v19 }
 0x8f3   : > { %v4262_v15 = vpop.permute.xlu0 %4261  ;;  %v4268_v63 = vpop.permute.xlu1 %4267  ;;  %v4197_v55 = vadd.f32 %v10583_v41, %v4154_v33 }
 0x8f4   : > { %v4285_v1 = vadd.f32 %v4262_v15, %v4196_v50 }
 0x8f7   : > { %v4336_v53 = vpop.permute.xlu0 %4335  ;;  %v4342_v6 = vpop.permute.xlu1 %4341 }
 0x8f8   : > { %v4359_v20 = vadd.f32 %v4336_v53, %v4285_v1 }
 0x8fb   : > { %v4413_v32 = vpop.permute.xlu0 %4412  ;;  %v4594_v56 = vpop.permute.xlu1 %4593 }
 0x8ff   : > { %v4486_v45 = vpop.permute.xlu0 %4485 }
 0x903   : > { %v4266_v16 = vpop.permute.xlu0 %4265 }
 0x907   : > { %v4340_v48 = vpop.permute.xlu0 %4339 }
 0x90b   : > { %v4264_v27 = vpop.permute.xlu1 %4263  ;;  %v4409_v28 = vpop.permute.xlu0 %4408 }
 0x90c   : > { %v4432_v9 = vadd.f32 %v4409_v28, %v4359_v20  ;;  %v4286_v31 = vadd.f32 %v4264_v27, %v4197_v55  ;;  %v12346_v27 = vmov 0.0  }
 0x90f   : > { %v4338_v46 = vpop.permute.xlu1 %4337  ;;  %v4482_v42 = vpop.permute.xlu0 %4481 }
 0x910   : > { %v4505_v12 = vadd.f32 %v4482_v42, %v4432_v9  ;;  %v4360_v54 = vadd.f32 %v4338_v46, %v4286_v31  ;;  %v4693_v42 = vsel %vm2220_vm3, %v7520_v19, 0 }
 0x911   : > { %7730 = vmatpush3.bf16.msra.mxu1 %v4693_v42 }
 0x912   : > { %v4548_v40 = vadd.f32 %v10607_v18, %v4505_v12  ;;  %7739 = vmatprep.subr.bf16.mxu1 %v12346_v27 }
 0x913   : > { %v4411_v24 = vpop.permute.xlu1 %4410  ;;  %v4592_v61 = vpop.permute.xlu0 %4591 }
 0x914   : > { %v4433_v39 = vadd.f32 %v4411_v24, %v4360_v54  ;;  %v4612_v15 = vadd.f32 %v4592_v61, %v4548_v40 }
 0x916   : > { %v4628_v20 = vmul.f32 %v10570_v22, %v4612_v15 }
 0x917   : > { %v4484_v50 = vpop.permute.xlu1 %4483 }
 0x918   : > { %v4506_v17 = vadd.f32 %v4484_v50, %v4433_v39  ;;  %v4644_v61 = vadd.f32 %v10566_v26, %v4628_v20  ;;  %v4156_v50 = vadd.f32 %v10431_v14, %v10633_v49  ;;  %v4159_v14 = vadd.f32 %v10489_v5, %v10692_v4 }
 0x91a   : > { %v4549_v28 = vadd.f32 %v10578_v7, %v4506_v17  ;;  %v4652_v12 = vmax.f32 %v4644_v61, 0.0  ;;  %v4199_v20 = vadd.f32 %v10573_v11, %v4156_v50 }
 0x91c   : > { %v4613_v9 = vadd.f32 %v4594_v56, %v4549_v28  ;;  %v4155_v56 = vadd.f32 %v10424_v29, %v10623_v43  ;;  %v4288_v61 = vadd.f32 %v4268_v63, %v4199_v20  ;;  %v4160_v29 = vadd.f32 %v10514_v10, %v10695_v35 }
 0x91d   : > { %v4157_v63 = vadd.f32 %v10629_v44, %v10496_v36  ;;  %v4158_v10 = vadd.f32 %v10663_v62, %v10541_v34 }
 0x91e   : > { %v4629_v31 = vmul.f32 %v10570_v22, %v4613_v9  ;;  %v4198_v1 = vadd.f32 %v10603_v38, %v4155_v56  ;;  %v4362_v38 = vadd.f32 %v4342_v6, %v4288_v61  ;;  %v4202_v6 = vadd.f32 %v10665_v47, %v4159_v14 }
 0x91f   : > { %v4200_v5 = vadd.f32 %v10580_v13, %v4157_v63 }
 0x920   : > { %v4645_v54 = vadd.f32 %v10566_v26, %v4629_v31  ;;  %v4287_v33 = vadd.f32 %v4266_v16, %v4198_v1 }
 0x922   : > { %v4653_v55 = vmax.f32 %v4645_v54, 0.0  ;;  %v4361_v40 = vadd.f32 %v4340_v48, %v4287_v33  ;;  %v4203_v54 = vadd.f32 %v10627_v51, %v4160_v29 }
 0x923   : > { %v4415_v7 = vpop.permute.xlu1 %4414 }
 0x924   : > { %v4664_v46 = vpack.c.bf16 %v4653_v55, %v4652_v12  ;;  %v4434_v19 = vadd.f32 %v4413_v32, %v4361_v40  ;;  %v4435_v31 = vadd.f32 %v4415_v7, %v4362_v38  ;;  %v4201_v7 = vadd.f32 %v10635_v30, %v4158_v10 }
 0x926   : > { %4672 = vrot.lane.b32.xlu0 %v4664_v46, %s11994_s24  ;;  %v4507_v28 = vadd.f32 %v4486_v45, %v4434_v19 }
 0x927   : > { %v4488_v59 = vpop.permute.xlu1 %4487 }
 0x928   : > { %v4550_v43 = vadd.f32 %v10585_v21, %v4507_v28  ;;  %v4508_v11 = vadd.f32 %v4488_v59, %v4435_v31 }
 0x92a   : > { %v4551_v51 = vadd.f32 %v10639_v25, %v4508_v11 }
 0x92b   : > { %v4270_v41 = vpop.permute.xlu0 %4269 }
 0x92c   : > { %v4289_v34 = vadd.f32 %v4270_v41, %v4200_v5 }
 0x92f   : > { %v4276_v18 = vpop.permute.xlu1 %4275  ;;  %v4344_v17 = vpop.permute.xlu0 %4343 }
 0x930   : > { %v4292_v49 = vadd.f32 %v4276_v18, %v4203_v54 }
 0x933   : > { %v4350_v53 = vpop.permute.xlu1 %4349  ;;  %v4596_v24 = vpop.permute.xlu0 %4595 }
 0x934   : > { %v4614_v12 = vadd.f32 %v4596_v24, %v4550_v43  ;;  %v4366_v35 = vadd.f32 %v4350_v53, %v4292_v49  ;;  %v4363_v53 = vadd.f32 %v4344_v17, %v4289_v34 }
 0x936   : > { %v4630_v21 = vmul.f32 %v10570_v22, %v4614_v12 }
 0x937   : > { %v4421_v39 = vpop.permute.xlu1 %4420  ;;  %v4423_v15 = vpop.permute.xlu0 %4422 }
 0x938   : > { %v4439_v55 = vadd.f32 %v4423_v15, %v4366_v35  ;;  %v4646_v36 = vadd.f32 %v10566_v26, %v4630_v21  ;;  %v7521_v35 = vld [vmem:[%s11828_s6 + $0x6] sm:$0x3] }
 0x93a   : > { %v4654_v33 = vmax.f32 %v4646_v36, 0.0 }
 0x93b   : > { %v4496_v42 = vpop.permute.xlu1 %4495  ;;  %v4494_v9 = vpop.permute.xlu0 %4493 }
 0x93c   : > { %v4512_v44 = vadd.f32 %v4496_v42, %v4439_v55 }
 0x93e   : > { %v4555_v13 = vadd.f32 %v4512_v44, %v9800_v23 }
 0x940   : > { %v4619_v61 = vadd.f32 %v4555_v13, %v9986_v3 }
 0x942   : > { %v4635_v31 = vmul.f32 %v10570_v22, %v4619_v61 }
 0x947   : > { %v4274_v16 = vpop.permute.xlu0 %4273 }
 0x948   : > { %v4291_v4 = vadd.f32 %v4274_v16, %v4202_v6 }
 0x94b   : > { %v4272_v48 = vpop.permute.xlu1 %4271  ;;  %v4348_v32 = vpop.permute.xlu0 %4347 }
 0x94c   : > { %v4290_v62 = vadd.f32 %v4272_v48, %v4201_v7  ;;  %v4365_v18 = vadd.f32 %v4348_v32, %v4291_v4  ;;  %v5293_v4 = vrot.slane %v7521_v35, %v12281_v8 }
 0x94e   : > { %v4438_v40 = vadd.f32 %v4421_v39, %v4365_v18 }
 0x94f   : > { %v4346_v45 = vpop.permute.xlu1 %4345  ;;  %v4417_v1 = vpop.permute.xlu0 %4416 }
 0x950   : > { %v4364_v25 = vadd.f32 %v4346_v45, %v4290_v62  ;;  %v4436_v30 = vadd.f32 %v4417_v1, %v4363_v53  ;;  %v4511_v38 = vadd.f32 %v4494_v9, %v4438_v40 }
 0x952   : > { %v4554_v14 = vadd.f32 %v10643_v52, %v4511_v38 }
 0x953   : > { %v4598_v46 = vpop.permute.xlu1 %4597 }
 0x954   : > { %v4615_v59 = vadd.f32 %v4598_v46, %v4551_v51  ;;  %v5309_v51 = vrot.slane %v7521_v35, %v12280_v2  ;;  %v12357_v35 = vld [vmem:[#allocation26_spill] sm:$0xff] }
 0x956   : > { %v4631_v56 = vmul.f32 %v10570_v22, %v4615_v59 }
 0x957   : > { %v4419_v47 = vpop.permute.xlu1 %4418 }
 0x958   : > { %v4647_v24 = vadd.f32 %v10566_v26, %v4631_v56  ;;  %v4437_v50 = vadd.f32 %v4419_v47, %v4364_v25 }
 0x95a   : > { %v4655_v15 = vmax.f32 %v4647_v24, 0.0 }
 0x95b   : > { %v4490_v19 = vpop.permute.xlu1 %4489  ;;  %v4492_v20 = vpop.permute.xlu0 %4491 }
 0x95c   : > { %v4509_v41 = vadd.f32 %v4490_v19, %v4436_v30  ;;  %v4510_v28 = vadd.f32 %v4492_v20, %v4437_v50  ;;  %v4665_v42 = vpack.c.bf16 %v4655_v15, %v4654_v33  ;;  %v12347_v33 = vld [vmem:[#allocation58_spill] sm:$0xff]  ;;  %v12348_v15 = vld [vmem:[#allocation16_spill] sm:$0xff]  ;;  %v12349_v20 = vld [vmem:[#allocation13_spill] sm:$0xff] }
 0x95e   : > { %4674 = vrot.lane.b32.xlu1 %v4665_v42, %s11994_s24  ;;  %v4552_v17 = vadd.f32 %v10667_v58, %v4509_v41  ;;  %v4553_v29 = vadd.f32 %v10631_v0, %v4510_v28  ;;  %v4651_v0 = vadd.f32 %v10566_v26, %v4635_v31  ;;  %v12353_v31 = vld [vmem:[#allocation85_spill] sm:$0xff] }
 0x95f   : > { %v4600_v43 = vpop.permute.xlu1 %4599  ;;  %v4602_v16 = vpop.permute.xlu0 %4601 }
 0x960   : > { %v4616_v39 = vadd.f32 %v4600_v43, %v4552_v17  ;;  %v4617_v48 = vadd.f32 %v4602_v16, %v4553_v29  ;;  %v4659_v6 = vmax.f32 %v4651_v0, 0.0  ;;  %v12350_v29 = vld [vmem:[#allocation78_spill] sm:$0xff] }
 0x961   : > { %v12351_v43 = vld [vmem:[#allocation62_spill] sm:$0xff] }
 0x962   : > { %v4632_v54 = vmul.f32 %v10570_v22, %v4616_v39  ;;  %v4633_v12 = vmul.f32 %v10570_v22, %v4617_v48  ;;  %v12352_v39 = vld [vmem:[#allocation59_spill] sm:$0xff] }
 0x963   : > { %v4604_v11 = vpop.permute.xlu1 %4603 }
 0x964   : > { %v4648_v49 = vadd.f32 %v10566_v26, %v4632_v54  ;;  %v4649_v58 = vadd.f32 %v10566_v26, %v4633_v12  ;;  %v4618_v45 = vadd.f32 %v4604_v11, %v4554_v14  ;;  %v12354_v14 = vld [vmem:[#allocation10_spill] sm:$0xff] }
 0x966   : > { %v4656_v9 = vmax.f32 %v4648_v49, 0.0  ;;  %v4657_v63 = vmax.f32 %v4649_v58, 0.0  ;;  %v4634_v10 = vmul.f32 %v10570_v22, %v4618_v45  ;;  %v12355_v49 = vld [vmem:[#allocation74_spill] sm:$0xff]  ;;  %v12356_v45 = vld [vmem:[#allocation84_spill] sm:$0xff] }
 0x968   : > { %v4650_v21 = vadd.f32 %v10566_v26, %v4634_v10  ;;  %v4666_v32 = vpack.c.bf16 %v4657_v63, %v4656_v9 }
 0x96a   : > { %v4658_v52 = vmax.f32 %v4650_v21, 0.0  ;;  %4676 = vrot.lane.b32.xlu0 %v4666_v32, %s11994_s24 }
 0x96c   : > { %v4667_v55 = vpack.c.bf16 %v4659_v6, %v4658_v52  ;;  %v12358_v52 = vld [vmem:[#allocation63_spill] sm:$0xff] }
 0x96e   : > { %4678 = vrot.lane.b32.xlu1 %v4667_v55, %s11994_s24  ;;  %5311 = vrot.lane.b32.xlu0 %v5309_v51, %s11990_s23 }
 0x972   : > { %5295 = vrot.lane.b32.xlu1 %v5293_v4, %s11990_s23 }
 0x998   : > { %v4673_v46 = vpop.permute.xlu0 %4672 }
 0x999   : > { %7731 = vmatprep.mubr.msk.bf16.mxu1 %vm2207_vm4, %v4673_v46  ;;  %v12359_v46 = vld [vmem:[#allocation49_spill] sm:$0xff] }
 0x9d0   : > { %v4675_v22 = vpop.permute.xlu1 %4674 }
 0x9d1   : > { %7732 = vmatmul.mubr.msk.bf16.vlgmr.msra.gmra.mxu1 %vm2207_vm4, %v4675_v22 }
 0x9dc   : > { %v4677_v5 = vpop.permute.xlu0 %4676 }
 0x9dd   : > { %7735 = vmatprep.mubr.msk.bf16.mxu1 %vm2207_vm4, %v4677_v5 }
 0x9e0   : > { %v4679_v26 = vpop.permute.xlu1 %4678 }
 0x9e1   : > { %7736 = vmatmul.mubr.msk.bf16.gmra.mxu1 %vm2207_vm4, %v4679_v26 }
 0xa91   : > { %v10767_v7 = vpop.f32.mrf.mxu1 }
 0xa92   : > { %v4833_v59 = vmul.f32 %v10767_v7, %v12282_v60  ;;  %v4879_v18 = vrot.slane %v10767_v7, 1  ;;  %v4771_v40 = vrot.slane %v10767_v7, 7 }
 0xa93   : > { %v10771_v36 = vpop.f32.mrf.mxu1 }
 0xa94   : > { %v4831_v44 = vmul.f32 %v10771_v36, %v12285_v37  ;;  %4849 = vrot.lane.b32.xlu0 %v4833_v59, %s8172_s30  ;;  %v4875_v34 = vrot.slane %v10771_v36, 1  ;;  %v4767_v37 = vrot.slane %v10771_v36, 7 }
 0xa95   : > { %v10777_v62 = vpop.f32.mrf.mxu1 }
 0xa96   : > { %4845 = vrot.lane.b32.xlu1 %v4831_v44, %s8172_s30  ;;  %v4881_v56 = vrot.slane %v10777_v62, 1  ;;  %v4876_v53 = vsel %vm2564_vm5, %v12287_v57, %v4875_v34  ;;  %v4768_v13 = vsel %vm1080_vm1, %v12347_v33, %v4767_v37  ;;  %v4834_v50 = vmul.f32 %v10777_v62, %v12348_v15 }
 0xa97   : > { %v10782_v1 = vpop.f32.mrf.mxu1  ;;  %v5185_v41 = vmul.f32 %v10777_v62, %v12349_v20  ;;  %v4773_v42 = vrot.slane %v10777_v62, 7  ;;  %v4788_v48 = vmul.f32 %v4768_v13, %v12352_v39  ;;  %v10904_v20 = vpop.permute.xlu0 %5311 }
 0xa98   : > { %v4882_v60 = vsel %vm2564_vm5, %v4879_v18, %v4881_v56  ;;  %v4877_v47 = vrot.slane %v10782_v1, 1  ;;  %v4769_v24 = vrot.slane %v10782_v1, 7  ;;  %v4832_v11 = vmul.f32 %v10782_v1, %v12354_v14 }
 0xa99   : > { %5228 = vrot.lane.b32.xlu0 %v4882_v60, %s11988_s17  ;;  %v4774_v61 = vsel %vm1080_vm1, %v4771_v40, %v4773_v42 }
 0xa9a   : > { %4891 = vrot.lane.b32.xlu1 %v4876_v53, %s8174_s16  ;;  %v4880_v25 = vsel %vm2564_vm5, %v4877_v47, %v4879_v18  ;;  %v4772_v30 = vsel %vm1080_vm1, %v4769_v24, %v4771_v40  ;;  %v4878_v19 = vsel %vm2564_vm5, %v4875_v34, %v4877_v47  ;;  %v4770_v28 = vsel %vm1080_vm1, %v4767_v37, %v4769_v24  ;;  %v12361_v37 = vld [vmem:[#allocation70_spill] sm:$0xff] }
 0xa9b   : > { %v4790_v16 = vmul.f32 %v4772_v30, %v12351_v43  ;;  %v4791_v21 = vmul.f32 %v4774_v61, %v12357_v35  ;;  %v4789_v6 = vmul.f32 %v4770_v28, %v12358_v52  ;;  %v12367_v35 = vld [vmem:[#allocation67_spill] sm:$0xff] }
 0xa9d   : > { %4895 = vrot.lane.b32.xlu0 %v4880_v25, %s8174_s16 }
 0xa9e   : > { %4965 = vrot.lane.b32.xlu1 %v4768_v13, %s8173_s26 }
 0xaa1   : > { %4969 = vrot.lane.b32.xlu0 %v4772_v30, %s8173_s26  ;;  %v10815_v17 = vpop.f32.mrf.mxu1 }
 0xaa2   : > { %4851 = vrot.lane.b32.xlu1 %v4834_v50, %s8172_s30  ;;  %v4837_v38 = vmul.f32 %v10815_v17, %v12350_v29  ;;  %v5188_v54 = vmul.f32 %v10815_v17, %v12353_v31  ;;  %v4887_v5 = vrot.slane %v10815_v17, 1  ;;  %v4779_v59 = vrot.slane %v10815_v17, 7 }
 0xaa3   : > { %v10829_v12 = vpop.f32.mrf.mxu1 }
 0xaa4   : > { %v4835_v58 = vmul.f32 %v10829_v12, %v12355_v49  ;;  %v5186_v0 = vmul.f32 %v10829_v12, %v12356_v45  ;;  %v4883_v9 = vrot.slane %v10829_v12, 1  ;;  %v4775_v10 = vrot.slane %v10829_v12, 7 }
 0xaa5   : > { %4893 = vrot.lane.b32.xlu0 %v4878_v19, %s8174_s16  ;;  %v10854_v51 = vpop.f32.mrf.mxu1 }
 0xaa6   : > { %5201 = vrot.lane.b32.xlu1 %v5185_v41, %s8173_s26  ;;  %v4884_v63 = vsel %vm2564_vm5, %v4881_v56, %v4883_v9  ;;  %v4776_v32 = vsel %vm1080_vm1, %v4773_v42, %v4775_v10  ;;  %v4889_v55 = vrot.slane %v10854_v51, 1  ;;  %v5189_v22 = vmul.f32 %v10854_v51, %v12359_v46  ;;  %v10908_v41 = vpop.permute.xlu1 %5295 }
 0xaa7   : > { %v4963_v26 = vrot.slane %v10854_v51, 7  ;;  %v10875_v18 = vpop.f32.mrf.mxu1  ;;  %v4792_v53 = vmul.f32 %v4776_v32, %v12361_v37 }
 0xaa8   : > { %v4890_v4 = vsel %vm2564_vm5, %v4887_v5, %v4889_v55  ;;  %v5037_v34 = vsel %vm2564_vm5, %v4889_v55, %v12287_v57  ;;  %v4885_v13 = vrot.slane %v10875_v18, 1 }
 0xaa9   : > { %4967 = vrot.lane.b32.xlu0 %v4770_v28, %s8173_s26  ;;  %v4964_v44 = vsel %vm1080_vm1, %v4779_v59, %v4963_v26  ;;  %v5110_v56 = vsel %vm1080_vm1, %v4963_v26, %v12347_v33 }
 0xaaa   : > { %4897 = vrot.lane.b32.xlu1 %v4882_v60, %s8174_s16  ;;  %v4888_v40 = vsel %vm2564_vm5, %v4885_v13, %v4887_v5  ;;  %v4886_v15 = vsel %vm2564_vm5, %v4883_v9, %v4885_v13  ;;  %v12369_v5 = vld [vmem:[#allocation15_spill] sm:$0xff] }
 0xaad   : > { %5040 = vrot.lane.b32.xlu0 %v4880_v25, %s8175_s18 }
 0xaae   : > { %4971 = vrot.lane.b32.xlu1 %v4774_v61, %s8173_s26 }
 0xab1   : > { %5113 = vrot.lane.b32.xlu0 %v4772_v30, %s11992_s25  ;;  %v4777_v30 = vrot.slane %v10875_v18, 7 }
 0xab2   : > { %5042 = vrot.lane.b32.xlu1 %v4882_v60, %s8175_s18  ;;  %v12360_v60 = vld [vmem:[#allocation22_spill] sm:$0xff] }
 0xab3   : > { %v4836_v47 = vmul.f32 %v10875_v18, %v12360_v60  ;;  %v4780_v50 = vsel %vm1080_vm1, %v4777_v30, %v4779_v59 }
 0xab5   : > { %4857 = vrot.lane.b32.xlu0 %v4837_v38, %s8172_s30 }
 0xab6   : > { %5115 = vrot.lane.b32.xlu1 %v4774_v61, %s11992_s25  ;;  %v12364_v61 = vld [vmem:[#allocation34_spill] sm:$0xff] }
 0xab9   : > { %4806 = vrot.lane.b32.xlu0 %v4790_v16, %s11990_s23 }
 0xaba   : > { %4802 = vrot.lane.b32.xlu1 %v4788_v48, %s11990_s23  ;;  %v12365_v48 = vld [vmem:[#allocation87_spill] sm:$0xff] }
 0xabd   : > { %5207 = vrot.lane.b32.xlu0 %v5188_v54, %s8173_s26 }
 0xabe   : > { %4847 = vrot.lane.b32.xlu1 %v4832_v11, %s8172_s30  ;;  %v12366_v11 = vld [vmem:[#allocation35_spill] sm:$0xff] }
 0xac1   : > { %4853 = vrot.lane.b32.xlu0 %v4835_v58, %s8172_s30 }
 0xac2   : > { %5038 = vrot.lane.b32.xlu1 %v4878_v19, %s8175_s18  ;;  %v4778_v19 = vsel %vm1080_vm1, %v4775_v10, %v4777_v30 }
 0xac3   : > { %v4793_v29 = vmul.f32 %v4778_v19, %v12364_v61 }
 0xac5   : > { %5203 = vrot.lane.b32.xlu0 %v5186_v0, %s8173_s26 }
 0xac6   : > { %5111 = vrot.lane.b32.xlu1 %v4770_v28, %s11992_s25  ;;  %v12363_v28 = vld [vmem:[#allocation72_spill] sm:$0xff] }
 0xac7   : > { %v4794_v42 = vmul.f32 %v4780_v50, %v12363_v28 }
 0xac9   : > { %4899 = vrot.lane.b32.xlu0 %v4884_v63, %s8174_s16 }
 0xaca   : > { %5226 = vrot.lane.b32.xlu1 %v4880_v25, %s11988_s17  ;;  %v12362_v25 = vld [vmem:[#allocation47_spill] sm:$0xff] }
 0xacb   : > { %v5187_v24 = vmul.f32 %v10875_v18, %v12362_v25 }
 0xacd   : > { %4973 = vrot.lane.b32.xlu0 %v4776_v32, %s8173_s26 }
 0xace   : > { %4808 = vrot.lane.b32.xlu1 %v4791_v21, %s11990_s23 }
 0xad1   : > { %5044 = vrot.lane.b32.xlu0 %v4884_v63, %s8175_s18 }
 0xad2   : > { %4804 = vrot.lane.b32.xlu1 %v4789_v6, %s11990_s23  ;;  %v12368_v6 = vld [vmem:[#allocation69_spill] sm:$0xff] }
 0xad5   : > { %5117 = vrot.lane.b32.xlu0 %v4776_v32, %s11992_s25 }
 0xad6   : > { %5230 = vrot.lane.b32.xlu1 %v4884_v63, %s11988_s17 }
 0xad9   : > { %5209 = vrot.lane.b32.xlu0 %v5189_v22, %s8173_s26 }
 0xada   : > { %4905 = vrot.lane.b32.xlu1 %v4890_v4, %s8174_s16 }
 0xadd   : > { %5050 = vrot.lane.b32.xlu0 %v4890_v4, %s8175_s18 }
 0xade   : > { %4979 = vrot.lane.b32.xlu1 %v4964_v44, %s8173_s26 }
 0xae1   : > { %5123 = vrot.lane.b32.xlu0 %v4964_v44, %s11992_s25  ;;  %v12370_v44 = vld [vmem:[#allocation68_spill] sm:$0xff] }
 0xae2   : > { %5052 = vrot.lane.b32.xlu1 %v5037_v34, %s8175_s18 }
 0xae5   : > { %5238 = vrot.lane.b32.xlu0 %v5037_v34, %s11988_s17 }
 0xae6   : > { %5125 = vrot.lane.b32.xlu1 %v5110_v56, %s11992_s25  ;;  %v12371_v56 = vld [vmem:[#allocation39_spill] sm:$0xff] }
 0xae9   : > { %5236 = vrot.lane.b32.xlu0 %v4890_v4, %s11988_s17 }
 0xaea   : > { %4855 = vrot.lane.b32.xlu1 %v4836_v47, %s8172_s30  ;;  %s8179_s30 = smov 48  }
 0xaed   : > { %4810 = vrot.lane.b32.xlu0 %v4792_v53, %s11990_s23  ;;  %v12372_v53 = vld [vmem:[#allocation11_spill] sm:$0xff] }
 0xaee   : > { %5205 = vrot.lane.b32.xlu1 %v5187_v24, %s8173_s26 }
 0xaf1   : > { %4903 = vrot.lane.b32.xlu0 %v4888_v40, %s8174_s16 }
 0xaf2   : > { %4901 = vrot.lane.b32.xlu1 %v4886_v15, %s8174_s16 }
 0xaf5   : > { %4977 = vrot.lane.b32.xlu0 %v4780_v50, %s8173_s26 }
 0xaf6   : > { %4975 = vrot.lane.b32.xlu1 %v4778_v19, %s8173_s26 }
 0xaf9   : > { %5046 = vrot.lane.b32.xlu0 %v4886_v15, %s8175_s18 }
 0xafa   : > { %5048 = vrot.lane.b32.xlu1 %v4888_v40, %s8175_s18 }
 0xafd   : > { %5119 = vrot.lane.b32.xlu0 %v4778_v19, %s11992_s25  ;;  %v12374_v19 = vld [vmem:[#allocation66_spill] sm:$0xff] }
 0xafe   : > { %5121 = vrot.lane.b32.xlu1 %v4780_v50, %s11992_s25  ;;  %s8180_s25 = smov 16  }
 0xb01   : > { %5232 = vrot.lane.b32.xlu0 %v4886_v15, %s11988_s17 }
 0xb02   : > { %5234 = vrot.lane.b32.xlu1 %v4888_v40, %s11988_s17  ;;  %v12373_v40 = vld [vmem:[#allocation23_spill] sm:$0xff]  ;;  %s12432_s17 = smov 96  }
 0xb05   : > { %4814 = vrot.lane.b32.xlu0 %v4794_v42, %s11990_s23  ;;  %v12375_v42 = vld [vmem:[#allocation17_spill] sm:$0xff] }
 0xb06   : > { %4812 = vrot.lane.b32.xlu1 %v4793_v29, %s11990_s23  ;;  %v10914_v38 = vpop.permute.xlu0 %4849 }
 0xb08   : > { %v10916_v43 = vpop.permute.xlu1 %4845 }
 0xb0b   : > { %v10918_v16 = vpop.permute.xlu0 %5228 }
 0xb0c   : > { %v4892_v39 = vpop.permute.xlu1 %4891 }
 0xb0d   : > { %v4915_v31 = vmul.f32 %v4892_v39, %v12365_v48  ;;  %v12377_v48 = vld [vmem:[#allocation71_spill] sm:$0xff] }
 0xb0f   : > { %4931 = vrot.lane.b32.xlu1 %v4915_v31, %s11990_s23  ;;  %v4896_v54 = vpop.permute.xlu0 %4895 }
 0xb10   : > { %v4966_v14 = vpop.permute.xlu1 %4965  ;;  %v4917_v25 = vmul.f32 %v4896_v54, %v12372_v53  ;;  %v12378_v54 = vld [vmem:[#allocation31_spill] sm:$0xff] }
 0xb11   : > { %v4989_v49 = vmul.f32 %v4966_v14, %v12366_v11 }
 0xb13   : > { %5005 = vrot.lane.b32.xlu0 %v4989_v49, %s11990_s23  ;;  %v4970_v58 = vpop.permute.xlu0 %4969  ;;  %v12379_v49 = vld [vmem:[#allocation30_spill] sm:$0xff] }
 0xb14   : > { %v10924_v45 = vpop.permute.xlu1 %4851  ;;  %v4991_v30 = vmul.f32 %v4970_v58, %v12373_v40  ;;  %v12385_v40 = vld [vmem:[#allocation44_spill] sm:$0xff] }
 0xb17   : > { %v4894_v0 = vpop.permute.xlu0 %4893 }
 0xb18   : > { %v10926_v9 = vpop.permute.xlu1 %5201  ;;  %v4916_v28 = vmul.f32 %v4894_v0, %v12374_v19  ;;  %v12386_v19 = vld [vmem:[#allocation89_spill] sm:$0xff] }
 0xb1b   : > { %v4968_v63 = vpop.permute.xlu0 %4967 }
 0xb1c   : > { %v4898_v10 = vpop.permute.xlu1 %4897  ;;  %v4990_v34 = vmul.f32 %v4968_v63, %v12370_v44  ;;  %v12380_v63 = vld [vmem:[#allocation76_spill] sm:$0xff] }
 0xb1d   : > { %v4918_v21 = vmul.f32 %v4898_v10, %v12367_v35 }
 0xb1f   : > { %4937 = vrot.lane.b32.xlu1 %v4918_v21, %s11990_s23  ;;  %v5041_v32 = vpop.permute.xlu0 %5040  ;;  %v12381_v21 = vld [vmem:[#allocation19_spill] sm:$0xff] }
 0xb20   : > { %v4972_v52 = vpop.permute.xlu1 %4971  ;;  %v5063_v31 = vmul.f32 %v5041_v32, %v12377_v48 }
 0xb21   : > { %v4992_v55 = vmul.f32 %v4972_v52, %v12368_v6 }
 0xb23   : > { %5011 = vrot.lane.b32.xlu1 %v4992_v55, %s11990_s23  ;;  %v5114_v46 = vpop.permute.xlu0 %5113  ;;  %v12382_v55 = vld [vmem:[#allocation73_spill] sm:$0xff] }
 0xb24   : > { %v5043_v22 = vpop.permute.xlu1 %5042  ;;  %v5136_v10 = vmul.f32 %v5114_v46, %v12380_v63  ;;  %v12383_v46 = vld [vmem:[#allocation79_spill] sm:$0xff] }
 0xb25   : > { %v5064_v26 = vmul.f32 %v5043_v22, %v12369_v5 }
 0xb27   : > { %5082 = vrot.lane.b32.xlu1 %v5064_v26, %s11990_s23  ;;  %v10934_v4 = vpop.permute.xlu0 %4857 }
 0xb28   : > { %v5116_v59 = vpop.permute.xlu1 %5115 }
 0xb29   : > { %v5137_v60 = vmul.f32 %v5116_v59, %v12371_v56 }
 0xb2b   : > { %5155 = vrot.lane.b32.xlu0 %v5137_v60, %s11990_s23  ;;  %5007 = vrot.lane.b32.xlu1 %v4990_v34, %s11990_s23  ;;  %v10940_v47 = vpop.permute.xlu0 %4806  ;;  %v12384_v60 = vld [vmem:[#allocation83_spill] sm:$0xff] }
 0xb2c   : > { %v10942_v37 = vpop.permute.xlu1 %4802 }
 0xb2f   : > { %4935 = vrot.lane.b32.xlu0 %v4917_v25, %s11990_s23  ;;  %v10946_v24 = vpop.permute.xlu0 %5207 }
 0xb30   : > { %v10948_v13 = vpop.permute.xlu1 %4847 }
 0xb33   : > { %5009 = vrot.lane.b32.xlu0 %v4991_v30, %s11990_s23  ;;  %v10952_v15 = vpop.permute.xlu0 %4853 }
 0xb34   : > { %v5039_v50 = vpop.permute.xlu1 %5038 }
 0xb35   : > { %v5062_v61 = vmul.f32 %v5039_v50, %v12375_v42 }
 0xb37   : > { %4933 = vrot.lane.b32.xlu0 %v4916_v28, %s11990_s23  ;;  %5078 = vrot.lane.b32.xlu1 %v5062_v61, %s11990_s23  ;;  %v10958_v29 = vpop.permute.xlu0 %5203  ;;  %v12387_v61 = vld [vmem:[#allocation25_spill] sm:$0xff] }
 0xb38   : > { %12376 = vst [vmem:[#allocation55_spill] sm:$0xff] %v10958_v29  ;;  %v5112_v39 = vpop.permute.xlu1 %5111 }
 0xb39   : > { %v5135_v14 = vmul.f32 %v5112_v39, %v12378_v54 }
 0xb3b   : > { %5151 = vrot.lane.b32.xlu1 %v5135_v14, %s11990_s23  ;;  %5080 = vrot.lane.b32.xlu0 %v5063_v31, %s11990_s23  ;;  %v4900_v11 = vpop.permute.xlu0 %4899  ;;  %v12388_v31 = vld [vmem:[#allocation92_spill] sm:$0xff] }
 0xb3c   : > { %v4919_v58 = vmul.f32 %v4900_v11, %v12379_v49  ;;  %v10965_v0 = vpop.permute.xlu1 %5226  ;;  %v12389_v49 = vld [vmem:[#allocation94_spill] sm:$0xff] }
 0xb3f   : > { %5153 = vrot.lane.b32.xlu0 %v5136_v10, %s11990_s23  ;;  %4939 = vrot.lane.b32.xlu1 %v4919_v58, %s11990_s23  ;;  %v4974_v35 = vpop.permute.xlu0 %4973  ;;  %v12390_v10 = vld [vmem:[#allocation20_spill] sm:$0xff] }
 0xb40   : > { %v4993_v32 = vmul.f32 %v4974_v35, %v12381_v21  ;;  %v10971_v52 = vpop.permute.xlu1 %4808 }
 0xb43   : > { %5013 = vrot.lane.b32.xlu1 %v4993_v32, %s11990_s23  ;;  %v5045_v6 = vpop.permute.xlu0 %5044  ;;  %v12391_v32 = vld [vmem:[#allocation28_spill] sm:$0xff] }
 0xb44   : > { %v5065_v22 = vmul.f32 %v5045_v6, %v12382_v55  ;;  %v10975_v5 = vpop.permute.xlu1 %4804 }
 0xb45   : > { %v4825_v33 = vadd.f32 %v10767_v7, %v10975_v5 }
 0xb46   : > { %5084 = vrot.lane.b32.xlu0 %v5065_v22, %s11990_s23 }
 0xb47   : > { %v5118_v26 = vpop.permute.xlu0 %5117  ;;  %v4868_v29 = vadd.f32 %v10948_v13, %v4825_v33 }
 0xb48   : > { %v5138_v59 = vmul.f32 %v5118_v26, %v12383_v46  ;;  %v5231_v44 = vpop.permute.xlu1 %5230  ;;  %v12392_v46 = vld [vmem:[#allocation38_spill] sm:$0xff] }
 0xb4a   : > { %5157 = vrot.lane.b32.xlu1 %v5138_v59, %s11990_s23 }
 0xb4b   : > { %v10980_v34 = vpop.permute.xlu0 %5209 }
 0xb4c   : > { %v4906_v56 = vpop.permute.xlu1 %4905 }
 0xb4d   : > { %v4922_v53 = vmul.f32 %v4906_v56, %v12384_v60  ;;  %v12393_v60 = vld [vmem:[#allocation80_spill] sm:$0xff] }
 0xb4f   : > { %4945 = vrot.lane.b32.xlu0 %v4922_v53, %s11990_s23  ;;  %v5051_v25 = vpop.permute.xlu0 %5050 }
 0xb50   : > { %v5068_v30 = vmul.f32 %v5051_v25, %v12385_v40  ;;  %v4980_v50 = vpop.permute.xlu1 %4979  ;;  %v12394_v40 = vld [vmem:[#allocation43_spill] sm:$0xff] }
 0xb51   : > { %v4996_v28 = vmul.f32 %v4980_v50, %v12386_v19  ;;  %v12395_v19 = vld [vmem:[#allocation86_spill] sm:$0xff] }
 0xb52   : > { %5090 = vrot.lane.b32.xlu1 %v5068_v30, %s11990_s23 }
 0xb53   : > { %5019 = vrot.lane.b32.xlu0 %v4996_v28, %s11990_s23  ;;  %v5124_v42 = vpop.permute.xlu0 %5123 }
 0xb54   : > { %v5141_v39 = vmul.f32 %v5124_v42, %v12387_v61  ;;  %v5053_v48 = vpop.permute.xlu1 %5052  ;;  %v12396_v61 = vld [vmem:[#allocation45_spill] sm:$0xff] }
 0xb55   : > { %v5069_v54 = vmul.f32 %v5053_v48, %v12388_v31  ;;  %v12397_v31 = vld [vmem:[#allocation91_spill] sm:$0xff] }
 0xb56   : > { %5163 = vrot.lane.b32.xlu1 %v5141_v39, %s11990_s23 }
 0xb57   : > { %5092 = vrot.lane.b32.xlu0 %v5069_v54, %s11990_s23  ;;  %v5239_v14 = vpop.permute.xlu0 %5238 }
 0xb58   : > { %v5126_v11 = vpop.permute.xlu1 %5125  ;;  %v5253_v6 = vmul.f32 %v5239_v14, %v12391_v32 }
 0xb59   : > { %v5142_v58 = vmul.f32 %v5126_v11, %v12389_v49  ;;  %v12398_v11 = vld [vmem:[#allocation21_spill] sm:$0xff] }
 0xb5b   : > { %5165 = vrot.lane.b32.xlu0 %v5142_v58, %s11990_s23  ;;  %v5237_v63 = vpop.permute.xlu0 %5236 }
 0xb5c   : > { %v5252_v35 = vmul.f32 %v5237_v63, %v12390_v10  ;;  %v10995_v21 = vpop.permute.xlu1 %4855  ;;  %v12399_v63 = vld [vmem:[#allocation93_spill] sm:$0xff] }
 0xb5e   : > { %5271 = vrot.lane.b32.xlu1 %v5252_v35, %s11990_s23  ;;  %v12400_v35 = vld [vmem:[#allocation42_spill] sm:$0xff] }
 0xb5f   : > { %5273 = vrot.lane.b32.xlu0 %v5253_v6, %s11990_s23  ;;  %v11000_v55 = vpop.permute.xlu0 %4810  ;;  %v5249_v32 = vmul.f32 %v5231_v44, %v12400_v35  ;;  %v12401_v6 = vld [vmem:[#allocation82_spill] sm:$0xff] }
 0xb60   : > { %v11002_v22 = vpop.permute.xlu1 %5205 }
 0xb63   : > { %v4904_v26 = vpop.permute.xlu0 %4903 }
 0xb64   : > { %v4921_v59 = vmul.f32 %v4904_v26, %v12392_v46  ;;  %v4902_v56 = vpop.permute.xlu1 %4901  ;;  %v5184_v26 = vmul.f32 %v10767_v7, %v12401_v6  ;;  %v4827_v7 = vadd.f32 %v10971_v52, %v10829_v12 }
 0xb65   : > { %v4920_v53 = vmul.f32 %v4902_v56, %v12393_v60  ;;  %v12403_v60 = vld [vmem:[#allocation14_spill] sm:$0xff] }
 0xb66   : > { %4943 = vrot.lane.b32.xlu1 %v4921_v59, %s11990_s23  ;;  %v12402_v59 = vld [vmem:[#allocation29_spill] sm:$0xff] }
 0xb67   : > { %4941 = vrot.lane.b32.xlu0 %v4920_v53, %s11990_s23  ;;  %v4978_v25 = vpop.permute.xlu0 %4977  ;;  %v5183_v53 = vmul.f32 %v10782_v1, %v12403_v60 }
 0xb68   : > { %v4995_v30 = vmul.f32 %v4978_v25, %v12394_v40  ;;  %v4976_v50 = vpop.permute.xlu1 %4975  ;;  %v12404_v40 = vld [vmem:[#allocation18_spill] sm:$0xff] }
 0xb69   : > { %v4994_v28 = vmul.f32 %v4976_v50, %v12395_v19  ;;  %v5247_v44 = vmul.f32 %v10965_v0, %v12404_v40  ;;  %v12406_v19 = vld [vmem:[#allocation88_spill] sm:$0xff] }
 0xb6a   : > { %5017 = vrot.lane.b32.xlu1 %v4995_v30, %s11990_s23  ;;  %v12405_v30 = vld [vmem:[#allocation90_spill] sm:$0xff] }
 0xb6b   : > { %5015 = vrot.lane.b32.xlu0 %v4994_v28, %s11990_s23  ;;  %v5047_v42 = vpop.permute.xlu0 %5046  ;;  %v5248_v28 = vmul.f32 %v10918_v16, %v12406_v19 }
 0xb6c   : > { %v5066_v39 = vmul.f32 %v5047_v42, %v12396_v61  ;;  %v5049_v48 = vpop.permute.xlu1 %5048 }
 0xb6d   : > { %v5067_v54 = vmul.f32 %v5049_v48, %v12397_v31 }
 0xb6f   : > { %5088 = vrot.lane.b32.xlu1 %v5067_v54, %s11990_s23  ;;  %5086 = vrot.lane.b32.xlu0 %v5066_v39, %s11990_s23  ;;  %v5120_v14 = vpop.permute.xlu0 %5119 }
 0xb70   : > { %v5139_v49 = vmul.f32 %v5120_v14, %v12398_v11  ;;  %v5122_v58 = vpop.permute.xlu1 %5121 }
 0xb71   : > { %v5140_v10 = vmul.f32 %v5122_v58, %v12399_v63 }
 0xb73   : > { %5161 = vrot.lane.b32.xlu1 %v5140_v10, %s11990_s23  ;;  %5159 = vrot.lane.b32.xlu0 %v5139_v49, %s11990_s23  ;;  %v5233_v25 = vpop.permute.xlu0 %5232 }
 0xb74   : > { %v5235_v46 = vpop.permute.xlu1 %5234  ;;  %v5250_v50 = vmul.f32 %v5233_v25, %v12405_v30 }
 0xb75   : > { %v5251_v56 = vmul.f32 %v5235_v46, %v12402_v59 }
 0xb77   : > { %5265 = vrot.lane.b32.xlu1 %v5249_v32, %s11990_s23  ;;  %5199 = vrot.lane.b32.xlu0 %v5184_v26, %s8173_s26  ;;  %v4815_v61 = vpop.permute.xlu0 %4814 }
 0xb78   : > { %v4813_v42 = vpop.permute.xlu1 %4812 }
 0xb79   : > { %v4829_v8 = vadd.f32 %v10815_v17, %v4813_v42 }
 0xb7b   : > { %5197 = vrot.lane.b32.xlu1 %v5183_v53, %s8173_s26  ;;  %5269 = vrot.lane.b32.xlu0 %v5251_v56, %s11990_s23  ;;  %v4830_v53 = vadd.f32 %v10854_v51, %v4815_v61  ;;  %s12436_s26 = smov 32  }
 0xb7f   : > { %5261 = vrot.lane.b32.xlu1 %v5247_v44, %s11990_s23  ;;  %5267 = vrot.lane.b32.xlu0 %v5250_v50, %s11990_s23  ;;  %v4873_v44 = vadd.f32 %v10934_v4, %v4830_v53  ;;  %v4872_v4 = vadd.f32 %v10995_v21, %v4829_v8  ;;  %v12408_v21 = vld [vmem:[#allocation37_spill] sm:$0xff] }
 0xb81   : > { %v11038_v39 = vpop.permute.xlu1 %4931 }
 0xb83   : > { %5263 = vrot.lane.b32.xlu0 %v5248_v28, %s11990_s23  ;;  %s12434_s23 = smov 80  }
 0xb85   : > { %v11040_v48 = vpop.permute.xlu0 %5005 }
 0xb91   : > { %v11042_v31 = vpop.permute.xlu1 %4937 }
 0xb95   : > { %v11046_v54 = vpop.permute.xlu1 %5011 }
 0xb99   : > { %v5083_v11 = vpop.permute.xlu1 %5082 }
 0xb9d   : > { %v11044_v0 = vpop.permute.xlu0 %5155  ;;  %v11048_v58 = vpop.permute.xlu1 %5007 }
 0xba1   : > { %v4936_v14 = vpop.permute.xlu0 %4935 }
 0xba2   : > { %v4957_v53 = vadd.f32 %v4936_v14, %v4868_v29 }
 0xba5   : > { %v5010_v49 = vpop.permute.xlu0 %5009 }
 0xba6   : > { %v5031_v5 = vadd.f32 %v5010_v49, %v4957_v53  ;;  %v4824_v49 = vadd.f32 %v10942_v37, %v10782_v1 }
 0xba8   : > { %v4867_v1 = vadd.f32 %v10916_v43, %v4824_v49  ;;  %v12415_v49 = vld [vmem:[#allocation40_spill] sm:$0xff] }
 0xba9   : > { %v11050_v16 = vpop.permute.xlu0 %4933  ;;  %v11052_v63 = vpop.permute.xlu1 %5078 }
 0xbad   : > { %v11054_v10 = vpop.permute.xlu0 %5080  ;;  %v11056_v35 = vpop.permute.xlu1 %5151 }
 0xbb1   : > { %v11058_v32 = vpop.permute.xlu0 %5153  ;;  %v4940_v6 = vpop.permute.xlu1 %4939 }
 0xbb2   : > { %12407 = vst [vmem:[#allocation54_spill] sm:$0xff] %v11058_v32 }
 0xbb5   : > { %v5014_v59 = vpop.permute.xlu1 %5013 }
 0xbb8   : > { %v11060_v26 = vpop.permute.xlu0 %5084 }
 0xbbc   : > { %v11062_v60 = vpop.permute.xlu1 %5157 }
 0xbc1   : > { %v4946_v46 = vpop.permute.xlu0 %4945 }
 0xbc2   : > { %v4962_v30 = vadd.f32 %v4946_v46, %v4873_v44 }
 0xbc4   : > { %v5091_v40 = vpop.permute.xlu1 %5090 }
 0xbc5   : > { %v5020_v56 = vpop.permute.xlu0 %5019 }
 0xbc6   : > { %v5036_v28 = vadd.f32 %v5020_v56, %v4962_v30  ;;  %v4828_v56 = vadd.f32 %v11000_v55, %v10875_v18  ;;  %v4870_v18 = vadd.f32 %v10924_v45, %v4827_v7  ;;  %v4823_v55 = vadd.f32 %v10771_v36, %v12408_v21  ;;  %v12409_v30 = vld [vmem:[#allocation36_spill] sm:$0xff] }
 0xbc8   : > { %v5164_v19 = vpop.permute.xlu1 %5163  ;;  %v4871_v13 = vadd.f32 %v10952_v15, %v4828_v56  ;;  %v4959_v15 = vadd.f32 %v4940_v6, %v4870_v18  ;;  %v4866_v36 = vadd.f32 %v4823_v55, %v12409_v30 }
 0xbc9   : > { %v5093_v25 = vpop.permute.xlu0 %5092 }
 0xbca   : > { %v5109_v57 = vadd.f32 %v5093_v25, %v5036_v28 }
 0xbcd   : > { %v5166_v50 = vpop.permute.xlu0 %5165 }
 0xbce   : > { %v5182_v27 = vadd.f32 %v5166_v50, %v5109_v57 }
 0xbd0   : > { %v5272_v2 = vpop.permute.xlu1 %5271  ;;  %v5225_v61 = vadd.f32 %v5182_v27, %v9800_v23  ;;  %v4826_v23 = vadd.f32 %v10777_v62, %v10940_v47  ;;  %v5104_v27 = vadd.f32 %v5083_v11, %v5031_v5  ;;  %v5033_v11 = vadd.f32 %v5014_v59, %v4959_v15 }
 0xbd1   : > { %v5274_v32 = vpop.permute.xlu0 %5273  ;;  %v12416_v15 = vmax.f32 %v12415_v49, 0.0  ;;  %v8088_v49 = vld [vmem:[%s11829_s7 + $0x10] sm:$0xff]  }
 0xbd2   : > { %v5289_v57 = vadd.f32 %v5225_v61, %v9986_v3  ;;  %v4869_v62 = vadd.f32 %v10914_v38, %v4826_v23  ;;  %v4955_v38 = vadd.f32 %v11038_v39, %v4866_v36 }
 0xbd4   : > { %v5305_v12 = vmul.f32 %v10908_v41, %v5289_v57  ;;  %v4958_v50 = vadd.f32 %v11042_v31, %v4869_v62  ;;  %v12412_v57 = vld [vmem:[#allocation46_spill] sm:$0xff] }
 0xbd8   : > { %v4944_v51 = vpop.permute.xlu1 %4943 }
 0xbd9   : > { %v4942_v46 = vpop.permute.xlu0 %4941  ;;  %v4961_v25 = vadd.f32 %v4944_v51, %v4872_v4 }
 0xbda   : > { %v4960_v29 = vadd.f32 %v4942_v46, %v4871_v13 }
 0xbdc   : > { %v5018_v17 = vpop.permute.xlu1 %5017 }
 0xbdd   : > { %v5035_v42 = vadd.f32 %v5018_v17, %v4961_v25  ;;  %v5016_v33 = vpop.permute.xlu0 %5015  ;;  %v12410_v25 = vld [vmem:[#allocation50_spill] sm:$0xff] }
 0xbde   : > { %v5034_v44 = vadd.f32 %v5016_v33, %v4960_v29  ;;  %v12411_v7 = vmax.f32 %v12410_v25, 0.0 }
 0xbdf   : > { %v5108_v8 = vadd.f32 %v5091_v40, %v5035_v42  ;;  %v5177_v40 = vadd.f32 %v11044_v0, %v5104_v27  ;;  %v4956_v0 = vadd.f32 %v11050_v16, %v4867_v1 }
 0xbe1   : > { %v5181_v52 = vadd.f32 %v5164_v19, %v5108_v8  ;;  %v5089_v14 = vpop.permute.xlu1 %5088  ;;  %v5087_v3 = vpop.permute.xlu0 %5086  ;;  %v5321_v19 = vadd.f32 %v10904_v20, %v5305_v12  ;;  %v5220_v46 = vadd.f32 %v10926_v9, %v5177_v40  ;;  %v5030_v9 = vadd.f32 %v11048_v58, %v4956_v0  ;;  %v12414_v12 = vld [vmem:[#allocation55_spill] sm:$0xff] }
 0xbe2   : > { %v5107_v45 = vadd.f32 %v5089_v14, %v5034_v44  ;;  %v5106_v37 = vadd.f32 %v5087_v3, %v5033_v11  ;;  %v12417_v44 = vld [vmem:[#allocation54_spill] sm:$0xff]  ;;  %v12418_v40 = vld [vmem:[#allocation51_spill] sm:$0xff]  ;;  %v12422_v0 = vmov 0.0  }
 0xbe3   : > { %v5224_v47 = vadd.f32 %v10980_v34, %v5181_v52  ;;  %v5032_v34 = vadd.f32 %v11046_v54, %v4958_v50  ;;  %v5329_v39 = vadd.f32 %v5321_v19, %v12411_v7  ;;  %v5103_v58 = vadd.f32 %v11054_v10, %v5030_v9  ;;  %7747 = vmatprep.mubr.msk.bf16.mxu1 %vm8178_vm6, %v12422_v0 }
 0xbe4   : > { %v12419_v30 = vmax.f32 %v12418_v40, 0.0 }
 0xbe5   : > { %v5288_v28 = vadd.f32 %v5274_v32, %v5224_v47  ;;  %v5162_v51 = vpop.permute.xlu1 %5161  ;;  %v5160_v61 = vpop.permute.xlu0 %5159  ;;  %v5029_v32 = vadd.f32 %v11040_v48, %v4955_v38  ;;  %v5105_v54 = vadd.f32 %v11060_v26, %v5032_v34  ;;  %v5176_v62 = vadd.f32 %v12417_v44, %v5103_v58  ;;  %v7592_v58 = vld [vmem:[%s11834_s12 + $0x78] sm:$0xff]  ;;  %v8091_v44 = vld [vmem:[%s11829_s7 + $0x28] sm:$0xff]  }
 0xbe6   : > { %v5180_v6 = vadd.f32 %v5162_v51, %v5107_v45  ;;  %v5179_v31 = vadd.f32 %v5160_v61, %v5106_v37 }
 0xbe7   : > { %v5304_v59 = vmul.f32 %v10908_v41, %v5288_v28  ;;  %v5102_v16 = vadd.f32 %v11052_v63, %v5029_v32  ;;  %v5178_v48 = vadd.f32 %v11062_v60, %v5105_v54  ;;  %v12420_v28 = vld [vmem:[#allocation32_spill] sm:$0xff] }
 0xbe8   : > { %v5223_v4 = vadd.f32 %v10946_v24, %v5180_v6  ;;  %v12413_v24 = vmax.f32 %v12412_v57, 0.0  ;;  %v5222_v13 = vadd.f32 %v11002_v22, %v5179_v31  ;;  %v12421_v51 = vmax.f32 %v12420_v28, 0.0 }
 0xbe9   : > { %v5266_v56 = vpop.permute.xlu1 %5265  ;;  %v5200_v53 = vpop.permute.xlu0 %5199  ;;  %v5320_v43 = vadd.f32 %v10904_v20, %v5304_v59  ;;  %v5175_v18 = vadd.f32 %v11056_v35, %v5102_v16  ;;  %v5221_v52 = vadd.f32 %v12414_v12, %v5178_v48  ;;  %v6424_v48 = vld [vmem:[%s11834_s12 + $0x8] sm:$0xff] }
 0xbea   : > { %v5287_v5 = vadd.f32 %v5272_v2, %v5223_v4  ;;  %v5284_v17 = vadd.f32 %v5266_v56, %v5220_v46  ;;  %v5337_v2 = vmax.f32 %v5329_v39, 0.0  ;;  %v5219_v45 = vadd.f32 %v5200_v53, %v5176_v62  ;;  %v12423_v4 = vld [vmem:[#allocation41_spill] sm:$0xff]  ;;  %v8092_v62 = vld [vmem:[%s11829_s7 + $0x30] sm:$0xff]  }
 0xbeb   : > { %v5328_v42 = vadd.f32 %v5320_v43, %v12413_v24  ;;  %v12424_v31 = vmax.f32 %v12423_v4, 0.0  ;;  %v12425_v43 = vld [vmem:[#allocation24_spill] sm:$0xff] }
 0xbec   : > { %v5303_v33 = vmul.f32 %v10908_v41, %v5287_v5  ;;  %v5300_v23 = vmul.f32 %v10908_v41, %v5284_v17  ;;  %v12426_v25 = vmax.f32 %v12425_v43, 0.0  ;;  %v12427_v5 = vld [vmem:[#allocation33_spill] sm:$0xff] }
 0xbed   : > { %v5198_v8 = vpop.permute.xlu1 %5197  ;;  %v5270_v27 = vpop.permute.xlu0 %5269  ;;  %v5336_v26 = vmax.f32 %v5328_v42, 0.0  ;;  %v12428_v17 = vmax.f32 %v12427_v5, 0.0 }
 0xbee   : > { %v5319_v63 = vadd.f32 %v10904_v20, %v5303_v33  ;;  %v5286_v29 = vadd.f32 %v5270_v27, %v5222_v13  ;;  %v5218_v55 = vadd.f32 %v5198_v8, %v5175_v18  ;;  %v5316_v22 = vadd.f32 %v10904_v20, %v5300_v23  ;;  %v7583_v33 = vld [vmem:[%s11834_s12 + $0x20] sm:$0xff]  ;;  %v7582_v13 = vld [vmem:[%s11834_s12 + $0x18] sm:$0xff]  ;;  %v7585_v23 = vld [vmem:[%s11834_s12 + $0x30] sm:$0xff] }
 0xbef   : > { %v5341_v21 = vpack.c.bf16 %v5337_v2, %v5336_v26  ;;  %v7584_v8 = vld [vmem:[%s11834_s12 + $0x28] sm:$0xff]  ;;  %v7587_v27 = vld [vmem:[%s11834_s12 + $0x50] sm:$0xff]  ;;  %v7586_v26 = vld [vmem:[%s11834_s12 + $0x38] sm:$0xff] }
 0xbf0   : > { %v5302_v60 = vmul.f32 %v10908_v41, %v5286_v29  ;;  %v5327_v35 = vadd.f32 %v5319_v63, %v12416_v15  ;;  %v5324_v61 = vadd.f32 %v5316_v22, %v12421_v51  ;;  %v7589_v2 = vld [vmem:[%s11834_s12 + $0x60] sm:$0xff]  ;;  %v7588_v18 = vld [vmem:[%s11834_s12 + $0x58] sm:$0xff]  ;;  %v7591_v63 = vld [vmem:[%s11834_s12 + $0x70] sm:$0xff] }
 0xbf1   : > { %v5262_v14 = vpop.permute.xlu1 %5261  ;;  %5359 = vrot.lane.b32.xlu1 %v5341_v21, %s11994_s24  ;;  %v5268_v3 = vpop.permute.xlu0 %5267  ;;  %v7590_v29 = vld [vmem:[%s11834_s12 + $0x68] sm:$0xff]  ;;  %v7593_v21 = vld [vmem:[%s11834_s12 + $0x80] sm:$0xff]  ;;  %v8089_v15 = vld [vmem:[%s11829_s7 + $0x18] sm:$0xff]  }
 0xbf2   : > { %v5318_v47 = vadd.f32 %v10904_v20, %v5302_v60  ;;  %v5282_v11 = vadd.f32 %v5262_v14, %v5218_v55  ;;  %v5285_v10 = vadd.f32 %v5268_v3, %v5221_v52  ;;  %v5335_v37 = vmax.f32 %v5327_v35, 0.0  ;;  %v7594_v55 = vld [vmem:[%s11834_s12 + $0x88] sm:$0xff]  ;;  %v8086_v14 = vld [vmem:[%s11829_s7] sm:$0xff]  }
 0xbf3   : > { %v5332_v53 = vmax.f32 %v5324_v61, 0.0  ;;  %v8087_v3 = vld [vmem:[%s11829_s7 + $0x8] sm:$0xff]   ;;  %v8090_v35 = vld [vmem:[%s11829_s7 + $0x20] sm:$0xff]  }
 0xbf4   : > { %v5326_v36 = vadd.f32 %v5318_v47, %v12419_v30  ;;  %v5298_v50 = vmul.f32 %v10908_v41, %v5282_v11  ;;  %v5301_v19 = vmul.f32 %v10908_v41, %v5285_v10  ;;  %v8093_v47 = vld [vmem:[%s11829_s7 + $0x38] sm:$0xff]   ;;  %v7560_v11 = vld [vmem:[%s11830_s8 + $0x4] sm:$0xf]  ;;  %v5835_v51 = vld [vmem:[%s11830_s8] sm:$0xf] }
 0xbf5   : > { %v5264_v1 = vpop.permute.xlu0 %5263  ;;  %v8094_v10 = vld [vmem:[%s11829_s7 + $0x40] sm:$0xff]  }
 0xbf6   : > { %v5334_v6 = vmax.f32 %v5326_v36, 0.0  ;;  %v5314_v38 = vadd.f32 %v10904_v20, %v5298_v50  ;;  %v5317_v34 = vadd.f32 %v10904_v20, %v5301_v19  ;;  %v5283_v59 = vadd.f32 %v5264_v1, %v5219_v45 }
 0xbf7   : > { %v5842_v45 = vsel %vm2220_vm3, %v7560_v11, 0 }
 0xbf8   : > { %v5325_v46 = vadd.f32 %v5317_v34, %v12424_v31  ;;  %v5299_v32 = vmul.f32 %v10908_v41, %v5283_v59  ;;  %v5340_v56 = vpack.c.bf16 %v5335_v37, %v5334_v6  ;;  %v5322_v7 = vadd.f32 %v5314_v38, %v12426_v25  ;;  %v6423_v41 = vld [vmem:[%s11834_s12] sm:$0xff]  ;;  %v7563_v38 = vld [vmem:[%s11830_s8 + $0x8] sm:$0xf] }
 0xbf9   : > { %v5889_v37 = vsel %vm2220_vm3, %v5835_v51, 0  ;;  %v5938_v59 = vsel %vm2220_vm3, %v7563_v38, 0 }
 0xbfa   : > { %v5333_v39 = vmax.f32 %v5325_v46, 0.0  ;;  %v5315_v54 = vadd.f32 %v10904_v20, %v5299_v32  ;;  %5357 = vrot.lane.b32.xlu0 %v5340_v56, %s11994_s24  ;;  %v5330_v24 = vmax.f32 %v5322_v7, 0.0  ;;  %v7581_v20 = vld [vmem:[%s11834_s12 + $0x10] sm:$0xff]  ;;  %v7565_v46 = vld [vmem:[%s11830_s8 + $0xc] sm:$0xf] }
 0xbfc   : > { %v5323_v16 = vadd.f32 %v5315_v54, %v12428_v17  ;;  %v5339_v57 = vpack.c.bf16 %v5333_v39, %v5332_v53  ;;  %v5989_v53 = vsel %vm2220_vm3, %v7565_v46, 0  ;;  %v7567_v39 = vld [vmem:[%s11830_s8 + $0x10] sm:$0xf] }
 0xbfd   : > { %v6040_v17 = vsel %vm2220_vm3, %v7567_v39, 0 }
 0xbfe   : > { %v5331_v42 = vmax.f32 %v5323_v16, 0.0  ;;  %5355 = vrot.lane.b32.xlu1 %v5339_v57, %s11994_s24 }
 0xc00   : > { %v5338_v9 = vpack.c.bf16 %v5331_v42, %v5330_v24  ;;  %v7569_v42 = vld [vmem:[%s11830_s8 + $0x14] sm:$0xf] }
 0xc02   : > { %6427 = vperm.xlu1 %7967, %v6423_v41   ;;  %5353 = vrot.lane.b32.xlu0 %v5338_v9, %s11994_s24  ;;  %s12437_s24 = smov 64  }
 0xc06   : > { %6462 = vperm.xlu1 %7967, %v7581_v20   ;;  %6432 = vperm.xlu0 %7966, %v6424_v48   ;;  %v6091_v20 = vsel %vm2220_vm3, %v7569_v42, 0 }
 0xc0a   : > { %6498 = vperm.xlu1 %7967, %v7583_v33   ;;  %6467 = vperm.xlu0 %7966, %v7582_v13  }
 0xc0e   : > { %6535 = vperm.xlu1 %7967, %v7585_v23   ;;  %6503 = vperm.xlu0 %7966, %v7584_v8   ;;  %v7571_v23 = vld [vmem:[%s11830_s8 + $0x18] sm:$0xf] }
 0xc12   : > { %6570 = vperm.xlu1 %7967, %v7587_v27   ;;  %6540 = vperm.xlu0 %7966, %v7586_v26   ;;  %v6142_v26 = vsel %vm2220_vm3, %v7571_v23, 0 }
 0xc16   : > { %6605 = vperm.xlu1 %7967, %v7589_v2   ;;  %6575 = vperm.xlu0 %7966, %v7588_v18  }
 0xc1a   : > { %6637 = vperm.xlu1 %7967, %v7591_v63   ;;  %6610 = vperm.xlu0 %7966, %v7590_v29   ;;  %v7573_v29 = vld [vmem:[%s11830_s8 + $0x1c] sm:$0xf] }
 0xc1e   : > { %6669 = vperm.xlu1 %7967, %v7593_v21   ;;  %6642 = vperm.xlu0 %7966, %v7592_v58  }
 0xc22   : > { %6674 = vperm.xlu0 %7966, %v7594_v55   ;;  %v6193_v55 = vsel %vm2220_vm3, %v7573_v29, 0 }
 0xc63   : > { %v11192_v60 = vpop.permute.xlu1 %5359 }
 0xc64   : > { %7740 = vmatpush3.bf16.msra.mxu1 %v11192_v60 }
 0xc65   : > { %7741 = vmatprep.subr.bf16.mxu1 %v12422_v0 }
 0xc6c   : > { %v11196_v12 = vpop.permute.xlu0 %5357 }
 0xc6d   : > { %7742 = vmatpush3.bf16.msra.mxu1 %v11196_v12 }
 0xc6e   : > { %7743 = vmatprep.subr.bf16.mxu1 %v12422_v0 }
 0xc70   : > { %v11200_v52 = vpop.permute.xlu1 %5355 }
 0xc71   : > { %7744 = vmatpush3.bf16.msra.mxu1 %v11200_v52 }
 0xc72   : > { %7745 = vmatprep.subr.bf16.mxu1 %v12422_v0 }
 0xc74   : > { %v11204_v22 = vpop.permute.xlu0 %5353 }
 0xc75   : > { %7746 = vmatpush3.bf16.msra.mxu1 %v11204_v22 }
 0xc76   : > { %7751 = vmatprep.subr.bf16.mxu1 %v12422_v0 }
 0xc78   : > { %7748 = vmatmul.mubr.msk.bf16.vlgmr.msra.gmra.mxu1 %vm5365_vm7, %v8086_v14 }
 0xc79   : > { %7752 = vmatpush3.bf16.msra.mxu1 %v11192_v60  ;;  %7759 = vmatprep.mubr.msk.bf16.mxu1 %vm8178_vm6, %v12422_v0 }
 0xc7a   : > { %7753 = vmatprep.subr.bf16.mxu1 %v12422_v0 }
 0xc7d   : > { %7754 = vmatpush3.bf16.msra.mxu1 %v11196_v12 }
 0xc7e   : > { %7755 = vmatprep.subr.bf16.mxu1 %v12422_v0 }
 0xc81   : > { %7756 = vmatpush3.bf16.msra.mxu1 %v11200_v52 }
 0xc82   : > { %7757 = vmatprep.subr.bf16.mxu1 %v12422_v0 }
 0xc85   : > { %7758 = vmatpush3.bf16.msra.mxu1 %v11204_v22 }
 0xc86   : > { %7763 = vmatprep.subr.bf16.mxu1 %v12422_v0 }
 0xc88   : > { %7760 = vmatmul.mubr.msk.bf16.vlgmr.msra.gmra.mxu1 %vm5365_vm7, %v8087_v3 }
 0xc89   : > { %7764 = vmatpush3.bf16.msra.mxu1 %v11192_v60  ;;  %7771 = vmatprep.mubr.msk.bf16.mxu1 %vm8178_vm6, %v12422_v0 }
 0xc8a   : > { %7765 = vmatprep.subr.bf16.mxu1 %v12422_v0 }
 0xc8d   : > { %7766 = vmatpush3.bf16.msra.mxu1 %v11196_v12 }
 0xc8e   : > { %7767 = vmatprep.subr.bf16.mxu1 %v12422_v0 }
 0xc91   : > { %7768 = vmatpush3.bf16.msra.mxu1 %v11200_v52 }
 0xc92   : > { %7769 = vmatprep.subr.bf16.mxu1 %v12422_v0 }
 0xc95   : > { %7770 = vmatpush3.bf16.msra.mxu1 %v11204_v22 }
 0xc96   : > { %7775 = vmatprep.subr.bf16.mxu1 %v12422_v0 }
 0xc98   : > { %7772 = vmatmul.mubr.msk.bf16.vlgmr.msra.gmra.mxu1 %vm5365_vm7, %v8088_v49 }
 0xc99   : > { %7776 = vmatpush3.bf16.msra.mxu1 %v11192_v60  ;;  %7783 = vmatprep.mubr.msk.bf16.mxu1 %vm8178_vm6, %v12422_v0 }
 0xc9a   : > { %7777 = vmatprep.subr.bf16.mxu1 %v12422_v0 }
 0xc9d   : > { %7778 = vmatpush3.bf16.msra.mxu1 %v11196_v12 }
 0xc9e   : > { %7779 = vmatprep.subr.bf16.mxu1 %v12422_v0 }
 0xca1   : > { %7780 = vmatpush3.bf16.msra.mxu1 %v11200_v52 }
 0xca2   : > { %7781 = vmatprep.subr.bf16.mxu1 %v12422_v0 }
 0xca5   : > { %7782 = vmatpush3.bf16.msra.mxu1 %v11204_v22 }
 0xca6   : > { %7787 = vmatprep.subr.bf16.mxu1 %v12422_v0 }
 0xca8   : > { %7784 = vmatmul.mubr.msk.bf16.vlgmr.msra.gmra.mxu1 %vm5365_vm7, %v8089_v15 }
 0xca9   : > { %7788 = vmatpush3.bf16.msra.mxu1 %v11192_v60  ;;  %7795 = vmatprep.mubr.msk.bf16.mxu1 %vm8178_vm6, %v12422_v0 }
 0xcaa   : > { %7789 = vmatprep.subr.bf16.mxu1 %v12422_v0 }
 0xcad   : > { %7790 = vmatpush3.bf16.msra.mxu1 %v11196_v12 }
 0xcae   : > { %7791 = vmatprep.subr.bf16.mxu1 %v12422_v0 }
 0xcb1   : > { %7792 = vmatpush3.bf16.msra.mxu1 %v11200_v52 }
 0xcb2   : > { %7793 = vmatprep.subr.bf16.mxu1 %v12422_v0 }
 0xcb5   : > { %7794 = vmatpush3.bf16.msra.mxu1 %v11204_v22 }
 0xcb6   : > { %7799 = vmatprep.subr.bf16.mxu1 %v12422_v0 }
 0xcb8   : > { %7796 = vmatmul.mubr.msk.bf16.vlgmr.msra.gmra.mxu1 %vm5365_vm7, %v8090_v35 }
 0xcb9   : > { %7800 = vmatpush3.bf16.msra.mxu1 %v11192_v60  ;;  %7807 = vmatprep.mubr.msk.bf16.mxu1 %vm8178_vm6, %v12422_v0 }
 0xcba   : > { %7801 = vmatprep.subr.bf16.mxu1 %v12422_v0 }
 0xcbd   : > { %7802 = vmatpush3.bf16.msra.mxu1 %v11196_v12 }
 0xcbe   : > { %7803 = vmatprep.subr.bf16.mxu1 %v12422_v0 }
 0xcc1   : > { %7804 = vmatpush3.bf16.msra.mxu1 %v11200_v52 }
 0xcc2   : > { %7805 = vmatprep.subr.bf16.mxu1 %v12422_v0 }
 0xcc5   : > { %7806 = vmatpush3.bf16.msra.mxu1 %v11204_v22 }
 0xcc6   : > { %7811 = vmatprep.subr.bf16.mxu1 %v12422_v0 }
 0xcc8   : > { %7808 = vmatmul.mubr.msk.bf16.vlgmr.msra.gmra.mxu1 %vm5365_vm7, %v8091_v44 }
 0xcc9   : > { %7812 = vmatpush3.bf16.msra.mxu1 %v11192_v60  ;;  %7819 = vmatprep.mubr.msk.bf16.mxu1 %vm8178_vm6, %v12422_v0 }
 0xcca   : > { %7813 = vmatprep.subr.bf16.mxu1 %v12422_v0 }
 0xccd   : > { %7814 = vmatpush3.bf16.msra.mxu1 %v11196_v12 }
 0xcce   : > { %7815 = vmatprep.subr.bf16.mxu1 %v12422_v0 }
 0xcd1   : > { %7816 = vmatpush3.bf16.msra.mxu1 %v11200_v52 }
 0xcd2   : > { %7817 = vmatprep.subr.bf16.mxu1 %v12422_v0 }
 0xcd5   : > { %7818 = vmatpush3.bf16.msra.mxu1 %v11204_v22 }
 0xcd6   : > { %7823 = vmatprep.subr.bf16.mxu1 %v12422_v0 }
 0xcd8   : > { %7820 = vmatmul.mubr.msk.bf16.vlgmr.msra.gmra.mxu1 %vm5365_vm7, %v8092_v62  ;;  %v6304_v62 = vld [vmem:[%s11832_s10] sm:$0xf] }
 0xcd9   : > { %7824 = vmatpush3.bf16.msra.mxu1 %v11192_v60  ;;  %7831 = vmatprep.mubr.msk.bf16.mxu1 %vm8178_vm6, %v12422_v0 }
 0xcda   : > { %7825 = vmatprep.subr.bf16.mxu1 %v12422_v0 }
 0xcdd   : > { %7826 = vmatpush3.bf16.msra.mxu1 %v11196_v12 }
 0xcde   : > { %7827 = vmatprep.subr.bf16.mxu1 %v12422_v0 }
 0xce1   : > { %7828 = vmatpush3.bf16.msra.mxu1 %v11200_v52 }
 0xce2   : > { %7829 = vmatprep.subr.bf16.mxu1 %v12422_v0 }
 0xce5   : > { %7830 = vmatpush3.bf16.msra.mxu1 %v11204_v22 }
 0xce6   : > { %7835 = vmatprep.subr.bf16.mxu1 %v12422_v0 }
 0xce8   : > { %7832 = vmatmul.mubr.msk.bf16.vlgmr.msra.gmra.mxu1 %vm5365_vm7, %v8093_v47 }
 0xce9   : > { %7836 = vmatpush3.bf16.msra.mxu1 %v11192_v60  ;;  %7843 = vmatprep.mubr.msk.bf16.mxu1 %vm8178_vm6, %v12422_v0 }
 0xcea   : > { %7837 = vmatprep.subr.bf16.mxu1 %v12422_v0 }
 0xced   : > { %7838 = vmatpush3.bf16.msra.mxu1 %v11196_v12 }
 0xcee   : > { %7839 = vmatprep.subr.bf16.mxu1 %v12422_v0 }
 0xcf1   : > { %7840 = vmatpush3.bf16.msra.mxu1 %v11200_v52 }
 0xcf2   : > { %7841 = vmatprep.subr.bf16.mxu1 %v12422_v0 }
 0xcf5   : > { %7842 = vmatpush3.bf16.msra.mxu1 %v11204_v22  ;;  %v7575_v22 = vld [vmem:[%s11830_s8 + $0x20] sm:$0xf] }
 0xcf6   : > { %7847 = vmatprep.subr.bf16.mxu1 %v12422_v0  ;;  %v6244_v49 = vsel %vm2220_vm3, %v7575_v22, 0 }
 0xcf8   : > { %7844 = vmatmul.mubr.msk.bf16.vlgmr.msra.gmra.mxu1 %vm5365_vm7, %v8094_v10  ;;  %v6306_v10 = vsel %vm2220_vm3, %v6304_v62, 0 }
 0xcf9   : > { %7848 = vmatpush3.bf16.msra.mxu1 %v5842_v45  ;;  %7849 = vmatprep.mubr.msk.bf16.mxu1 %vm8178_vm6, %v12422_v0 }
 0xcfa   : > { %7853 = vmatprep.subr.bf16.mxu1 %v12422_v0 }
 0xd38   : > { %v5403_v40 = vpop.f32.mrf.mxu1 }
 0xd3a   : > { %v7749_v30 = vpop.f32.mrf.mxu1 }
 0xd3b   : > { %v8097_v30 = vld [vmem:[%s11835_s13 + $0x4] ss:$8 sps:$4 sm:$0xff]  }
 0xd3c   : > { %v5406_v36 = vpop.f32.mrf.mxu1 }
 0xd3d   : > { %v5410_v34 = vpack.c.bf16 %v5406_v36, %v5403_v40  ;;  %v12429_v40 = vmov 0   ;;  %v8095_v36 = vld [vmem:[%s11835_s13] ss:$8 sps:$4 sm:$0xff]  }
 0xd3e   : > { %v7750_v50 = vpop.f32.mrf.mxu1 }
 0xd48   : > { %v5456_v19 = vpop.f32.mrf.mxu1 }
 0xd4a   : > { %v7761_v28 = vpop.f32.mrf.mxu1 }
 0xd4c   : > { %v5459_v61 = vpop.f32.mrf.mxu1 }
 0xd4d   : > { %v5463_v1 = vpack.c.bf16 %v5459_v61, %v5456_v19 }
 0xd4e   : > { %v7762_v6 = vpop.f32.mrf.mxu1 }
 0xd4f   : > { %7850 = vmatmul.mubr.msk.bf16.vlgmr.msra.gmra.mxu1 %vm2207_vm4, %v5463_v1 }
 0xd50   : > { %7854 = vmatpush3.bf16.msra.mxu1 %v5889_v37  ;;  %7855 = vmatprep.mubr.msk.bf16.mxu1 %vm8178_vm6, %v12422_v0 }
 0xd51   : > { %7859 = vmatprep.subr.bf16.mxu1 %v12422_v0 }
 0xd57   : > { %7856 = vmatmul.mubr.msk.bf16.vlgmr.msra.gmra.mxu1 %vm2207_vm4, %v5410_v34 }
 0xd58   : > { %v5509_v4 = vpop.f32.mrf.mxu1  ;;  %7860 = vmatpush3.bf16.msra.mxu1 %v5938_v59  ;;  %7861 = vmatprep.mubr.msk.bf16.mxu1 %vm8178_vm6, %v12422_v0 }
 0xd59   : > { %7865 = vmatprep.subr.bf16.mxu1 %v12422_v0 }
 0xd5a   : > { %v7773_v31 = vpop.f32.mrf.mxu1 }
 0xd5c   : > { %v5512_v32 = vpop.f32.mrf.mxu1 }
 0xd5d   : > { %v5516_v56 = vpack.c.bf16 %v5512_v32, %v5509_v4 }
 0xd5e   : > { %v7774_v43 = vpop.f32.mrf.mxu1 }
 0xd5f   : > { %7862 = vmatmul.mubr.msk.bf16.vlgmr.msra.gmra.mxu1 %vm2207_vm4, %v5516_v56 }
 0xd60   : > { %7866 = vmatpush3.bf16.msra.mxu1 %v5989_v53  ;;  %7867 = vmatprep.mubr.msk.bf16.mxu1 %vm8178_vm6, %v12422_v0 }
 0xd61   : > { %7871 = vmatprep.subr.bf16.mxu1 %v12422_v0 }
 0xd68   : > { %v5562_v25 = vpop.f32.mrf.mxu1 }
 0xd6a   : > { %v7785_v7 = vpop.f32.mrf.mxu1 }
 0xd6c   : > { %v5565_v54 = vpop.f32.mrf.mxu1 }
 0xd6d   : > { %v5569_v5 = vpack.c.bf16 %v5565_v54, %v5562_v25 }
 0xd6e   : > { %v7786_v16 = vpop.f32.mrf.mxu1 }
 0xd6f   : > { %7868 = vmatmul.mubr.msk.bf16.vlgmr.msra.gmra.mxu1 %vm2207_vm4, %v5569_v5 }
 0xd70   : > { %7872 = vmatpush3.bf16.msra.mxu1 %v6040_v17  ;;  %7873 = vmatprep.mubr.msk.bf16.mxu1 %vm8178_vm6, %v12422_v0 }
 0xd71   : > { %7877 = vmatprep.subr.bf16.mxu1 %v12422_v0 }
 0xd78   : > { %v5615_v57 = vpop.f32.mrf.mxu1 }
 0xd7a   : > { %v7797_v24 = vpop.f32.mrf.mxu1 }
 0xd7c   : > { %v5618_v41 = vpop.f32.mrf.mxu1 }
 0xd7d   : > { %v5622_v9 = vpack.c.bf16 %v5618_v41, %v5615_v57 }
 0xd7e   : > { %v7798_v48 = vpop.f32.mrf.mxu1 }
 0xd7f   : > { %7874 = vmatmul.mubr.msk.bf16.vlgmr.msra.gmra.mxu1 %vm2207_vm4, %v5622_v9 }
 0xd80   : > { %7878 = vmatpush3.bf16.msra.mxu1 %v6091_v20  ;;  %7879 = vmatprep.mubr.msk.bf16.mxu1 %vm8178_vm6, %v12422_v0 }
 0xd81   : > { %7883 = vmatprep.subr.bf16.mxu1 %v12422_v0 }
 0xd88   : > { %v5668_v33 = vpop.f32.mrf.mxu1 }
 0xd8a   : > { %v7809_v13 = vpop.f32.mrf.mxu1 }
 0xd8c   : > { %v5671_v8 = vpop.f32.mrf.mxu1 }
 0xd8d   : > { %v5675_v27 = vpack.c.bf16 %v5671_v8, %v5668_v33 }
 0xd8e   : > { %v7810_v2 = vpop.f32.mrf.mxu1 }
 0xd8f   : > { %7880 = vmatmul.mubr.msk.bf16.vlgmr.msra.gmra.mxu1 %vm2207_vm4, %v5675_v27 }
 0xd90   : > { %7884 = vmatpush3.bf16.msra.mxu1 %v6142_v26  ;;  %7885 = vmatprep.mubr.msk.bf16.mxu1 %vm8178_vm6, %v12422_v0 }
 0xd91   : > { %7889 = vmatprep.subr.bf16.mxu1 %v12422_v0 }
 0xd98   : > { %v5721_v18 = vpop.f32.mrf.mxu1 }
 0xd9a   : > { %v7821_v63 = vpop.f32.mrf.mxu1 }
 0xd9b   : > { %v6289_v63 = vld [vmem:[%s11831_s9] sm:$0x3] }
 0xd9c   : > { %v5724_v21 = vpop.f32.mrf.mxu1 }
 0xd9d   : > { %v5728_v58 = vpack.c.bf16 %v5724_v21, %v5721_v18 }
 0xd9e   : > { %v7822_v60 = vpop.f32.mrf.mxu1 }
 0xd9f   : > { %7886 = vmatmul.mubr.msk.bf16.vlgmr.msra.gmra.mxu1 %vm2207_vm4, %v5728_v58  ;;  %v12430_v60 = vld [vmem:[#allocation81_spill] sm:$0xff] }
 0xda0   : > { %7890 = vmatpush3.bf16.msra.mxu1 %v6193_v55  ;;  %7891 = vmatprep.mubr.msk.bf16.mxu1 %vm8178_vm6, %v12422_v0 }
 0xda1   : > { %7895 = vmatprep.subr.bf16.mxu1 %v12422_v0 }
 0xda8   : > { %v5774_v12 = vpop.f32.mrf.mxu1 }
 0xdaa   : > { %v7833_v52 = vpop.f32.mrf.mxu1 }
 0xdac   : > { %v5777_v14 = vpop.f32.mrf.mxu1 }
 0xdad   : > { %v5781_v3 = vpack.c.bf16 %v5777_v14, %v5774_v12  ;;  %v6293_v12 = vrot.slane %v6289_v63, %v12430_v60 }
 0xdae   : > { %v7834_v15 = vpop.f32.mrf.mxu1 }
 0xdaf   : > { %7892 = vmatmul.mubr.msk.bf16.vlgmr.msra.gmra.mxu1 %vm2207_vm4, %v5781_v3 }
 0xdb0   : > { %7896 = vmatpush3.bf16.msra.mxu1 %v6244_v49  ;;  %7897 = vmatprep.mubr.msk.bf16.mxu1 %vm8178_vm6, %v12422_v0 }
 0xdb1   : > { %7901 = vmatprep.subr.bf16.mxu1 %v12422_v0 }
 0xdb8   : > { %v5827_v35 = vpop.f32.mrf.mxu1 }
 0xdba   : > { %v7845_v44 = vpop.f32.mrf.mxu1 }
 0xdbc   : > { %v5830_v47 = vpop.f32.mrf.mxu1 }
 0xdbd   : > { %v5834_v11 = vpack.c.bf16 %v5830_v47, %v5827_v35  ;;  %v12431_v35 = vld [vmem:[#allocation61_spill] sm:$0xff] }
 0xdbe   : > { %v7846_v45 = vpop.f32.mrf.mxu1  ;;  %v6299_v44 = vrot.slane %v6289_v63, %v12431_v35  ;;  %v12435_v63 = vld [vmem:[#allocation60_spill] sm:$0xff] }
 0xdbf   : > { %7898 = vmatmul.mubr.msk.bf16.vlgmr.msra.gmra.mxu1 %vm2207_vm4, %v5834_v11 }
 0xdc0   : > { %7902 = vmatpush3.bf16.msra.mxu1 %v6306_v10  ;;  %7903 = vmatprep.mubr.msk.bf16.mxu1 %vm8178_vm6, %v12422_v0 }
 0xdc1   : > { %6394 = vmatprep.subr.bf16.mxu1 %v8097_v30 }
 0xdc7   : > { %7904 = vmatmul.mubr.msk.bf16.vlgmr.msra.gmra.mxu1 %vm2207_vm4, %v5622_v9 }
 0xdc8   : > { %6412 = vmatprep.mubr.bf16.mxu1 %v12429_v40  ;;  %6395 = vmatpush1.bf16.msra.mxu1 %v8095_v36 }
 0xe0f   : > { %v5878_v50 = vpop.f32.mrf.mxu1 }
 0xe11   : > { %v7851_v19 = vpop.f32.mrf.mxu1 }
 0xe13   : > { %v5881_v28 = vpop.f32.mrf.mxu1 }
 0xe15   : > { %v7852_v51 = vpop.f32.mrf.mxu1 }
 0xe17   : > { %v5925_v61 = vpop.f32.mrf.mxu1 }
 0xe18   : > { %v5926_v1 = vadd.f32 %v5925_v61, %v5878_v50 }
 0xe19   : > { %v7857_v37 = vpop.f32.mrf.mxu1 }
 0xe1a   : > { %v11421_v37 = vpop.permute.xlu1 %6427 }
 0xe1b   : > { %v5928_v6 = vpop.f32.mrf.mxu1 }
 0xe1c   : > { %v5929_v38 = vadd.f32 %v5928_v6, %v5881_v28  ;;  %v11423_v6 = vpop.permute.xlu0 %6432 }
 0xe1d   : > { %v7858_v34 = vpop.f32.mrf.mxu1 }
 0xe1f   : > { %v5974_v59 = vpop.f32.mrf.mxu1 }
 0xe20   : > { %v5981_v4 = vadd.f32 %v5974_v59, %v5926_v1  ;;  %v11427_v34 = vpop.permute.xlu0 %6467 }
 0xe21   : > { %v7863_v31 = vpop.f32.mrf.mxu1 }
 0xe23   : > { %v5977_v46 = vpop.f32.mrf.mxu1 }
 0xe24   : > { %v5982_v32 = vadd.f32 %v5977_v46, %v5929_v38  ;;  %v11425_v38 = vpop.permute.xlu1 %6462 }
 0xe25   : > { %v7864_v56 = vpop.f32.mrf.mxu1 }
 0xe26   : > { %v11437_v56 = vpop.permute.xlu0 %6503 }
 0xe28   : > { %v11429_v59 = vpop.permute.xlu1 %6498 }
 0xe2f   : > { %v6025_v53 = vpop.f32.mrf.mxu1 }
 0xe30   : > { %v6032_v43 = vadd.f32 %v6025_v53, %v5981_v4  ;;  %v11432_v4 = vrot.slane %v12422_v0, 4 }
 0xe31   : > { %v7869_v25 = vpop.f32.mrf.mxu1 }
 0xe33   : > { %v6028_v7 = vpop.f32.mrf.mxu1 }
 0xe34   : > { %v6033_v39 = vadd.f32 %v6028_v7, %v5982_v32 }
 0xe35   : > { %v7870_v54 = vpop.f32.mrf.mxu1 }
 0xe3f   : > { %v6076_v5 = vpop.f32.mrf.mxu1 }
 0xe40   : > { %v6083_v2 = vadd.f32 %v6076_v5, %v6032_v43  ;;  %v11442_v43 = vrot.slane %v12422_v0, 5 }
 0xe41   : > { %v7875_v17 = vpop.f32.mrf.mxu1 }
 0xe43   : > { %v6079_v16 = vpop.f32.mrf.mxu1 }
 0xe44   : > { %v6084_v29 = vadd.f32 %v6079_v16, %v6033_v39  ;;  %v11448_v39 = vpop.permute.xlu1 %6535 }
 0xe45   : > { %v7876_v57 = vpop.f32.mrf.mxu1 }
 0xe4f   : > { %v6127_v24 = vpop.f32.mrf.mxu1 }
 0xe50   : > { %v6134_v18 = vadd.f32 %v6127_v24, %v6083_v2  ;;  %v11458_v24 = vpop.permute.xlu0 %6540 }
 0xe51   : > { %v7881_v42 = vpop.f32.mrf.mxu1 }
 0xe52   : > { %v11460_v42 = vpop.permute.xlu1 %6570 }
 0xe53   : > { %v6130_v41 = vpop.f32.mrf.mxu1 }
 0xe54   : > { %v6135_v58 = vadd.f32 %v6130_v41, %v6084_v29  ;;  %v12433_v41 = vld [vmem:[#allocation58_spill] sm:$0xff] }
 0xe55   : > { %v7882_v9 = vpop.f32.mrf.mxu1 }
 0xe56   : > { %v11477_v2 = vpop.permute.xlu1 %6605 }
 0xe5f   : > { %v6178_v20 = vpop.f32.mrf.mxu1 }
 0xe60   : > { %v6185_v21 = vadd.f32 %v6178_v20, %v6134_v18 }
 0xe61   : > { %v7887_v48 = vpop.f32.mrf.mxu1 }
 0xe63   : > { %v6181_v33 = vpop.f32.mrf.mxu1 }
 0xe64   : > { %v6186_v22 = vadd.f32 %v6181_v33, %v6135_v58  ;;  %v11484_v58 = vrot.slane %v12422_v0, 3 }
 0xe65   : > { %v7888_v13 = vpop.f32.mrf.mxu1 }
 0xe6f   : > { %v6229_v23 = vpop.f32.mrf.mxu1 }
 0xe70   : > { %v6236_v55 = vadd.f32 %v6229_v23, %v6185_v21  ;;  %v11470_v23 = vpop.permute.xlu0 %6575 }
 0xe71   : > { %v7893_v8 = vpop.f32.mrf.mxu1 }
 0xe73   : > { %v6232_v27 = vpop.f32.mrf.mxu1 }
 0xe74   : > { %v6237_v49 = vadd.f32 %v6232_v27, %v6186_v22 }
 0xe75   : > { %v7894_v26 = vpop.f32.mrf.mxu1 }
 0xe7f   : > { %v6280_v52 = vpop.f32.mrf.mxu1 }
 0xe80   : > { %v6287_v14 = vadd.f32 %v6280_v52, %v6236_v55  ;;  %v11490_v52 = vpop.permute.xlu1 %6637 }
 0xe81   : > { %v7899_v3 = vpop.f32.mrf.mxu1 }
 0xe82   : > { %v6294_v15 = vmul.f32 %v6293_v12, %v6287_v14 }
 0xe83   : > { %v6283_v62 = vpop.f32.mrf.mxu1 }
 0xe84   : > { %v6288_v47 = vadd.f32 %v6283_v62, %v6237_v49  ;;  %v6300_v10 = vadd.f32 %v6299_v44, %v6294_v15 }
 0xe85   : > { %v7900_v11 = vpop.f32.mrf.mxu1 }
 0xe86   : > { %v6295_v45 = vmul.f32 %v6293_v12, %v6288_v47  ;;  %v6302_v19 = vmax.f32 %v6300_v10, 0.0  ;;  %v11488_v12 = vpop.permute.xlu0 %6610  ;;  %v11506_v47 = vpop.permute.xlu1 %6669 }
 0xe87   : > { %v11415_v30 = vpop.f32.mrf.mxu1 }
 0xe88   : > { %v6301_v36 = vadd.f32 %v6299_v44, %v6295_v45 }
 0xe89   : > { %v7905_v50 = vpop.f32.mrf.mxu1 }
 0xe8a   : > { %v6303_v28 = vmax.f32 %v6301_v36, 0.0  ;;  %v11499_v15 = vpop.permute.xlu0 %6642 }
 0xe8b   : > { %v11417_v51 = vpop.f32.mrf.mxu1 }
 0xe8c   : > { %v6365_v61 = vpack.c.bf16 %v6303_v28, %v6302_v19 }
 0xe8d   : > { %v7906_v1 = vpop.f32.mrf.mxu1 }
 0xe8e   : > { %7580 = vmatmul.mubr.msk.bf16.vlgmr.msra.gmra.mxu1 %vm6376_vm8, %v6365_v61  ;;  %v11514_v36 = vpop.permute.xlu0 %6674 }
 0xe8f   : > { %6783 = vmatprep.mubr.bf16.mxu1 %v12429_v40 }
 0xf4e   : > { %v11434_v31 = vpop.f32.mrf.mxu1 }
 0xf4f   : > { %v6471_v46 = vrot.slane %v11434_v31, 4  ;;  %v6508_v25 = vrot.slane %v11434_v31, 5  ;;  %v6543_v16 = vrot.slane %v11434_v31, 7  ;;  %v6578_v13 = vrot.slane %v11434_v31, 1 }
 0xf50   : > { %v6416_v32 = vpop.f32.mrf.mxu1  ;;  %v6439_v18 = vrot.slane %v11434_v31, 3 }
 0xf51   : > { %v6472_v53 = vsel %vm2220_vm3, %v11432_v4, %v6471_v46  ;;  %v6509_v5 = vsel %vm6506_vm9, %v11442_v43, %v6508_v25  ;;  %v6544_v9 = vsel %vm1080_vm1, %v12433_v41, %v6543_v16  ;;  %v6679_v0 = vrot.slane %v6416_v32, 5 }
 0xf52   : > { %6475 = vrot.lane.b32.xlu1 %v6472_v53, %s8174_s16  ;;  %v11446_v7 = vpop.f32.mrf.mxu1  ;;  %v6440_v3 = vsel %vm6437_vm10, %v11484_v58, %v6439_v18 }
 0xf53   : > { %v6473_v54 = vrot.slane %v11446_v7, 4  ;;  %v6510_v57 = vrot.slane %v11446_v7, 5  ;;  %v6579_v48 = vrot.slane %v11446_v7, 1  ;;  %v6545_v33 = vrot.slane %v11446_v7, 7 }
 0xf54   : > { %v6441_v26 = vrot.slane %v11446_v7, 3  ;;  %v6420_v55 = vpop.f32.mrf.mxu1  ;;  %v6445_v49 = vmul.f32 %v6440_v3, %v11421_v37 }
 0xf55   : > { %v6474_v17 = vsel %vm2220_vm3, %v6471_v46, %v6473_v54  ;;  %v6511_v20 = vsel %vm6506_vm9, %v6508_v25, %v6510_v57  ;;  %v6580_v8 = vsel %vm2564_vm5, %v6578_v13, %v6579_v48  ;;  %v6546_v27 = vsel %vm1080_vm1, %v6543_v16, %v6545_v33 }
 0xf56   : > { %6512 = vrot.lane.b32.xlu1 %v6509_v5, %s12432_s17  ;;  %6477 = vrot.lane.b32.xlu0 %v6474_v17, %s8174_s16  ;;  %v6581_v29 = vsel %vm2564_vm5, %v6579_v48, %v12435_v63  ;;  %v6442_v21 = vsel %vm6437_vm10, %v6439_v18, %v6441_v26  ;;  %v6680_v22 = vrot.slane %v6420_v55, 5  ;;  %v6613_v14 = vsel %vm6437_vm10, %v6441_v26, %v11484_v58  ;;  %v6364_v18 = vld [vmem:[%s11836_s14] sm:$0x3] }
 0xf57   : > { %v6645_v62 = vsel %vm2220_vm3, %v6473_v54, %v11432_v4  ;;  %v6446_v10 = vmul.f32 %v6442_v21, %v11423_v6 }
 0xf58   : > { %v6681_v44 = vsel %vm6506_vm9, %v6679_v0, %v6680_v22  ;;  %v6682_v45 = vsel %vm6506_vm9, %v6680_v22, %v11442_v43  ;;  %v6700_v22 = vrot.slane %v6364_v18, %v12430_v60 }
 0xf59   : > { %v6685_v11 = vmul.f32 %v6681_v44, %v11506_v47  ;;  %v6686_v50 = vmul.f32 %v6682_v45, %v11514_v36  ;;  %v6710_v44 = vrot.slane %v6364_v18, %v12431_v35 }
 0xf5a   : > { %6547 = vrot.lane.b32.xlu1 %v6544_v9, %s12434_s23  ;;  %6514 = vrot.lane.b32.xlu0 %v6511_v20, %s12432_s17 }
 0xf5e   : > { %6582 = vrot.lane.b32.xlu1 %v6580_v8, %s8179_s30  ;;  %6549 = vrot.lane.b32.xlu0 %v6546_v27, %s12434_s23  ;;  %v6349_v8 = vld [vmem:[%s11833_s11] sm:$0x3] }
 0xf5f   : > { %v6359_v0 = vrot.slane %v6349_v8, %v12431_v35 }
 0xf62   : > { %6584 = vrot.lane.b32.xlu0 %v6581_v29, %s8179_s30  ;;  %6614 = vrot.lane.b32.xlu1 %v6442_v21, %s12436_s26  ;;  %v6353_v29 = vrot.slane %v6349_v8, %v12430_v60 }
 0xf64   : > { %v6354_v3 = vmul.f32 %v6353_v29, %v11415_v30  ;;  %v6355_v30 = vmul.f32 %v6353_v29, %v11417_v51 }
 0xf66   : > { %6616 = vrot.lane.b32.xlu0 %v6613_v14, %s12436_s26  ;;  %6646 = vrot.lane.b32.xlu1 %v6474_v17, %s8180_s25  ;;  %v6361_v45 = vadd.f32 %v6359_v0, %v6355_v30 }
 0xf6a   : > { %6648 = vrot.lane.b32.xlu0 %v6645_v62, %s8180_s25  ;;  %6449 = vrot.lane.b32.xlu1 %v6445_v49, %s12437_s24  ;;  %v8098_v62 = vld [vmem:[%s11835_s13 + $0x10] ss:$8 sps:$4 sm:$0xff]  }
 0xf6e   : > { %6689 = vrot.lane.b32.xlu1 %v6685_v11, %s12437_s24  ;;  %6451 = vrot.lane.b32.xlu0 %v6446_v10, %s12437_s24  ;;  %v8100_v11 = vld [vmem:[%s11835_s13 + $0x14] ss:$8 sps:$4 sm:$0xff]   ;;  %v6360_v10 = vadd.f32 %v6359_v0, %v6354_v3 }
 0xf6f   : > { %6765 = vmatprep.subr.bf16.mxu1 %v8100_v11 }
 0xf70   : > { %6766 = vmatpush1.bf16.msra.mxu1 %v8098_v62 }
 0xf72   : > { %6691 = vrot.lane.b32.xlu0 %v6686_v50, %s12437_s24 }
 0xfc4   : > { %v6476_v19 = vpop.permute.xlu1 %6475 }
 0xfc5   : > { %v6481_v28 = vmul.f32 %v6476_v19, %v11425_v38 }
 0xfc7   : > { %6485 = vrot.lane.b32.xlu1 %v6481_v28, %s12437_s24 }
 0xfc8   : > { %v6513_v61 = vpop.permute.xlu1 %6512  ;;  %v6478_v1 = vpop.permute.xlu0 %6477 }
 0xfc9   : > { %v6518_v46 = vmul.f32 %v6513_v61, %v11429_v59  ;;  %v6482_v32 = vmul.f32 %v6478_v1, %v11427_v34 }
 0xfcb   : > { %6522 = vrot.lane.b32.xlu1 %v6518_v46, %s12437_s24  ;;  %6487 = vrot.lane.b32.xlu0 %v6482_v32, %s12437_s24 }
 0xfcc   : > { %v6548_v53 = vpop.permute.xlu1 %6547  ;;  %v6515_v25 = vpop.permute.xlu0 %6514 }
 0xfcd   : > { %v6553_v54 = vmul.f32 %v6548_v53, %v11448_v39  ;;  %v6519_v5 = vmul.f32 %v6515_v25, %v11437_v56 }
 0xfcf   : > { %6557 = vrot.lane.b32.xlu1 %v6553_v54, %s12437_s24  ;;  %6524 = vrot.lane.b32.xlu0 %v6519_v5, %s12437_s24 }
 0xfd0   : > { %v6583_v17 = vpop.permute.xlu1 %6582  ;;  %v6550_v16 = vpop.permute.xlu0 %6549 }
 0xfd1   : > { %v6588_v57 = vmul.f32 %v6583_v17, %v11460_v42  ;;  %v6554_v9 = vmul.f32 %v6550_v16, %v11458_v24 }
 0xfd3   : > { %6592 = vrot.lane.b32.xlu1 %v6588_v57, %s12437_s24  ;;  %6559 = vrot.lane.b32.xlu0 %v6554_v9, %s12437_s24 }
 0xfd4   : > { %v6615_v20 = vpop.permute.xlu1 %6614  ;;  %v6585_v48 = vpop.permute.xlu0 %6584 }
 0xfd5   : > { %v6620_v33 = vmul.f32 %v6615_v20, %v11477_v2  ;;  %v6589_v13 = vmul.f32 %v6585_v48, %v11470_v23 }
 0xfd7   : > { %6624 = vrot.lane.b32.xlu1 %v6620_v33, %s12437_s24  ;;  %6594 = vrot.lane.b32.xlu0 %v6589_v13, %s12437_s24 }
 0xfd8   : > { %v6647_v27 = vpop.permute.xlu1 %6646  ;;  %v6617_v26 = vpop.permute.xlu0 %6616 }
 0xfd9   : > { %v6652_v21 = vmul.f32 %v6647_v27, %v11490_v52  ;;  %v6621_v55 = vmul.f32 %v6617_v26, %v11488_v12 }
 0xfdb   : > { %6656 = vrot.lane.b32.xlu1 %v6652_v21, %s12437_s24  ;;  %6626 = vrot.lane.b32.xlu0 %v6621_v55, %s12437_s24 }
 0xfdc   : > { %v6649_v14 = vpop.permute.xlu0 %6648  ;;  %v6450_v50 = vpop.permute.xlu1 %6449 }
 0xfdd   : > { %v6653_v49 = vmul.f32 %v6649_v14, %v11499_v15  ;;  %v6455_v51 = vadd.f32 %v6450_v50, %v11434_v31 }
 0xfdf   : > { %6702 = vrot.lane.b32.xlu1 %v6700_v22, %s12437_s24  ;;  %6658 = vrot.lane.b32.xlu0 %v6653_v49, %s12437_s24 }
 0xfe0   : > { %v6452_v19 = vpop.permute.xlu0 %6451  ;;  %v6690_v28 = vpop.permute.xlu1 %6689 }
 0xfe1   : > { %v6456_v16 = vadd.f32 %v6452_v19, %v11446_v7 }
 0xfe3   : > { %6719 = vrot.lane.b32.xlu1 %v6360_v10, %s12437_s24  ;;  %6712 = vrot.lane.b32.xlu0 %v6710_v44, %s12437_s24 }
 0xfe4   : > { %v6692_v61 = vpop.permute.xlu0 %6691 }
 0xfe7   : > { %6721 = vrot.lane.b32.xlu0 %v6361_v45, %s12437_s24 }
0x1039   : > { %v6486_v1 = vpop.permute.xlu1 %6485 }
0x103a   : > { %v6491_v54 = vadd.f32 %v6486_v1, %v6455_v51 }
0x103d   : > { %v6523_v46 = vpop.permute.xlu1 %6522  ;;  %v6488_v32 = vpop.permute.xlu0 %6487 }
0x103e   : > { %v6528_v57 = vadd.f32 %v6523_v46, %v6491_v54  ;;  %v6492_v9 = vadd.f32 %v6488_v32, %v6456_v16 }
0x1041   : > { %v6558_v53 = vpop.permute.xlu1 %6557  ;;  %v6525_v25 = vpop.permute.xlu0 %6524 }
0x1042   : > { %v6563_v20 = vadd.f32 %v6558_v53, %v6528_v57  ;;  %v6529_v13 = vadd.f32 %v6525_v25, %v6492_v9 }
0x1045   : > { %v6593_v5 = vpop.permute.xlu1 %6592  ;;  %v6560_v17 = vpop.permute.xlu0 %6559 }
0x1046   : > { %v6598_v8 = vadd.f32 %v6593_v5, %v6563_v20  ;;  %v6564_v27 = vadd.f32 %v6560_v17, %v6529_v13 }
0x1049   : > { %v6625_v48 = vpop.permute.xlu1 %6624  ;;  %v6595_v33 = vpop.permute.xlu0 %6594 }
0x104a   : > { %v6630_v26 = vadd.f32 %v6625_v48, %v6598_v8  ;;  %v6599_v21 = vadd.f32 %v6595_v33, %v6564_v27 }
0x104d   : > { %v6657_v18 = vpop.permute.xlu1 %6656  ;;  %v6627_v29 = vpop.permute.xlu0 %6626 }
0x104e   : > { %v6662_v55 = vadd.f32 %v6657_v18, %v6630_v26  ;;  %v6631_v31 = vadd.f32 %v6627_v29, %v6599_v21 }
0x1050   : > { %v6695_v22 = vadd.f32 %v6690_v28, %v6662_v55 }
0x1051   : > { %v6703_v14 = vpop.permute.xlu1 %6702  ;;  %v6659_v3 = vpop.permute.xlu0 %6658 }
0x1052   : > { %v6663_v0 = vadd.f32 %v6659_v3, %v6631_v31  ;;  %v6705_v49 = vmul.f32 %v6703_v14, %v6695_v22 }
0x1054   : > { %v6696_v7 = vadd.f32 %v6692_v61, %v6663_v0 }
0x1055   : > { %v6713_v44 = vpop.permute.xlu0 %6712  ;;  %v6720_v10 = vpop.permute.xlu1 %6719 }
0x1056   : > { %v6706_v62 = vmul.f32 %v6703_v14, %v6696_v7  ;;  %v6715_v11 = vadd.f32 %v6713_v44, %v6705_v49 }
0x1058   : > { %v6716_v30 = vadd.f32 %v6713_v44, %v6706_v62  ;;  %v11566_v45 = vadd.f32 %v6720_v10, %v6715_v11 }
0x1059   : > { %v6722_v50 = vpop.permute.xlu0 %6721 }
0x105a   : > { %v11568_v19 = vadd.f32 %v6722_v50, %v6716_v30  ;;  %v6727_v1 = vmax.f32 %v11566_v45, 0.0 }
0x105c   : > { %v6728_v28 = vmax.f32 %v11568_v19, 0.0 }
0x105e   : > { %v6734_v46 = vpack.c.bf16 %v6728_v28, %v6727_v1 }
0x1060   : > { %6736 = vrot.lane.b32.xlu1 %v6734_v46, %s12437_s24 }
0x10d2   : > { %v6737_v61 = vpop.permute.xlu1 %6736 }
0x10d3   : > { %7600 = vmatmul.mubr.msk.bf16.vlgmr.msra.gmra.mxu1 %vm6376_vm8, %v6737_v61 }
0x10d4   : > { %7036 = vmatprep.mubr.bf16.mxu1 %v12429_v40 }
0x1193   : > { %v11579_v32 = vpop.f32.mrf.mxu1 }
0x1194   : > { %v6814_v53 = vrot.slane %v11579_v32, 4  ;;  %v6836_v54 = vrot.slane %v11579_v32, 5  ;;  %v6858_v57 = vrot.slane %v11579_v32, 7  ;;  %v6880_v8 = vrot.slane %v11579_v32, 1 }
0x1195   : > { %v6787_v25 = vpop.f32.mrf.mxu1  ;;  %v6796_v29 = vrot.slane %v11579_v32, 3 }
0x1196   : > { %v6815_v51 = vsel %vm2220_vm3, %v11432_v4, %v6814_v53  ;;  %v6837_v16 = vsel %vm6506_vm9, %v11442_v43, %v6836_v54  ;;  %v6859_v20 = vsel %vm1080_vm1, %v12433_v41, %v6858_v57  ;;  %v6942_v0 = vrot.slane %v6787_v25, 5 }
0x1197   : > { %6818 = vrot.lane.b32.xlu0 %v6815_v51, %s8174_s16  ;;  %v11586_v5 = vpop.f32.mrf.mxu1  ;;  %v6797_v3 = vsel %vm6437_vm10, %v11484_v58, %v6796_v29 }
0x1198   : > { %v6816_v17 = vrot.slane %v11586_v5, 4  ;;  %v6838_v9 = vrot.slane %v11586_v5, 5  ;;  %v6881_v33 = vrot.slane %v11586_v5, 1  ;;  %v6860_v13 = vrot.slane %v11586_v5, 7 }
0x1199   : > { %v6798_v18 = vrot.slane %v11586_v5, 3  ;;  %v6791_v22 = vpop.f32.mrf.mxu1  ;;  %v6802_v49 = vmul.f32 %v6797_v3, %v11421_v37  ;;  %v8101_v3 = vld [vmem:[%s11835_s13 + $0x20] ss:$8 sps:$4 sm:$0xff]  }
0x119a   : > { %v6817_v40 = vsel %vm2220_vm3, %v6814_v53, %v6816_v17  ;;  %v6839_v48 = vsel %vm6506_vm9, %v6836_v54, %v6838_v9  ;;  %v6882_v27 = vsel %vm2564_vm5, %v6880_v8, %v6881_v33  ;;  %v6861_v26 = vsel %vm1080_vm1, %v6858_v57, %v6860_v13 }
0x119b   : > { %6840 = vrot.lane.b32.xlu0 %v6837_v16, %s12432_s17  ;;  %6820 = vrot.lane.b32.xlu1 %v6817_v40, %s8174_s16  ;;  %v6883_v21 = vsel %vm2564_vm5, %v6881_v33, %v12435_v63  ;;  %v6799_v55 = vsel %vm6437_vm10, %v6796_v29, %v6798_v18  ;;  %v6943_v31 = vrot.slane %v6791_v22, 5  ;;  %v6902_v14 = vsel %vm6437_vm10, %v6798_v18, %v11484_v58 }
0x119c   : > { %v6921_v44 = vsel %vm2220_vm3, %v6816_v17, %v11432_v4  ;;  %v6803_v11 = vmul.f32 %v6799_v55, %v11423_v6 }
0x119d   : > { %v6944_v7 = vsel %vm6506_vm9, %v6942_v0, %v6943_v31  ;;  %v8103_v0 = vld [vmem:[%s11835_s13 + $0x24] ss:$8 sps:$4 sm:$0xff]  }
0x119e   : > { %v6948_v62 = vmul.f32 %v6944_v7, %v11506_v47  ;;  %7018 = vmatprep.subr.bf16.mxu1 %v8103_v0 }
0x119f   : > { %6862 = vrot.lane.b32.xlu0 %v6859_v20, %s12434_s23  ;;  %6842 = vrot.lane.b32.xlu1 %v6839_v48, %s12432_s17 }
0x11a0   : > { %7019 = vmatpush1.bf16.msra.mxu1 %v8101_v3 }
0x11a3   : > { %6884 = vrot.lane.b32.xlu0 %v6882_v27, %s8179_s30  ;;  %6864 = vrot.lane.b32.xlu1 %v6861_v26, %s12434_s23  ;;  %v7597_v26 = vld [vmem:[%s11836_s14 + $0x2] sm:$0x3] }
0x11a4   : > { %v6973_v7 = vrot.slane %v7597_v26, %v12431_v35 }
0x11a7   : > { %6886 = vrot.lane.b32.xlu1 %v6883_v21, %s8179_s30  ;;  %6903 = vrot.lane.b32.xlu0 %v6799_v55, %s12436_s26  ;;  %v6963_v21 = vrot.slane %v7597_v26, %v12430_v60 }
0x11ab   : > { %6905 = vrot.lane.b32.xlu1 %v6902_v14, %s12436_s26  ;;  %6922 = vrot.lane.b32.xlu0 %v6817_v40, %s8180_s25  ;;  %v6945_v14 = vsel %vm6506_vm9, %v6943_v31, %v11442_v43 }
0x11af   : > { %6924 = vrot.lane.b32.xlu1 %v6921_v44, %s8180_s25  ;;  %6806 = vrot.lane.b32.xlu0 %v6802_v49, %s12437_s24  ;;  %v6949_v49 = vmul.f32 %v6945_v14, %v11514_v36 }
0x11b3   : > { %6808 = vrot.lane.b32.xlu1 %v6803_v11, %s12437_s24  ;;  %6952 = vrot.lane.b32.xlu0 %v6948_v62, %s12437_s24 }
0x1209   : > { %v6819_v10 = vpop.permute.xlu0 %6818 }
0x120a   : > { %v6824_v30 = vmul.f32 %v6819_v10, %v11425_v38 }
0x120c   : > { %6828 = vrot.lane.b32.xlu0 %v6824_v30, %s12437_s24 }
0x120d   : > { %v6841_v50 = vpop.permute.xlu0 %6840  ;;  %v6821_v46 = vpop.permute.xlu1 %6820 }
0x120e   : > { %v6846_v61 = vmul.f32 %v6841_v50, %v11429_v59  ;;  %v6825_v53 = vmul.f32 %v6821_v46, %v11427_v34 }
0x1210   : > { %6830 = vrot.lane.b32.xlu1 %v6825_v53, %s12437_s24  ;;  %6850 = vrot.lane.b32.xlu0 %v6846_v61, %s12437_s24 }
0x1211   : > { %v6863_v25 = vpop.permute.xlu0 %6862  ;;  %v6843_v51 = vpop.permute.xlu1 %6842 }
0x1212   : > { %v6868_v54 = vmul.f32 %v6863_v25, %v11448_v39  ;;  %v6847_v17 = vmul.f32 %v6843_v51, %v11437_v56 }
0x1214   : > { %6852 = vrot.lane.b32.xlu1 %v6847_v17, %s12437_s24  ;;  %6872 = vrot.lane.b32.xlu0 %v6868_v54, %s12437_s24 }
0x1215   : > { %v6885_v16 = vpop.permute.xlu0 %6884  ;;  %v6865_v40 = vpop.permute.xlu1 %6864 }
0x1216   : > { %v6890_v57 = vmul.f32 %v6885_v16, %v11460_v42  ;;  %v6869_v9 = vmul.f32 %v6865_v40, %v11458_v24 }
0x1218   : > { %6874 = vrot.lane.b32.xlu1 %v6869_v9, %s12437_s24  ;;  %6894 = vrot.lane.b32.xlu0 %v6890_v57, %s12437_s24 }
0x1219   : > { %v6887_v20 = vpop.permute.xlu1 %6886  ;;  %v6904_v48 = vpop.permute.xlu0 %6903 }
0x121a   : > { %v6891_v33 = vmul.f32 %v6887_v20, %v11470_v23  ;;  %v6909_v13 = vmul.f32 %v6904_v48, %v11477_v2 }
0x121c   : > { %6896 = vrot.lane.b32.xlu1 %v6891_v33, %s12437_s24  ;;  %6913 = vrot.lane.b32.xlu0 %v6909_v13, %s12437_s24 }
0x121d   : > { %v6906_v8 = vpop.permute.xlu1 %6905  ;;  %v6923_v27 = vpop.permute.xlu0 %6922 }
0x121e   : > { %v6910_v18 = vmul.f32 %v6906_v8, %v11488_v12  ;;  %v6928_v29 = vmul.f32 %v6923_v27, %v11490_v52 }
0x1220   : > { %6915 = vrot.lane.b32.xlu1 %v6910_v18, %s12437_s24  ;;  %6932 = vrot.lane.b32.xlu0 %v6928_v29, %s12437_s24 }
0x1221   : > { %v6925_v55 = vpop.permute.xlu1 %6924  ;;  %v6807_v31 = vpop.permute.xlu0 %6806 }
0x1222   : > { %v6929_v22 = vmul.f32 %v6925_v55, %v11499_v15  ;;  %v6812_v61 = vadd.f32 %v6807_v31, %v11579_v32 }
0x1224   : > { %6934 = vrot.lane.b32.xlu1 %v6929_v22, %s12437_s24  ;;  %6965 = vrot.lane.b32.xlu0 %v6963_v21, %s12437_s24 }
0x1225   : > { %v6953_v44 = vpop.permute.xlu0 %6952  ;;  %v6809_v62 = vpop.permute.xlu1 %6808 }
0x1226   : > { %v6813_v54 = vadd.f32 %v6809_v62, %v11586_v5 }
0x1228   : > { %6954 = vrot.lane.b32.xlu1 %v6949_v49, %s12437_s24 }
0x122c   : > { %6975 = vrot.lane.b32.xlu1 %v6973_v7, %s12437_s24 }
0x127e   : > { %v6829_v11 = vpop.permute.xlu0 %6828 }
0x127f   : > { %v6834_v51 = vadd.f32 %v6829_v11, %v6812_v61 }
0x1282   : > { %v6831_v10 = vpop.permute.xlu1 %6830  ;;  %v6851_v30 = vpop.permute.xlu0 %6850 }
0x1283   : > { %v6856_v17 = vadd.f32 %v6851_v30, %v6834_v51  ;;  %v6835_v57 = vadd.f32 %v6831_v10, %v6813_v54 }
0x1286   : > { %v6853_v50 = vpop.permute.xlu1 %6852  ;;  %v6873_v46 = vpop.permute.xlu0 %6872 }
0x1287   : > { %v6878_v9 = vadd.f32 %v6873_v46, %v6856_v17  ;;  %v6857_v20 = vadd.f32 %v6853_v50, %v6835_v57 }
0x128a   : > { %v6875_v53 = vpop.permute.xlu1 %6874  ;;  %v6895_v25 = vpop.permute.xlu0 %6894 }
0x128b   : > { %v6900_v48 = vadd.f32 %v6895_v25, %v6878_v9  ;;  %v6879_v8 = vadd.f32 %v6875_v53, %v6857_v20 }
0x128e   : > { %v6897_v16 = vpop.permute.xlu1 %6896  ;;  %v6914_v40 = vpop.permute.xlu0 %6913 }
0x128f   : > { %v6919_v27 = vadd.f32 %v6914_v40, %v6900_v48  ;;  %v6901_v26 = vadd.f32 %v6897_v16, %v6879_v8 }
0x1292   : > { %v6916_v33 = vpop.permute.xlu1 %6915  ;;  %v6933_v13 = vpop.permute.xlu0 %6932 }
0x1293   : > { %v6938_v18 = vadd.f32 %v6933_v13, %v6919_v27  ;;  %v6920_v32 = vadd.f32 %v6916_v33, %v6901_v26 }
0x1295   : > { %v6958_v21 = vadd.f32 %v6953_v44, %v6938_v18 }
0x1296   : > { %v6935_v29 = vpop.permute.xlu1 %6934  ;;  %v6966_v22 = vpop.permute.xlu0 %6965 }
0x1297   : > { %v6939_v55 = vadd.f32 %v6935_v29, %v6920_v32  ;;  %v6968_v3 = vmul.f32 %v6966_v22, %v6958_v21 }
0x129a   : > { %v6955_v14 = vpop.permute.xlu1 %6954 }
0x129b   : > { %v6959_v5 = vadd.f32 %v6955_v14, %v6939_v55 }
0x129d   : > { %v6969_v0 = vmul.f32 %v6966_v22, %v6959_v5 }
0x129e   : > { %v6976_v49 = vpop.permute.xlu1 %6975 }
0x129f   : > { %v6978_v7 = vadd.f32 %v6976_v49, %v6968_v3  ;;  %v6979_v31 = vadd.f32 %v6976_v49, %v6969_v0 }
0x12a1   : > { %v6980_v62 = vmax.f32 %v6978_v7, 0.0  ;;  %v6981_v11 = vmax.f32 %v6979_v31, 0.0 }
0x12a3   : > { %v6987_v10 = vpack.c.bf16 %v6981_v11, %v6980_v62 }
0x12a5   : > { %6989 = vrot.lane.b32.xlu0 %v6987_v10, %s12437_s24 }
0x1317   : > { %v6990_v30 = vpop.permute.xlu0 %6989 }
0x1318   : > { %7606 = vmatmul.mubr.msk.bf16.vlgmr.msra.gmra.mxu1 %vm6376_vm8, %v6990_v30 }
0x13d8   : > { %v11676_v50 = vpop.f32.mrf.mxu1 }
0x13d9   : > { %v7067_v44 = vrot.slane %v11676_v50, 4  ;;  %v7089_v53 = vrot.slane %v11676_v50, 5  ;;  %v7111_v16 = vrot.slane %v11676_v50, 7  ;;  %v7133_v33 = vrot.slane %v11676_v50, 1 }
0x13da   : > { %v7040_v46 = vpop.f32.mrf.mxu1 }
0x13db   : > { %v7068_v61 = vsel %vm2220_vm3, %v11432_v4, %v7067_v44  ;;  %v7090_v54 = vsel %vm6506_vm9, %v11442_v43, %v7089_v53  ;;  %v7112_v57 = vsel %vm1080_vm1, %v12433_v41, %v7111_v16  ;;  %v7049_v41 = vrot.slane %v11676_v50, 3 }
0x13dc   : > { %7071 = vrot.lane.b32.xlu1 %v7068_v61, %s8174_s16  ;;  %v11683_v25 = vpop.f32.mrf.mxu1  ;;  %v7195_v22 = vrot.slane %v7040_v46, 5 }
0x13dd   : > { %v7069_v51 = vrot.slane %v11683_v25, 4  ;;  %v7091_v40 = vrot.slane %v11683_v25, 5  ;;  %v7134_v20 = vrot.slane %v11683_v25, 1  ;;  %v7113_v48 = vrot.slane %v11683_v25, 7 }
0x13de   : > { %v7051_v27 = vrot.slane %v11683_v25, 3  ;;  %v7044_v29 = vpop.f32.mrf.mxu1  ;;  %v7050_v55 = vsel %vm6437_vm10, %v11484_v58, %v7049_v41 }
0x13df   : > { %v7070_v17 = vsel %vm2220_vm3, %v7067_v44, %v7069_v51  ;;  %v7092_v9 = vsel %vm6506_vm9, %v7089_v53, %v7091_v40  ;;  %v7135_v13 = vsel %vm2564_vm5, %v7133_v33, %v7134_v20  ;;  %v7114_v8 = vsel %vm1080_vm1, %v7111_v16, %v7113_v48 }
0x13e0   : > { %7093 = vrot.lane.b32.xlu1 %v7090_v54, %s12432_s17  ;;  %7073 = vrot.lane.b32.xlu0 %v7070_v17, %s8174_s16  ;;  %v7136_v26 = vsel %vm2564_vm5, %v7134_v20, %v12435_v63  ;;  %v7052_v18 = vsel %vm6437_vm10, %v7049_v41, %v7051_v27  ;;  %v7196_v32 = vrot.slane %v7044_v29, 5  ;;  %v7155_v21 = vsel %vm6437_vm10, %v7051_v27, %v11484_v58 }
0x13e1   : > { %v7055_v63 = vmul.f32 %v7050_v55, %v11421_v37  ;;  %v7174_v5 = vsel %vm2220_vm3, %v7069_v51, %v11432_v4  ;;  %v7056_v58 = vmul.f32 %v7052_v18, %v11423_v6 }
0x13e2   : > { %v7197_v14 = vsel %vm6506_vm9, %v7195_v22, %v7196_v32  ;;  %v7198_v54 = vsel %vm6506_vm9, %v7196_v32, %v11442_v43 }
0x13e3   : > { %v7201_v3 = vmul.f32 %v7197_v14, %v11506_v47 }
0x13e4   : > { %7115 = vrot.lane.b32.xlu1 %v7112_v57, %s12434_s23  ;;  %7095 = vrot.lane.b32.xlu0 %v7092_v9, %s12432_s17  ;;  %s8109_s17 = sshll.u32 %s8181_s22, 4  ;;  %s8110_s17 = int_to_ptr.vmem [resolvable:$false] %s8109_s17 }
0x13e8   : > { %7137 = vrot.lane.b32.xlu1 %v7135_v13, %s8179_s30  ;;  %7117 = vrot.lane.b32.xlu0 %v7114_v8, %s12434_s23  ;;  %s488_s23 = sand.u32 1, %s8157_s19  }
0x13ec   : > { %7139 = vrot.lane.b32.xlu0 %v7136_v26, %s8179_s30  ;;  %7156 = vrot.lane.b32.xlu1 %v7052_v18, %s12436_s26  ;;  %s7327_s30 = sshll.u32 %s488_s23, 4 }
0x13f0   : > { %7158 = vrot.lane.b32.xlu0 %v7155_v21, %s12436_s26  ;;  %7175 = vrot.lane.b32.xlu1 %v7070_v17, %s8180_s25  ;;  %s490_s26 = scalar_lea.vmem [#allocation2], %s7327_s30  ;;  %s8111_s30 = scalar_lea.vmem %s8110_s17, 512 }
0x13f4   : > { %7177 = vrot.lane.b32.xlu0 %v7174_v5, %s8180_s25  ;;  %7059 = vrot.lane.b32.xlu1 %v7055_v63, %s12437_s24  ;;  %s7261_s25 = sshll.u32 %s490_s26, 4  ;;  %s11773_s25 = int_to_ptr.vmem [resolvable:$true] %s7261_s25 }
0x13f5   : > { %s8105_s16 = scalar_lea.vmem %s11773_s25, 256  ;;  %p8112_p0 = scmp.lt.s32.totalorder %s11773_s25, %s8110_s17 }
0x13f6   : > { %p8106_p11 = scmp.ne.s32.totalorder %s11773_s25, %s8105_s16  ;;  %p8113_p1 = scmp.lt.s32.totalorder %s8111_s30, %s8105_s16 }
0x13f8   : > { %7061 = vrot.lane.b32.xlu0 %v7056_v58, %s12437_s24  ;;  %7205 = vrot.lane.b32.xlu1 %v7201_v3, %s12437_s24  ;;  %p8107_p12 = pnand %p8106_p11, %p8302_p5  ;;  %p8114_p2 = por %p8113_p1, %p8112_p0 }
0x13fa   : > { %p8108_p13 = pneg %p8107_p12 }
0x13fc   : > { %p8115_p3 = pnand %p8114_p2, %p8108_p13 }
0x144e   : > { %v7072_v0 = vpop.permute.xlu1 %7071 }
0x144f   : > { %v7077_v37 = vmul.f32 %v7072_v0, %v11425_v38 }
0x1451   : > { %7081 = vrot.lane.b32.xlu1 %v7077_v37, %s12437_s24 }
0x1452   : > { %v7094_v49 = vpop.permute.xlu1 %7093  ;;  %v7074_v7 = vpop.permute.xlu0 %7073 }
0x1453   : > { %v7099_v4 = vmul.f32 %v7094_v49, %v11429_v59  ;;  %v7078_v31 = vmul.f32 %v7074_v7, %v11427_v34 }
0x1455   : > { %7083 = vrot.lane.b32.xlu0 %v7078_v31, %s12437_s24  ;;  %7103 = vrot.lane.b32.xlu1 %v7099_v4, %s12437_s24 }
0x1456   : > { %v7116_v6 = vpop.permute.xlu1 %7115  ;;  %v7096_v47 = vpop.permute.xlu0 %7095 }
0x1457   : > { %v7121_v62 = vmul.f32 %v7116_v6, %v11448_v39  ;;  %v7100_v11 = vmul.f32 %v7096_v47, %v11437_v56 }
0x1459   : > { %7105 = vrot.lane.b32.xlu0 %v7100_v11, %s12437_s24  ;;  %7125 = vrot.lane.b32.xlu1 %v7121_v62, %s12437_s24 }
0x145a   : > { %v7138_v38 = vpop.permute.xlu1 %7137  ;;  %v7118_v10 = vpop.permute.xlu0 %7117 }
0x145b   : > { %v7143_v59 = vmul.f32 %v7138_v38, %v11460_v42  ;;  %v7122_v34 = vmul.f32 %v7118_v10, %v11458_v24  ;;  %v7603_v24 = vld [vmem:[%s11836_s14 + $0x4] sm:$0x3] }
0x145d   : > { %7127 = vrot.lane.b32.xlu0 %v7122_v34, %s12437_s24  ;;  %7147 = vrot.lane.b32.xlu1 %v7143_v59, %s12437_s24 }
0x145e   : > { %v7140_v30 = vpop.permute.xlu0 %7139  ;;  %v7157_v44 = vpop.permute.xlu1 %7156 }
0x145f   : > { %v7144_v39 = vmul.f32 %v7140_v30, %v11470_v23  ;;  %v7162_v56 = vmul.f32 %v7157_v44, %v11477_v2  ;;  %v7216_v23 = vrot.slane %v7603_v24, %v12430_v60 }
0x1461   : > { %7149 = vrot.lane.b32.xlu0 %v7144_v39, %s12437_s24  ;;  %7166 = vrot.lane.b32.xlu1 %v7162_v56, %s12437_s24 }
0x1462   : > { %v7159_v46 = vpop.permute.xlu0 %7158  ;;  %v7176_v61 = vpop.permute.xlu1 %7175 }
0x1463   : > { %v7163_v42 = vmul.f32 %v7159_v46, %v11488_v12  ;;  %v7181_v53 = vmul.f32 %v7176_v61, %v11490_v52  ;;  %v7202_v12 = vmul.f32 %v7198_v54, %v11514_v36  ;;  %v7226_v52 = vrot.slane %v7603_v24, %v12431_v35 }
0x1465   : > { %7168 = vrot.lane.b32.xlu0 %v7163_v42, %s12437_s24  ;;  %7185 = vrot.lane.b32.xlu1 %v7181_v53, %s12437_s24 }
0x1466   : > { %v7178_v2 = vpop.permute.xlu0 %7177  ;;  %v7060_v17 = vpop.permute.xlu1 %7059 }
0x1467   : > { %v7182_v51 = vmul.f32 %v7178_v2, %v11499_v15  ;;  %v7065_v20 = vadd.f32 %v7060_v17, %v11676_v50 }
0x1469   : > { %7187 = vrot.lane.b32.xlu0 %v7182_v51, %s12437_s24  ;;  %7218 = vrot.lane.b32.xlu1 %v7216_v23, %s12437_s24 }
0x146a   : > { %v7206_v60 = vpop.permute.xlu1 %7205  ;;  %v7062_v16 = vpop.permute.xlu0 %7061 }
0x146b   : > { %v7066_v36 = vadd.f32 %v7062_v16, %v11683_v25 }
0x146d   : > { %7207 = vrot.lane.b32.xlu0 %v7202_v12, %s12437_s24 }
0x1471   : > { %7228 = vrot.lane.b32.xlu0 %v7226_v52, %s12437_s24 }
0x14c3   : > { %v7082_v40 = vpop.permute.xlu1 %7081 }
0x14c4   : > { %v7087_v13 = vadd.f32 %v7082_v40, %v7065_v20 }
0x14c7   : > { %v7084_v15 = vpop.permute.xlu0 %7083  ;;  %v7104_v57 = vpop.permute.xlu1 %7103 }
0x14c8   : > { %v7109_v8 = vadd.f32 %v7104_v57, %v7087_v13  ;;  %v7088_v41 = vadd.f32 %v7084_v15, %v7066_v36 }
0x14cb   : > { %v7106_v9 = vpop.permute.xlu0 %7105  ;;  %v7126_v43 = vpop.permute.xlu1 %7125 }
0x14cc   : > { %v7131_v26 = vadd.f32 %v7126_v43, %v7109_v8  ;;  %v7110_v18 = vadd.f32 %v7106_v9, %v7088_v41 }
0x14cf   : > { %v7128_v48 = vpop.permute.xlu0 %7127  ;;  %v7148_v33 = vpop.permute.xlu1 %7147 }
0x14d0   : > { %v7153_v29 = vadd.f32 %v7148_v33, %v7131_v26  ;;  %v7132_v55 = vadd.f32 %v7128_v48, %v7110_v18 }
0x14d3   : > { %v7150_v27 = vpop.permute.xlu0 %7149  ;;  %v7167_v35 = vpop.permute.xlu1 %7166 }
0x14d4   : > { %v7172_v22 = vadd.f32 %v7167_v35, %v7153_v29  ;;  %v7154_v63 = vadd.f32 %v7150_v27, %v7132_v55 }
0x14d7   : > { %v7169_v32 = vpop.permute.xlu0 %7168  ;;  %v7186_v21 = vpop.permute.xlu1 %7185 }
0x14d8   : > { %v7191_v14 = vadd.f32 %v7186_v21, %v7172_v22  ;;  %v7173_v50 = vadd.f32 %v7169_v32, %v7154_v63 }
0x14da   : > { %v7211_v3 = vadd.f32 %v7206_v60, %v7191_v14 }
0x14db   : > { %v7188_v5 = vpop.permute.xlu0 %7187  ;;  %v7219_v0 = vpop.permute.xlu1 %7218 }
0x14dc   : > { %v7192_v58 = vadd.f32 %v7188_v5, %v7173_v50  ;;  %v7221_v49 = vmul.f32 %v7219_v0, %v7211_v3 }
0x14df   : > { %v7208_v25 = vpop.permute.xlu0 %7207 }
0x14e0   : > { %v7212_v37 = vadd.f32 %v7208_v25, %v7192_v58 }
0x14e2   : > { %v7222_v7 = vmul.f32 %v7219_v0, %v7212_v37 }
0x14e3   : > { %v7229_v4 = vpop.permute.xlu0 %7228 }
0x14e4   : > { %v7231_v31 = vadd.f32 %v7229_v4, %v7221_v49  ;;  %v7232_v6 = vadd.f32 %v7229_v4, %v7222_v7 }
0x14e6   : > { %v7233_v47 = vadd.f32 %v7231_v31, %v6727_v1  ;;  %v7234_v62 = vadd.f32 %v7232_v6, %v6728_v28 }
0x14e8   : > { %v7235_v11 = vmax.f32 %v7233_v47, 0.0  ;;  %v7236_v38 = vmax.f32 %v7234_v62, 0.0 }
0x14ea   : > { %7241 = vrot.lane.b32.xlu0 %v7236_v38, %s12437_s24  ;;  %7239 = vrot.lane.b32.xlu1 %v7235_v11, %s12437_s24  ;;  %s11782_s24 = scalar_lea.sflag [#allocation3], %s488_s23 }
0x155c   : > { %v7242_v45 = vpop.permute.xlu0 %7241  ;;  %v7240_v19 = vpop.permute.xlu1 %7239 }
0x155d   : > { %7246 = vst.msk [vmem:[%s490_s26 + $0x8] sm:$0xff] %vm6376_vm8, %v7242_v45  ;;  %7245 = vst.msk [vmem:[%s490_s26] sm:$0xff] %vm6376_vm8, %v7240_v19 }
0x155e   : > { %8118 = shalt.err (!%p8115_p3)
}
0x155f   : > { %s8119_s23 = scalar_lea.hbm %s11778_s29, 256  ;;  %s8123_s27 = scalar_lea.hbm %s11837_s15, 512 }
0x1560   : > { %p8120_p4 = scmp.ne.s32.totalorder %s11778_s29, %s8119_s23  ;;  %p8124_p9 = scmp.lt.s32.totalorder %s11778_s29, %s11837_s15 }
0x1561   : > { %p8125_p10 = scmp.lt.s32.totalorder %s8123_s27, %s8119_s23 }
0x1562   : > { %p8121_p7 = pnand %p8120_p4, %p8302_p5 }
0x1563   : > { %p8126_p11 = por %p8125_p10, %p8124_p9 }
0x1564   : > { %p8122_p8 = pneg %p8121_p7 }
0x1566   : > { %p8127_p12 = pnand %p8126_p11, %p8122_p8 }
0x1568   : > { %8130 = shalt.err (!%p8127_p12)
}
0x1569   : > { %s8182_s16 = smov 128   ;;  %s8183_s17 = smov 8  }
0x156a   : > { %7911 = dma.vmem_to_hbm [thread:$0]  (%p8302_p5), %s11773_s25, 256, %s11778_s29, %s11782_s24, %s8182_s16, %s8182_s16, %s8183_s17  }
0x156b PF: > { %s12438_s30 = sld [smem:[#allocation5_spill]]  ;;  %p7917_p13 = scmp.ge.s32.totalorder %s8165_s21, 2 }
0x156d   : > { %p7914_p0 = pnand %p7917_p13, %p8306_p6 }
0x156f   : > { %p7915_p1 = pneg %p7914_p0 }
0x1571   : > { %s7276_s20 = sand.u32 1, %s12438_s30  }
0x1572   : > { %s7277_s23 = scalar_lea.sflag [#allocation3], %s7276_s20 }
0x1573   : > { %8148 = dma.done.wait (%p7915_p1), %s7277_s23, 256  }
0x1574   : > { %8150 = vsyncadd (%p7915_p1), %s7277_s23, 4294967040  ;;  %s12440_s21 = sld [smem:[#allocation7_spill]]  ;;  %s12443_s18 = smov %s8157_s19 }
0x1575   : > { %s12441_s27 = sld [smem:[#allocation6_spill]] }
0x1576   : > { %s12442_s20 = sld [smem:[#allocation8_spill]] }
0x157a   : > { %p25_p2 = scmp.ge.s32.totalorder %s12440_s21, 4  }
0x157b   : > { %s12444_s19 = smov %s12441_s27 }
0x157c   :  { %27 = sbr.rel (!%p25_p2) target bundleno = 3 (0x3), region = 155 }
0x1581   :  { %7282 = vsyncpa [#allocation3], 1 }
0x1582   :  { %7284 = vsyncpa [#allocation3 + $0x1], 1 }

</bundles_post_ra>
